<compile_context>
chip_gen: v5e
topology: v5e:2x2
jax: 0.10.0
libtpu: 0.0.40
codegen_flags: <defaults>
</compile_context>

<pallas_src>
import numpy as np
import jax
import jax.numpy as jnp
from jax.experimental import pallas as pl
from jax.experimental.pallas import tpu as pltpu

# ---------------- synthetic sensor / simulator parameters ----------------
HEIGHT, WIDTH = 32, 128          # sensor resolution (small for the demo)
NUM_BINS = 16                    # polynomial-calibration bins
PIXMM = 0.1                      # mm per pixel
KERNEL_SIZE = 5                  # sim_params.kernel_size
PYRAMID_KERNEL_SIZE = (5, 5)     # sim_params.pyramid_kernel_size
CONTACT_SCALE = 0.4              # sim_params.contact_scale
KSCALE = 1.0                     # sim_params.kscale (blur sigma for f0)
FRAME_MIX = 0.66                 # sim_params.frame_mixing_percentage
DIFF_THRESHOLD = 0.02            # sim_params.diff_threshold

SHADE_TILE = 2048                # lane chunk for the shade kernel

_HIGHEST = jax.lax.Precision.HIGHEST
_N_PYR = len(PYRAMID_KERNEL_SIZE)

# bin edges for the in-kernel (arctan-free) binning
_X_BINR = 0.5 * np.pi / (NUM_BINS - 1)
_Y_BINR = 2.0 * np.pi / (NUM_BINS - 1)
# grad_mag >= k*x_binr  <=>  mag^2 >= tan(k*x_binr)^2        (k = 1..NB-2)
_MAG_EDGES_SQ = tuple(float(np.tan(k * _X_BINR) ** 2) for k in range(1, NUM_BINS - 1))
# atan2(dzdx,dzdy) >= -pi + k*y_binr  <=>  tan(theta/2) >= tan(edge/2)
_DIR_EDGES = tuple(float(np.tan((-np.pi + k * _Y_BINR) / 2.0))
                   for k in range(1, NUM_BINS - 1))


# ---------------- host-side blur / stencil matrix construction ----------------
def _resolve_kernel(kernel_size, sigma):
    if kernel_size is None:
        assert sigma is not None
        kernel_size = 2 * int(round(4.0 * sigma)) + 1
    if sigma is None:
        sigma = 0.3 * ((kernel_size - 1) * 0.5 - 1) + 0.8
    return kernel_size, sigma


def _gaussian_kernel1d(kernel_size, sigma):
    # matches TaximTorch._get_gaussian_kernel1d
    x = np.linspace(-(kernel_size - 1) * 0.5, (kernel_size - 1) * 0.5, kernel_size)
    pdf = np.exp(-0.5 * (x / sigma) ** 2)
    return pdf / pdf.sum()


def _reflect_idx(i, n):
    if i < 0:
        return -i
    if i >= n:
        return 2 * (n - 1) - i
    return i


def _blur_matrix(n, kernel_size=None, sigma=None):
    """(n, n) matrix M with  M @ x == reflect-pad + 'same' 1-D Gaussian
    cross-correlation along the first axis (fast_conv2d semantics)."""
    kernel_size, sigma = _resolve_kernel(kernel_size, sigma)
    k1d = _gaussian_kernel1d(kernel_size, sigma)
    p = (kernel_size - 1) // 2
    m = np.zeros((n, n), np.float64)
    for o in range(n):
        for t in range(kernel_size):
            m[o, _reflect_idx(o - p + t, n)] += k1d[t]
    return m.astype(np.float32)


def _blur_pair(h, w, kernel_size=None, sigma=None):
    """(Mv, MhT) such that  blur(x) == Mv @ x @ MhT  (reflect-pad Gaussian)."""
    mv = _blur_matrix(h, kernel_size, sigma)
    mht = _blur_matrix(w, kernel_size, sigma).T.copy()
    return mv, mht


def _stencil_pair(h, w, pixmm):
    """Banded / clamp matrices implementing the normals stencil on the MXU.

    With g = deformed gel (mm) and hmn = -g/pixmm:
      dzdx_padded = (Rv @ Dv) @ g @ Cw        (vertical central diff + clamp)
      dzdy_padded =  Rv       @ g @ (Dh @ Cw) (horizontal central diff + clamp)
    where the clamp matrices reproduce torch's 'replicate' padding of the
    (h-2, w-2) interior gradient field.
    """
    c = -1.0 / (2.0 * pixmm)
    dv = np.zeros((h, h), np.float64)
    for i in range(1, h - 1):
        dv[i, i + 1] += c
        dv[i, i - 1] -= c
    rv = np.zeros((h, h), np.float64)
    for i in range(h):
        rv[i, min(max(i, 1), h - 2)] = 1.0
    dh = np.zeros((w, w), np.float64)
    for x in range(1, w - 1):
        dh[x + 1, x] += c
        dh[x - 1, x] -= c
    cw = np.zeros((w, w), np.float64)
    for x in range(w):
        cw[min(max(x, 1), w - 2), x] = 1.0
    av = (rv @ dv).astype(np.float32)   # dzdx row operator (clamp folded)
    bh = (dh @ cw).astype(np.float32)   # dzdy column operator (clamp folded)
    return av, cw.astype(np.float32), rv.astype(np.float32), bh


def _blur_plain(img, kernel_size=None, sigma=None):
    """Plain-JAX separable Gaussian blur on (..., H, W) -- init-time only."""
    mv, mht = _blur_pair(img.shape[-2], img.shape[-1], kernel_size, sigma)
    return jnp.einsum("ij,...jk,kl->...il",
                      jnp.asarray(mv), img.astype(jnp.float32), jnp.asarray(mht),
                      precision=_HIGHEST)


# ---------------- Pallas kernel 1: deformation + normals + binning ----------------
def _geom_kernel(hm_ref, gel_ref, bv_ref, bh_ref, bin_ref):
    hm = hm_ref[0]                      # (H, W)
    gel = gel_ref[...]                  # (H, W)

    # pressing depth / contact mask / joined height map (kept in vregs)
    min_hm = jnp.min(jnp.min(hm, axis=1, keepdims=True), axis=0, keepdims=True)
    contact = hm < 0.0
    joined = jnp.minimum(hm, gel)
    mask = jnp.logical_and(joined - gel < min_hm * CONTACT_SCALE, contact)

    def mm(s, x):
        # banded row/col operator pair as two small MXU matmuls: Bv[s] @ x @ Bh[s]
        t = jnp.dot(bv_ref[s], x, precision=_HIGHEST,
                    preferred_element_type=jnp.float32)
        return jnp.dot(t, bh_ref[s], precision=_HIGHEST,
                       preferred_element_type=jnp.float32)

    # deformation pyramid: masked blurs + final blur (stages 0.._N_PYR)
    blurred = joined
    for s in range(_N_PYR):             # static unroll (2 pyramid stages)
        blurred = mm(s, blurred)
        blurred = jnp.where(mask, joined, blurred)
    deformed = mm(_N_PYR, blurred)      # final KERNEL_SIZE blur (mm)

    # surface-normal central differences of -deformed/pixmm with replicate
    # padding, both folded into the host-built banded/clamp matrices
    dzdx = mm(_N_PYR + 1, deformed)
    dzdy = mm(_N_PYR + 2, deformed)

    mag2 = dzdx * dzdx + dzdy * dzdy
    mag = jnp.sqrt(mag2)

    # idx_mag = floor(arctan(|grad|)/x_binr) via monotone threshold compares
    idx_mag = jnp.zeros(mag2.shape, jnp.int32)
    for t2 in _MAG_EDGES_SQ:
        idx_mag = idx_mag + (mag2 >= t2).astype(jnp.int32)

    # idx_dir = floor((atan2(dzdx,dzdy)+pi)/y_binr) via the half-angle tangent
    # t = dzdx / (|grad| + dzdy), monotone in the angle on (-pi, pi)
    denom = mag + dzdy
    pos = denom > 0.0
    t = dzdx / jnp.where(pos, denom, 1.0)
    idx_dir = jnp.zeros(mag2.shape, jnp.int32)
    for tau in _DIR_EDGES:
        idx_dir = idx_dir + (t >= tau).astype(jnp.int32)
    # denom == 0: angle is exactly pi (last bin) unless the gradient is zero,
    # in which case the reference sets grad_dir = 0 -> middle bin.
    idx_dir = jnp.where(pos, idx_dir,
                        jnp.where(mag2 > 0.0,
                                  jnp.int32(NUM_BINS - 1),
                                  jnp.int32((NUM_BINS - 1) // 2)))

    bin_ref[0] = idx_mag * NUM_BINS + idx_dir


def _geom_pallas(hm, gel, bvs, bhs):
    B, H, W = hm.shape
    S = bvs.shape[0]
    return pl.pallas_call(
        _geom_kernel,
        out_shape=jax.ShapeDtypeStruct((B, H, W), jnp.int32),
        grid=(B,),
        in_specs=[
            pl.BlockSpec((1, H, W), lambda b: (b, 0, 0)),
            pl.BlockSpec((H, W), lambda b: (0, 0)),
            pl.BlockSpec((S, H, H), lambda b: (0, 0, 0)),
            pl.BlockSpec((S, W, W), lambda b: (0, 0, 0)),
        ],
        out_specs=pl.BlockSpec((1, H, W), lambda b: (b, 0, 0)),
        compiler_params=pltpu.CompilerParams(dimension_semantics=("parallel",)),
    )(hm, gel, bvs, bhs)


# ---------------- Pallas kernel 2: fused gather + polynomial shading ----------------
def _shade_kernel(bin_ref, tab_ref, feat_ref, gsum_ref, bg_ref, out_ref):
    nbins2 = tab_ref.shape[1]           # 256 flat bins
    tile = bin_ref.shape[-1]            # lane chunk of the pixel axis

    bin_plane = bin_ref[0]              # (1, tile) int32, flat bin per pixel
    iota = jax.lax.broadcasted_iota(jnp.int32, (nbins2, tile), 0)
    onehot = (iota == bin_plane).astype(jnp.bfloat16)          # exact 0/1 in bf16

    # gather == (18, 256) @ one-hot, single bf16 MXU pass, f32 accumulate
    params = jnp.dot(tab_ref[...], onehot,
                     preferred_element_type=jnp.float32)       # (18, tile)
    prod = params * feat_ref[...]                              # (18, tile) f32
    # per-channel 6-term sum via a tiny 0/1 selector matmul (rows 3..7 zero)
    chan = jnp.dot(gsum_ref[...], prod, precision=_HIGHEST,
                   preferred_element_type=jnp.float32)         # (8, tile)
    out_ref[0] = jnp.clip(chan + bg_ref[...], 0.0, 1.0)        # 8-row unmasked store


def _shade_pallas(bin_flat, tab_bf16, featst, gsum, bg8):
    B, _, HW = bin_flat.shape
    tile = SHADE_TILE if HW % SHADE_TILE == 0 else HW
    nc = HW // tile
    return pl.pallas_call(
        _shade_kernel,
        out_shape=jax.ShapeDtypeStruct((B, 8, HW), jnp.float32),
        grid=(B, nc),
        in_specs=[
            pl.BlockSpec((1, 1, tile), lambda b, c: (b, 0, c)),
            pl.BlockSpec(tab_bf16.shape, lambda b, c: (0, 0)),
            pl.BlockSpec((featst.shape[0], tile), lambda b, c: (0, c)),
            pl.BlockSpec(gsum.shape, lambda b, c: (0, 0)),
            pl.BlockSpec((8, tile), lambda b, c: (0, c)),
        ],
        out_specs=pl.BlockSpec((1, 8, tile), lambda b, c: (b, 0, c)),
        compiler_params=pltpu.CompilerParams(
            dimension_semantics=("parallel", "parallel")),
    )(bin_flat, tab_bf16, featst, gsum, bg8)


# ---------------- the module ----------------
class TaximPallas:
    """JAX/Pallas re-implementation of TaximTorch.forward (with_shadow=False path)."""

    def __init__(self, key: jax.Array):
        k_poly, k_f0 = jax.random.split(key, 2)

        # polynomial calibration table (3 colour channels, NB x NB bins, 6 coeffs)
        self.poly_grad = (
            jax.random.uniform(k_poly, (3, NUM_BINS, NUM_BINS, 6), jnp.float32) / 255.0
        ) * 1e-2

        # per-stage matrices: 3 blur stages + dzdx stencil + dzdy stencil
        sizes = tuple(PYRAMID_KERNEL_SIZE) + (KERNEL_SIZE,)
        bvs, bhs = [], []
        for ks in sizes:
            mv, mht = _blur_pair(HEIGHT, WIDTH, kernel_size=ks)
            bvs.append(mv)
            bhs.append(mht)
        av, cw, rv, bh = _stencil_pair(HEIGHT, WIDTH, PIXMM)
        bvs += [av, rv]
        bhs += [cw, bh]
        self.bvs = jnp.asarray(np.stack(bvs, axis=0))   # (5, H, H)
        self.bhs = jnp.asarray(np.stack(bhs, axis=0))   # (5, W, W)

        # synthetic gel map (smooth dome): blur -> * pixmm -> shift so max() == 0
        yy, xx = jnp.meshgrid(
            jnp.arange(HEIGHT, dtype=jnp.float32),
            jnp.arange(WIDTH, dtype=jnp.float32),
            indexing="ij",
        )
        r2 = (yy - HEIGHT / 2.0) ** 2 + (xx - WIDTH / 2.0) ** 2
        gel_raw = 20.0 * jnp.exp(-r2 / (2.0 * (WIDTH / 4.0) ** 2))
        gel_map = _blur_plain(gel_raw[None], kernel_size=KERNEL_SIZE)[0] * PIXMM
        self.gel_map_shift = float(jnp.max(gel_map))
        self.gel_map = gel_map - self.gel_map_shift

        # synthetic initial frame f0 (RGB in [0,1]) -> processed background,
        # kept flat and padded to 8 sublanes (rows 3..7 zero)
        f0 = jax.random.uniform(k_f0, (3, HEIGHT, WIDTH), jnp.float32) * 0.5 + 0.2
        bg = self._process_initial_frame(f0).reshape(3, HEIGHT * WIDTH)
        self.bg8 = jnp.concatenate(
            [bg, jnp.zeros((5, HEIGHT * WIDTH), jnp.float32)], axis=0)     # (8, HW)

        # polynomial features [x^2, y^2, x*y, x, y, 1], flat, tiled per channel
        xf = xx.reshape(-1)
        yf = yy.reshape(-1)
        feats = jnp.stack([xf * xf, yf * yf, xf * yf, xf, yf, jnp.ones_like(xf)], axis=0)
        self.featst = jnp.tile(feats, (3, 1)).astype(jnp.float32)          # (18, HW) f32

        # table transposed/flattened for the in-kernel one-hot matmul gather
        # (bf16 copy: one-hot operand is exact, table loses ~0.4% rel -> OK)
        tabT = jnp.transpose(self.poly_grad, (0, 3, 1, 2)).reshape(
            3 * 6, NUM_BINS * NUM_BINS)
        self.tab_bf16 = tabT.astype(jnp.bfloat16)                          # (18, 256)

        # per-channel group-sum selector (padded to 8 rows; rows 3..7 zero)
        g = np.zeros((8, 3 * 6), np.float32)
        for c in range(3):
            g[c, c * 6:(c + 1) * 6] = 1.0
        self.gsum = jnp.asarray(g)

    # ----- init helpers -----
    def _process_initial_frame(self, f0: jax.Array) -> jax.Array:
        f0_blurred = _blur_plain(f0, sigma=KSCALE)
        d_i = jnp.mean(f0_blurred - f0, axis=0)  # (H, W)
        mixed = FRAME_MIX * f0_blurred + (1.0 - FRAME_MIX) * f0
        return jnp.where((d_i < DIFF_THRESHOLD)[None], mixed, f0)

    # ----- forward -----
    def __call__(self, height_map: jax.Array, with_shadow: bool = False,
                 press_depth=None, orig_hm_fmt: bool = False) -> jax.Array:
        if with_shadow:
            # TODO(synk): shadow path (fan-ray casting + torch_scatter.scatter_min) not ported.
            raise NotImplementedError("shadow rendering is not implemented")

        batch_shape = height_map.shape[:-2]
        hm = height_map.reshape((-1,) + height_map.shape[-2:]).astype(jnp.float32)
        if orig_hm_fmt:
            hm = self.gel_map_shift - hm
        if press_depth is not None:
            hm = hm - jnp.min(hm, axis=(-2, -1), keepdims=True) - press_depth

        # kernel 1: deformation pyramid + normals + binning -> int32 bins
        bins = _geom_pallas(hm, self.gel_map, self.bvs, self.bhs)   # (B, H, W)
        bin_flat = bins.reshape(-1, 1, HEIGHT * WIDTH)              # metadata-only

        # kernel 2: one-hot gather + polynomial shading + background + clip
        sim8 = _shade_pallas(bin_flat, self.tab_bf16, self.featst,
                             self.gsum, self.bg8)                   # (B, 8, HW)
        return sim8[:, :3].reshape(batch_shape + (3, HEIGHT, WIDTH))


if __name__ == "__main__":
    key = jax.random.PRNGKey(0)
    k_sim, k_in = jax.random.split(key)

    sim = TaximPallas(k_sim)

    # synthetic height map (mm); negative values = object penetrating the gel
    yy, xx = jnp.meshgrid(
        jnp.arange(HEIGHT, dtype=jnp.float32),
        jnp.arange(WIDTH, dtype=jnp.float32),
        indexing="ij",
    )
    r2 = (yy - HEIGHT / 2.0) ** 2 + (xx - WIDTH / 2.0) ** 2
    base = jnp.stack([r2 * 0.002 - 1.0, r2 * 0.003 - 0.5], axis=0)  # batch = 2
    noise = 0.01 * jax.random.normal(k_in, base.shape, jnp.float32)
    height_map = (base + noise).astype(jnp.float32)                 # (2, 32, 128)

    forward = jax.jit(lambda x: sim(x))
    out = jax.block_until_ready(forward(height_map))                # (2, 3, 32, 128)

    assert out.shape == (2, 3, HEIGHT, WIDTH), out.shape
    assert bool(jnp.all(jnp.isfinite(out)))
    assert bool(jnp.all((out >= 0.0) & (out <= 1.0)))
    print("KERNEL_OK")
</pallas_src>

<mosaic_0001>
module attributes {stable_mosaic.version = 11 : i64} {
  func.func @_shade_kernel(%arg0: i32, %arg1: i32, %arg2: memref<1x1x2048xi32, #tpu.memory_space<vmem>>, %arg3: memref<18x256xbf16, #tpu.memory_space<vmem>>, %arg4: memref<18x2048xf32, #tpu.memory_space<vmem>>, %arg5: memref<8x18xf32, #tpu.memory_space<vmem>>, %arg6: memref<8x2048xf32, #tpu.memory_space<vmem>>, %arg7: memref<1x8x2048xf32, #tpu.memory_space<vmem>>) attributes {dimension_semantics = [#tpu.dimension_semantics<parallel>, #tpu.dimension_semantics<parallel>], iteration_bounds = array<i64: 2, 2>, scalar_prefetch = 0 : i64, scratch_operands = 0 : i64, tpu.core_type = #tpu.core_type<tc>, window_params = [{transform_indices = @transform_0, window_bounds = array<i64: 1, 1, 2048>}, {pipeline_mode = #tpu.pipeline_mode<synchronous>, transform_indices = @transform_1, window_bounds = array<i64: 18, 256>}, {transform_indices = @transform_2, window_bounds = array<i64: 18, 2048>}, {pipeline_mode = #tpu.pipeline_mode<synchronous>, transform_indices = @transform_3, window_bounds = array<i64: 8, 18>}, {transform_indices = @transform_4, window_bounds = array<i64: 8, 2048>}, {transform_indices = @transform_5, window_bounds = array<i64: 1, 8, 2048>}]} {
    %c0 = arith.constant 0 : index
    %c0_0 = arith.constant 0 : index
    %c0_1 = arith.constant 0 : index
    %0 = vector.load %arg2[%c0, %c0_0, %c0_1] : memref<1x1x2048xi32, #tpu.memory_space<vmem>>, vector<1x1x2048xi32>
    %1 = vector.shape_cast %0 : vector<1x1x2048xi32> to vector<1x2048xi32>
    %2 = tpu.iota {dimensions = array<i32: 0>} : vector<256x2048xi32>
    %3 = vector.broadcast %1 : vector<1x2048xi32> to vector<256x2048xi32>
    %4 = arith.cmpi eq, %2, %3 : vector<256x2048xi32>
    %5 = arith.extui %4 : vector<256x2048xi1> to vector<256x2048xi32>
    %6 = arith.sitofp %5 : vector<256x2048xi32> to vector<256x2048xf32>
    %7 = arith.truncf %6 : vector<256x2048xf32> to vector<256x2048xbf16>
    %c0_2 = arith.constant 0 : index
    %c0_3 = arith.constant 0 : index
    %8 = vector.load %arg3[%c0_2, %c0_3] : memref<18x256xbf16, #tpu.memory_space<vmem>>, vector<18x256xbf16>
    %cst = arith.constant dense<0.000000e+00> : vector<18x2048xf32>
    %9 = tpu.matmul %8, %7, %cst {dimension_numbers = #tpu.dot_dimension_numbers<[1], [0], [0], [1], [0, 0, 1, 1], [], []>} : vector<18x256xbf16>, vector<256x2048xbf16>, vector<18x2048xf32> -> vector<18x2048xf32>
    %c0_4 = arith.constant 0 : index
    %c0_5 = arith.constant 0 : index
    %10 = vector.load %arg4[%c0_4, %c0_5] : memref<18x2048xf32, #tpu.memory_space<vmem>>, vector<18x2048xf32>
    %11 = arith.mulf %9, %10 : vector<18x2048xf32>
    %c0_6 = arith.constant 0 : index
    %c0_7 = arith.constant 0 : index
    %12 = vector.load %arg5[%c0_6, %c0_7] : memref<8x18xf32, #tpu.memory_space<vmem>>, vector<8x18xf32>
    %cst_8 = arith.constant dense<0.000000e+00> : vector<8x2048xf32>
    %13 = tpu.matmul %12, %11, %cst_8 {dimension_numbers = #tpu.dot_dimension_numbers<[1], [0], [0], [1], [0, 0, 1, 1], [], []>, precision = #tpu.contract_precision<fp32>} : vector<8x18xf32>, vector<18x2048xf32>, vector<8x2048xf32> -> vector<8x2048xf32>
    %c0_9 = arith.constant 0 : index
    %c0_10 = arith.constant 0 : index
    %14 = vector.load %arg6[%c0_9, %c0_10] : memref<8x2048xf32, #tpu.memory_space<vmem>>, vector<8x2048xf32>
    %15 = arith.addf %13, %14 : vector<8x2048xf32>
    %cst_11 = arith.constant 0.000000e+00 : f32
    %cst_12 = arith.constant 1.000000e+00 : f32
    %16 = vector.broadcast %cst_11 : f32 to vector<8x2048xf32>
    %17 = arith.maximumf %16, %15 : vector<8x2048xf32>
    %18 = vector.broadcast %cst_12 : f32 to vector<8x2048xf32>
    %19 = arith.minimumf %18, %17 : vector<8x2048xf32>
    %c0_13 = arith.constant 0 : index
    %c0_14 = arith.constant 0 : index
    %c0_15 = arith.constant 0 : index
    %20 = vector.load %arg7[%c0_13, %c0_14, %c0_15] : memref<1x8x2048xf32, #tpu.memory_space<vmem>>, vector<1x8x2048xf32>
    %21 = vector.shape_cast %20 : vector<1x8x2048xf32> to vector<8x2048xf32>
    %22 = vector.shape_cast %19 : vector<8x2048xf32> to vector<1x8x2048xf32>
    tpu.vector_store %arg7[%c0_13, %c0_14, %c0_15], %22 {strides = array<i32>} : memref<1x8x2048xf32, #tpu.memory_space<vmem>>, vector<1x8x2048xf32>,
    return
  }
  func.func @transform_0(%arg0: i32, %arg1: i32) -> (i32, i32, i32) {
    %c0_i32 = arith.constant 0 : i32
    %c0_i32_0 = arith.constant 0 : i32
    return %arg0, %c0_i32, %arg1 : i32, i32, i32
  }
  func.func @transform_1(%arg0: i32, %arg1: i32) -> (i32, i32) {
    %c0_i32 = arith.constant 0 : i32
    %c0_i32_0 = arith.constant 0 : i32
    %c0_i32_1 = arith.constant 0 : i32
    return %c0_i32, %c0_i32_0 : i32, i32
  }
  func.func @transform_2(%arg0: i32, %arg1: i32) -> (i32, i32) {
    %c0_i32 = arith.constant 0 : i32
    %c0_i32_0 = arith.constant 0 : i32
    return %c0_i32, %arg1 : i32, i32
  }
  func.func @transform_3(%arg0: i32, %arg1: i32) -> (i32, i32) {
    %c0_i32 = arith.constant 0 : i32
    %c0_i32_0 = arith.constant 0 : i32
    %c0_i32_1 = arith.constant 0 : i32
    return %c0_i32, %c0_i32_0 : i32, i32
  }
  func.func @transform_4(%arg0: i32, %arg1: i32) -> (i32, i32) {
    %c0_i32 = arith.constant 0 : i32
    %c0_i32_0 = arith.constant 0 : i32
    return %c0_i32, %arg1 : i32, i32
  }
  func.func @transform_5(%arg0: i32, %arg1: i32) -> (i32, i32, i32) {
    %c0_i32 = arith.constant 0 : i32
    %c0_i32_0 = arith.constant 0 : i32
    return %arg0, %c0_i32, %arg1 : i32, i32, i32
  }
}

module attributes {stable_mosaic.version = 11 : i64} {
  func.func @_geom_kernel(%arg0: i32, %arg1: memref<1x32x128xf32, #tpu.memory_space<vmem>>, %arg2: memref<32x128xf32, #tpu.memory_space<vmem>>, %arg3: memref<5x32x32xf32, #tpu.memory_space<vmem>>, %arg4: memref<5x128x128xf32, #tpu.memory_space<vmem>>, %arg5: memref<1x32x128xi32, #tpu.memory_space<vmem>>) attributes {dimension_semantics = [#tpu.dimension_semantics<parallel>], iteration_bounds = array<i64: 2>, scalar_prefetch = 0 : i64, scratch_operands = 0 : i64, tpu.core_type = #tpu.core_type<tc>, window_params = [{transform_indices = @transform_0, window_bounds = array<i64: 1, 32, 128>}, {pipeline_mode = #tpu.pipeline_mode<synchronous>, transform_indices = @transform_1, window_bounds = array<i64: 32, 128>}, {pipeline_mode = #tpu.pipeline_mode<synchronous>, transform_indices = @transform_2, window_bounds = array<i64: 5, 32, 32>}, {pipeline_mode = #tpu.pipeline_mode<synchronous>, transform_indices = @transform_3, window_bounds = array<i64: 5, 128, 128>}, {transform_indices = @transform_4, window_bounds = array<i64: 1, 32, 128>}]} {
    %c0 = arith.constant 0 : index
    %c0_0 = arith.constant 0 : index
    %c0_1 = arith.constant 0 : index
    %0 = vector.load %arg1[%c0, %c0_0, %c0_1] : memref<1x32x128xf32, #tpu.memory_space<vmem>>, vector<1x32x128xf32>
    %1 = vector.shape_cast %0 : vector<1x32x128xf32> to vector<32x128xf32>
    %c0_2 = arith.constant 0 : index
    %c0_3 = arith.constant 0 : index
    %2 = vector.load %arg2[%c0_2, %c0_3] : memref<32x128xf32, #tpu.memory_space<vmem>>, vector<32x128xf32>
    %cst = arith.constant dense<0x7F800000> : vector<32xf32>
    %3 = vector.multi_reduction <minimumf>, %1, %cst [1] : vector<32x128xf32> to vector<32xf32>
    %4 = vector.shape_cast %3 : vector<32xf32> to vector<32x1xf32>
    %cst_4 = arith.constant dense<0x7F800000> : vector<1xf32>
    %5 = vector.multi_reduction <minimumf>, %4, %cst_4 [0] : vector<32x1xf32> to vector<1xf32>
    %6 = vector.shape_cast %5 : vector<1xf32> to vector<1x1xf32>
    %cst_5 = arith.constant 0.000000e+00 : f32
    %7 = vector.broadcast %cst_5 : f32 to vector<32x128xf32>
    %8 = arith.cmpf olt, %1, %7 : vector<32x128xf32>
    %9 = arith.minimumf %1, %2 : vector<32x128xf32>
    %10 = arith.subf %9, %2 : vector<32x128xf32>
    %cst_6 = arith.constant 4.000000e-01 : f32
    %11 = vector.broadcast %cst_6 : f32 to vector<1x1xf32>
    %12 = arith.mulf %6, %11 : vector<1x1xf32>
    %13 = vector.broadcast %12 : vector<1x1xf32> to vector<32x128xf32>
    %14 = arith.cmpf olt, %10, %13 : vector<32x128xf32>
    %15 = arith.andi %14, %8 : vector<32x128xi1>
    %c0_7 = arith.constant 0 : index
    %c0_8 = arith.constant 0 : index
    %c0_9 = arith.constant 0 : index
    %16 = vector.load %arg3[%c0_7, %c0_8, %c0_9] : memref<5x32x32xf32, #tpu.memory_space<vmem>>, vector<1x32x32xf32>
    %17 = vector.shape_cast %16 : vector<1x32x32xf32> to vector<32x32xf32>
    %cst_10 = arith.constant dense<0.000000e+00> : vector<32x128xf32>
    %18 = tpu.matmul %17, %9, %cst_10 {dimension_numbers = #tpu.dot_dimension_numbers<[1], [0], [0], [1], [0, 0, 1, 1], [], []>, precision = #tpu.contract_precision<fp32>} : vector<32x32xf32>, vector<32x128xf32>, vector<32x128xf32> -> vector<32x128xf32>
    %c0_11 = arith.constant 0 : index
    %c0_12 = arith.constant 0 : index
    %c0_13 = arith.constant 0 : index
    %19 = vector.load %arg4[%c0_11, %c0_12, %c0_13] : memref<5x128x128xf32, #tpu.memory_space<vmem>>, vector<1x128x128xf32>
    %20 = vector.shape_cast %19 : vector<1x128x128xf32> to vector<128x128xf32>
    %cst_14 = arith.constant dense<0.000000e+00> : vector<32x128xf32>
    %21 = tpu.matmul %18, %20, %cst_14 {dimension_numbers = #tpu.dot_dimension_numbers<[1], [0], [0], [1], [0, 0, 1, 1], [], []>, precision = #tpu.contract_precision<fp32>} : vector<32x128xf32>, vector<128x128xf32>, vector<32x128xf32> -> vector<32x128xf32>
    %22 = arith.select %15, %9, %21 : vector<32x128xi1>, vector<32x128xf32>
    %c1 = arith.constant 1 : index
    %c0_15 = arith.constant 0 : index
    %c0_16 = arith.constant 0 : index
    %23 = vector.load %arg3[%c1, %c0_15, %c0_16] : memref<5x32x32xf32, #tpu.memory_space<vmem>>, vector<1x32x32xf32>
    %24 = vector.shape_cast %23 : vector<1x32x32xf32> to vector<32x32xf32>
    %cst_17 = arith.constant dense<0.000000e+00> : vector<32x128xf32>
    %25 = tpu.matmul %24, %22, %cst_17 {dimension_numbers = #tpu.dot_dimension_numbers<[1], [0], [0], [1], [0, 0, 1, 1], [], []>, precision = #tpu.contract_precision<fp32>} : vector<32x32xf32>, vector<32x128xf32>, vector<32x128xf32> -> vector<32x128xf32>
    %c1_18 = arith.constant 1 : index
    %c0_19 = arith.constant 0 : index
    %c0_20 = arith.constant 0 : index
    %26 = vector.load %arg4[%c1_18, %c0_19, %c0_20] : memref<5x128x128xf32, #tpu.memory_space<vmem>>, vector<1x128x128xf32>
    %27 = vector.shape_cast %26 : vector<1x128x128xf32> to vector<128x128xf32>
    %cst_21 = arith.constant dense<0.000000e+00> : vector<32x128xf32>
    %28 = tpu.matmul %25, %27, %cst_21 {dimension_numbers = #tpu.dot_dimension_numbers<[1], [0], [0], [1], [0, 0, 1, 1], [], []>, precision = #tpu.contract_precision<fp32>} : vector<32x128xf32>, vector<128x128xf32>, vector<32x128xf32> -> vector<32x128xf32>
    %29 = arith.select %15, %9, %28 : vector<32x128xi1>, vector<32x128xf32>
    %c2 = arith.constant 2 : index
    %c0_22 = arith.constant 0 : index
    %c0_23 = arith.constant 0 : index
    %30 = vector.load %arg3[%c2, %c0_22, %c0_23] : memref<5x32x32xf32, #tpu.memory_space<vmem>>, vector<1x32x32xf32>
    %31 = vector.shape_cast %30 : vector<1x32x32xf32> to vector<32x32xf32>
    %cst_24 = arith.constant dense<0.000000e+00> : vector<32x128xf32>
    %32 = tpu.matmul %31, %29, %cst_24 {dimension_numbers = #tpu.dot_dimension_numbers<[1], [0], [0], [1], [0, 0, 1, 1], [], []>, precision = #tpu.contract_precision<fp32>} : vector<32x32xf32>, vector<32x128xf32>, vector<32x128xf32> -> vector<32x128xf32>
    %c2_25 = arith.constant 2 : index
    %c0_26 = arith.constant 0 : index
    %c0_27 = arith.constant 0 : index
    %33 = vector.load %arg4[%c2_25, %c0_26, %c0_27] : memref<5x128x128xf32, #tpu.memory_space<vmem>>, vector<1x128x128xf32>
    %34 = vector.shape_cast %33 : vector<1x128x128xf32> to vector<128x128xf32>
    %cst_28 = arith.constant dense<0.000000e+00> : vector<32x128xf32>
    %35 = tpu.matmul %32, %34, %cst_28 {dimension_numbers = #tpu.dot_dimension_numbers<[1], [0], [0], [1], [0, 0, 1, 1], [], []>, precision = #tpu.contract_precision<fp32>} : vector<32x128xf32>, vector<128x128xf32>, vector<32x128xf32> -> vector<32x128xf32>
    %c3 = arith.constant 3 : index
    %c0_29 = arith.constant 0 : index
    %c0_30 = arith.constant 0 : index
    %36 = vector.load %arg3[%c3, %c0_29, %c0_30] : memref<5x32x32xf32, #tpu.memory_space<vmem>>, vector<1x32x32xf32>
    %37 = vector.shape_cast %36 : vector<1x32x32xf32> to vector<32x32xf32>
    %cst_31 = arith.constant dense<0.000000e+00> : vector<32x128xf32>
    %38 = tpu.matmul %37, %35, %cst_31 {dimension_numbers = #tpu.dot_dimension_numbers<[1], [0], [0], [1], [0, 0, 1, 1], [], []>, precision = #tpu.contract_precision<fp32>} : vector<32x32xf32>, vector<32x128xf32>, vector<32x128xf32> -> vector<32x128xf32>
    %c3_32 = arith.constant 3 : index
    %c0_33 = arith.constant 0 : index
    %c0_34 = arith.constant 0 : index
    %39 = vector.load %arg4[%c3_32, %c0_33, %c0_34] : memref<5x128x128xf32, #tpu.memory_space<vmem>>, vector<1x128x128xf32>
    %40 = vector.shape_cast %39 : vector<1x128x128xf32> to vector<128x128xf32>
    %cst_35 = arith.constant dense<0.000000e+00> : vector<32x128xf32>
    %41 = tpu.matmul %38, %40, %cst_35 {dimension_numbers = #tpu.dot_dimension_numbers<[1], [0], [0], [1], [0, 0, 1, 1], [], []>, precision = #tpu.contract_precision<fp32>} : vector<32x128xf32>, vector<128x128xf32>, vector<32x128xf32> -> vector<32x128xf32>
    %c4 = arith.constant 4 : index
    %c0_36 = arith.constant 0 : index
    %c0_37 = arith.constant 0 : index
    %42 = vector.load %arg3[%c4, %c0_36, %c0_37] : memref<5x32x32xf32, #tpu.memory_space<vmem>>, vector<1x32x32xf32>
    %43 = vector.shape_cast %42 : vector<1x32x32xf32> to vector<32x32xf32>
    %cst_38 = arith.constant dense<0.000000e+00> : vector<32x128xf32>
    %44 = tpu.matmul %43, %35, %cst_38 {dimension_numbers = #tpu.dot_dimension_numbers<[1], [0], [0], [1], [0, 0, 1, 1], [], []>, precision = #tpu.contract_precision<fp32>} : vector<32x32xf32>, vector<32x128xf32>, vector<32x128xf32> -> vector<32x128xf32>
    %c4_39 = arith.constant 4 : index
    %c0_40 = arith.constant 0 : index
    %c0_41 = arith.constant 0 : index
    %45 = vector.load %arg4[%c4_39, %c0_40, %c0_41] : memref<5x128x128xf32, #tpu.memory_space<vmem>>, vector<1x128x128xf32>
    %46 = vector.shape_cast %45 : vector<1x128x128xf32> to vector<128x128xf32>
    %cst_42 = arith.constant dense<0.000000e+00> : vector<32x128xf32>
    %47 = tpu.matmul %44, %46, %cst_42 {dimension_numbers = #tpu.dot_dimension_numbers<[1], [0], [0], [1], [0, 0, 1, 1], [], []>, precision = #tpu.contract_precision<fp32>} : vector<32x128xf32>, vector<128x128xf32>, vector<32x128xf32> -> vector<32x128xf32>
    %48 = arith.mulf %41, %41 : vector<32x128xf32>
    %49 = arith.mulf %47, %47 : vector<32x128xf32>
    %50 = arith.addf %48, %49 : vector<32x128xf32>
    %51 = math.sqrt %50 : vector<32x128xf32>
    %c0_i32 = arith.constant 0 : i32
    %52 = vector.broadcast %c0_i32 : i32 to vector<32x128xi32>
    %cst_43 = arith.constant 1.104690e-02 : f32
    %53 = vector.broadcast %cst_43 : f32 to vector<32x128xf32>
    %54 = arith.cmpf oge, %50, %53 : vector<32x128xf32>
    %55 = arith.extui %54 : vector<32x128xi1> to vector<32x128xi32>
    %56 = arith.addi %52, %55 : vector<32x128xi32>
    %cst_44 = arith.constant 0.0451802909 : f32
    %57 = vector.broadcast %cst_44 : f32 to vector<32x128xf32>
    %58 = arith.cmpf oge, %50, %57 : vector<32x128xf32>
    %59 = arith.extui %58 : vector<32x128xi1> to vector<32x128xi32>
    %60 = arith.addi %56, %59 : vector<32x128xi32>
    %cst_45 = arith.constant 0.105572812 : f32
    %61 = vector.broadcast %cst_45 : f32 to vector<32x128xf32>
    %62 = arith.cmpf oge, %50, %61 : vector<32x128xf32>
    %63 = arith.extui %62 : vector<32x128xi1> to vector<32x128xi32>
    %64 = arith.addi %60, %63 : vector<32x128xi32>
    %cst_46 = arith.constant 0.198228583 : f32
    %65 = vector.broadcast %cst_46 : f32 to vector<32x128xf32>
    %66 = arith.cmpf oge, %50, %65 : vector<32x128xf32>
    %67 = arith.extui %66 : vector<32x128xi1> to vector<32x128xi32>
    %68 = arith.addi %64, %67 : vector<32x128xi32>
    %cst_47 = arith.constant 0.333333343 : f32
    %69 = vector.broadcast %cst_47 : f32 to vector<32x128xf32>
    %70 = arith.cmpf oge, %50, %69 : vector<32x128xf32>
    %71 = arith.extui %70 : vector<32x128xi1> to vector<32x128xi32>
    %72 = arith.addi %68, %71 : vector<32x128xi32>
    %cst_48 = arith.constant 0.527864039 : f32
    %73 = vector.broadcast %cst_48 : f32 to vector<32x128xf32>
    %74 = arith.cmpf oge, %50, %73 : vector<32x128xf32>
    %75 = arith.extui %74 : vector<32x128xi1> to vector<32x128xi32>
    %76 = arith.addi %72, %75 : vector<32x128xi32>
    %cst_49 = arith.constant 0.810727417 : f32
    %77 = vector.broadcast %cst_49 : f32 to vector<32x128xf32>
    %78 = arith.cmpf oge, %50, %77 : vector<32x128xf32>
    %79 = arith.extui %78 : vector<32x128xi1> to vector<32x128xi32>
    %80 = arith.addi %76, %79 : vector<32x128xi32>
    %cst_50 = arith.constant 1.23346019 : f32
    %81 = vector.broadcast %cst_50 : f32 to vector<32x128xf32>
    %82 = arith.cmpf oge, %50, %81 : vector<32x128xf32>
    %83 = arith.extui %82 : vector<32x128xi1> to vector<32x128xi32>
    %84 = arith.addi %80, %83 : vector<32x128xi32>
    %cst_51 = arith.constant 1.89442718 : f32
    %85 = vector.broadcast %cst_51 : f32 to vector<32x128xf32>
    %86 = arith.cmpf oge, %50, %85 : vector<32x128xf32>
    %87 = arith.extui %86 : vector<32x128xi1> to vector<32x128xi32>
    %88 = arith.addi %84, %87 : vector<32x128xi32>
    %cst_52 = arith.constant 3.000000e+00 : f32
    %89 = vector.broadcast %cst_52 : f32 to vector<32x128xf32>
    %90 = arith.cmpf oge, %50, %89 : vector<32x128xf32>
    %91 = arith.extui %90 : vector<32x128xi1> to vector<32x128xi32>
    %92 = arith.addi %88, %91 : vector<32x128xi32>
    %cst_53 = arith.constant 5.04468107 : f32
    %93 = vector.broadcast %cst_53 : f32 to vector<32x128xf32>
    %94 = arith.cmpf oge, %50, %93 : vector<32x128xf32>
    %95 = arith.extui %94 : vector<32x128xi1> to vector<32x128xi32>
    %96 = arith.addi %92, %95 : vector<32x128xi32>
    %cst_54 = arith.constant 9.47213554 : f32
    %97 = vector.broadcast %cst_54 : f32 to vector<32x128xf32>
    %98 = arith.cmpf oge, %50, %97 : vector<32x128xf32>
    %99 = arith.extui %98 : vector<32x128xi1> to vector<32x128xi32>
    %100 = arith.addi %96, %99 : vector<32x128xi32>
    %cst_55 = arith.constant 22.1335449 : f32
    %101 = vector.broadcast %cst_55 : f32 to vector<32x128xf32>
    %102 = arith.cmpf oge, %50, %101 : vector<32x128xf32>
    %103 = arith.extui %102 : vector<32x128xi1> to vector<32x128xi32>
    %104 = arith.addi %100, %103 : vector<32x128xi32>
    %cst_56 = arith.constant 90.5231323 : f32
    %105 = vector.broadcast %cst_56 : f32 to vector<32x128xf32>
    %106 = arith.cmpf oge, %50, %105 : vector<32x128xf32>
    %107 = arith.extui %106 : vector<32x128xi1> to vector<32x128xi32>
    %108 = arith.addi %104, %107 : vector<32x128xi32>
    %109 = arith.addf %51, %47 : vector<32x128xf32>
    %cst_57 = arith.constant 0.000000e+00 : f32
    %110 = vector.broadcast %cst_57 : f32 to vector<32x128xf32>
    %111 = arith.cmpf ogt, %109, %110 : vector<32x128xf32>
    %cst_58 = arith.constant 1.000000e+00 : f32
    %112 = vector.broadcast %cst_58 : f32 to vector<32x128xf32>
    %113 = arith.select %111, %109, %112 : vector<32x128xi1>, vector<32x128xf32>
    %114 = arith.divf %41, %113 : vector<32x128xf32>
    %c0_i32_59 = arith.constant 0 : i32
    %115 = vector.broadcast %c0_i32_59 : i32 to vector<32x128xi32>
    %cst_60 = arith.constant -4.704630e+00 : f32
    %116 = vector.broadcast %cst_60 : f32 to vector<32x128xf32>
    %117 = arith.cmpf oge, %114, %116 : vector<32x128xf32>
    %118 = arith.extui %117 : vector<32x128xi1> to vector<32x128xi32>
    %119 = arith.addi %115, %118 : vector<32x128xi32>
    %cst_61 = arith.constant -2.24603677 : f32
    %120 = vector.broadcast %cst_61 : f32 to vector<32x128xf32>
    %121 = arith.cmpf oge, %114, %120 : vector<32x128xf32>
    %122 = arith.extui %121 : vector<32x128xi1> to vector<32x128xi32>
    %123 = arith.addi %119, %122 : vector<32x128xi32>
    %cst_62 = arith.constant -1.37638187 : f32
    %124 = vector.broadcast %cst_62 : f32 to vector<32x128xf32>
    %125 = arith.cmpf oge, %114, %124 : vector<32x128xf32>
    %126 = arith.extui %125 : vector<32x128xi1> to vector<32x128xi32>
    %127 = arith.addi %123, %126 : vector<32x128xi32>
    %cst_63 = arith.constant -0.900404036 : f32
    %128 = vector.broadcast %cst_63 : f32 to vector<32x128xf32>
    %129 = arith.cmpf oge, %114, %128 : vector<32x128xf32>
    %130 = arith.extui %129 : vector<32x128xi1> to vector<32x128xi32>
    %131 = arith.addi %127, %130 : vector<32x128xi32>
    %cst_64 = arith.constant -0.577350259 : f32
    %132 = vector.broadcast %cst_64 : f32 to vector<32x128xf32>
    %133 = arith.cmpf oge, %114, %132 : vector<32x128xf32>
    %134 = arith.extui %133 : vector<32x128xi1> to vector<32x128xi32>
    %135 = arith.addi %131, %134 : vector<32x128xi32>
    %cst_65 = arith.constant -0.324919701 : f32
    %136 = vector.broadcast %cst_65 : f32 to vector<32x128xf32>
    %137 = arith.cmpf oge, %114, %136 : vector<32x128xf32>
    %138 = arith.extui %137 : vector<32x128xi1> to vector<32x128xi32>
    %139 = arith.addi %135, %138 : vector<32x128xi32>
    %cst_66 = arith.constant -0.105104238 : f32
    %140 = vector.broadcast %cst_66 : f32 to vector<32x128xf32>
    %141 = arith.cmpf oge, %114, %140 : vector<32x128xf32>
    %142 = arith.extui %141 : vector<32x128xi1> to vector<32x128xi32>
    %143 = arith.addi %139, %142 : vector<32x128xi32>
    %cst_67 = arith.constant 0.105104238 : f32
    %144 = vector.broadcast %cst_67 : f32 to vector<32x128xf32>
    %145 = arith.cmpf oge, %114, %144 : vector<32x128xf32>
    %146 = arith.extui %145 : vector<32x128xi1> to vector<32x128xi32>
    %147 = arith.addi %143, %146 : vector<32x128xi32>
    %cst_68 = arith.constant 0.324919701 : f32
    %148 = vector.broadcast %cst_68 : f32 to vector<32x128xf32>
    %149 = arith.cmpf oge, %114, %148 : vector<32x128xf32>
    %150 = arith.extui %149 : vector<32x128xi1> to vector<32x128xi32>
    %151 = arith.addi %147, %150 : vector<32x128xi32>
    %cst_69 = arith.constant 0.577350259 : f32
    %152 = vector.broadcast %cst_69 : f32 to vector<32x128xf32>
    %153 = arith.cmpf oge, %114, %152 : vector<32x128xf32>
    %154 = arith.extui %153 : vector<32x128xi1> to vector<32x128xi32>
    %155 = arith.addi %151, %154 : vector<32x128xi32>
    %cst_70 = arith.constant 0.900404036 : f32
    %156 = vector.broadcast %cst_70 : f32 to vector<32x128xf32>
    %157 = arith.cmpf oge, %114, %156 : vector<32x128xf32>
    %158 = arith.extui %157 : vector<32x128xi1> to vector<32x128xi32>
    %159 = arith.addi %155, %158 : vector<32x128xi32>
    %cst_71 = arith.constant 1.37638187 : f32
    %160 = vector.broadcast %cst_71 : f32 to vector<32x128xf32>
    %161 = arith.cmpf oge, %114, %160 : vector<32x128xf32>
    %162 = arith.extui %161 : vector<32x128xi1> to vector<32x128xi32>
    %163 = arith.addi %159, %162 : vector<32x128xi32>
    %cst_72 = arith.constant 2.24603677 : f32
    %164 = vector.broadcast %cst_72 : f32 to vector<32x128xf32>
    %165 = arith.cmpf oge, %114, %164 : vector<32x128xf32>
    %166 = arith.extui %165 : vector<32x128xi1> to vector<32x128xi32>
    %167 = arith.addi %163, %166 : vector<32x128xi32>
    %cst_73 = arith.constant 4.704630e+00 : f32
    %168 = vector.broadcast %cst_73 : f32 to vector<32x128xf32>
    %169 = arith.cmpf oge, %114, %168 : vector<32x128xf32>
    %170 = arith.extui %169 : vector<32x128xi1> to vector<32x128xi32>
    %171 = arith.addi %167, %170 : vector<32x128xi32>
    %cst_74 = arith.constant 0.000000e+00 : f32
    %172 = vector.broadcast %cst_74 : f32 to vector<32x128xf32>
    %173 = arith.cmpf ogt, %50, %172 : vector<32x128xf32>
    %c15_i32 = arith.constant 15 : i32
    %c7_i32 = arith.constant 7 : i32
    %174 = vector.broadcast %c15_i32 : i32 to vector<32x128xi32>
    %175 = vector.broadcast %c7_i32 : i32 to vector<32x128xi32>
    %176 = arith.select %173, %174, %175 : vector<32x128xi1>, vector<32x128xi32>
    %177 = arith.select %111, %171, %176 : vector<32x128xi1>, vector<32x128xi32>
    %c16_i32 = arith.constant 16 : i32
    %178 = vector.broadcast %c16_i32 : i32 to vector<32x128xi32>
    %179 = arith.muli %108, %178 : vector<32x128xi32>
    %180 = arith.addi %179, %177 : vector<32x128xi32>
    %c0_75 = arith.constant 0 : index
    %c0_76 = arith.constant 0 : index
    %c0_77 = arith.constant 0 : index
    %181 = vector.load %arg5[%c0_75, %c0_76, %c0_77] : memref<1x32x128xi32, #tpu.memory_space<vmem>>, vector<1x32x128xi32>
    %182 = vector.shape_cast %181 : vector<1x32x128xi32> to vector<32x128xi32>
    %183 = vector.shape_cast %180 : vector<32x128xi32> to vector<1x32x128xi32>
    tpu.vector_store %arg5[%c0_75, %c0_76, %c0_77], %183 {strides = array<i32>} : memref<1x32x128xi32, #tpu.memory_space<vmem>>, vector<1x32x128xi32>,
    return
  }
  func.func @transform_0(%arg0: i32) -> (i32, i32, i32) {
    %c0_i32 = arith.constant 0 : i32
    %c0_i32_0 = arith.constant 0 : i32
    %c0_i32_1 = arith.constant 0 : i32
    return %arg0, %c0_i32, %c0_i32_0 : i32, i32, i32
  }
  func.func @transform_1(%arg0: i32) -> (i32, i32) {
    %c0_i32 = arith.constant 0 : i32
    %c0_i32_0 = arith.constant 0 : i32
    %c0_i32_1 = arith.constant 0 : i32
    return %c0_i32, %c0_i32_0 : i32, i32
  }
  func.func @transform_2(%arg0: i32) -> (i32, i32, i32) {
    %c0_i32 = arith.constant 0 : i32
    %c0_i32_0 = arith.constant 0 : i32
    %c0_i32_1 = arith.constant 0 : i32
    %c0_i32_2 = arith.constant 0 : i32
    return %c0_i32, %c0_i32_0, %c0_i32_1 : i32, i32, i32
  }
  func.func @transform_3(%arg0: i32) -> (i32, i32, i32) {
    %c0_i32 = arith.constant 0 : i32
    %c0_i32_0 = arith.constant 0 : i32
    %c0_i32_1 = arith.constant 0 : i32
    %c0_i32_2 = arith.constant 0 : i32
    return %c0_i32, %c0_i32_0, %c0_i32_1 : i32, i32, i32
  }
  func.func @transform_4(%arg0: i32) -> (i32, i32, i32) {
    %c0_i32 = arith.constant 0 : i32
    %c0_i32_0 = arith.constant 0 : i32
    %c0_i32_1 = arith.constant 0 : i32
    return %arg0, %c0_i32, %c0_i32_0 : i32, i32, i32
  }
}

</mosaic_0001>

<bundles_post_ra>
// kernel: _lambda_.2
= control target key start
LH: loop header
LB: loop body
LE: loop exit
PB: predicated region body
PF: predicated region fallthrough
CT: control target
= control target key end

     0   :  { %9 = vsyncpa [#allocation3], 0  ;;  %s7058_s0 = inlined_call_operand.hbm [shape: f32[2,32,128], index: 0, kind: input, shape index: {}]   ;;  %s7059_s1 = inlined_call_operand.hbm [shape: f32[32,128], index: 1, kind: input, shape index: {}]   ;;  %s7060_s2 = inlined_call_operand.hbm [shape: f32[5,32,32], index: 2, kind: input, shape index: {}]   ;;  %s7061_s3 = inlined_call_operand.hbm [shape: f32[5,128,128], index: 3, kind: input, shape index: {}]   ;;  %s7062_s4 = inlined_call_operand.vmem [shape: s32[2,32,128], index: 4, kind: output, shape index: {}]  }
   0x1   :  { %11 = vsyncpa [#allocation3 + $0x1], 0 }
   0x2   :  { %12 = vsyncpa [#allocation5], 0 }
   0x3   :  { %13 = vsyncpa [#allocation8], 0  ;;  %s4939_s15 = smov 0   ;;  %s4941_s16 = smov 0  }
   0x4   :  { %s4943_s17 = smov 0   ;;  %s4945_s18 = smov 0  }
   0x5 LB: > { %s4958_s19 = sadd.s32 4294967295, %s4905_s18   ;;  %p39_p0 = scmp.ne.s32.totalorder %s4897_s16, %s4893_s15  ;;  %s4905_s18 = sphi %s4945_s18, %s7114_s18   ;;  %s4901_s17 = sphi %s4943_s17, %s7113_s17   ;;  %s4897_s16 = sphi %s4941_s16, %s7112_s16   ;;  %s4893_s15 = sphi %s4939_s15, %s7111_s15  }
   0x6   : > { %p40_p1 = scmp.eq.s32.totalorder %s4958_s19, 0  ;;  %p4634_p2 = scmp.ge.s32.totalorder %s4905_s18, 1 }
   0x7   : > { %p139_p3 = scmp.lt.s32.totalorder %s4905_s18, 3  ;;  %s150_s23 = sshll.u32 %s7059_s1, 4  ;;  %s151_s23 = int_to_ptr.hbm [resolvable:$true] %s150_s23 }
   0x8   : > { %p4966_p4 = por %p40_p1, %p39_p0  ;;  %s4907_s25 = smov [#allocation4]  }
   0x9   : > { %p4973_p5 = pnand %p4634_p2, %p139_p3  ;;  %s152_s26 = sshll.u32 %s4907_s25, 4  ;;  %s153_s26 = int_to_ptr.vmem [resolvable:$true] %s152_s26 }
   0xa   : > { %s164_s30 = sshll.u32 %s7060_s2, 4  ;;  %s4908_s5 = smov 128   ;;  %s165_s30 = int_to_ptr.hbm [resolvable:$true] %s164_s30 }
   0xb   : > { %p4667_p6 = pneg %p4973_p5  ;;  %s4909_s6 = smov 8  }
   0xc   : > { %s4910_s7 = smov [#allocation6]   ;;  %s178_s11 = sshll.u32 %s7061_s3, 4  ;;  %s179_s11 = int_to_ptr.hbm [resolvable:$true] %s178_s11 }
   0xd   : > { %p4981_p7 = pnand %p4667_p6, %p40_p1  ;;  %s166_s8 = sshll.u32 %s4910_s7, 4  ;;  %s167_s8 = int_to_ptr.vmem [resolvable:$true] %s166_s8 }
   0xe   : > { %s4911_s12 = smov [#allocation7]   ;;  %s5002_s14 = sadd.s32 1, %s4905_s18  }
   0xf   : > { %4670 = dma.hbm_to_vmem [thread:$0]  (!%p4981_p7), %s151_s23, 512, %s153_s26, [#allocation5], %s4908_s5, %s4908_s5, %s4909_s6  }
  0x10   : > { %4673 = dma.hbm_to_vmem [thread:$0]  (!%p4981_p7), %s165_s30, 2560, %s167_s8, [#allocation5], %s4908_s5, %s4908_s5, %s4909_s6  }
  0x11   : > { %s180_s13 = sshll.u32 %s4911_s12, 4  ;;  %s23_s15 = ssub.s32 %s4905_s18, %s5002_s14  ;;  %s181_s13 = int_to_ptr.vmem [resolvable:$true] %s180_s13 }
  0x12   : > { %4676 = dma.hbm_to_vmem [thread:$0]  (!%p4981_p7), %s179_s11, 10240, %s181_s13, [#allocation8], %s4908_s5, %s4908_s5, %s4909_s6  }
  0x13   : > { %s26_s21 = sadd.s32 1, %s4901_s17  ;;  %p24_p8 = scmp.eq.s32.totalorder %s23_s15, 0 }
  0x14   : > { %p33_p9 = scmp.ne.s32.totalorder %s4901_s17, %s4897_s16  ;;  %p34_p10 = scmp.eq.s32.totalorder %s4905_s18, 0 }
  0x15   : > { %p4684_p11 = scmp.lt.s32.totalorder %s4905_s18, 2  ;;  %s194_s23 = sand.u32 1, %s4901_s17  }
  0x16   : > { %s5017_s22 = scalar_select %p24_p8, %s4901_s17, %s26_s21  }
  0x17   : > { %p35_p12 = por %p34_p10, %p33_p9  ;;  %s4639_s25 = sshll.u32 %s194_s23, 5 }
  0x18   : > { %s4651_s26 = sshll.u32 %s4905_s18, 5  ;;  %s198_s30 = scalar_lea.vmem [#allocation2], %s4639_s25 }
  0x19   : > { %s203_s27 = scalar_lea.hbm %s7058_s0, %s4651_s26  ;;  %s206_s7 = sshll.u32 %s198_s30, 4  ;;  %s207_s7 = int_to_ptr.vmem [resolvable:$true] %s206_s7 }
  0x1a   : > { %s204_s8 = sshll.u32 %s203_s27, 4  ;;  %p5024_p13 = pnand %p4684_p11, %p35_p12  ;;  %s205_s8 = int_to_ptr.hbm [resolvable:$true] %s204_s8 }
  0x1b   : > { %s195_s10 = scalar_lea.sflag [#allocation3], %s194_s23  ;;  %s4833_s11 = sshra.s32 %s205_s8, 4  ;;  %s4834_s11 = int_to_ptr.hbm [resolvable:$true] %s4833_s11 }
  0x1c   : > { %s4835_s12 = scalar_lea.hbm %s4834_s11, 32  ;;  %p4837_p2 = pneg %p5024_p13 }
  0x1d   : > { %p4836_p0 = scmp.ne.s32.totalorder %s4834_s11, %s4835_s12  ;;  %s4840_s15 = scalar_lea.hbm %s7058_s0, 64 }
  0x1e   : > { %p4841_p7 = scmp.lt.s32.totalorder %s4834_s11, %s7058_s0  ;;  %p4842_p8 = scmp.lt.s32.totalorder %s4840_s15, %s4835_s12 }
  0x1f   : > { %p4838_p3 = pnand %p4837_p2, %p4836_p0 }
  0x20   : > { %p4843_p9 = por %p4842_p8, %p4841_p7 }
  0x21   : > { %p4839_p6 = pneg %p4838_p3 }
  0x23   : > { %p4844_p10 = pnand %p4843_p9, %p4839_p6 }
  0x25   : > { %4847 = shalt.err (!%p4844_p10)
}
  0x26   : > { %4680 = dma.hbm_to_vmem [thread:$0]  (!%p5024_p13), %s205_s8, 512, %s207_s7, %s195_s10, %s4908_s5, %s4908_s5, %s4909_s6  }
  0x27   : > { %218 = sbr.rel (%p4973_p5) target bundleno = 1922 (0x782), region = 36  ;;  %s220_s23 = sand.u32 (!%p4973_p5), 1, %s4897_s16  }
  0x28   : > { %s4643_s26 = sshll.u32 (!%p4973_p5), %s220_s23, 5  ;;  %s221_s28 = scalar_lea.sflag (!%p4973_p5), [#allocation3], %s220_s23 }
  0x29   : > { %s224_s29 = scalar_lea.vmem (!%p4973_p5), [#allocation2], %s4643_s26 }
  0x2c   : > { %4880 = dma.done.wait (%p4966_p4), %s221_s28, 512  }
  0x2d   : > { %4882 = vsyncadd (%p4966_p4), %s221_s28, 4294966784 }
  0x2e   : > { %4884 = dma.done.wait (%p40_p1), [#allocation5], 3072  }
  0x2f   : > { %4886 = vsyncadd (%p40_p1), [#allocation5], 4294964224 }
  0x30   : > { %4888 = dma.done.wait (%p40_p1), [#allocation8], 10240  }
  0x31   : > { %4890 = vsyncadd (%p40_p1), [#allocation8], 4294957056  ;;  %v5056_v0 = vld [vmem:[%s224_s29 + $0x18] sm:$0xff]  ;;  %v5060_v2 = vld [vmem:[%s224_s29 + $0x10] sm:$0xff]  ;;  %vm320_vm0 = vcmask 261120   ;;  %p265_p1 = scmp.lt.s32.totalorder %s4958_s19, 1 }
  0x32   : > { %v5058_v1 = vld [vmem:[#allocation4 + $0x18] sm:$0xff]  ;;  %v5066_v4 = vld [vmem:[#allocation4 + $0x10] sm:$0xff]  ;;  %v5068_v5 = vld [vmem:[%s224_s29 + $0x8] sm:$0xff]  ;;  %282 = vmin.xlane.f32.xlu1 %v5060_v2  ;;  %vm297_vm3 = vcmp.lt.f32.partialorder %v5060_v2, 0.0  ;;  %vm298_vm10 = vcmp.lt.f32.partialorder %v5056_v0, 0.0 }
  0x33   : > { %v5064_v3 = vmin.f32 %v5056_v0, %v5058_v1  ;;  %v5070_v6 = vld [vmem:[#allocation4 + $0x8] sm:$0xff]  ;;  %v5075_v7 = vmin.f32 %v5060_v2, %v5066_v4  ;;  %v5081_v9 = vld [vmem:[%s224_s29] sm:$0xff]  ;;  %v318_v16 = vld [vmem:[#allocation6 + $0x10] sm:$0xff]  ;;  %vm296_vm1 = vcmp.lt.f32.partialorder %v5068_v5, 0.0  ;;  %s7116_s19 = smov (!%p265_p1, %s4958_s19), 1 }
  0x34   : > { %v5079_v8 = vmin.f32 %v5068_v5, %v5070_v6  ;;  %v5083_v10 = vld [vmem:[#allocation4] sm:$0xff]  ;;  %v317_v15 = vld [vmem:[#allocation6 + $0x8] sm:$0xff]  ;;  %278 = vmin.xlane.f32.xlu0 %v5081_v9  ;;  %v328_v27 = vsel %vm320_vm0, %v318_v16, 0  ;;  %v319_v45 = vld [vmem:[#allocation6 + $0x18] sm:$0xff]  ;;  %vm295_vm5 = vcmp.lt.f32.partialorder %v5081_v9, 0.0  ;;  %s4652_s20 = sshll.u32 %s7116_s19, 5 }
  0x35   : > { %v316_v11 = vld [vmem:[#allocation6] sm:$0xff]  ;;  %v5086_v12 = vand.u32 4294901760, %v5064_v3  ;;  %v5090_v13 = vmin.f32 %v5081_v9, %v5083_v10  ;;  %v5095_v17 = vand.u32 4294901760, %v5075_v7  ;;  %v325_v20 = vsel %vm320_vm0, %v317_v15, 0  ;;  %v626_v60 = vld [vmem:[#allocation7 + $0x78] sm:$0xff]  ;;  %v625_v62 = vld [vmem:[#allocation7 + $0x70] sm:$0xff]  ;;  %s6890_s5 = scalar_lea.vmem %s7062_s4, %s4652_s20 }
  0x36   : > { %v322_v14 = vsel %vm320_vm0, %v316_v11, 0  ;;  %v5098_v18 = vand.u32 4294901760, %v5079_v8  ;;  %v5110_v23 = vand.u32 4294901760, %v325_v20  ;;  %v5124_v36 = vand.u32 4294901760, %v328_v27 }
  0x37   : > { %v5100_v19 = vand.u32 4294901760, %v322_v14  ;;  %346 = vmatpush.msra.mxu0 %v5086_v12  ;;  %v399_v21 = vsub.f32 %v5064_v3, %v5086_v12  ;;  %v5107_v22 = vand.u32 4294901760, %v5090_v13  ;;  %497 = vmatpush.msra.mxu3 %v5086_v12  ;;  %v405_v24 = vsub.f32 %v5075_v7, %v5095_v17 }
  0x38   : > { %v411_v26 = vsub.f32 %v5079_v8, %v5098_v18  ;;  %v362_v30 = vsub.f32 %v325_v20, %v5110_v23  ;;  %v370_v48 = vsub.f32 %v328_v27, %v5124_v36  ;;  %v331_v50 = vsel %vm320_vm0, %v319_v45, 0 }
  0x39   : > { %v354_v25 = vsub.f32 %v322_v14, %v5100_v19  ;;  %348 = vmatpush.msra.mxu0 %v5095_v17  ;;  %453 = vmatpush.msra.mxu2 %v399_v21  ;;  %v400_v28 = vand.u32 4294901760, %v399_v21  ;;  %v417_v29 = vsub.f32 %v5090_v13, %v5107_v22  ;;  %v406_v32 = vand.u32 4294901760, %v405_v24 }
  0x3a   : > { %499 = vmatpush.msra.mxu3 %v5095_v17  ;;  %v412_v33 = vand.u32 4294901760, %v411_v26  ;;  %v363_v40 = vand.u32 4294901760, %v362_v30  ;;  %284 = vmin.xlane.f32.xlu1 %v5056_v0  ;;  %v371_v52 = vand.u32 4294901760, %v370_v48  ;;  %v377_v53 = vand.u32 4294901760, %v331_v50 }
  0x3b   : > { %v355_v31 = vand.u32 4294901760, %v354_v25  ;;  %350 = vmatpush.msra.mxu0 %v5098_v18  ;;  %456 = vmatpush.msra.mxu2 %v405_v24  ;;  %v401_v34 = vsub.f32 %v399_v21, %v400_v28  ;;  %v418_v35 = vand.u32 4294901760, %v417_v29  ;;  %v407_v38 = vsub.f32 %v405_v24, %v406_v32 }
  0x3c   : > { %501 = vmatpush.msra.mxu3 %v5098_v18  ;;  %v413_v39 = vsub.f32 %v411_v26, %v412_v33  ;;  %v364_v47 = vsub.f32 %v362_v30, %v363_v40  ;;  %280 = vmin.xlane.f32.xlu0 %v5068_v5  ;;  %v372_v54 = vsub.f32 %v370_v48, %v371_v52  ;;  %v5146_v61 = vand.u32 4294901760, %v626_v60 }
  0x3d   : > { %v356_v37 = vsub.f32 %v354_v25, %v355_v31  ;;  %352 = vmatpush.msra.mxu0 %v5107_v22  ;;  %v402_v41 = vand.u32 4294901760, %v401_v34  ;;  %459 = vmatpush.msra.mxu2 %v411_v26  ;;  %v419_v42 = vsub.f32 %v417_v29, %v418_v35  ;;  %v408_v44 = vand.u32 4294901760, %v407_v38  ;;  %v620_v34 = vld [vmem:[#allocation7 + $0x48] sm:$0xff] }
  0x3e   : > { %503 = vmatpush.msra.mxu3 %v5107_v22  ;;  %v414_v46 = vand.u32 4294901760, %v413_v39  ;;  %v365_v51 = vand.u32 4294901760, %v364_v47  ;;  %v378_v55 = vsub.f32 %v331_v50, %v377_v53  ;;  %v373_v56 = vand.u32 4294901760, %v372_v54 }
  0x3f   : > { %v357_v43 = vand.u32 4294901760, %v356_v37  ;;  %544 = vmatpush.msrb.mxu0 %v400_v28  ;;  %403 = vmatpush.msra.mxu1 %v402_v41  ;;  %v420_v49 = vand.u32 4294901760, %v419_v42  ;;  %v5149_v63 = vsub.f32 %v626_v60, %v5146_v61  ;;  %v5151_v11 = vand.u32 4294901760, %v625_v62  ;;  %v621_v28 = vld [vmem:[#allocation7 + $0x50] sm:$0xff] }
  0x40   : > { %462 = vmatpush.msra.mxu2 %v417_v29  ;;  %507 = vmatmul.f32.vlgmr.msra.gmra.mxu3 %v355_v31  ;;  %v379_v57 = vand.u32 4294901760, %v378_v55  ;;  %v5206_v38 = vand.u32 4294901760, %v620_v34  ;;  %v306_v9 = vsub.f32 %v5064_v3, %v5058_v1 }
  0x41   : > { %358 = vmatmul.f32.vlgmr.msra.gmra.mxu0 %v357_v43  ;;  %465 = vmatmul.f32.vlgmr.msra.gmra.mxu2 %v354_v25  ;;  %v694_v14 = vand.u32 4294901760, %v5149_v63  ;;  %v5157_v15 = vsub.f32 %v625_v62, %v5151_v11 }
  0x42   : > { %409 = vmatpush.msra.mxu1 %v408_v44  ;;  %548 = vmatpush.msrb.mxu0 %v406_v32  ;;  %v380_v58 = vsub.f32 %v378_v55, %v379_v57  ;;  %v5193_v32 = vand.u32 4294901760, %v621_v28  ;;  %v5213_v43 = vsub.f32 %v620_v34, %v5206_v38 }
  0x43   : > { %628 = vmatpush.msrb.mxu2 %v5146_v61 }
  0x44   : > { %415 = vmatpush.msra.mxu1 %v414_v46  ;;  %552 = vmatpush.msrb.mxu0 %v412_v33  ;;  %v381_v59 = vand.u32 4294901760, %v380_v58  ;;  %v5204_v37 = vsub.f32 %v621_v28, %v5193_v32  ;;  %v618_v46 = vld [vmem:[#allocation7 + $0x38] sm:$0xff]  ;;  %v616_v58 = vld [vmem:[#allocation7 + $0x28] sm:$0xff] }
  0x45   : > { %630 = vmatpush.msrb.mxu2 %v5151_v11  ;;  %v5230_v50 = vand.u32 4294901760, %v618_v46 }
  0x46   : > { %421 = vmatpush.msra.mxu1 %v420_v49  ;;  %556 = vmatpush.msrb.mxu0 %v418_v35  ;;  %v724_v42 = vand.u32 4294901760, %v5204_v37 }
  0x47   : > { %423 = vmatmul.f32.vlgmr.msra.gmra.mxu1 %v5100_v19 }
  0x48   : > { %587 = vmatpush.msrb.mxu1 %v5086_v12  ;;  %513 = vmatmul.f32.gmra.mxu3 %v363_v40  ;;  %v624_v12 = vld [vmem:[#allocation7 + $0x68] sm:$0xff]  ;;  %v619_v40 = vld [vmem:[#allocation7 + $0x40] sm:$0xff]  ;;  %v725_v47 = vsub.f32 %v5204_v37, %v724_v42 }
  0x49   : > { %366 = vmatmul.f32.gmra.mxu0 %v365_v51  ;;  %470 = vmatmul.f32.gmra.mxu2 %v362_v30  ;;  %v5160_v16 = vand.u32 4294901760, %v624_v12  ;;  %v5215_v44 = vand.u32 4294901760, %v619_v40 }
  0x4a   : > { %589 = vmatpush.msrb.mxu1 %v5095_v17  ;;  %807 = vmatpush.msra.mxu0 %v5149_v63  ;;  %v623_v17 = vld [vmem:[#allocation7 + $0x60] sm:$0xff] }
  0x4b   : > { %v5169_v20 = vsub.f32 %v624_v12, %v5160_v16  ;;  %v5172_v21 = vand.u32 4294901760, %v623_v17  ;;  %632 = vmatpush.msrb.mxu2 %v5160_v16  ;;  %v5228_v49 = vsub.f32 %v619_v40, %v5215_v44  ;;  %v5250_v12 = vand.u32 4294901760, %v616_v58 }
  0x4c   : > { %591 = vmatpush.msrb.mxu1 %v5098_v18  ;;  %v695_v18 = vsub.f32 %v5149_v63, %v694_v14  ;;  %810 = vmatpush.msra.mxu0 %v5157_v15 }
  0x4d   : > { %v706_v25 = vand.u32 4294901760, %v5169_v20  ;;  %v5181_v26 = vsub.f32 %v623_v17, %v5172_v21  ;;  %634 = vmatpush.msrb.mxu2 %v5172_v21 }
  0x4e   : > { %593 = vmatpush.msrb.mxu1 %v5107_v22  ;;  %v622_v22 = vld [vmem:[#allocation7 + $0x58] sm:$0xff]  ;;  %813 = vmatpush.msra.mxu0 %v5169_v20 }
  0x4f   : > { %427 = vmatmul.f32.gmra.mxu1 %v5110_v23  ;;  %v5185_v27 = vand.u32 4294901760, %v622_v22  ;;  %v707_v30 = vsub.f32 %v5169_v20, %v706_v25  ;;  %v712_v31 = vand.u32 4294901760, %v5181_v26 }
  0x50   : > { %519 = vmatmul.f32.gmra.mxu3 %v371_v52  ;;  %875 = vmatpush.msra.mxu1 %v5146_v61  ;;  %v617_v52 = vld [vmem:[#allocation7 + $0x30] sm:$0xff] }
  0x51   : > { %374 = vmatmul.f32.gmra.mxu0 %v373_v56  ;;  %475 = vmatmul.f32.gmra.mxu2 %v370_v48  ;;  %v5196_v33 = vsub.f32 %v622_v22, %v5185_v27  ;;  %v708_v35 = vand.u32 4294901760, %v707_v30  ;;  %v730_v48 = vand.u32 4294901760, %v5213_v43  ;;  %v5240_v56 = vsub.f32 %v618_v46, %v5230_v50  ;;  %v614_v30 = vld [vmem:[#allocation7 + $0x18] sm:$0xff] }
  0x52   : > { %877 = vmatpush.msra.mxu1 %v5151_v11  ;;  %816 = vmatpush.msra.mxu0 %v5181_v26  ;;  %v5274_v40 = vand.u32 4294901760, %v614_v30 }
  0x53   : > { %636 = vmatpush.msrb.mxu2 %v5185_v27  ;;  %v718_v39 = vand.u32 4294901760, %v5196_v33  ;;  %v731_v54 = vsub.f32 %v5213_v43, %v730_v48  ;;  %v742_v62 = vand.u32 4294901760, %v5240_v56 }
  0x54   : > { %879 = vmatpush.msra.mxu1 %v5160_v16  ;;  %819 = vmatpush.msra.mxu0 %v5196_v33 }
  0x55   : > { %638 = vmatpush.msrb.mxu2 %v5193_v32  ;;  %v719_v45 = vsub.f32 %v5196_v33, %v718_v39 }
  0x56   : > { %881 = vmatpush.msra.mxu1 %v5172_v21  ;;  %822 = vmatpush.msra.mxu0 %v5204_v37 }
  0x57   : > { %431 = vmatmul.f32.gmra.mxu1 %v5124_v36  ;;  %640 = vmatpush.msrb.mxu2 %v5206_v38  ;;  %v720_v51 = vand.u32 4294901760, %v719_v45  ;;  %v613_v45 = vld [vmem:[#allocation7 + $0x10] sm:$0xff] }
  0x58   : > { %525 = vmatmul.f32.gmra.mxu3 %v379_v57  ;;  %883 = vmatpush.msra.mxu1 %v5185_v27  ;;  %v5244_v57 = vand.u32 4294901760, %v617_v52 }
  0x59   : > { %382 = vmatmul.f32.gmra.mxu0 %v381_v59  ;;  %480 = vmatmul.f32.gmra.mxu2 %v378_v55  ;;  %v736_v55 = vand.u32 4294901760, %v5228_v49  ;;  %v732_v59 = vand.u32 4294901760, %v731_v54  ;;  %v612_v54 = vld [vmem:[#allocation7 + $0x8] sm:$0xff] }
  0x5a   : > { %885 = vmatpush.msra.mxu1 %v5193_v32  ;;  %825 = vmatpush.msra.mxu0 %v5213_v43  ;;  %v5255_v17 = vsub.f32 %v617_v52, %v5244_v57  ;;  %v5289_v52 = vand.u32 4294901760, %v613_v45 }
  0x5b   : > { %642 = vmatpush.msrb.mxu2 %v5215_v44  ;;  %v737_v60 = vsub.f32 %v5228_v49, %v736_v55 }
  0x5c   : > { %887 = vmatpush.msra.mxu1 %v5206_v38  ;;  %828 = vmatpush.msra.mxu0 %v5228_v49 }
  0x5d   : > { %644 = vmatpush.msrb.mxu2 %v5230_v50  ;;  %v738_v22 = vand.u32 4294901760, %v737_v60 }
  0x5e   : > { %889 = vmatpush.msra.mxu1 %v5215_v44  ;;  %831 = vmatpush.msra.mxu0 %v5240_v56 }
  0x5f   : > { %435 = vmatmul.f32.gmra.mxu1 %v377_v53  ;;  %646 = vmatpush.msrb.mxu2 %v5244_v57 }
  0x60   : > { %891 = vmatpush.msra.mxu1 %v5230_v50  ;;  %834 = vmatpush.msra.mxu0 %v5255_v17 }
  0x61   : > { %558 = vmatmul.f32.vlgmr.msrb.gmra.mxu0 %v5100_v19  ;;  %648 = vmatpush.msrb.mxu2 %v5250_v12 }
  0x62   : > { %893 = vmatpush.msra.mxu1 %v5244_v57 }
  0x64   : > { %895 = vmatpush.msra.mxu1 %v5250_v12 }
  0x67   : > { %595 = vmatmul.f32.vlgmr.msrb.gmra.mxu1 %v5100_v19  ;;  %v700_v19 = vand.u32 4294901760, %v5157_v15 }
  0x69   : > { %562 = vmatmul.f32.gmra.mxu0 %v5110_v23  ;;  %v701_v24 = vsub.f32 %v5157_v15, %v700_v19  ;;  %v7084_v15 = vand.u32 4294901760, %v5255_v17 }
  0x6b   : > { %v702_v29 = vand.u32 4294901760, %v701_v24  ;;  %v5262_v24 = vsub.f32 %v616_v58, %v5250_v12 }
  0x6d   : > { %837 = vmatpush.msra.mxu0 %v5262_v24 }
  0x6f   : > { %599 = vmatmul.f32.gmra.mxu1 %v5110_v23  ;;  %v696_v23 = vand.u32 4294901760, %v695_v18  ;;  %v615_v18 = vld [vmem:[#allocation7 + $0x20] sm:$0xff] }
  0x70   : > { %v5264_v28 = vand.u32 4294901760, %v615_v18 }
  0x71   : > { %566 = vmatmul.f32.gmra.mxu0 %v5124_v36  ;;  %697 = vmatpush.msrb.mxu3 %v696_v23  ;;  %v743_v23 = vsub.f32 %v5240_v56, %v742_v62 }
  0x72   : > { %897 = vmatpush.msra.mxu1 %v5264_v28  ;;  %650 = vmatpush.msrb.mxu2 %v5264_v28 }
  0x73   : > { %703 = vmatpush.msrb.mxu3 %v702_v29  ;;  %v7067_v29 = vand.u32 4294901760, %v5255_v17  ;;  %v744_v34 = vand.u32 4294901760, %v743_v23  ;;  %v5306_v23 = vand.u32 4294901760, %v612_v54 }
  0x74   : > { %899 = vmatpush.msra.mxu1 %v5274_v40  ;;  %652 = vmatpush.msrb.mxu2 %v5274_v40 }
  0x75   : > { %709 = vmatpush.msrb.mxu3 %v708_v35  ;;  %v7065_v35 = vand.u32 4294901760, %v5262_v24 }
  0x76   : > { %901 = vmatpush.msra.mxu1 %v5289_v52  ;;  %654 = vmatpush.msrb.mxu2 %v5289_v52 }
  0x77   : > { %603 = vmatmul.f32.gmra.mxu1 %v5124_v36  ;;  %v713_v36 = vsub.f32 %v5181_v26, %v712_v31  ;;  %v755_v46 = vsub.f32 %v5262_v24, %v7065_v35 }
  0x78   : > { %903 = vmatpush.msra.mxu1 %v5306_v23  ;;  %656 = vmatpush.msrb.mxu2 %v5306_v23 }
  0x79   : > { %570 = vmatmul.f32.gmra.mxu0 %v377_v53  ;;  %v714_v41 = vand.u32 4294901760, %v713_v36  ;;  %v5272_v36 = vsub.f32 %v615_v18, %v5264_v28 }
  0x7b   : > { %715 = vmatpush.msrb.mxu3 %v714_v41  ;;  %v749_v41 = vsub.f32 %v5255_v17, %v7067_v29  ;;  %840 = vmatpush.msra.mxu0 %v5272_v36 }
  0x7d   : > { %721 = vmatpush.msrb.mxu3 %v720_v51  ;;  %v5287_v51 = vsub.f32 %v614_v30, %v5274_v40  ;;  %v611_v30 = vld [vmem:[#allocation7] sm:$0xff] }
  0x7f   : > { %607 = vmatmul.f32.gmra.mxu1 %v377_v53  ;;  %v726_v53 = vand.u32 4294901760, %v725_v47  ;;  %v7063_v47 = vand.u32 4294901760, %v5272_v36  ;;  %v7064_v18 = vand.u32 4294901760, %v5287_v51  ;;  %843 = vmatpush.msra.mxu0 %v5287_v51 }
  0x81   : > { %727 = vmatpush.msrb.mxu3 %v726_v53  ;;  %v750_v53 = vand.u32 4294901760, %v749_v41  ;;  %v761_v60 = vsub.f32 %v5272_v36, %v7063_v47  ;;  %v767_v41 = vsub.f32 %v5287_v51, %v7064_v18  ;;  %v5312_v47 = vand.u32 4294901760, %v611_v30 }
  0x83   : > { %733 = vmatpush.msrb.mxu3 %v732_v59  ;;  %v756_v59 = vand.u32 4294901760, %v755_v46  ;;  %v5324_v18 = vsub.f32 %v611_v30, %v5312_v47  ;;  %905 = vmatpush.msra.mxu1 %v5312_v47 }
  0x84   : > { %658 = vmatpush.msrb.mxu2 %v5312_v47 }
  0x85   : > { %739 = vmatpush.msrb.mxu3 %v738_v22  ;;  %v5301_v22 = vsub.f32 %v613_v45, %v5289_v52  ;;  %v5317_v45 = vsub.f32 %v612_v54, %v5306_v23 }
  0x86   : > { %934 = vmatpush.msra.mxu2 %v694_v14 }
  0x87   : > { %745 = vmatpush.msrb.mxu3 %v744_v34  ;;  %v762_v34 = vand.u32 4294901760, %v761_v60  ;;  %v7066_v46 = vand.u32 4294901760, %v5301_v22  ;;  %846 = vmatpush.msra.mxu0 %v5301_v22 }
  0x88   : > { %938 = vmatpush.msra.mxu2 %v700_v19  ;;  %v7085_v19 = vand.u32 4294901760, %v5262_v24 }
  0x89   : > { %751 = vmatpush.msrb.mxu3 %v750_v53  ;;  %v768_v53 = vand.u32 4294901760, %v767_v41  ;;  %v773_v60 = vsub.f32 %v5301_v22, %v7066_v46  ;;  %849 = vmatpush.msra.mxu0 %v5317_v45  ;;  %v784_v41 = vand.u32 4294901760, %v5324_v18 }
  0x8a   : > { %942 = vmatpush.msra.mxu2 %v706_v25 }
  0x8b   : > { %757 = vmatpush.msrb.mxu3 %v756_v59  ;;  %v778_v59 = vand.u32 4294901760, %v5317_v45  ;;  %v774_v35 = vand.u32 4294901760, %v773_v60  ;;  %852 = vmatpush.msra.mxu0 %v5324_v18 }
  0x8c   : > { %946 = vmatpush.msra.mxu2 %v712_v31  ;;  %v7087_v31 = vand.u32 4294901760, %v5287_v51 }
  0x8d   : > { %763 = vmatpush.msrb.mxu3 %v762_v34  ;;  %v779_v30 = vsub.f32 %v5317_v45, %v778_v59  ;;  %v785_v34 = vsub.f32 %v5324_v18, %v784_v41 }
  0x8e   : > { %950 = vmatpush.msra.mxu2 %v718_v39 }
  0x8f   : > { %769 = vmatpush.msrb.mxu3 %v768_v53  ;;  %v780_v29 = vand.u32 4294901760, %v779_v30  ;;  %v786_v60 = vand.u32 4294901760, %v785_v34 }
  0x90   : > { %954 = vmatpush.msra.mxu2 %v724_v42 }
  0x91   : > { %775 = vmatpush.msrb.mxu3 %v774_v35 }
  0x92   : > { %958 = vmatpush.msra.mxu2 %v730_v48 }
  0x93   : > { %781 = vmatpush.msrb.mxu3 %v780_v29 }
  0x94   : > { %962 = vmatpush.msra.mxu2 %v736_v55 }
  0x95   : > { %787 = vmatpush.msrb.mxu3 %v786_v60 }
  0x96   : > { %966 = vmatpush.msra.mxu2 %v742_v62 }
  0x97   : > { %1013 = vmatpush.msra.mxu3 %v5146_v61 }
  0x98   : > { %970 = vmatpush.msra.mxu2 %v7084_v15 }
  0x99   : > { %1015 = vmatpush.msra.mxu3 %v5151_v11 }
  0x9a   : > { %974 = vmatpush.msra.mxu2 %v7085_v19 }
  0x9b   : > { %1017 = vmatpush.msra.mxu3 %v5160_v16 }
  0x9d   : > { %1019 = vmatpush.msra.mxu3 %v5172_v21  ;;  %v7086_v21 = vand.u32 4294901760, %v5272_v36 }
  0x9f   : > { %1021 = vmatpush.msra.mxu3 %v5185_v27  ;;  %978 = vmatpush.msra.mxu2 %v7086_v21 }
  0xa1   : > { %1023 = vmatpush.msra.mxu3 %v5193_v32  ;;  %982 = vmatpush.msra.mxu2 %v7087_v31  ;;  %v7088_v32 = vand.u32 4294901760, %v5301_v22 }
  0xa3   : > { %1025 = vmatpush.msra.mxu3 %v5206_v38  ;;  %986 = vmatpush.msra.mxu2 %v7088_v32 }
  0xa5   : > { %1027 = vmatpush.msra.mxu3 %v5215_v44  ;;  %990 = vmatpush.msra.mxu2 %v778_v59 }
  0xa7   : > { %1029 = vmatpush.msra.mxu3 %v5230_v50  ;;  %994 = vmatpush.msra.mxu2 %v784_v41 }
  0xa9   : > { %1031 = vmatpush.msra.mxu3 %v5244_v57 }
  0xab   : > { %1033 = vmatpush.msra.mxu3 %v5250_v12 }
  0xad   : > { %1035 = vmatpush.msra.mxu3 %v5264_v28 }
  0xaf   : > { %1037 = vmatpush.msra.mxu3 %v5274_v40 }
  0xb1   : > { %1039 = vmatpush.msra.mxu3 %v5289_v52 }
  0xb3   : > { %1041 = vmatpush.msra.mxu3 %v5306_v23 }
  0xb5   : > { %1043 = vmatpush.msra.mxu3 %v5312_v47 }
  0xbe   : > { %v5294_v58 = vpop.f32.mrf.mxu0 }
  0xc3   : > { %v508_v14 = vpop.f32.mrf.mxu3 }
  0xc4   : > { %v424_v54 = vpop.f32.mrf.mxu1  ;;  %v466_v61 = vpop.f32.mrf.mxu2 }
  0xc5   : > { %v425_v16 = vadd.f32 %v424_v54, %v5294_v58 }
  0xc6   : > { %v367_v46 = vpop.f32.mrf.mxu0 }
  0xc7   : > { %v467_v25 = vadd.f32 %v466_v61, %v425_v16 }
  0xc9   : > { %v509_v33 = vadd.f32 %v508_v14, %v467_v25 }
  0xcb   : > { %v514_v38 = vpop.f32.mrf.mxu3 }
  0xcc   : > { %v428_v45 = vpop.f32.mrf.mxu1  ;;  %v471_v26 = vpop.f32.mrf.mxu2 }
  0xcd   : > { %v429_v37 = vadd.f32 %v428_v45, %v367_v46 }
  0xce   : > { %v375_v18 = vpop.f32.mrf.mxu0 }
  0xcf   : > { %v472_v43 = vadd.f32 %v471_v26, %v429_v37  ;;  %v283_v37 = vpop.xlane.xlu1 %282 }
  0xd1   : > { %v515_v55 = vadd.f32 %v514_v38, %v472_v43  ;;  %v279_v38 = vpop.xlane.xlu0 %278 }
  0xd3   : > { %v520_v17 = vpop.f32.mrf.mxu3 }
  0xd4   : > { %v432_v63 = vpop.f32.mrf.mxu1  ;;  %v476_v50 = vpop.f32.mrf.mxu2 }
  0xd5   : > { %v433_v56 = vadd.f32 %v432_v63, %v375_v18 }
  0xd6   : > { %v383_v11 = vpop.f32.mrf.mxu0 }
  0xd7   : > { %v477_v28 = vadd.f32 %v476_v50, %v433_v56  ;;  %v285_v43 = vpop.xlane.xlu1 %284 }
  0xd9   : > { %v521_v52 = vadd.f32 %v520_v17, %v477_v28 }
  0xdb   : > { %v526_v30 = vpop.f32.mrf.mxu3 }
  0xdc   : > { %v436_v20 = vpop.f32.mrf.mxu1  ;;  %v481_v23 = vpop.f32.mrf.mxu2 }
  0xdd   : > { %v437_v58 = vadd.f32 %v436_v20, %v383_v11 }
  0xde   : > { %v559_v27 = vpop.f32.mrf.mxu0 }
  0xdf   : > { %v560_v39 = vadd.f32 %v559_v27, %v509_v33  ;;  %v482_v59 = vadd.f32 %v481_v23, %v437_v58 }
  0xe1   : > { %v527_v18 = vadd.f32 %v526_v30, %v482_v59 }
  0xe4   : > { %v596_v42 = vpop.f32.mrf.mxu1 }
  0xe5   : > { %v597_v44 = vadd.f32 %v596_v42, %v560_v39 }
  0xe6   : > { %v563_v48 = vpop.f32.mrf.mxu0 }
  0xe7   : > { %v659_v49 = vand.u32 4294901760, %v597_v44  ;;  %v564_v62 = vadd.f32 %v563_v48, %v515_v55  ;;  %v287_v48 = vmin.f32 %v283_v37, %v285_v43 }
  0xe9   : > { %v660_v57 = vsub.f32 %v597_v44, %v659_v49  ;;  %789 = vmatmul.f32.vlgmr.msrb.gmra.mxu3 %v659_v49  ;;  %v281_v44 = vpop.xlane.xlu0 %280 }
  0xea   : > { %v286_v50 = vmin.f32 %v279_v38, %v281_v44  ;;  %v1067_v38 = vld [vmem:[#allocation6 + $0x28] sm:$0xff] }
  0xeb   : > { %855 = vmatmul.f32.vlgmr.msra.gmra.mxu0 %v660_v57  ;;  %v661_v12 = vand.u32 4294901760, %v660_v57 }
  0xec   : > { %v600_v24 = vpop.f32.mrf.mxu1  ;;  %v288_v56 = vmin.f32 %v286_v50, %v287_v48 }
  0xed   : > { %v601_v29 = vadd.f32 %v600_v24, %v564_v62  ;;  %909 = vmatmul.f32.vlgmr.msra.gmra.mxu1 %v661_v12  ;;  %v662_v35 = vsub.f32 %v660_v57, %v661_v12 }
  0xee   : > { %v567_v36 = vpop.f32.mrf.mxu0  ;;  %v289_v62 = vrot.slane %v288_v56, 4 }
  0xef   : > { %v667_v40 = vand.u32 4294901760, %v601_v29  ;;  %v663_v51 = vand.u32 4294901760, %v662_v35  ;;  %v568_v46 = vadd.f32 %v567_v36, %v521_v52 }
  0xf0   : > { %v290_v24 = vmin.f32 %v288_v56, %v289_v62  ;;  %v1074_v56 = vsel %vm320_vm0, %v1067_v38, 0 }
  0xf1   : > { %v668_v22 = vsub.f32 %v601_v29, %v667_v40  ;;  %664 = vmatmul.f32.vlgmr.msrb.gmra.mxu2 %v663_v51  ;;  %793 = vmatmul.f32.gmra.mxu3 %v667_v40 }
  0xf2   : > { %v291_v35 = vrot.slane %v290_v24, 2 }
  0xf3   : > { %860 = vmatmul.f32.gmra.mxu0 %v668_v22  ;;  %v669_v47 = vand.u32 4294901760, %v668_v22 }
  0xf4   : > { %v604_v53 = vpop.f32.mrf.mxu1  ;;  %v292_v51 = vmin.f32 %v290_v24, %v291_v35  ;;  %v5423_v24 = vand.u32 4294901760, %v1074_v56 }
  0xf5   : > { %v605_v54 = vadd.f32 %v604_v53, %v568_v46  ;;  %915 = vmatmul.f32.gmra.mxu1 %v669_v47  ;;  %v670_v41 = vsub.f32 %v668_v22, %v669_v47 }
  0xf6   : > { %v571_v45 = vpop.f32.mrf.mxu0  ;;  %v293_v58 = vrot.slane %v292_v51, 1 }
  0xf7   : > { %v675_v34 = vand.u32 4294901760, %v605_v54  ;;  %v671_v60 = vand.u32 4294901760, %v670_v41  ;;  %v572_v63 = vadd.f32 %v571_v45, %v527_v18  ;;  %v305_v18 = vsub.f32 %v5075_v7, %v5066_v4 }
  0xf9   : > { %v676_v61 = vsub.f32 %v605_v54, %v675_v34  ;;  %672 = vmatmul.f32.gmra.mxu2 %v671_v60  ;;  %797 = vmatmul.f32.gmra.mxu3 %v675_v34  ;;  %v294_v54 = vmin.f32 %v292_v51, %v293_v58  ;;  %v304_v60 = vsub.f32 %v5079_v8, %v5070_v6 }
  0xfa   : > { %v1111_v58 = vsub.f32 %v1074_v56, %v5423_v24  ;;  %v1373_v56 = vld [vmem:[#allocation7 + $0xe0] sm:$0xff] }
  0xfb   : > { %865 = vmatmul.f32.gmra.mxu0 %v676_v61  ;;  %v677_v11 = vand.u32 4294901760, %v676_v61 }
  0xfc   : > { %v608_v14 = vpop.f32.mrf.mxu1 }
  0xfd   : > { %v609_v15 = vadd.f32 %v608_v14, %v572_v63  ;;  %921 = vmatmul.f32.gmra.mxu1 %v677_v11  ;;  %v678_v16 = vsub.f32 %v676_v61, %v677_v11  ;;  %v1066_v61 = vld [vmem:[#allocation6 + $0x20] sm:$0xff]  ;;  %v307_v63 = vmul.f32 0.4, %v294_v54  ;;  %v303_v11 = vsub.f32 %v5090_v13, %v5083_v10 }
  0xfe   : > { %v1071_v6 = vsel %vm320_vm0, %v1066_v61, 0 }
  0xff   : > { %v683_v19 = vand.u32 4294901760, %v609_v15  ;;  %v679_v20 = vand.u32 4294901760, %v678_v16  ;;  %vm309_vm2 = vcmp.lt.f32.partialorder %v304_v60, %v307_v63  ;;  %vm310_vm4 = vcmp.lt.f32.partialorder %v305_v18, %v307_v63  ;;  %v1069_v18 = vld [vmem:[#allocation6 + $0x38] sm:$0xff] }
 0x100   : > { %vm308_vm6 = vcmp.lt.f32.partialorder %v303_v11, %v307_v63  ;;  %vm5391_vm7 = vmand %vm309_vm2, %vm296_vm1  ;;  %vm311_vm11 = vcmp.lt.f32.partialorder %v306_v9, %v307_v63  ;;  %v1376_v9 = vld [vmem:[#allocation7 + $0xf8] sm:$0xff] }
 0x101   : > { %v684_v21 = vsub.f32 %v609_v15, %v683_v19  ;;  %680 = vmatmul.f32.gmra.mxu2 %v679_v20  ;;  %801 = vmatmul.f32.gmra.mxu3 %v683_v19  ;;  %vm5397_vm8 = vmand %vm310_vm4, %vm297_vm3  ;;  %v5461_v38 = vand.u32 4294901760, %v1376_v9 }
 0x102   : > { %vm5406_vm9 = vmand %vm308_vm6, %vm295_vm5 }
 0x103   : > { %870 = vmatmul.f32.gmra.mxu0 %v684_v21  ;;  %v685_v25 = vand.u32 4294901760, %v684_v21  ;;  %vm5425_vm12 = vmand %vm311_vm11, %vm298_vm10 }
 0x105   : > { %927 = vmatmul.f32.gmra.mxu1 %v685_v25  ;;  %v686_v26 = vsub.f32 %v684_v21, %v685_v25 }
 0x107   : > { %v687_v27 = vand.u32 4294901760, %v686_v26 }
 0x109   : > { %688 = vmatmul.f32.gmra.mxu2 %v687_v27  ;;  %1045 = vmatmul.f32.vlgmr.msra.gmra.mxu3 %v659_v49 }
 0x111   : > { %996 = vmatmul.f32.vlgmr.msra.gmra.mxu2 %v659_v49  ;;  %1049 = vmatmul.f32.gmra.mxu3 %v667_v40 }
 0x119   : > { %1000 = vmatmul.f32.gmra.mxu2 %v667_v40  ;;  %1053 = vmatmul.f32.gmra.mxu3 %v675_v34 }
 0x121   : > { %1004 = vmatmul.f32.gmra.mxu2 %v675_v34  ;;  %1057 = vmatmul.f32.gmra.mxu3 %v683_v19 }
 0x129   : > { %1008 = vmatmul.f32.gmra.mxu2 %v683_v19 }
 0x168   : > { %v856_v57 = vpop.f32.mrf.mxu0 }
 0x16a   : > { %v910_v12 = vpop.f32.mrf.mxu1 }
 0x16c   : > { %v790_v31 = vpop.f32.mrf.mxu3 }
 0x170   : > { %v861_v29 = vpop.f32.mrf.mxu0 }
 0x172   : > { %v916_v40 = vpop.f32.mrf.mxu1 }
 0x174   : > { %v665_v32 = vpop.f32.mrf.mxu2  ;;  %v794_v33 = vpop.f32.mrf.mxu3 }
 0x175   : > { %v791_v23 = vadd.f32 %v790_v31, %v665_v32  ;;  %v5395_v32 = vand.u32 4294901760, %v1071_v6 }
 0x177   : > { %v857_v41 = vadd.f32 %v856_v57, %v791_v23  ;;  %v1103_v48 = vsub.f32 %v1071_v6, %v5395_v32 }
 0x178   : > { %v866_v47 = vpop.f32.mrf.mxu0 }
 0x179   : > { %v911_v15 = vadd.f32 %v910_v12, %v857_v41  ;;  %v1112_v41 = vand.u32 4294901760, %v1111_v58 }
 0x17a   : > { %v922_v34 = vpop.f32.mrf.mxu1 }
 0x17b   : > { %v1113_v11 = vsub.f32 %v1111_v58, %v1112_v41 }
 0x17c   : > { %v673_v39 = vpop.f32.mrf.mxu2  ;;  %v798_v42 = vpop.f32.mrf.mxu3 }
 0x17d   : > { %v795_v52 = vadd.f32 %v794_v33, %v673_v39 }
 0x17f   : > { %v862_v59 = vadd.f32 %v861_v29, %v795_v52 }
 0x180   : > { %v871_v26 = vpop.f32.mrf.mxu0 }
 0x181   : > { %v917_v45 = vadd.f32 %v916_v40, %v862_v59 }
 0x182   : > { %v928_v39 = vpop.f32.mrf.mxu1 }
 0x184   : > { %v681_v55 = vpop.f32.mrf.mxu2  ;;  %v802_v49 = vpop.f32.mrf.mxu3 }
 0x185   : > { %v799_v46 = vadd.f32 %v798_v42, %v681_v55 }
 0x187   : > { %v867_v30 = vadd.f32 %v866_v47, %v799_v46 }
 0x189   : > { %v923_v19 = vadd.f32 %v922_v34, %v867_v30 }
 0x18c   : > { %v689_v17 = vpop.f32.mrf.mxu2  ;;  %v1046_v28 = vpop.f32.mrf.mxu3 }
 0x18d   : > { %v803_v14 = vadd.f32 %v802_v49, %v689_v17  ;;  %v1104_v17 = vand.u32 4294901760, %v1103_v48 }
 0x18f   : > { %v872_v10 = vadd.f32 %v871_v26, %v803_v14  ;;  %v1105_v52 = vsub.f32 %v1103_v48, %v1104_v17 }
 0x191   : > { %v929_v44 = vadd.f32 %v928_v39, %v872_v10  ;;  %v1106_v54 = vand.u32 4294901760, %v1105_v52  ;;  %v1375_v39 = vld [vmem:[#allocation7 + $0xf0] sm:$0xff] }
 0x194   : > { %v997_v36 = vpop.f32.mrf.mxu2  ;;  %v1050_v22 = vpop.f32.mrf.mxu3 }
 0x195   : > { %v998_v25 = vadd.f32 %v997_v36, %v911_v15  ;;  %v1068_v36 = vld [vmem:[#allocation6 + $0x30] sm:$0xff] }
 0x196   : > { %v1077_v47 = vsel %vm320_vm0, %v1068_v36, 0  ;;  %v1371_v36 = vld [vmem:[#allocation7 + $0xd0] sm:$0xff] }
 0x197   : > { %v1047_v2 = vadd.f32 %v1046_v28, %v998_v25  ;;  %v5441_v30 = vand.u32 4294901760, %v1077_v47 }
 0x199   : > { %v1061_v1 = vsel %vm5406_vm9, %v5090_v13, %v1047_v2  ;;  %v1119_v14 = vsub.f32 %v1077_v47, %v5441_v30 }
 0x19a   : > { %v5430_v35 = vand.u32 4294901760, %v1061_v1 }
 0x19b   : > { %v1120_v6 = vand.u32 4294901760, %v1119_v14 }
 0x19c   : > { %v1001_v53 = vpop.f32.mrf.mxu2  ;;  %v1054_v20 = vpop.f32.mrf.mxu3  ;;  %v1166_v23 = vsub.f32 %v1061_v1, %v5430_v35 }
 0x19d   : > { %v1002_v16 = vadd.f32 %v1001_v53, %v917_v45  ;;  %v1121_v26 = vsub.f32 %v1119_v14, %v1120_v6 }
 0x19e   : > { %v1167_v45 = vand.u32 4294901760, %v1166_v23 }
 0x19f   : > { %v1051_v5 = vadd.f32 %v1050_v22, %v1002_v16 }
 0x1a0   : > { %v1168_v16 = vsub.f32 %v1166_v23, %v1167_v45 }
 0x1a1   : > { %v1062_v43 = vsel %vm5391_vm7, %v5079_v8, %v1051_v5  ;;  %v1122_v5 = vand.u32 4294901760, %v1121_v26  ;;  %v1366_v26 = vld [vmem:[#allocation7 + $0xa8] sm:$0xff] }
 0x1a2   : > { %v5421_v62 = vand.u32 4294901760, %v1062_v43 }
 0x1a4   : > { %v1005_v21 = vpop.f32.mrf.mxu2  ;;  %v1058_v57 = vpop.f32.mrf.mxu3  ;;  %v1160_v51 = vsub.f32 %v1062_v43, %v5421_v62  ;;  %v5464_v43 = vsub.f32 %v1376_v9, %v5461_v38  ;;  %v1365_v9 = vld [vmem:[#allocation7 + $0xa0] sm:$0xff] }
 0x1a5   : > { %v1006_v4 = vadd.f32 %v1005_v21, %v923_v19  ;;  %v1080_v19 = vsel %vm320_vm0, %v1069_v18, 0  ;;  %v1114_v21 = vand.u32 4294901760, %v1113_v11 }
 0x1a6   : > { %v1161_v59 = vand.u32 4294901760, %v1160_v51  ;;  %v1126_v25 = vand.u32 4294901760, %v1080_v19 }
 0x1a7   : > { %v1055_v31 = vadd.f32 %v1054_v20, %v1006_v4  ;;  %v1169_v4 = vand.u32 4294901760, %v1168_v16 }
 0x1a8   : > { %v1162_v63 = vsub.f32 %v1160_v51, %v1161_v59  ;;  %v1127_v10 = vsub.f32 %v1080_v19, %v1126_v25  ;;  %v1367_v19 = vld [vmem:[#allocation7 + $0xb0] sm:$0xff] }
 0x1a9   : > { %v1063_v37 = vsel %vm5397_vm8, %v5075_v7, %v1055_v31 }
 0x1aa   : > { %v5414_v55 = vand.u32 4294901760, %v1063_v37  ;;  %v1163_v20 = vand.u32 4294901760, %v1162_v63  ;;  %v1128_v31 = vand.u32 4294901760, %v1127_v10 }
 0x1ac   : > { %v1009_v50 = vpop.f32.mrf.mxu2  ;;  %v1154_v29 = vsub.f32 %v1063_v37, %v5414_v55  ;;  %v1129_v2 = vsub.f32 %v1127_v10, %v1128_v31 }
 0x1ad   : > { %v1010_v49 = vadd.f32 %v1009_v50, %v929_v44  ;;  %v5466_v44 = vand.u32 4294901760, %v1375_v39 }
 0x1ae   : > { %v1155_v46 = vand.u32 4294901760, %v1154_v29  ;;  %v1130_v37 = vand.u32 4294901760, %v1129_v2  ;;  %v5565_v2 = vand.u32 4294901760, %v1366_v26 }
 0x1af   : > { %v1059_v12 = vadd.f32 %v1058_v57, %v1010_v49  ;;  %v5472_v50 = vsub.f32 %v1375_v39, %v5466_v44 }
 0x1b0   : > { %v1156_v60 = vsub.f32 %v1154_v29, %v1155_v46 }
 0x1b1   : > { %v1064_v0 = vsel %vm5425_vm12, %v5064_v3, %v1059_v12  ;;  %v1450_v49 = vand.u32 4294901760, %v5472_v50  ;;  %v1372_v12 = vld [vmem:[#allocation7 + $0xd8] sm:$0xff] }
 0x1b2   : > { %v1094_v40 = vand.u32 4294901760, %v1064_v0  ;;  %v1157_v15 = vand.u32 4294901760, %v1156_v60 }
 0x1b4   : > { %1095 = vmatpush.msrb.mxu0 %v1094_v40  ;;  %1246 = vmatpush.msrb.mxu3 %v1094_v40  ;;  %v1148_v22 = vsub.f32 %v1064_v0, %v1094_v40  ;;  %v5500_v0 = vand.u32 4294901760, %v1372_v12 }
 0x1b6   : > { %1097 = vmatpush.msrb.mxu0 %v5414_v55  ;;  %1202 = vmatpush.msrb.mxu2 %v1148_v22  ;;  %v1149_v53 = vand.u32 4294901760, %v1148_v22 }
 0x1b7   : > { %1248 = vmatpush.msrb.mxu3 %v5414_v55 }
 0x1b8   : > { %1099 = vmatpush.msrb.mxu0 %v5421_v62  ;;  %1205 = vmatpush.msrb.mxu2 %v1154_v29  ;;  %v1150_v34 = vsub.f32 %v1148_v22, %v1149_v53  ;;  %v5511_v22 = vsub.f32 %v1372_v12, %v5500_v0 }
 0x1b9   : > { %1250 = vmatpush.msrb.mxu3 %v5421_v62 }
 0x1ba   : > { %1101 = vmatpush.msrb.mxu0 %v5430_v35  ;;  %1208 = vmatpush.msrb.mxu2 %v1160_v51  ;;  %v1151_v61 = vand.u32 4294901760, %v1150_v34 }
 0x1bb   : > { %1252 = vmatpush.msrb.mxu3 %v5430_v35  ;;  %1107 = vmatmul.f32.vlgmr.msrb.gmra.mxu0 %v1106_v54  ;;  %v1468_v54 = vand.u32 4294901760, %v5511_v22 }
 0x1bc   : > { %1293 = vmatpush.msra.mxu0 %v1149_v53  ;;  %1152 = vmatpush.msrb.mxu1 %v1151_v61  ;;  %v1368_v61 = vld [vmem:[#allocation7 + $0xb8] sm:$0xff] }
 0x1bd   : > { %1211 = vmatpush.msrb.mxu2 %v1166_v23  ;;  %1256 = vmatmul.f32.vlgmr.msrb.gmra.mxu3 %v1104_v17  ;;  %v1370_v23 = vld [vmem:[#allocation7 + $0xc8] sm:$0xff]  ;;  %v1469_v18 = vsub.f32 %v5511_v22, %v1468_v54 }
 0x1be   : > { %1297 = vmatpush.msra.mxu0 %v1155_v46  ;;  %1158 = vmatpush.msrb.mxu1 %v1157_v15  ;;  %v5545_v15 = vand.u32 4294901760, %v1368_v61 }
 0x1bf   : > { %1214 = vmatmul.f32.vlgmr.msrb.gmra.mxu2 %v1103_v48  ;;  %v1444_v48 = vand.u32 4294901760, %v5464_v43  ;;  %v1470_v16 = vand.u32 4294901760, %v1469_v18 }
 0x1c0   : > { %1301 = vmatpush.msra.mxu0 %v1161_v59  ;;  %1164 = vmatpush.msrb.mxu1 %v1163_v20  ;;  %v5521_v59 = vand.u32 4294901760, %v1370_v23 }
 0x1c1   : > { %1378 = vmatpush.msra.mxu2 %v5461_v38  ;;  %v1445_v1 = vsub.f32 %v5464_v43, %v1444_v48 }
 0x1c2   : > { %1305 = vmatpush.msra.mxu0 %v1167_v45  ;;  %1170 = vmatpush.msrb.mxu1 %v1169_v4  ;;  %v5528_v60 = vsub.f32 %v1370_v23, %v5521_v59  ;;  %v5559_v4 = vand.u32 4294901760, %v1367_v19 }
 0x1c3   : > { %1115 = vmatmul.f32.gmra.mxu0 %v1114_v21  ;;  %1172 = vmatmul.f32.vlgmr.msrb.gmra.mxu1 %v5395_v32  ;;  %v1446_v17 = vand.u32 4294901760, %v1445_v1  ;;  %v5579_v1 = vand.u32 4294901760, %v1365_v9 }
 0x1c4   : > { %1336 = vmatpush.msra.mxu1 %v1094_v40  ;;  %1557 = vmatpush.msrb.mxu0 %v5464_v43  ;;  %v1480_v11 = vand.u32 4294901760, %v5528_v60 }
 0x1c5   : > { %1262 = vmatmul.f32.gmra.mxu3 %v1112_v41  ;;  %1380 = vmatpush.msra.mxu2 %v5466_v44  ;;  %v1369_v41 = vld [vmem:[#allocation7 + $0xc0] sm:$0xff] }
 0x1c6   : > { %1338 = vmatpush.msra.mxu1 %v5414_v55  ;;  %1560 = vmatpush.msrb.mxu0 %v5472_v50  ;;  %v5530_v45 = vand.u32 4294901760, %v1369_v41  ;;  %v1481_v21 = vsub.f32 %v5528_v60, %v1480_v11 }
 0x1c7   : > { %1219 = vmatmul.f32.gmra.mxu2 %v1111_v58  ;;  %1447 = vmatpush.msra.mxu3 %v1446_v17  ;;  %v5508_v58 = vand.u32 4294901760, %v1371_v36  ;;  %v1364_v17 = vld [vmem:[#allocation7 + $0x98] sm:$0xff] }
 0x1c8   : > { %1340 = vmatpush.msra.mxu1 %v5421_v62  ;;  %v5487_v62 = vand.u32 4294901760, %v1373_v56 }
 0x1c9   : > { %v5519_v53 = vsub.f32 %v1371_v36, %v5508_v58 }
 0x1ca   : > { %1342 = vmatpush.msra.mxu1 %v5430_v35  ;;  %v5496_v35 = vsub.f32 %v1373_v56, %v5487_v62  ;;  %v5577_v56 = vsub.f32 %v1366_v26, %v5565_v2 }
 0x1cb   : > { %1123 = vmatmul.f32.gmra.mxu0 %v1122_v5  ;;  %1176 = vmatmul.f32.gmra.mxu1 %v5423_v24  ;;  %v1474_v34 = vand.u32 4294901760, %v5519_v53 }
 0x1cc   : > { %1625 = vmatpush.msrb.mxu1 %v5461_v38  ;;  %v1462_v52 = vand.u32 4294901760, %v5496_v35  ;;  %v1504_v36 = vand.u32 4294901760, %v5577_v56 }
 0x1cd   : > { %1268 = vmatmul.f32.gmra.mxu3 %v1120_v6  ;;  %v1475_v63 = vsub.f32 %v5519_v53, %v1474_v34 }
 0x1ce   : > { %1627 = vmatpush.msrb.mxu1 %v5466_v44  ;;  %v1463_v47 = vsub.f32 %v5496_v35, %v1462_v52 }
 0x1cf   : > { %1224 = vmatmul.f32.gmra.mxu2 %v1119_v14  ;;  %v5543_v14 = vsub.f32 %v1369_v41, %v5530_v45  ;;  %v1476_v20 = vand.u32 4294901760, %v1475_v63  ;;  %v1505_v41 = vsub.f32 %v5577_v56, %v1504_v36 }
 0x1d1   : > { %v1486_v6 = vand.u32 4294901760, %v5543_v14 }
 0x1d3   : > { %1131 = vmatmul.f32.gmra.mxu0 %v1130_v37  ;;  %1180 = vmatmul.f32.gmra.mxu1 %v5441_v30  ;;  %v1487_v5 = vsub.f32 %v5543_v14, %v1486_v6  ;;  %v5570_v37 = vsub.f32 %v1367_v19, %v5559_v4  ;;  %v1506_v19 = vand.u32 4294901760, %v1505_v41 }
 0x1d5   : > { %1274 = vmatmul.f32.gmra.mxu3 %v1128_v31  ;;  %v1488_v39 = vand.u32 4294901760, %v1487_v5  ;;  %v1498_v12 = vand.u32 4294901760, %v5570_v37  ;;  %v1361_v5 = vld [vmem:[#allocation7 + $0x80] sm:$0xff] }
 0x1d7   : > { %1229 = vmatmul.f32.gmra.mxu2 %v1127_v10  ;;  %v1482_v10 = vand.u32 4294901760, %v1481_v21  ;;  %v1499_v23 = vsub.f32 %v5570_v37, %v1498_v12 }
 0x1d9   : > { %v1500_v63 = vand.u32 4294901760, %v1499_v23 }
 0x1db   : > { %1184 = vmatmul.f32.gmra.mxu1 %v1126_v25  ;;  %1307 = vmatmul.f32.vlgmr.msra.gmra.mxu0 %v5395_v32 }
 0x1e3   : > { %1311 = vmatmul.f32.gmra.mxu0 %v5423_v24  ;;  %1344 = vmatmul.f32.vlgmr.msra.gmra.mxu1 %v5395_v32  ;;  %v1374_v32 = vld [vmem:[#allocation7 + $0xe8] sm:$0xff] }
 0x1e4   : > { %v5475_v55 = vand.u32 4294901760, %v1374_v32 }
 0x1e6   : > { %v5484_v57 = vsub.f32 %v1374_v32, %v5475_v55  ;;  %1629 = vmatpush.msrb.mxu1 %v5475_v55  ;;  %1382 = vmatpush.msra.mxu2 %v5475_v55 }
 0x1e8   : > { %v1456_v29 = vand.u32 4294901760, %v5484_v57  ;;  %1563 = vmatpush.msrb.mxu0 %v5484_v57  ;;  %1631 = vmatpush.msrb.mxu1 %v5487_v62 }
 0x1e9   : > { %1384 = vmatpush.msra.mxu2 %v5487_v62 }
 0x1ea   : > { %v1457_v51 = vsub.f32 %v5484_v57, %v1456_v29  ;;  %1566 = vmatpush.msrb.mxu0 %v5496_v35  ;;  %1633 = vmatpush.msrb.mxu1 %v5500_v0 }
 0x1eb   : > { %1315 = vmatmul.f32.gmra.mxu0 %v5441_v30  ;;  %1348 = vmatmul.f32.gmra.mxu1 %v5423_v24  ;;  %v1451_v24 = vsub.f32 %v5472_v50, %v1450_v49 }
 0x1ec   : > { %1386 = vmatpush.msra.mxu2 %v5500_v0  ;;  %v1458_v46 = vand.u32 4294901760, %v1457_v51  ;;  %1569 = vmatpush.msrb.mxu0 %v5511_v22  ;;  %v5589_v51 = vand.u32 4294901760, %v1364_v17 }
 0x1ed   : > { %v1452_v40 = vand.u32 4294901760, %v1451_v24  ;;  %1635 = vmatpush.msrb.mxu1 %v5508_v58 }
 0x1ee   : > { %1388 = vmatpush.msra.mxu2 %v5508_v58  ;;  %1572 = vmatpush.msrb.mxu0 %v5519_v53  ;;  %v5604_v18 = vsub.f32 %v1364_v17, %v5589_v51  ;;  %v5627_v17 = vand.u32 4294901760, %v1361_v5 }
 0x1ef   : > { %1453 = vmatpush.msra.mxu3 %v1452_v40  ;;  %1637 = vmatpush.msrb.mxu1 %v5521_v59  ;;  %v5587_v40 = vsub.f32 %v1365_v9, %v5579_v1 }
 0x1f0   : > { %1390 = vmatpush.msra.mxu2 %v5521_v59  ;;  %1575 = vmatpush.msrb.mxu0 %v5528_v60  ;;  %v7069_v21 = vand.u32 4294901760, %v5604_v18  ;;  %v5639_v41 = vsub.f32 %v1361_v5, %v5627_v17 }
 0x1f1   : > { %1459 = vmatpush.msra.mxu3 %v1458_v46  ;;  %1639 = vmatpush.msrb.mxu1 %v5530_v45  ;;  %v1363_v46 = vld [vmem:[#allocation7 + $0x90] sm:$0xff] }
 0x1f2   : > { %1392 = vmatpush.msra.mxu2 %v5530_v45  ;;  %1578 = vmatpush.msrb.mxu0 %v5543_v14 }
 0x1f3   : > { %1319 = vmatmul.f32.gmra.mxu0 %v1126_v25  ;;  %1352 = vmatmul.f32.gmra.mxu1 %v5441_v30  ;;  %v1464_v30 = vand.u32 4294901760, %v1463_v47 }
 0x1f4   : > { %1641 = vmatpush.msrb.mxu1 %v5545_v15  ;;  %1394 = vmatpush.msra.mxu2 %v5545_v15 }
 0x1f5   : > { %1465 = vmatpush.msra.mxu3 %v1464_v30  ;;  %v1510_v30 = vand.u32 4294901760, %v5587_v40 }
 0x1f6   : > { %1643 = vmatpush.msrb.mxu1 %v5559_v4  ;;  %1396 = vmatpush.msra.mxu2 %v5559_v4 }
 0x1f7   : > { %1471 = vmatpush.msra.mxu3 %v1470_v16  ;;  %v1362_v16 = vld [vmem:[#allocation7 + $0x88] sm:$0xff] }
 0x1f8   : > { %1645 = vmatpush.msrb.mxu1 %v5565_v2  ;;  %1398 = vmatpush.msra.mxu2 %v5565_v2 }
 0x1f9   : > { %1477 = vmatpush.msra.mxu3 %v1476_v20  ;;  %v1511_v20 = vsub.f32 %v5587_v40, %v1510_v30 }
 0x1fa   : > { %1647 = vmatpush.msrb.mxu1 %v5579_v1  ;;  %1400 = vmatpush.msra.mxu2 %v5579_v1 }
 0x1fb   : > { %1356 = vmatmul.f32.gmra.mxu1 %v1126_v25  ;;  %v5555_v25 = vsub.f32 %v1368_v61, %v5545_v15  ;;  %1483 = vmatpush.msra.mxu3 %v1482_v10  ;;  %v5606_v61 = vand.u32 4294901760, %v1363_v46  ;;  %v5621_v10 = vand.u32 4294901760, %v1362_v16  ;;  %v1512_v9 = vand.u32 4294901760, %v1511_v20 }
 0x1fc   : > { %1649 = vmatpush.msrb.mxu1 %v5589_v51  ;;  %1402 = vmatpush.msra.mxu2 %v5589_v51 }
 0x1fd   : > { %v1492_v31 = vand.u32 4294901760, %v5555_v25  ;;  %1581 = vmatpush.msrb.mxu0 %v5555_v25  ;;  %1489 = vmatpush.msra.mxu3 %v1488_v39  ;;  %v5616_v26 = vsub.f32 %v1363_v46, %v5606_v61  ;;  %v1517_v39 = vsub.f32 %v5604_v18, %v7069_v21 }
 0x1fe   : > { %1651 = vmatpush.msrb.mxu1 %v5606_v61  ;;  %1404 = vmatpush.msra.mxu2 %v5606_v61 }
 0x1ff   : > { %v1493_v32 = vsub.f32 %v5555_v25, %v1492_v31  ;;  %1584 = vmatpush.msrb.mxu0 %v5570_v37  ;;  %v1518_v23 = vand.u32 4294901760, %v1517_v39  ;;  %v1534_v39 = vand.u32 4294901760, %v5639_v41  ;;  %v7098_v35 = vand.u32 4294901760, %v5616_v26 }
 0x200   : > { %1653 = vmatpush.msrb.mxu1 %v5621_v10  ;;  %1406 = vmatpush.msra.mxu2 %v5621_v10 }
 0x201   : > { %v1494_v24 = vand.u32 4294901760, %v1493_v32  ;;  %1587 = vmatpush.msrb.mxu0 %v5577_v56  ;;  %v7068_v32 = vand.u32 4294901760, %v5616_v26 }
 0x202   : > { %1655 = vmatpush.msrb.mxu1 %v5627_v17  ;;  %1408 = vmatpush.msra.mxu2 %v5627_v17 }
 0x203   : > { %1495 = vmatpush.msra.mxu3 %v1494_v24  ;;  %1590 = vmatpush.msrb.mxu0 %v5587_v40  ;;  %v5632_v24 = vsub.f32 %v1362_v16, %v5621_v10  ;;  %v1523_v46 = vsub.f32 %v5616_v26, %v7068_v32 }
 0x204   : > { %1684 = vmatpush.msrb.mxu2 %v1444_v48 }
 0x205   : > { %1501 = vmatpush.msra.mxu3 %v1500_v63  ;;  %1593 = vmatpush.msrb.mxu0 %v5604_v18  ;;  %v1528_v63 = vand.u32 4294901760, %v5632_v24  ;;  %v1524_v20 = vand.u32 4294901760, %v1523_v46 }
 0x206   : > { %1688 = vmatpush.msrb.mxu2 %v1450_v49 }
 0x207   : > { %1507 = vmatpush.msra.mxu3 %v1506_v19  ;;  %1596 = vmatpush.msrb.mxu0 %v5616_v26  ;;  %v1529_v5 = vsub.f32 %v5632_v24, %v1528_v63 }
 0x208   : > { %1692 = vmatpush.msrb.mxu2 %v1456_v29  ;;  %v7097_v29 = vand.u32 4294901760, %v5604_v18 }
 0x209   : > { %1513 = vmatpush.msra.mxu3 %v1512_v9  ;;  %1599 = vmatpush.msrb.mxu0 %v5632_v24  ;;  %v1535_v9 = vsub.f32 %v5639_v41, %v1534_v39  ;;  %v1530_v32 = vand.u32 4294901760, %v1529_v5 }
 0x20a   : > { %1696 = vmatpush.msrb.mxu2 %v1462_v52 }
 0x20b   : > { %1519 = vmatpush.msra.mxu3 %v1518_v23  ;;  %1602 = vmatpush.msrb.mxu0 %v5639_v41  ;;  %v1536_v21 = vand.u32 4294901760, %v1535_v9 }
 0x20c   : > { %1700 = vmatpush.msrb.mxu2 %v1468_v54 }
 0x20d   : > { %1525 = vmatpush.msra.mxu3 %v1524_v20 }
 0x20e   : > { %1704 = vmatpush.msrb.mxu2 %v1474_v34 }
 0x20f   : > { %1531 = vmatpush.msra.mxu3 %v1530_v32 }
 0x210   : > { %1708 = vmatpush.msrb.mxu2 %v1480_v11 }
 0x211   : > { %1537 = vmatpush.msra.mxu3 %v1536_v21 }
 0x212   : > { %1712 = vmatpush.msrb.mxu2 %v1486_v6 }
 0x213   : > { %1763 = vmatpush.msrb.mxu3 %v5461_v38 }
 0x214   : > { %1716 = vmatpush.msrb.mxu2 %v1492_v31 }
 0x215   : > { %1765 = vmatpush.msrb.mxu3 %v5466_v44 }
 0x216   : > { %1720 = vmatpush.msrb.mxu2 %v1498_v12 }
 0x217   : > { %1767 = vmatpush.msrb.mxu3 %v5475_v55 }
 0x218   : > { %1724 = vmatpush.msrb.mxu2 %v1504_v36 }
 0x219   : > { %1769 = vmatpush.msrb.mxu3 %v5487_v62 }
 0x21a   : > { %1728 = vmatpush.msrb.mxu2 %v1510_v30 }
 0x21b   : > { %1771 = vmatpush.msrb.mxu3 %v5500_v0 }
 0x21c   : > { %1732 = vmatpush.msrb.mxu2 %v7097_v29 }
 0x21d   : > { %1773 = vmatpush.msrb.mxu3 %v5508_v58 }
 0x21e   : > { %1736 = vmatpush.msrb.mxu2 %v7098_v35 }
 0x21f   : > { %1775 = vmatpush.msrb.mxu3 %v5521_v59 }
 0x220   : > { %1740 = vmatpush.msrb.mxu2 %v1528_v63 }
 0x221   : > { %1777 = vmatpush.msrb.mxu3 %v5530_v45 }
 0x222   : > { %1744 = vmatpush.msrb.mxu2 %v1534_v39 }
 0x223   : > { %1779 = vmatpush.msrb.mxu3 %v5545_v15 }
 0x225   : > { %1781 = vmatpush.msrb.mxu3 %v5559_v4 }
 0x227   : > { %1783 = vmatpush.msrb.mxu3 %v5565_v2 }
 0x229   : > { %1785 = vmatpush.msrb.mxu3 %v5579_v1 }
 0x22b   : > { %1787 = vmatpush.msrb.mxu3 %v5589_v51 }
 0x22d   : > { %1789 = vmatpush.msrb.mxu3 %v5606_v61 }
 0x22f   : > { %1791 = vmatpush.msrb.mxu3 %v5621_v10 }
 0x231   : > { %1793 = vmatpush.msrb.mxu3 %v5627_v17 }
 0x238   : > { %v5597_v47 = vpop.f32.mrf.mxu0 }
 0x240   : > { %v1116_v16 = vpop.f32.mrf.mxu0  ;;  %v1173_v19 = vpop.f32.mrf.mxu1 }
 0x241   : > { %v1257_v44 = vpop.f32.mrf.mxu3  ;;  %v1174_v50 = vadd.f32 %v1173_v19, %v5597_v47 }
 0x242   : > { %v1215_v43 = vpop.f32.mrf.mxu2 }
 0x243   : > { %v1216_v57 = vadd.f32 %v1215_v43, %v1174_v50 }
 0x245   : > { %v1258_v0 = vadd.f32 %v1257_v44, %v1216_v57 }
 0x248   : > { %v1124_v23 = vpop.f32.mrf.mxu0  ;;  %v1177_v24 = vpop.f32.mrf.mxu1 }
 0x249   : > { %v1178_v52 = vadd.f32 %v1177_v24, %v1116_v16  ;;  %v1263_v58 = vpop.f32.mrf.mxu3 }
 0x24a   : > { %v1220_v62 = vpop.f32.mrf.mxu2 }
 0x24b   : > { %v1221_v54 = vadd.f32 %v1220_v62, %v1178_v52 }
 0x24d   : > { %v1264_v11 = vadd.f32 %v1263_v58, %v1221_v54 }
 0x250   : > { %v1132_v38 = vpop.f32.mrf.mxu0  ;;  %v1181_v48 = vpop.f32.mrf.mxu1 }
 0x251   : > { %v1182_v14 = vadd.f32 %v1181_v48, %v1124_v23  ;;  %v1269_v4 = vpop.f32.mrf.mxu3 }
 0x252   : > { %v1225_v45 = vpop.f32.mrf.mxu2 }
 0x253   : > { %v1226_v2 = vadd.f32 %v1225_v45, %v1182_v14 }
 0x255   : > { %v1270_v40 = vadd.f32 %v1269_v4, %v1226_v2 }
 0x258   : > { %v1185_v55 = vpop.f32.mrf.mxu1  ;;  %v1308_v49 = vpop.f32.mrf.mxu0 }
 0x259   : > { %v1309_v22 = vadd.f32 %v1308_v49, %v1258_v0  ;;  %v1186_v51 = vadd.f32 %v1185_v55, %v1132_v38  ;;  %v1275_v17 = vpop.f32.mrf.mxu3 }
 0x25a   : > { %v1230_v30 = vpop.f32.mrf.mxu2 }
 0x25b   : > { %v1231_v26 = vadd.f32 %v1230_v30, %v1186_v51 }
 0x25d   : > { %v1276_v16 = vadd.f32 %v1275_v17, %v1231_v26 }
 0x260   : > { %v1312_v53 = vpop.f32.mrf.mxu0  ;;  %v1345_v59 = vpop.f32.mrf.mxu1 }
 0x261   : > { %v1346_v34 = vadd.f32 %v1345_v59, %v1309_v22  ;;  %v1313_v6 = vadd.f32 %v1312_v53, %v1264_v11 }
 0x263   : > { %v1409_v60 = vand.u32 4294901760, %v1346_v34 }
 0x265   : > { %v1410_v15 = vsub.f32 %v1346_v34, %v1409_v60  ;;  %1539 = vmatmul.f32.vlgmr.msra.gmra.mxu3 %v1409_v60 }
 0x267   : > { %1605 = vmatmul.f32.vlgmr.msrb.gmra.mxu0 %v1410_v15  ;;  %v1411_v25 = vand.u32 4294901760, %v1410_v15 }
 0x268   : > { %v1349_v31 = vpop.f32.mrf.mxu1  ;;  %v1316_v1 = vpop.f32.mrf.mxu0 }
 0x269   : > { %v1350_v37 = vadd.f32 %v1349_v31, %v1313_v6  ;;  %1659 = vmatmul.f32.vlgmr.msrb.gmra.mxu1 %v1411_v25  ;;  %v1412_v56 = vsub.f32 %v1410_v15, %v1411_v25  ;;  %v1317_v18 = vadd.f32 %v1316_v1, %v1270_v40 }
 0x26b   : > { %v1417_v12 = vand.u32 4294901760, %v1350_v37  ;;  %v1413_v36 = vand.u32 4294901760, %v1412_v56  ;;  %v1816_v56 = vld [vmem:[#allocation6 + $0x40] sm:$0xff] }
 0x26c   : > { %v1821_v30 = vsel %vm320_vm0, %v1816_v56, 0 }
 0x26d   : > { %v1418_v47 = vsub.f32 %v1350_v37, %v1417_v12  ;;  %1414 = vmatmul.f32.vlgmr.msra.gmra.mxu2 %v1413_v36  ;;  %1543 = vmatmul.f32.gmra.mxu3 %v1417_v12  ;;  %v5697_v17 = vand.u32 4294901760, %v1821_v30 }
 0x26f   : > { %1610 = vmatmul.f32.gmra.mxu0 %v1418_v47  ;;  %v1419_v61 = vand.u32 4294901760, %v1418_v47 }
 0x270   : > { %v1353_v21 = vpop.f32.mrf.mxu1  ;;  %v1320_v63 = vpop.f32.mrf.mxu0 }
 0x271   : > { %v1354_v10 = vadd.f32 %v1353_v21, %v1317_v18  ;;  %1665 = vmatmul.f32.gmra.mxu1 %v1419_v61  ;;  %v1420_v32 = vsub.f32 %v1418_v47, %v1419_v61  ;;  %v1321_v20 = vadd.f32 %v1320_v63, %v1276_v16  ;;  %v1817_v63 = vld [vmem:[#allocation6 + $0x48] sm:$0xff] }
 0x273   : > { %v1425_v46 = vand.u32 4294901760, %v1354_v10  ;;  %v1421_v41 = vand.u32 4294901760, %v1420_v32 }
 0x275   : > { %v1426_v19 = vsub.f32 %v1354_v10, %v1425_v46  ;;  %1422 = vmatmul.f32.gmra.mxu2 %v1421_v41  ;;  %1547 = vmatmul.f32.gmra.mxu3 %v1425_v46 }
 0x277   : > { %1615 = vmatmul.f32.gmra.mxu0 %v1426_v19  ;;  %v1427_v39 = vand.u32 4294901760, %v1426_v19 }
 0x278   : > { %v1357_v5 = vpop.f32.mrf.mxu1 }
 0x279   : > { %v1358_v9 = vadd.f32 %v1357_v5, %v1321_v20  ;;  %1671 = vmatmul.f32.gmra.mxu1 %v1427_v39  ;;  %v1428_v23 = vsub.f32 %v1426_v19, %v1427_v39  ;;  %v1853_v39 = vsub.f32 %v1821_v30, %v5697_v17  ;;  %v2126_v30 = vld [vmem:[#allocation7 + $0x178] sm:$0xff] }
 0x27b   : > { %v1433_v24 = vand.u32 4294901760, %v1358_v9  ;;  %v1429_v43 = vand.u32 4294901760, %v1428_v23  ;;  %v1824_v23 = vsel %vm320_vm0, %v1817_v63, 0 }
 0x27c   : > { %v5714_v27 = vand.u32 4294901760, %v1824_v23 }
 0x27d   : > { %v1434_v38 = vsub.f32 %v1358_v9, %v1433_v24  ;;  %1430 = vmatmul.f32.gmra.mxu2 %v1429_v43  ;;  %1551 = vmatmul.f32.gmra.mxu3 %v1433_v24 }
 0x27f   : > { %1620 = vmatmul.f32.gmra.mxu0 %v1434_v38  ;;  %v1435_v48 = vand.u32 4294901760, %v1434_v38 }
 0x281   : > { %1677 = vmatmul.f32.gmra.mxu1 %v1435_v48  ;;  %v1436_v44 = vsub.f32 %v1434_v38, %v1435_v48  ;;  %v1854_v48 = vand.u32 4294901760, %v1853_v39 }
 0x283   : > { %v1437_v50 = vand.u32 4294901760, %v1436_v44  ;;  %v1855_v42 = vsub.f32 %v1853_v39, %v1854_v48 }
 0x285   : > { %1438 = vmatmul.f32.gmra.mxu2 %v1437_v50  ;;  %1795 = vmatmul.f32.vlgmr.msrb.gmra.mxu3 %v1409_v60 }
 0x28d   : > { %1746 = vmatmul.f32.vlgmr.msrb.gmra.mxu2 %v1409_v60  ;;  %1799 = vmatmul.f32.gmra.mxu3 %v1417_v12 }
 0x295   : > { %1750 = vmatmul.f32.gmra.mxu2 %v1417_v12  ;;  %1803 = vmatmul.f32.gmra.mxu3 %v1425_v46 }
 0x29d   : > { %1754 = vmatmul.f32.gmra.mxu2 %v1425_v46  ;;  %1807 = vmatmul.f32.gmra.mxu3 %v1433_v24 }
 0x2a5   : > { %1758 = vmatmul.f32.gmra.mxu2 %v1433_v24 }
 0x2e4   : > { %v1606_v52 = vpop.f32.mrf.mxu0 }
 0x2e6   : > { %v1660_v58 = vpop.f32.mrf.mxu1 }
 0x2e8   : > { %v1540_v55 = vpop.f32.mrf.mxu3 }
 0x2ec   : > { %v1611_v59 = vpop.f32.mrf.mxu0 }
 0x2ee   : > { %v1666_v34 = vpop.f32.mrf.mxu1 }
 0x2f0   : > { %v1415_v49 = vpop.f32.mrf.mxu2  ;;  %v1544_v57 = vpop.f32.mrf.mxu3 }
 0x2f1   : > { %v1541_v11 = vadd.f32 %v1540_v55, %v1415_v49  ;;  %v1818_v55 = vld [vmem:[#allocation6 + $0x50] sm:$0xff] }
 0x2f3   : > { %v1607_v4 = vadd.f32 %v1606_v52, %v1541_v11  ;;  %v1856_v52 = vand.u32 4294901760, %v1855_v42 }
 0x2f4   : > { %v1616_v15 = vpop.f32.mrf.mxu0 }
 0x2f5   : > { %v1661_v12 = vadd.f32 %v1660_v58, %v1607_v4 }
 0x2f6   : > { %v1672_v2 = vpop.f32.mrf.mxu1 }
 0x2f8   : > { %v1423_v62 = vpop.f32.mrf.mxu2  ;;  %v1548_v29 = vpop.f32.mrf.mxu3 }
 0x2f9   : > { %v1545_v60 = vadd.f32 %v1544_v57, %v1423_v62  ;;  %v1861_v57 = vsub.f32 %v1824_v23, %v5714_v27 }
 0x2fb   : > { %v1612_v25 = vadd.f32 %v1611_v59, %v1545_v60  ;;  %v1862_v58 = vand.u32 4294901760, %v1861_v57 }
 0x2fc   : > { %v1621_v21 = vpop.f32.mrf.mxu0 }
 0x2fd   : > { %v1667_v37 = vadd.f32 %v1666_v34, %v1612_v25  ;;  %v1819_v34 = vld [vmem:[#allocation6 + $0x58] sm:$0xff]  ;;  %v1863_v11 = vsub.f32 %v1861_v57, %v1862_v58 }
 0x2fe   : > { %v1678_v16 = vpop.f32.mrf.mxu1  ;;  %v1830_v25 = vsel %vm320_vm0, %v1819_v34, 0 }
 0x300   : > { %v1431_v35 = vpop.f32.mrf.mxu2  ;;  %v1552_v0 = vpop.f32.mrf.mxu3 }
 0x301   : > { %v1549_v14 = vadd.f32 %v1548_v29, %v1431_v35 }
 0x303   : > { %v1617_v31 = vadd.f32 %v1616_v15, %v1549_v14 }
 0x305   : > { %v1673_v40 = vadd.f32 %v1672_v2, %v1617_v31  ;;  %v1864_v31 = vand.u32 4294901760, %v1863_v11 }
 0x308   : > { %v1439_v22 = vpop.f32.mrf.mxu2  ;;  %v1796_v53 = vpop.f32.mrf.mxu3 }
 0x309   : > { %v1553_v1 = vadd.f32 %v1552_v0, %v1439_v22  ;;  %v1827_v0 = vsel %vm320_vm0, %v1818_v55, 0 }
 0x30a   : > { %v5728_v22 = vand.u32 4294901760, %v1827_v0 }
 0x30b   : > { %v1622_v26 = vadd.f32 %v1621_v21, %v1553_v1 }
 0x30c   : > { %v1869_v14 = vsub.f32 %v1827_v0, %v5728_v22 }
 0x30d   : > { %v1679_v20 = vadd.f32 %v1678_v16, %v1622_v26 }
 0x30e   : > { %v1870_v2 = vand.u32 4294901760, %v1869_v14 }
 0x310   : > { %v1747_v54 = vpop.f32.mrf.mxu2  ;;  %v1800_v45 = vpop.f32.mrf.mxu3  ;;  %v1871_v1 = vsub.f32 %v1869_v14, %v1870_v2 }
 0x311   : > { %v1748_v18 = vadd.f32 %v1747_v54, %v1661_v12 }
 0x313   : > { %v1797_v46 = vadd.f32 %v1796_v53, %v1748_v18  ;;  %v5748_v18 = vand.u32 4294901760, %v2126_v30 }
 0x315   : > { %v1811_v24 = vsel %vm5406_vm9, %v5090_v13, %v1797_v46  ;;  %v5751_v21 = vsub.f32 %v2126_v30, %v5748_v18 }
 0x316   : > { %v5717_v44 = vand.u32 4294901760, %v1811_v24 }
 0x318   : > { %v1751_v6 = vpop.f32.mrf.mxu2  ;;  %v1804_v51 = vpop.f32.mrf.mxu3  ;;  %v1916_v29 = vsub.f32 %v1811_v24, %v5717_v44 }
 0x319   : > { %v1752_v36 = vadd.f32 %v1751_v6, %v1667_v37  ;;  %v1876_v37 = vand.u32 4294901760, %v1830_v25 }
 0x31a   : > { %v1917_v54 = vand.u32 4294901760, %v1916_v29 }
 0x31b   : > { %v1801_v10 = vadd.f32 %v1800_v45, %v1752_v36  ;;  %v1877_v12 = vsub.f32 %v1830_v25, %v1876_v37  ;;  %v1872_v36 = vand.u32 4294901760, %v1871_v1 }
 0x31c   : > { %v1918_v6 = vsub.f32 %v1916_v29, %v1917_v54 }
 0x31d   : > { %v1812_v19 = vsel %vm5391_vm7, %v5079_v8, %v1801_v10  ;;  %v2124_v10 = vld [vmem:[#allocation7 + $0x168] sm:$0xff] }
 0x31e   : > { %v5712_v43 = vand.u32 4294901760, %v1812_v19  ;;  %v1919_v56 = vand.u32 4294901760, %v1918_v6  ;;  %v5762_v46 = vand.u32 4294901760, %v2124_v10 }
 0x320   : > { %v1755_v47 = vpop.f32.mrf.mxu2  ;;  %v1910_v13 = vsub.f32 %v1812_v19, %v5712_v43  ;;  %v5771_v19 = vsub.f32 %v2124_v10, %v5762_v46 }
 0x321   : > { %v1756_v61 = vadd.f32 %v1755_v47, %v1673_v40  ;;  %v1878_v40 = vand.u32 4294901760, %v1877_v12 }
 0x322   : > { %v2206_v23 = vand.u32 4294901760, %v5771_v19 }
 0x323   : > { %v1805_v32 = vadd.f32 %v1804_v51, %v1756_v61  ;;  %v1879_v51 = vsub.f32 %v1877_v12, %v1878_v40  ;;  %v2125_v61 = vld [vmem:[#allocation7 + $0x170] sm:$0xff] }
 0x324   : > { %v5753_v26 = vand.u32 4294901760, %v2125_v61 }
 0x325   : > { %v1813_v41 = vsel %vm5397_vm8, %v5075_v7, %v1805_v32  ;;  %v1808_v7 = vpop.f32.mrf.mxu3  ;;  %v1880_v47 = vand.u32 4294901760, %v1879_v51  ;;  %v2194_v32 = vand.u32 4294901760, %v5751_v21  ;;  %v2114_v51 = vld [vmem:[#allocation7 + $0x118] sm:$0xff] }
 0x326   : > { %v5706_v9 = vand.u32 4294901760, %v1813_v41  ;;  %v5876_v10 = vand.u32 4294901760, %v2114_v51 }
 0x327   : > { %v2195_v63 = vsub.f32 %v5751_v21, %v2194_v32 }
 0x328   : > { %v1759_v5 = vpop.f32.mrf.mxu2  ;;  %v1904_v8 = vsub.f32 %v1813_v41, %v5706_v9  ;;  %v2123_v41 = vld [vmem:[#allocation7 + $0x160] sm:$0xff] }
 0x329   : > { %v1760_v33 = vadd.f32 %v1759_v5, %v1679_v20  ;;  %v5774_v20 = vand.u32 4294901760, %v2123_v41  ;;  %v2196_v5 = vand.u32 4294901760, %v2195_v63  ;;  %v2113_v63 = vld [vmem:[#allocation7 + $0x110] sm:$0xff] }
 0x32a   : > { %v1905_v35 = vand.u32 4294901760, %v1904_v8 }
 0x32b   : > { %v1809_v38 = vadd.f32 %v1808_v7, %v1760_v33  ;;  %v5783_v24 = vsub.f32 %v2123_v41, %v5774_v20  ;;  %v2121_v7 = vld [vmem:[#allocation7 + $0x150] sm:$0xff] }
 0x32c   : > { %v1906_v59 = vsub.f32 %v1904_v8, %v1905_v35 }
 0x32d   : > { %v1814_v50 = vsel %vm5425_vm12, %v5064_v3, %v1809_v38  ;;  %v1911_v3 = vand.u32 4294901760, %v1910_v13  ;;  %v2207_v38 = vsub.f32 %v5771_v19, %v2206_v23 }
 0x32e   : > { %v1844_v49 = vand.u32 4294901760, %v1814_v50  ;;  %v1907_v15 = vand.u32 4294901760, %v1906_v59 }
 0x32f   : > { %v1912_v45 = vsub.f32 %v1910_v13, %v1911_v3 }
 0x330   : > { %1845 = vmatpush.msra.mxu0 %v1844_v49  ;;  %1996 = vmatpush.msra.mxu3 %v1844_v49  ;;  %v1898_v62 = vsub.f32 %v1814_v50, %v1844_v49  ;;  %v2208_v50 = vand.u32 4294901760, %v2207_v38 }
 0x331   : > { %v1913_v4 = vand.u32 4294901760, %v1912_v45 }
 0x332   : > { %1847 = vmatpush.msra.mxu0 %v5706_v9  ;;  %1952 = vmatpush.msra.mxu2 %v1898_v62  ;;  %v1899_v28 = vand.u32 4294901760, %v1898_v62 }
 0x333   : > { %1998 = vmatpush.msra.mxu3 %v5706_v9 }
 0x334   : > { %1849 = vmatpush.msra.mxu0 %v5712_v43  ;;  %1955 = vmatpush.msra.mxu2 %v1904_v8  ;;  %v1900_v53 = vsub.f32 %v1898_v62, %v1899_v28 }
 0x335   : > { %2000 = vmatpush.msra.mxu3 %v5712_v43 }
 0x336   : > { %1851 = vmatpush.msra.mxu0 %v5717_v44  ;;  %1958 = vmatpush.msra.mxu2 %v1910_v13  ;;  %v1901_v60 = vand.u32 4294901760, %v1900_v53 }
 0x337   : > { %2002 = vmatpush.msra.mxu3 %v5717_v44  ;;  %1857 = vmatmul.f32.vlgmr.msra.gmra.mxu0 %v1856_v52 }
 0x338   : > { %2043 = vmatpush.msrb.mxu0 %v1899_v28  ;;  %1902 = vmatpush.msra.mxu1 %v1901_v60 }
 0x339   : > { %1961 = vmatpush.msra.mxu2 %v1916_v29  ;;  %2006 = vmatmul.f32.vlgmr.msra.gmra.mxu3 %v1854_v48  ;;  %v2212_v48 = vand.u32 4294901760, %v5783_v24 }
 0x33a   : > { %2047 = vmatpush.msrb.mxu0 %v1905_v35  ;;  %1908 = vmatpush.msra.mxu1 %v1907_v15  ;;  %v2116_v15 = vld [vmem:[#allocation7 + $0x128] sm:$0xff] }
 0x33b   : > { %1964 = vmatmul.f32.vlgmr.msra.gmra.mxu2 %v1853_v39  ;;  %v2122_v39 = vld [vmem:[#allocation7 + $0x158] sm:$0xff]  ;;  %2197 = vmatpush.msrb.mxu3 %v2196_v5  ;;  %v2213_v55 = vsub.f32 %v5783_v24, %v2212_v48 }
 0x33c   : > { %2051 = vmatpush.msrb.mxu0 %v1911_v3  ;;  %1914 = vmatpush.msra.mxu1 %v1913_v4  ;;  %v5787_v33 = vand.u32 4294901760, %v2122_v39  ;;  %v2118_v3 = vld [vmem:[#allocation7 + $0x138] sm:$0xff] }
 0x33d   : > { %2128 = vmatpush.msrb.mxu2 %v5748_v18  ;;  %v2214_v62 = vand.u32 4294901760, %v2213_v55  ;;  %v5832_v53 = vand.u32 4294901760, %v2118_v3 }
 0x33e   : > { %2055 = vmatpush.msrb.mxu0 %v1917_v54  ;;  %1920 = vmatpush.msra.mxu1 %v1919_v56  ;;  %v5798_v8 = vsub.f32 %v2122_v39, %v5787_v33  ;;  %v2117_v54 = vld [vmem:[#allocation7 + $0x130] sm:$0xff] }
 0x33f   : > { %1865 = vmatmul.f32.gmra.mxu0 %v1864_v31  ;;  %1922 = vmatmul.f32.vlgmr.msra.gmra.mxu1 %v5697_v17  ;;  %v5842_v11 = vsub.f32 %v2118_v3, %v5832_v53  ;;  %v5852_v31 = vand.u32 4294901760, %v2116_v15  ;;  %v2111_v3 = vld [vmem:[#allocation7 + $0x100] sm:$0xff] }
 0x340   : > { %2086 = vmatpush.msrb.mxu1 %v1844_v49  ;;  %2307 = vmatpush.msra.mxu0 %v5751_v21  ;;  %v2218_v42 = vand.u32 4294901760, %v5798_v8 }
 0x341   : > { %2012 = vmatmul.f32.gmra.mxu3 %v1862_v58  ;;  %2130 = vmatpush.msrb.mxu2 %v5753_v26  ;;  %v2242_v4 = vand.u32 4294901760, %v5842_v11 }
 0x342   : > { %2088 = vmatpush.msrb.mxu1 %v5706_v9  ;;  %v2219_v28 = vsub.f32 %v5798_v8, %v2218_v42 }
 0x343   : > { %1969 = vmatmul.f32.gmra.mxu2 %v1861_v57  ;;  %v2119_v57 = vld [vmem:[#allocation7 + $0x140] sm:$0xff]  ;;  %v2243_v1 = vsub.f32 %v5842_v11, %v2242_v4 }
 0x344   : > { %2090 = vmatpush.msrb.mxu1 %v5712_v43  ;;  %2132 = vmatpush.msrb.mxu2 %v5762_v46  ;;  %v5817_v0 = vand.u32 4294901760, %v2119_v57  ;;  %v2220_v59 = vand.u32 4294901760, %v2219_v28 }
 0x346   : > { %2092 = vmatpush.msrb.mxu1 %v5717_v44  ;;  %2134 = vmatpush.msrb.mxu2 %v5774_v20  ;;  %v2120_v44 = vld [vmem:[#allocation7 + $0x148] sm:$0xff] }
 0x347   : > { %1873 = vmatmul.f32.gmra.mxu0 %v1872_v36  ;;  %1926 = vmatmul.f32.gmra.mxu1 %v5714_v27  ;;  %v5808_v13 = vand.u32 4294901760, %v2120_v44 }
 0x348   : > { %2375 = vmatpush.msra.mxu1 %v5748_v18  ;;  %2136 = vmatpush.msrb.mxu2 %v5787_v33 }
 0x349   : > { %2018 = vmatmul.f32.gmra.mxu3 %v1870_v2  ;;  %v5815_v35 = vsub.f32 %v2120_v44, %v5808_v13  ;;  %v2112_v44 = vld [vmem:[#allocation7 + $0x108] sm:$0xff] }
 0x34a   : > { %2377 = vmatpush.msra.mxu1 %v5753_v26  ;;  %v5908_v28 = vand.u32 4294901760, %v2112_v44 }
 0x34b   : > { %1974 = vmatmul.f32.gmra.mxu2 %v1869_v14  ;;  %v2230_v58 = vand.u32 4294901760, %v5815_v35  ;;  %v5846_v14 = vand.u32 4294901760, %v2117_v54 }
 0x34c   : > { %2379 = vmatpush.msra.mxu1 %v5762_v46 }
 0x34d   : > { %v2231_v60 = vsub.f32 %v5815_v35, %v2230_v58  ;;  %v5857_v2 = vsub.f32 %v2117_v54, %v5846_v14 }
 0x34e   : > { %2381 = vmatpush.msra.mxu1 %v5774_v20 }
 0x34f   : > { %1881 = vmatmul.f32.gmra.mxu0 %v1880_v47  ;;  %1930 = vmatmul.f32.gmra.mxu1 %v5728_v22  ;;  %v2232_v6 = vand.u32 4294901760, %v2231_v60  ;;  %v2244_v47 = vand.u32 4294901760, %v2243_v1  ;;  %v5919_v60 = vsub.f32 %v2112_v44, %v5908_v28 }
 0x350   : > { %2383 = vmatpush.msra.mxu1 %v5787_v33 }
 0x351   : > { %2024 = vmatmul.f32.gmra.mxu3 %v1878_v40  ;;  %v2248_v40 = vand.u32 4294901760, %v5857_v2 }
 0x353   : > { %1979 = vmatmul.f32.gmra.mxu2 %v1877_v12  ;;  %v5864_v12 = vsub.f32 %v2116_v15, %v5852_v31  ;;  %v2249_v41 = vsub.f32 %v5857_v2, %v2248_v40 }
 0x355   : > { %v2254_v30 = vand.u32 4294901760, %v5864_v12  ;;  %v2250_v38 = vand.u32 4294901760, %v2249_v41 }
 0x357   : > { %1934 = vmatmul.f32.gmra.mxu1 %v1876_v37  ;;  %2057 = vmatmul.f32.vlgmr.msrb.gmra.mxu0 %v5697_v17  ;;  %v2255_v5 = vsub.f32 %v5864_v12, %v2254_v30 }
 0x35f   : > { %2061 = vmatmul.f32.gmra.mxu0 %v5714_v27  ;;  %2094 = vmatmul.f32.vlgmr.msrb.gmra.mxu1 %v5697_v17  ;;  %v5759_v17 = vsub.f32 %v2125_v61, %v5753_v26 }
 0x361   : > { %v2200_v16 = vand.u32 4294901760, %v5759_v17  ;;  %2310 = vmatpush.msra.mxu0 %v5759_v17 }
 0x363   : > { %v2201_v9 = vsub.f32 %v5759_v17, %v2200_v16  ;;  %2313 = vmatpush.msra.mxu0 %v5771_v19 }
 0x365   : > { %v2202_v43 = vand.u32 4294901760, %v2201_v9  ;;  %2316 = vmatpush.msra.mxu0 %v5783_v24 }
 0x367   : > { %2065 = vmatmul.f32.gmra.mxu0 %v5728_v22  ;;  %2098 = vmatmul.f32.gmra.mxu1 %v5714_v27  ;;  %v5795_v27 = vand.u32 4294901760, %v2121_v7 }
 0x368   : > { %2203 = vmatpush.msrb.mxu3 %v2202_v43  ;;  %2319 = vmatpush.msra.mxu0 %v5798_v8  ;;  %v5893_v43 = vand.u32 4294901760, %v2113_v63 }
 0x369   : > { %v5806_v49 = vsub.f32 %v2121_v7, %v5795_v27  ;;  %2385 = vmatpush.msra.mxu1 %v5795_v27  ;;  %2138 = vmatpush.msrb.mxu2 %v5795_v27  ;;  %v5891_v7 = vsub.f32 %v2114_v51, %v5876_v10 }
 0x36a   : > { %2209 = vmatpush.msrb.mxu3 %v2208_v50  ;;  %v2256_v50 = vand.u32 4294901760, %v2255_v5 }
 0x36b   : > { %v2224_v29 = vand.u32 4294901760, %v5806_v49  ;;  %2322 = vmatpush.msra.mxu0 %v5806_v49  ;;  %2387 = vmatpush.msra.mxu1 %v5808_v13 }
 0x36c   : > { %2215 = vmatpush.msrb.mxu3 %v2214_v62  ;;  %2140 = vmatpush.msrb.mxu2 %v5808_v13  ;;  %v5903_v62 = vsub.f32 %v2113_v63, %v5893_v43 }
 0x36d   : > { %v2225_v52 = vsub.f32 %v5806_v49, %v2224_v29  ;;  %2325 = vmatpush.msra.mxu0 %v5815_v35  ;;  %2389 = vmatpush.msra.mxu1 %v5817_v0 }
 0x36e   : > { %2142 = vmatpush.msrb.mxu2 %v5817_v0  ;;  %2221 = vmatpush.msrb.mxu3 %v2220_v59  ;;  %v2272_v54 = vand.u32 4294901760, %v5903_v62 }
 0x36f   : > { %2069 = vmatmul.f32.gmra.mxu0 %v1876_v37  ;;  %2102 = vmatmul.f32.gmra.mxu1 %v5728_v22  ;;  %v5830_v22 = vsub.f32 %v2119_v57, %v5817_v0  ;;  %v2226_v34 = vand.u32 4294901760, %v2225_v52  ;;  %v2266_v57 = vand.u32 4294901760, %v5891_v7 }
 0x370   : > { %2391 = vmatpush.msra.mxu1 %v5832_v53  ;;  %2144 = vmatpush.msrb.mxu2 %v5832_v53 }
 0x371   : > { %v2236_v45 = vand.u32 4294901760, %v5830_v22  ;;  %2328 = vmatpush.msra.mxu0 %v5830_v22  ;;  %2227 = vmatpush.msrb.mxu3 %v2226_v34  ;;  %v2267_v59 = vsub.f32 %v5891_v7, %v2266_v57  ;;  %v5914_v34 = vand.u32 4294901760, %v2111_v3 }
 0x372   : > { %2393 = vmatpush.msra.mxu1 %v5846_v14  ;;  %2146 = vmatpush.msrb.mxu2 %v5846_v14 }
 0x373   : > { %v2237_v25 = vsub.f32 %v5830_v22, %v2236_v45  ;;  %2331 = vmatpush.msra.mxu0 %v5842_v11  ;;  %2233 = vmatpush.msrb.mxu3 %v2232_v6  ;;  %v2268_v15 = vand.u32 4294901760, %v2267_v59  ;;  %v2273_v6 = vsub.f32 %v5903_v62, %v2272_v54 }
 0x374   : > { %2395 = vmatpush.msra.mxu1 %v5852_v31  ;;  %2148 = vmatpush.msrb.mxu2 %v5852_v31 }
 0x375   : > { %v2238_v56 = vand.u32 4294901760, %v2237_v25  ;;  %2334 = vmatpush.msra.mxu0 %v5857_v2  ;;  %v5926_v25 = vsub.f32 %v2111_v3, %v5914_v34  ;;  %v2274_v51 = vand.u32 4294901760, %v2273_v6 }
 0x377   : > { %2106 = vmatmul.f32.gmra.mxu1 %v1876_v37  ;;  %v2115_v37 = vld [vmem:[#allocation7 + $0x120] sm:$0xff]  ;;  %2239 = vmatpush.msrb.mxu3 %v2238_v56 }
 0x378   : > { %v5866_v36 = vand.u32 4294901760, %v2115_v37  ;;  %2337 = vmatpush.msra.mxu0 %v5864_v12 }
 0x379   : > { %2245 = vmatpush.msrb.mxu3 %v2244_v47  ;;  %v2284_v47 = vand.u32 4294901760, %v5926_v25 }
 0x37a   : > { %v5874_v61 = vsub.f32 %v2115_v37, %v5866_v36  ;;  %2397 = vmatpush.msra.mxu1 %v5866_v36  ;;  %2150 = vmatpush.msrb.mxu2 %v5866_v36  ;;  %v2278_v37 = vand.u32 4294901760, %v5919_v60 }
 0x37b   : > { %2251 = vmatpush.msrb.mxu3 %v2250_v38  ;;  %v2285_v63 = vsub.f32 %v5926_v25, %v2284_v47 }
 0x37c   : > { %v2260_v9 = vand.u32 4294901760, %v5874_v61  ;;  %2340 = vmatpush.msra.mxu0 %v5874_v61  ;;  %2399 = vmatpush.msra.mxu1 %v5876_v10  ;;  %v2279_v41 = vsub.f32 %v5919_v60, %v2278_v37 }
 0x37d   : > { %2152 = vmatpush.msrb.mxu2 %v5876_v10  ;;  %2257 = vmatpush.msrb.mxu3 %v2256_v50  ;;  %v2286_v38 = vand.u32 4294901760, %v2285_v63 }
 0x37e   : > { %v2261_v55 = vsub.f32 %v5874_v61, %v2260_v9  ;;  %2343 = vmatpush.msra.mxu0 %v5891_v7  ;;  %2401 = vmatpush.msra.mxu1 %v5893_v43  ;;  %v2280_v5 = vand.u32 4294901760, %v2279_v41 }
 0x37f   : > { %2154 = vmatpush.msrb.mxu2 %v5893_v43 }
 0x380   : > { %v2262_v52 = vand.u32 4294901760, %v2261_v55  ;;  %2346 = vmatpush.msra.mxu0 %v5903_v62  ;;  %2403 = vmatpush.msra.mxu1 %v5908_v28 }
 0x381   : > { %2156 = vmatpush.msrb.mxu2 %v5908_v28 }
 0x382   : > { %2263 = vmatpush.msrb.mxu3 %v2262_v52  ;;  %2349 = vmatpush.msra.mxu0 %v5919_v60 }
 0x383   : > { %2405 = vmatpush.msra.mxu1 %v5914_v34  ;;  %2158 = vmatpush.msrb.mxu2 %v5914_v34 }
 0x384   : > { %2269 = vmatpush.msrb.mxu3 %v2268_v15  ;;  %2352 = vmatpush.msra.mxu0 %v5926_v25 }
 0x385   : > { %2434 = vmatpush.msra.mxu2 %v2194_v32 }
 0x386   : > { %2275 = vmatpush.msrb.mxu3 %v2274_v51 }
 0x387   : > { %2438 = vmatpush.msra.mxu2 %v2200_v16 }
 0x388   : > { %2281 = vmatpush.msrb.mxu3 %v2280_v5 }
 0x389   : > { %2442 = vmatpush.msra.mxu2 %v2206_v23 }
 0x38a   : > { %2287 = vmatpush.msrb.mxu3 %v2286_v38 }
 0x38b   : > { %2446 = vmatpush.msra.mxu2 %v2212_v48 }
 0x38c   : > { %2513 = vmatpush.msra.mxu3 %v5748_v18 }
 0x38d   : > { %2450 = vmatpush.msra.mxu2 %v2218_v42 }
 0x38e   : > { %2515 = vmatpush.msra.mxu3 %v5753_v26 }
 0x38f   : > { %2454 = vmatpush.msra.mxu2 %v2224_v29 }
 0x390   : > { %2517 = vmatpush.msra.mxu3 %v5762_v46 }
 0x391   : > { %2458 = vmatpush.msra.mxu2 %v2230_v58 }
 0x392   : > { %2519 = vmatpush.msra.mxu3 %v5774_v20 }
 0x393   : > { %2462 = vmatpush.msra.mxu2 %v2236_v45 }
 0x394   : > { %2521 = vmatpush.msra.mxu3 %v5787_v33 }
 0x395   : > { %2466 = vmatpush.msra.mxu2 %v2242_v4 }
 0x396   : > { %2523 = vmatpush.msra.mxu3 %v5795_v27 }
 0x397   : > { %2470 = vmatpush.msra.mxu2 %v2248_v40 }
 0x398   : > { %2525 = vmatpush.msra.mxu3 %v5808_v13 }
 0x399   : > { %2474 = vmatpush.msra.mxu2 %v2254_v30 }
 0x39a   : > { %2527 = vmatpush.msra.mxu3 %v5817_v0 }
 0x39b   : > { %2478 = vmatpush.msra.mxu2 %v2260_v9 }
 0x39c   : > { %2529 = vmatpush.msra.mxu3 %v5832_v53 }
 0x39d   : > { %2482 = vmatpush.msra.mxu2 %v2266_v57 }
 0x39e   : > { %2531 = vmatpush.msra.mxu3 %v5846_v14 }
 0x39f   : > { %2486 = vmatpush.msra.mxu2 %v2272_v54 }
 0x3a0   : > { %2533 = vmatpush.msra.mxu3 %v5852_v31 }
 0x3a1   : > { %2490 = vmatpush.msra.mxu2 %v2278_v37 }
 0x3a2   : > { %2535 = vmatpush.msra.mxu3 %v5866_v36 }
 0x3a3   : > { %2494 = vmatpush.msra.mxu2 %v2284_v47 }
 0x3a4   : > { %2537 = vmatpush.msra.mxu3 %v5876_v10 }
 0x3a6   : > { %2539 = vmatpush.msra.mxu3 %v5893_v43 }
 0x3a8   : > { %2541 = vmatpush.msra.mxu3 %v5908_v28 }
 0x3aa   : > { %2543 = vmatpush.msra.mxu3 %v5914_v34 }
 0x3b4   : > { %v5884_v39 = vpop.f32.mrf.mxu0 }
 0x3bc   : > { %v1866_v56 = vpop.f32.mrf.mxu0  ;;  %v1923_v1 = vpop.f32.mrf.mxu1 }
 0x3bd   : > { %v2007_v26 = vpop.f32.mrf.mxu3  ;;  %v1924_v17 = vadd.f32 %v1923_v1, %v5884_v39 }
 0x3be   : > { %v1965_v21 = vpop.f32.mrf.mxu2 }
 0x3bf   : > { %v1966_v19 = vadd.f32 %v1965_v21, %v1924_v17 }
 0x3c1   : > { %v2008_v23 = vadd.f32 %v2007_v26, %v1966_v19 }
 0x3c4   : > { %v1874_v44 = vpop.f32.mrf.mxu0  ;;  %v1927_v50 = vpop.f32.mrf.mxu1 }
 0x3c5   : > { %v1928_v24 = vadd.f32 %v1927_v50, %v1866_v56  ;;  %v2013_v33 = vpop.f32.mrf.mxu3 }
 0x3c6   : > { %v1970_v20 = vpop.f32.mrf.mxu2 }
 0x3c7   : > { %v1971_v49 = vadd.f32 %v1970_v20, %v1928_v24 }
 0x3c9   : > { %v2014_v35 = vadd.f32 %v2013_v33, %v1971_v49 }
 0x3cc   : > { %v1882_v18 = vpop.f32.mrf.mxu0  ;;  %v1931_v32 = vpop.f32.mrf.mxu1 }
 0x3cd   : > { %v1932_v0 = vadd.f32 %v1931_v32, %v1874_v44  ;;  %v2019_v45 = vpop.f32.mrf.mxu3 }
 0x3ce   : > { %v1975_v29 = vpop.f32.mrf.mxu2 }
 0x3cf   : > { %v1976_v14 = vadd.f32 %v1975_v29, %v1932_v0 }
 0x3d1   : > { %v2020_v40 = vadd.f32 %v2019_v45, %v1976_v14 }
 0x3d4   : > { %v1935_v46 = vpop.f32.mrf.mxu1  ;;  %v2058_v16 = vpop.f32.mrf.mxu0 }
 0x3d5   : > { %v2059_v48 = vadd.f32 %v2058_v16, %v2008_v23  ;;  %v1936_v30 = vadd.f32 %v1935_v46, %v1882_v18  ;;  %v2025_v62 = vpop.f32.mrf.mxu3 }
 0x3d6   : > { %v1980_v10 = vpop.f32.mrf.mxu2 }
 0x3d7   : > { %v1981_v43 = vadd.f32 %v1980_v10, %v1936_v30 }
 0x3d9   : > { %v2026_v59 = vadd.f32 %v2025_v62, %v1981_v43 }
 0x3dc   : > { %v2062_v27 = vpop.f32.mrf.mxu0  ;;  %v2095_v8 = vpop.f32.mrf.mxu1 }
 0x3dd   : > { %v2096_v13 = vadd.f32 %v2095_v8, %v2059_v48  ;;  %v2063_v22 = vadd.f32 %v2062_v27, %v2014_v35 }
 0x3df   : > { %v2159_v42 = vand.u32 4294901760, %v2096_v13 }
 0x3e1   : > { %v2160_v58 = vsub.f32 %v2096_v13, %v2159_v42  ;;  %2289 = vmatmul.f32.vlgmr.msrb.gmra.mxu3 %v2159_v42 }
 0x3e3   : > { %v2161_v53 = vand.u32 4294901760, %v2160_v58  ;;  %2355 = vmatmul.f32.vlgmr.msra.gmra.mxu0 %v2160_v58 }
 0x3e4   : > { %v2099_v11 = vpop.f32.mrf.mxu1  ;;  %v2066_v2 = vpop.f32.mrf.mxu0 }
 0x3e5   : > { %v2162_v4 = vsub.f32 %v2160_v58, %v2161_v53  ;;  %v2100_v31 = vadd.f32 %v2099_v11, %v2063_v22  ;;  %2409 = vmatmul.f32.vlgmr.msra.gmra.mxu1 %v2161_v53  ;;  %v2067_v39 = vadd.f32 %v2066_v2, %v2020_v40  ;;  %v2562_v22 = vld [vmem:[#allocation6 + $0x60] sm:$0xff] }
 0x3e6   : > { %v2567_v2 = vsel %vm320_vm0, %v2562_v22, 0 }
 0x3e7   : > { %v2163_v12 = vand.u32 4294901760, %v2162_v4  ;;  %v2167_v36 = vand.u32 4294901760, %v2100_v31 }
 0x3e9   : > { %v2168_v61 = vsub.f32 %v2100_v31, %v2167_v36  ;;  %2164 = vmatmul.f32.vlgmr.msrb.gmra.mxu2 %v2163_v12  ;;  %2293 = vmatmul.f32.gmra.mxu3 %v2167_v36 }
 0x3eb   : > { %2360 = vmatmul.f32.gmra.mxu0 %v2168_v61  ;;  %v2169_v9 = vand.u32 4294901760, %v2168_v61 }
 0x3ec   : > { %v2103_v7 = vpop.f32.mrf.mxu1  ;;  %v2070_v52 = vpop.f32.mrf.mxu0 }
 0x3ed   : > { %v2104_v55 = vadd.f32 %v2103_v7, %v2067_v39  ;;  %2415 = vmatmul.f32.gmra.mxu1 %v2169_v9  ;;  %v2170_v57 = vsub.f32 %v2168_v61, %v2169_v9  ;;  %v2071_v34 = vadd.f32 %v2070_v52, %v2026_v59  ;;  %v5984_v61 = vand.u32 4294901760, %v2567_v2 }
 0x3ef   : > { %v2175_v28 = vand.u32 4294901760, %v2104_v55  ;;  %v2171_v3 = vand.u32 4294901760, %v2170_v57 }
 0x3f1   : > { %v2176_v54 = vsub.f32 %v2104_v55, %v2175_v28  ;;  %2172 = vmatmul.f32.gmra.mxu2 %v2171_v3  ;;  %2297 = vmatmul.f32.gmra.mxu3 %v2175_v28  ;;  %v2563_v55 = vld [vmem:[#allocation6 + $0x68] sm:$0xff] }
 0x3f3   : > { %2365 = vmatmul.f32.gmra.mxu0 %v2176_v54  ;;  %v2177_v60 = vand.u32 4294901760, %v2176_v54 }
 0x3f4   : > { %v2107_v15 = vpop.f32.mrf.mxu1 }
 0x3f5   : > { %v2108_v6 = vadd.f32 %v2107_v15, %v2071_v34  ;;  %2421 = vmatmul.f32.gmra.mxu1 %v2177_v60  ;;  %v2178_v25 = vsub.f32 %v2176_v54, %v2177_v60  ;;  %v2570_v34 = vsel %vm320_vm0, %v2563_v55, 0  ;;  %v2864_v55 = vld [vmem:[#allocation7 + $0x1b8] sm:$0xff] }
 0x3f7   : > { %v2183_v37 = vand.u32 4294901760, %v2108_v6  ;;  %v2179_v56 = vand.u32 4294901760, %v2178_v25  ;;  %v6002_v25 = vand.u32 4294901760, %v2570_v34 }
 0x3f9   : > { %v2184_v1 = vsub.f32 %v2108_v6, %v2183_v37  ;;  %2180 = vmatmul.f32.gmra.mxu2 %v2179_v56  ;;  %2301 = vmatmul.f32.gmra.mxu3 %v2183_v37 }
 0x3fb   : > { %2370 = vmatmul.f32.gmra.mxu0 %v2184_v1  ;;  %v2185_v51 = vand.u32 4294901760, %v2184_v1 }
 0x3fd   : > { %2427 = vmatmul.f32.gmra.mxu1 %v2185_v51  ;;  %v2186_v47 = vsub.f32 %v2184_v1, %v2185_v51  ;;  %v2564_v51 = vld [vmem:[#allocation6 + $0x70] sm:$0xff] }
 0x3ff   : > { %v2187_v41 = vand.u32 4294901760, %v2186_v47 }
 0x401   : > { %2188 = vmatmul.f32.gmra.mxu2 %v2187_v41  ;;  %2545 = vmatmul.f32.vlgmr.msra.gmra.mxu3 %v2159_v42 }
 0x409   : > { %2496 = vmatmul.f32.vlgmr.msra.gmra.mxu2 %v2159_v42  ;;  %2549 = vmatmul.f32.gmra.mxu3 %v2167_v36 }
 0x411   : > { %2500 = vmatmul.f32.gmra.mxu2 %v2167_v36  ;;  %2553 = vmatmul.f32.gmra.mxu3 %v2175_v28 }
 0x419   : > { %2504 = vmatmul.f32.gmra.mxu2 %v2175_v28  ;;  %2557 = vmatmul.f32.gmra.mxu3 %v2183_v37  ;;  %v2599_v28 = vsub.f32 %v2567_v2, %v5984_v61  ;;  %v2866_v2 = vld [vmem:[#allocation7 + $0x1c8] sm:$0xff] }
 0x41b   : > { %v2600_v6 = vand.u32 4294901760, %v2599_v28 }
 0x421   : > { %2508 = vmatmul.f32.gmra.mxu2 %v2183_v37 }
 0x460   : > { %v2356_v32 = vpop.f32.mrf.mxu0 }
 0x462   : > { %v2410_v26 = vpop.f32.mrf.mxu1 }
 0x464   : > { %v2290_v63 = vpop.f32.mrf.mxu3 }
 0x468   : > { %v2361_v16 = vpop.f32.mrf.mxu0 }
 0x46a   : > { %v2416_v20 = vpop.f32.mrf.mxu1 }
 0x46c   : > { %v2165_v5 = vpop.f32.mrf.mxu2  ;;  %v2294_v38 = vpop.f32.mrf.mxu3 }
 0x46d   : > { %v2291_v8 = vadd.f32 %v2290_v63, %v2165_v5  ;;  %v2601_v63 = vsub.f32 %v2599_v28, %v2600_v6  ;;  %v2872_v5 = vld [vmem:[#allocation7 + $0x1f8] sm:$0xff] }
 0x46f   : > { %v2357_v29 = vadd.f32 %v2356_v32, %v2291_v8  ;;  %v2871_v32 = vld [vmem:[#allocation7 + $0x1f0] sm:$0xff]  ;;  %v2565_v8 = vld [vmem:[#allocation6 + $0x78] sm:$0xff] }
 0x470   : > { %v2366_v48 = vpop.f32.mrf.mxu0 }
 0x471   : > { %v2411_v11 = vadd.f32 %v2410_v26, %v2357_v29 }
 0x472   : > { %v2422_v42 = vpop.f32.mrf.mxu1 }
 0x474   : > { %v2173_v44 = vpop.f32.mrf.mxu2  ;;  %v2298_v50 = vpop.f32.mrf.mxu3 }
 0x475   : > { %v2295_v24 = vadd.f32 %v2294_v38, %v2173_v44  ;;  %v6025_v38 = vsub.f32 %v2570_v34, %v6002_v25 }
 0x477   : > { %v2362_v49 = vadd.f32 %v2361_v16, %v2295_v24  ;;  %v6044_v16 = vand.u32 4294901760, %v2872_v5 }
 0x478   : > { %v2371_v31 = vpop.f32.mrf.mxu0 }
 0x479   : > { %v2417_v0 = vadd.f32 %v2416_v20, %v2362_v49  ;;  %v2608_v20 = vand.u32 4294901760, %v6025_v38 }
 0x47a   : > { %v2428_v10 = vpop.f32.mrf.mxu1 }
 0x47b   : > { %v2609_v29 = vsub.f32 %v6025_v38, %v2608_v20 }
 0x47c   : > { %v2181_v21 = vpop.f32.mrf.mxu2  ;;  %v2302_v18 = vpop.f32.mrf.mxu3 }
 0x47d   : > { %v2299_v33 = vadd.f32 %v2298_v50, %v2181_v21 }
 0x47f   : > { %v2367_v13 = vadd.f32 %v2366_v48, %v2299_v33  ;;  %v6057_v48 = vand.u32 4294901760, %v2871_v32 }
 0x481   : > { %v2423_v58 = vadd.f32 %v2422_v42, %v2367_v13  ;;  %v6064_v13 = vsub.f32 %v2872_v5, %v6044_v16  ;;  %v6077_v22 = vsub.f32 %v2871_v32, %v6057_v48 }
 0x484   : > { %v2189_v17 = vpop.f32.mrf.mxu2  ;;  %v2546_v46 = vpop.f32.mrf.mxu3 }
 0x485   : > { %v2303_v35 = vadd.f32 %v2302_v18, %v2189_v17  ;;  %v2573_v18 = vsel %vm320_vm0, %v2564_v51, 0  ;;  %v2602_v17 = vand.u32 4294901760, %v2601_v63  ;;  %v2862_v63 = vld [vmem:[#allocation7 + $0x1a8] sm:$0xff] }
 0x486   : > { %v6143_v32 = vand.u32 4294901760, %v2862_v63 }
 0x487   : > { %v2372_v12 = vadd.f32 %v2371_v31, %v2303_v35  ;;  %v2868_v35 = vld [vmem:[#allocation7 + $0x1d8] sm:$0xff]  ;;  %v2610_v31 = vand.u32 4294901760, %v2609_v29 }
 0x489   : > { %v2429_v7 = vadd.f32 %v2428_v10, %v2372_v12  ;;  %v2865_v10 = vld [vmem:[#allocation7 + $0x1c0] sm:$0xff] }
 0x48c   : > { %v2497_v19 = vpop.f32.mrf.mxu2  ;;  %v2550_v23 = vpop.f32.mrf.mxu3 }
 0x48d   : > { %v2498_v36 = vadd.f32 %v2497_v19, %v2411_v11  ;;  %v2870_v19 = vld [vmem:[#allocation7 + $0x1e8] sm:$0xff]  ;;  %v2867_v11 = vld [vmem:[#allocation7 + $0x1d0] sm:$0xff] }
 0x48e   : > { %v6066_v42 = vand.u32 4294901760, %v2870_v19 }
 0x48f   : > { %v2547_v39 = vadd.f32 %v2546_v46, %v2498_v36 }
 0x491   : > { %v5991_v52 = vand.u32 4294901760, %v2547_v39 }
 0x493   : > { %v6005_v37 = vsub.f32 %v2547_v39, %v5991_v52 }
 0x494   : > { %v2501_v27 = vpop.f32.mrf.mxu2  ;;  %v2554_v53 = vpop.f32.mrf.mxu3 }
 0x495   : > { %v2502_v14 = vadd.f32 %v2501_v27, %v2417_v0  ;;  %v6034_v21 = vand.u32 4294901760, %v6005_v37  ;;  %v2869_v27 = vld [vmem:[#allocation7 + $0x1e0] sm:$0xff] }
 0x497   : > { %v2551_v30 = vadd.f32 %v2550_v23, %v2502_v14  ;;  %v6049_v23 = vand.u32 4294901760, %v2573_v18  ;;  %v2664_v33 = vsub.f32 %v6005_v37, %v6034_v21  ;;  %v6087_v14 = vsub.f32 %v2870_v19, %v6066_v42 }
 0x499   : > { %v5988_v57 = vand.u32 4294901760, %v2551_v30  ;;  %v6071_v0 = vsub.f32 %v2573_v18, %v6049_v23 }
 0x49b   : > { %v5998_v60 = vsub.f32 %v2551_v30, %v5988_v57  ;;  %v2616_v12 = vand.u32 4294901760, %v6071_v0  ;;  %v6101_v30 = vand.u32 4294901760, %v2867_v11 }
 0x49c   : > { %v2505_v45 = vpop.f32.mrf.mxu2  ;;  %v2558_v3 = vpop.f32.mrf.mxu3 }
 0x49d   : > { %v2506_v4 = vadd.f32 %v2505_v45, %v2423_v58  ;;  %v6021_v41 = vand.u32 4294901760, %v5998_v60  ;;  %v6074_v58 = vand.u32 4294901760, %v2664_v33  ;;  %v2576_v45 = vsel %vm320_vm0, %v2565_v8, 0  ;;  %v2859_v33 = vld [vmem:[#allocation7 + $0x190] sm:$0xff] }
 0x49e   : > { %v6093_v36 = vand.u32 4294901760, %v2576_v45 }
 0x49f   : > { %v2555_v40 = vadd.f32 %v2554_v53, %v2506_v4  ;;  %v2658_v46 = vsub.f32 %v5998_v60, %v6021_v41  ;;  %v6079_v53 = vand.u32 4294901760, %v2869_v27  ;;  %v6089_v4 = vand.u32 4294901760, %v2868_v35 }
 0x4a1   : > { %v5986_v9 = vand.u32 4294901760, %v2555_v40  ;;  %v6061_v49 = vand.u32 4294901760, %v2658_v46  ;;  %v6107_v39 = vsub.f32 %v2868_v35, %v6089_v4  ;;  %v2860_v46 = vld [vmem:[#allocation7 + $0x198] sm:$0xff]  ;;  %v2858_v35 = vld [vmem:[#allocation7 + $0x188] sm:$0xff] }
 0x4a2   : > { %v6159_v8 = vand.u32 4294901760, %v2860_v46 }
 0x4a3   : > { %v5994_v59 = vsub.f32 %v2555_v40, %v5986_v9  ;;  %v6099_v40 = vsub.f32 %v2869_v27, %v6079_v53  ;;  %v6157_v27 = vsub.f32 %v2862_v63, %v6143_v32 }
 0x4a4   : > { %v2509_v43 = vpop.f32.mrf.mxu2 }
 0x4a5   : > { %v2510_v62 = vadd.f32 %v2509_v43, %v2429_v7  ;;  %v6013_v1 = vand.u32 4294901760, %v5994_v59  ;;  %v6109_v7 = vand.u32 4294901760, %v2866_v2  ;;  %v2617_v43 = vsub.f32 %v6071_v0, %v2616_v12 }
 0x4a6   : > { %v7071_v63 = vand.u32 4294901760, %v6099_v40 }
 0x4a7   : > { %v2559_v54 = vadd.f32 %v2558_v3, %v2510_v62  ;;  %v2652_v50 = vsub.f32 %v5994_v59, %v6013_v1  ;;  %v2623_v62 = vsub.f32 %v2576_v45, %v6093_v36  ;;  %v6118_v3 = vand.u32 4294901760, %v2865_v10 }
 0x4a8   : > { %v6124_v34 = vsub.f32 %v2866_v2, %v6109_v7  ;;  %v2618_v51 = vand.u32 4294901760, %v2617_v43  ;;  %v6168_v45 = vand.u32 4294901760, %v2859_v33  ;;  %v6175_v2 = vand.u32 4294901760, %v2858_v35 }
 0x4a9   : > { %v6000_v15 = vand.u32 4294901760, %v2559_v54  ;;  %v6053_v24 = vand.u32 4294901760, %v2652_v50  ;;  %v2624_v5 = vand.u32 4294901760, %v2623_v62  ;;  %v2861_v50 = vld [vmem:[#allocation7 + $0x1a0] sm:$0xff] }
 0x4aa   : > { %v6189_v43 = vsub.f32 %v2858_v35, %v6175_v2 }
 0x4ab   : > { %v6008_v56 = vsub.f32 %v2559_v54, %v6000_v15  ;;  %2591 = vmatpush.msrb.mxu0 %v6000_v15  ;;  %2742 = vmatpush.msrb.mxu3 %v6000_v15  ;;  %v2863_v54 = vld [vmem:[#allocation7 + $0x1b0] sm:$0xff] }
 0x4ad   : > { %2593 = vmatpush.msrb.mxu0 %v5986_v9  ;;  %2698 = vmatpush.msrb.mxu2 %v6008_v56  ;;  %v6018_v47 = vand.u32 4294901760, %v6008_v56 }
 0x4ae   : > { %2744 = vmatpush.msrb.mxu3 %v5986_v9 }
 0x4af   : > { %2595 = vmatpush.msrb.mxu0 %v5988_v57  ;;  %2701 = vmatpush.msrb.mxu2 %v5994_v59  ;;  %v2646_v44 = vsub.f32 %v6008_v56, %v6018_v47 }
 0x4b0   : > { %2746 = vmatpush.msrb.mxu3 %v5988_v57 }
 0x4b1   : > { %2597 = vmatpush.msrb.mxu0 %v5991_v52  ;;  %2704 = vmatpush.msrb.mxu2 %v5998_v60  ;;  %v6040_v26 = vand.u32 4294901760, %v2646_v44  ;;  %v6135_v44 = vand.u32 4294901760, %v2863_v54 }
 0x4b2   : > { %2748 = vmatpush.msrb.mxu3 %v5991_v52  ;;  %2603 = vmatmul.f32.vlgmr.msrb.gmra.mxu0 %v2602_v17  ;;  %v2625_v17 = vsub.f32 %v2623_v62, %v2624_v5 }
 0x4b3   : > { %2789 = vmatpush.msra.mxu0 %v6018_v47  ;;  %2648 = vmatpush.msrb.mxu1 %v6040_v26  ;;  %v6149_v19 = vsub.f32 %v2863_v54, %v6135_v44  ;;  %v7073_v54 = vand.u32 4294901760, %v6077_v22 }
 0x4b4   : > { %2707 = vmatpush.msrb.mxu2 %v6005_v37  ;;  %2752 = vmatmul.f32.vlgmr.msrb.gmra.mxu3 %v2600_v6  ;;  %v6126_v6 = vand.u32 4294901760, %v2864_v55  ;;  %v2626_v29 = vand.u32 4294901760, %v2625_v17 }
 0x4b5   : > { %2793 = vmatpush.msra.mxu0 %v6013_v1  ;;  %2710 = vmatmul.f32.vlgmr.msrb.gmra.mxu2 %v2599_v28  ;;  %v6116_v28 = vsub.f32 %v2867_v11, %v6101_v30  ;;  %v2857_v11 = vld [vmem:[#allocation7 + $0x180] sm:$0xff] }
 0x4b6   : > { %2654 = vmatpush.msrb.mxu1 %v6053_v24  ;;  %2874 = vmatpush.msra.mxu2 %v6044_v16  ;;  %v6141_v18 = vsub.f32 %v2864_v55, %v6126_v6 }
 0x4b7   : > { %2797 = vmatpush.msra.mxu0 %v6021_v41  ;;  %v2970_v35 = vand.u32 4294901760, %v6116_v28 }
 0x4b8   : > { %2660 = vmatpush.msrb.mxu1 %v6061_v49  ;;  %2876 = vmatpush.msra.mxu2 %v6057_v48 }
 0x4b9   : > { %2801 = vmatpush.msra.mxu0 %v6034_v21 }
 0x4ba   : > { %2666 = vmatpush.msrb.mxu1 %v6074_v58  ;;  %2611 = vmatmul.f32.gmra.mxu0 %v2610_v31  ;;  %v6173_v31 = vsub.f32 %v2860_v46, %v6159_v8  ;;  %v7072_v46 = vand.u32 4294901760, %v6107_v39 }
 0x4bb   : > { %3053 = vmatpush.msrb.mxu0 %v6064_v13  ;;  %2668 = vmatmul.f32.vlgmr.msrb.gmra.mxu1 %v5984_v61 }
 0x4bc   : > { %2832 = vmatpush.msra.mxu1 %v6000_v15  ;;  %2758 = vmatmul.f32.gmra.mxu3 %v2608_v20  ;;  %v6151_v20 = vand.u32 4294901760, %v2861_v50 }
 0x4bd   : > { %3056 = vmatpush.msrb.mxu0 %v6077_v22  ;;  %2715 = vmatmul.f32.gmra.mxu2 %v6025_v38  ;;  %v6133_v38 = vsub.f32 %v2865_v10, %v6118_v3  ;;  %v6183_v10 = vsub.f32 %v2859_v33, %v6168_v45 }
 0x4be   : > { %2834 = vmatpush.msra.mxu1 %v5986_v9  ;;  %2878 = vmatpush.msra.mxu2 %v6066_v42 }
 0x4bf   : > { %3059 = vmatpush.msrb.mxu0 %v6087_v14 }
 0x4c0   : > { %2836 = vmatpush.msra.mxu1 %v5988_v57  ;;  %2880 = vmatpush.msra.mxu2 %v6079_v53 }
 0x4c1   : > { %3062 = vmatpush.msrb.mxu0 %v6099_v40 }
 0x4c2   : > { %2838 = vmatpush.msra.mxu1 %v5991_v52  ;;  %2882 = vmatpush.msra.mxu2 %v6089_v4 }
 0x4c3   : > { %3065 = vmatpush.msrb.mxu0 %v6107_v39  ;;  %2672 = vmatmul.f32.gmra.mxu1 %v6002_v25 }
 0x4c4   : > { %3121 = vmatpush.msrb.mxu1 %v6044_v16  ;;  %2619 = vmatmul.f32.gmra.mxu0 %v2618_v51  ;;  %v7070_v51 = vand.u32 4294901760, %v6087_v14 }
 0x4c5   : > { %3068 = vmatpush.msrb.mxu0 %v6116_v28  ;;  %2720 = vmatmul.f32.gmra.mxu2 %v6071_v0  ;;  %v6166_v0 = vsub.f32 %v2861_v50, %v6151_v20  ;;  %v2947_v50 = vsub.f32 %v6077_v22, %v7073_v54  ;;  %v2988_v54 = vand.u32 4294901760, %v6141_v18 }
 0x4c6   : > { %3123 = vmatpush.msrb.mxu1 %v6057_v48  ;;  %2764 = vmatmul.f32.gmra.mxu3 %v2616_v12  ;;  %v6179_v12 = vand.u32 4294901760, %v2857_v11  ;;  %v2953_v17 = vsub.f32 %v6087_v14, %v7070_v51  ;;  %v2965_v51 = vsub.f32 %v6107_v39, %v7072_v46 }
 0x4c7   : > { %3071 = vmatpush.msrb.mxu0 %v6124_v34  ;;  %2884 = vmatpush.msra.mxu2 %v6101_v30 }
 0x4c8   : > { %3125 = vmatpush.msrb.mxu1 %v6066_v42  ;;  %v6193_v55 = vsub.f32 %v2857_v11, %v6179_v12  ;;  %v2954_v11 = vand.u32 4294901760, %v2953_v17  ;;  %v2982_v17 = vand.u32 4294901760, %v6133_v38 }
 0x4c9   : > { %3074 = vmatpush.msrb.mxu0 %v6133_v38  ;;  %2886 = vmatpush.msra.mxu2 %v6109_v7 }
 0x4ca   : > { %3127 = vmatpush.msrb.mxu1 %v6079_v53 }
 0x4cb   : > { %3077 = vmatpush.msrb.mxu0 %v6141_v18  ;;  %2676 = vmatmul.f32.gmra.mxu1 %v6049_v23 }
 0x4cc   : > { %3129 = vmatpush.msrb.mxu1 %v6089_v4  ;;  %2888 = vmatpush.msra.mxu2 %v6118_v3 }
 0x4cd   : > { %3080 = vmatpush.msrb.mxu0 %v6149_v19  ;;  %2725 = vmatmul.f32.gmra.mxu2 %v2623_v62  ;;  %v2940_v62 = vand.u32 4294901760, %v6064_v13 }
 0x4ce   : > { %3131 = vmatpush.msrb.mxu1 %v6101_v30  ;;  %2627 = vmatmul.f32.gmra.mxu0 %v2626_v29  ;;  %v2948_v29 = vand.u32 4294901760, %v2947_v50 }
 0x4cf   : > { %3083 = vmatpush.msrb.mxu0 %v6157_v27  ;;  %2770 = vmatmul.f32.gmra.mxu3 %v2624_v5  ;;  %v2941_v5 = vsub.f32 %v6064_v13, %v2940_v62  ;;  %v2959_v13 = vsub.f32 %v6099_v40, %v7071_v63  ;;  %v2971_v63 = vsub.f32 %v6116_v28, %v2970_v35 }
 0x4d0   : > { %3133 = vmatpush.msrb.mxu1 %v6109_v7  ;;  %2890 = vmatpush.msra.mxu2 %v6126_v6  ;;  %v2983_v28 = vsub.f32 %v6133_v38, %v2982_v17 }
 0x4d1   : > { %3086 = vmatpush.msrb.mxu0 %v6166_v0  ;;  %v2942_v33 = vand.u32 4294901760, %v2941_v5  ;;  %v2976_v5 = vand.u32 4294901760, %v6124_v34  ;;  %v2960_v50 = vand.u32 4294901760, %v2959_v13  ;;  %v3000_v13 = vand.u32 4294901760, %v6157_v27 }
 0x4d2   : > { %3135 = vmatpush.msrb.mxu1 %v6118_v3  ;;  %2892 = vmatpush.msra.mxu2 %v6135_v44  ;;  %v2984_v38 = vand.u32 4294901760, %v2983_v28 }
 0x4d3   : > { %3089 = vmatpush.msrb.mxu0 %v6173_v31  ;;  %2680 = vmatmul.f32.gmra.mxu1 %v6093_v36  ;;  %v2977_v46 = vsub.f32 %v6124_v34, %v2976_v5 }
 0x4d4   : > { %3137 = vmatpush.msrb.mxu1 %v6126_v6  ;;  %2894 = vmatpush.msra.mxu2 %v6143_v32 }
 0x4d5   : > { %3092 = vmatpush.msrb.mxu0 %v6183_v10  ;;  %2943 = vmatpush.msra.mxu3 %v2942_v33  ;;  %v2966_v33 = vand.u32 4294901760, %v2965_v51  ;;  %v2978_v34 = vand.u32 4294901760, %v2977_v46  ;;  %v2989_v51 = vsub.f32 %v6141_v18, %v2988_v54  ;;  %v7099_v18 = vand.u32 4294901760, %v6077_v22 }
 0x4d6   : > { %3139 = vmatpush.msrb.mxu1 %v6135_v44  ;;  %2803 = vmatmul.f32.vlgmr.msra.gmra.mxu0 %v5984_v61  ;;  %v3012_v22 = vand.u32 4294901760, %v6173_v31 }
 0x4d7   : > { %3095 = vmatpush.msrb.mxu0 %v6189_v43  ;;  %2896 = vmatpush.msra.mxu2 %v6151_v20 }
 0x4d8   : > { %3141 = vmatpush.msrb.mxu1 %v6143_v32  ;;  %2949 = vmatpush.msra.mxu3 %v2948_v29  ;;  %v2994_v29 = vand.u32 4294901760, %v6149_v19 }
 0x4d9   : > { %3098 = vmatpush.msrb.mxu0 %v6193_v55  ;;  %2898 = vmatpush.msra.mxu2 %v6159_v8 }
 0x4da   : > { %3143 = vmatpush.msrb.mxu1 %v6151_v20  ;;  %2955 = vmatpush.msra.mxu3 %v2954_v11  ;;  %v2990_v11 = vand.u32 4294901760, %v2989_v51 }
 0x4db   : > { %3337 = vmatpush.msra.mxu0 %v6000_v15  ;;  %2840 = vmatmul.f32.vlgmr.msra.gmra.mxu1 %v5984_v61  ;;  %v2972_v61 = vand.u32 4294901760, %v2971_v63  ;;  %v2995_v63 = vsub.f32 %v6149_v19, %v2994_v29  ;;  %v7100_v19 = vand.u32 4294901760, %v6087_v14  ;;  %v3013_v14 = vsub.f32 %v6173_v31, %v3012_v22 }
 0x4dc   : > { %3145 = vmatpush.msrb.mxu1 %v6159_v8  ;;  %2900 = vmatpush.msra.mxu2 %v6168_v45 }
 0x4dd   : > { %3339 = vmatpush.msra.mxu0 %v5986_v9  ;;  %2961 = vmatpush.msra.mxu3 %v2960_v50 }
 0x4de   : > { %3147 = vmatpush.msrb.mxu1 %v6168_v45  ;;  %2807 = vmatmul.f32.gmra.mxu0 %v6002_v25 }
 0x4df   : > { %3341 = vmatpush.msra.mxu0 %v5988_v57  ;;  %2902 = vmatpush.msra.mxu2 %v6175_v2 }
 0x4e0   : > { %3149 = vmatpush.msrb.mxu1 %v6175_v2  ;;  %2967 = vmatpush.msra.mxu3 %v2966_v33 }
 0x4e1   : > { %3343 = vmatpush.msra.mxu0 %v5991_v52  ;;  %2904 = vmatpush.msra.mxu2 %v6179_v12 }
 0x4e2   : > { %3151 = vmatpush.msrb.mxu1 %v6179_v12  ;;  %2973 = vmatpush.msra.mxu3 %v2972_v61 }
 0x4e3   : > { %2844 = vmatmul.f32.gmra.mxu1 %v6002_v25  ;;  %3180 = vmatpush.msrb.mxu2 %v2940_v62  ;;  %v2996_v25 = vand.u32 4294901760, %v2995_v63  ;;  %v7101_v62 = vand.u32 4294901760, %v6099_v40 }
 0x4e4   : > { %3394 = vmatpush.msra.mxu1 %v6040_v26  ;;  %2979 = vmatpush.msra.mxu3 %v2978_v34  ;;  %v3001_v26 = vsub.f32 %v6157_v27, %v3000_v13  ;;  %v3018_v27 = vand.u32 4294901760, %v6183_v10 }
 0x4e5   : > { %3184 = vmatpush.msrb.mxu2 %v7099_v18 }
 0x4e6   : > { %3400 = vmatpush.msra.mxu1 %v6053_v24  ;;  %2811 = vmatmul.f32.gmra.mxu0 %v6049_v23  ;;  %v3002_v24 = vand.u32 4294901760, %v3001_v26 }
 0x4e7   : > { %2985 = vmatpush.msra.mxu3 %v2984_v38  ;;  %3188 = vmatpush.msrb.mxu2 %v7100_v19 }
 0x4e8   : > { %3406 = vmatpush.msra.mxu1 %v6061_v49  ;;  %v7102_v49 = vand.u32 4294901760, %v6107_v39  ;;  %v3014_v39 = vand.u32 4294901760, %v3013_v14 }
 0x4e9   : > { %2991 = vmatpush.msra.mxu3 %v2990_v11  ;;  %3192 = vmatpush.msrb.mxu2 %v7101_v62 }
 0x4ea   : > { %3412 = vmatpush.msra.mxu1 %v6074_v58  ;;  %v3006_v58 = vand.u32 4294901760, %v6166_v0 }
 0x4eb   : > { %2848 = vmatmul.f32.gmra.mxu1 %v6049_v23  ;;  %2997 = vmatpush.msra.mxu3 %v2996_v25 }
 0x4ec   : > { %3196 = vmatpush.msrb.mxu2 %v7102_v49  ;;  %v3007_v23 = vsub.f32 %v6166_v0, %v3006_v58  ;;  %v3030_v0 = vand.u32 4294901760, %v6193_v55 }
 0x4ed   : > { %3003 = vmatpush.msra.mxu3 %v3002_v24 }
 0x4ee   : > { %3200 = vmatpush.msrb.mxu2 %v2970_v35  ;;  %2815 = vmatmul.f32.gmra.mxu0 %v6093_v36  ;;  %v3008_v40 = vand.u32 4294901760, %v3007_v23 }
 0x4f0   : > { %3204 = vmatpush.msrb.mxu2 %v2976_v5  ;;  %3009 = vmatpush.msra.mxu3 %v3008_v40  ;;  %v3031_v5 = vsub.f32 %v6193_v55, %v3030_v0 }
 0x4f2   : > { %3208 = vmatpush.msrb.mxu2 %v2982_v17  ;;  %3015 = vmatpush.msra.mxu3 %v3014_v39  ;;  %v3032_v50 = vand.u32 4294901760, %v3031_v5 }
 0x4f3   : > { %2852 = vmatmul.f32.gmra.mxu1 %v6093_v36  ;;  %v3024_v36 = vand.u32 4294901760, %v6189_v43 }
 0x4f4   : > { %3212 = vmatpush.msrb.mxu2 %v2988_v54  ;;  %v3019_v54 = vsub.f32 %v6183_v10, %v3018_v27 }
 0x4f5   : > { %v3025_v46 = vsub.f32 %v6189_v43, %v3024_v36 }
 0x4f6   : > { %3216 = vmatpush.msrb.mxu2 %v2994_v29  ;;  %v3020_v35 = vand.u32 4294901760, %v3019_v54 }
 0x4f7   : > { %v3026_v31 = vand.u32 4294901760, %v3025_v46 }
 0x4f8   : > { %3220 = vmatpush.msrb.mxu2 %v3000_v13  ;;  %3021 = vmatpush.msra.mxu3 %v3020_v35 }
 0x4fa   : > { %3224 = vmatpush.msrb.mxu2 %v3006_v58  ;;  %3027 = vmatpush.msra.mxu3 %v3026_v31 }
 0x4fc   : > { %3228 = vmatpush.msrb.mxu2 %v3012_v22  ;;  %3033 = vmatpush.msra.mxu3 %v3032_v50 }
 0x4fe   : > { %3232 = vmatpush.msrb.mxu2 %v3018_v27  ;;  %3259 = vmatpush.msrb.mxu3 %v6044_v16 }
 0x500   : > { %3236 = vmatpush.msrb.mxu2 %v3024_v36  ;;  %3261 = vmatpush.msrb.mxu3 %v6057_v48 }
 0x502   : > { %3240 = vmatpush.msrb.mxu2 %v3030_v0  ;;  %3263 = vmatpush.msrb.mxu3 %v6066_v42  ;;  %v3309_v0 = vld [vmem:[#allocation6 + $0x88] sm:$0xff] }
 0x504   : > { %3265 = vmatpush.msrb.mxu3 %v6079_v53 }
 0x506   : > { %3267 = vmatpush.msrb.mxu3 %v6089_v4 }
 0x508   : > { %3269 = vmatpush.msrb.mxu3 %v6101_v30 }
 0x50a   : > { %3271 = vmatpush.msrb.mxu3 %v6109_v7 }
 0x50c   : > { %3273 = vmatpush.msrb.mxu3 %v6118_v3 }
 0x50e   : > { %3275 = vmatpush.msrb.mxu3 %v6126_v6 }
 0x510   : > { %3277 = vmatpush.msrb.mxu3 %v6135_v44 }
 0x512   : > { %3279 = vmatpush.msrb.mxu3 %v6143_v32 }
 0x514   : > { %3281 = vmatpush.msrb.mxu3 %v6151_v20 }
 0x516   : > { %3283 = vmatpush.msrb.mxu3 %v6159_v8 }
 0x518   : > { %3285 = vmatpush.msrb.mxu3 %v6168_v45 }
 0x51a   : > { %3287 = vmatpush.msrb.mxu3 %v6175_v2 }
 0x51c   : > { %3289 = vmatpush.msrb.mxu3 %v6179_v12 }
 0x52f   : > { %v2604_v10 = vpop.f32.mrf.mxu0 }
 0x537   : > { %v2612_v48 = vpop.f32.mrf.mxu0  ;;  %v2753_v3 = vpop.f32.mrf.mxu3 }
 0x538   : > { %v2669_v16 = vpop.f32.mrf.mxu1  ;;  %v2711_v30 = vpop.f32.mrf.mxu2 }
 0x539   : > { %v2670_v6 = vadd.f32 %v2669_v16, %v2604_v10  ;;  %v3316_v10 = vsel %vm320_vm0, %v3309_v0, 0 }
 0x53b   : > { %v2712_v32 = vadd.f32 %v2711_v30, %v2670_v6  ;;  %v3310_v30 = vld [vmem:[#allocation6 + $0x90] sm:$0xff] }
 0x53d   : > { %v2754_v8 = vadd.f32 %v2753_v3, %v2712_v32 }
 0x53f   : > { %v2759_v17 = vpop.f32.mrf.mxu3 }
 0x540   : > { %v2673_v42 = vpop.f32.mrf.mxu1  ;;  %v2716_v43 = vpop.f32.mrf.mxu2 }
 0x541   : > { %v2620_v53 = vpop.f32.mrf.mxu0  ;;  %v2674_v55 = vadd.f32 %v2673_v42, %v2612_v48  ;;  %v3352_v42 = vand.u32 4294901760, %v3316_v10 }
 0x543   : > { %v2717_v2 = vadd.f32 %v2716_v43, %v2674_v55  ;;  %v3353_v3 = vsub.f32 %v3316_v10, %v3352_v42 }
 0x545   : > { %v2760_v13 = vadd.f32 %v2759_v17, %v2717_v2 }
 0x548   : > { %v2677_v4 = vpop.f32.mrf.mxu1  ;;  %v2721_v29 = vpop.f32.mrf.mxu2 }
 0x549   : > { %v2678_v34 = vadd.f32 %v2677_v4, %v2620_v53  ;;  %v2765_v26 = vpop.f32.mrf.mxu3 }
 0x54b   : > { %v2628_v7 = vpop.f32.mrf.mxu0  ;;  %v2722_v19 = vadd.f32 %v2721_v29, %v2678_v34 }
 0x54d   : > { %v2766_v22 = vadd.f32 %v2765_v26, %v2722_v19 }
 0x550   : > { %v2681_v44 = vpop.f32.mrf.mxu1 }
 0x551   : > { %v2682_v49 = vadd.f32 %v2681_v44, %v2628_v7  ;;  %v3319_v44 = vsel %vm320_vm0, %v3310_v30, 0 }
 0x552   : > { %v3360_v55 = vand.u32 4294901760, %v3319_v44 }
 0x553   : > { %v2804_v20 = vpop.f32.mrf.mxu0 }
 0x554   : > { %v2805_v33 = vadd.f32 %v2804_v20, %v2754_v8  ;;  %v3354_v20 = vand.u32 4294901760, %v3353_v3  ;;  %v3311_v8 = vld [vmem:[#allocation6 + $0x98] sm:$0xff] }
 0x556   : > { %v3355_v17 = vsub.f32 %v3353_v3, %v3354_v20 }
 0x558   : > { %v2841_v45 = vpop.f32.mrf.mxu1 }
 0x559   : > { %v2842_v61 = vadd.f32 %v2841_v45, %v2805_v33  ;;  %v3361_v33 = vsub.f32 %v3319_v44, %v3360_v55  ;;  %v3322_v45 = vsel %vm320_vm0, %v3311_v8, 0 }
 0x55b   : > { %v6293_v28 = vand.u32 4294901760, %v2842_v61  ;;  %v2808_v12 = vpop.f32.mrf.mxu0  ;;  %v3362_v2 = vand.u32 4294901760, %v3361_v33 }
 0x55c   : > { %v2809_v63 = vadd.f32 %v2808_v12, %v2760_v13  ;;  %v3368_v12 = vand.u32 4294901760, %v3322_v45 }
 0x55d   : > { %v2906_v51 = vsub.f32 %v2842_v61, %v6293_v28  ;;  %3035 = vmatmul.f32.vlgmr.msra.gmra.mxu3 %v6293_v28  ;;  %v3356_v61 = vand.u32 4294901760, %v3355_v17  ;;  %v3363_v29 = vsub.f32 %v3361_v33, %v3362_v2 }
 0x55e   : > { %3488 = vmatpush.msra.mxu3 %v6000_v15  ;;  %v3369_v34 = vsub.f32 %v3322_v45, %v3368_v12 }
 0x55f   : > { %v2907_v38 = vand.u32 4294901760, %v2906_v51  ;;  %3101 = vmatmul.f32.vlgmr.msrb.gmra.mxu0 %v2906_v51 }
 0x560   : > { %3490 = vmatpush.msra.mxu3 %v5986_v9  ;;  %3535 = vmatpush.msrb.mxu0 %v6018_v47  ;;  %v2845_v11 = vpop.f32.mrf.mxu1  ;;  %v3370_v13 = vand.u32 4294901760, %v3369_v34 }
 0x561   : > { %v2908_v18 = vsub.f32 %v2906_v51, %v2907_v38  ;;  %v2846_v25 = vadd.f32 %v2845_v11, %v2809_v63  ;;  %3155 = vmatmul.f32.vlgmr.msrb.gmra.mxu1 %v2907_v38  ;;  %v3364_v51 = vand.u32 4294901760, %v3363_v29 }
 0x562   : > { %3492 = vmatpush.msra.mxu3 %v5988_v57  ;;  %3539 = vmatpush.msrb.mxu0 %v6013_v1  ;;  %v2726_v1 = vpop.f32.mrf.mxu2  ;;  %v3371_v38 = vsub.f32 %v3369_v34, %v3370_v13 }
 0x563   : > { %v2909_v24 = vand.u32 4294901760, %v2908_v18  ;;  %v6302_v62 = vand.u32 4294901760, %v2846_v25  ;;  %3578 = vmatpush.msrb.mxu1 %v6000_v15  ;;  %v2812_v47 = vpop.f32.mrf.mxu0  ;;  %v2727_v40 = vadd.f32 %v2726_v1, %v2682_v49 }
 0x564   : > { %3494 = vmatpush.msra.mxu3 %v5991_v52  ;;  %3543 = vmatpush.msrb.mxu0 %v6021_v41  ;;  %v2813_v23 = vadd.f32 %v2812_v47, %v2766_v22  ;;  %v3308_v41 = vld [vmem:[#allocation6 + $0x80] sm:$0xff]  ;;  %v3372_v63 = vand.u32 4294901760, %v3371_v38  ;;  %v3618_v22 = vld [vmem:[#allocation7 + $0x278] sm:$0xff] }
 0x565   : > { %v2914_v58 = vsub.f32 %v2846_v25, %v6302_v62  ;;  %3580 = vmatpush.msrb.mxu1 %v5986_v9  ;;  %2910 = vmatmul.f32.vlgmr.msra.gmra.mxu2 %v2909_v24  ;;  %v3313_v27 = vsel %vm320_vm0, %v3308_v41, 0  ;;  %v6333_v1 = vand.u32 4294901760, %v3618_v22 }
 0x566   : > { %3039 = vmatmul.f32.gmra.mxu3 %v6302_v62  ;;  %3444 = vmatpush.msra.mxu2 %v6008_v56  ;;  %v2771_v56 = vpop.f32.mrf.mxu3  ;;  %v6318_v54 = vand.u32 4294901760, %v3313_v27 }
 0x567   : > { %3547 = vmatpush.msrb.mxu0 %v6034_v21  ;;  %3582 = vmatpush.msrb.mxu1 %v5988_v57  ;;  %v2915_v15 = vand.u32 4294901760, %v2914_v58  ;;  %v2772_v46 = vadd.f32 %v2771_v56, %v2727_v40 }
 0x568   : > { %3106 = vmatmul.f32.gmra.mxu0 %v2914_v58  ;;  %3447 = vmatpush.msra.mxu2 %v5994_v59  ;;  %v2849_v14 = vpop.f32.mrf.mxu1  ;;  %v3345_v5 = vsub.f32 %v3313_v27, %v6318_v54  ;;  %v3616_v27 = vld [vmem:[#allocation7 + $0x268] sm:$0xff] }
 0x569   : > { %3584 = vmatpush.msrb.mxu1 %v5991_v52  ;;  %v2850_v9 = vadd.f32 %v2849_v14, %v2813_v23  ;;  %v2916_v39 = vsub.f32 %v2914_v58, %v2915_v15  ;;  %v6338_v14 = vsub.f32 %v3618_v22, %v6333_v1 }
 0x56a   : > { %3161 = vmatmul.f32.gmra.mxu1 %v2915_v15  ;;  %3450 = vmatpush.msra.mxu2 %v5998_v60  ;;  %v3346_v48 = vand.u32 4294901760, %v3345_v5  ;;  %v3617_v15 = vld [vmem:[#allocation7 + $0x270] sm:$0xff] }
 0x56b   : > { %v2921_v21 = vand.u32 4294901760, %v2850_v9  ;;  %v2917_v36 = vand.u32 4294901760, %v2916_v39  ;;  %v2816_v57 = vpop.f32.mrf.mxu0  ;;  %v3686_v56 = vand.u32 4294901760, %v6338_v14 }
 0x56c   : > { %3453 = vmatpush.msra.mxu2 %v6005_v37  ;;  %v2817_v52 = vadd.f32 %v2816_v57, %v2772_v46  ;;  %v3347_v7 = vsub.f32 %v3345_v5, %v3346_v48 }
 0x56d   : > { %v2922_v59 = vsub.f32 %v2850_v9, %v2921_v21  ;;  %2918 = vmatmul.f32.gmra.mxu2 %v2917_v36  ;;  %v6340_v9 = vand.u32 4294901760, %v3617_v15  ;;  %v6349_v36 = vand.u32 4294901760, %v3616_v27 }
 0x56e   : > { %3043 = vmatmul.f32.gmra.mxu3 %v2921_v21  ;;  %v3348_v43 = vand.u32 4294901760, %v3347_v7 }
 0x56f   : > { %v2923_v35 = vand.u32 4294901760, %v2922_v59 }
 0x570   : > { %3111 = vmatmul.f32.gmra.mxu0 %v2922_v59  ;;  %v2853_v31 = vpop.f32.mrf.mxu1 }
 0x571   : > { %v2854_v60 = vadd.f32 %v2853_v31, %v2817_v52  ;;  %v2924_v50 = vsub.f32 %v2922_v59, %v2923_v35  ;;  %v3687_v59 = vsub.f32 %v6338_v14, %v3686_v56  ;;  %v6358_v52 = vsub.f32 %v3616_v27, %v6349_v36 }
 0x572   : > { %3167 = vmatmul.f32.gmra.mxu1 %v2923_v35 }
 0x573   : > { %v2929_v37 = vand.u32 4294901760, %v2854_v60  ;;  %v2925_v16 = vand.u32 4294901760, %v2924_v50  ;;  %v3698_v10 = vand.u32 4294901760, %v6358_v52 }
 0x575   : > { %v2930_v53 = vsub.f32 %v2854_v60, %v2929_v37  ;;  %2926 = vmatmul.f32.gmra.mxu2 %v2925_v16  ;;  %v3688_v60 = vand.u32 4294901760, %v3687_v59  ;;  %v3699_v30 = vsub.f32 %v6358_v52, %v3698_v10 }
 0x576   : > { %3047 = vmatmul.f32.gmra.mxu3 %v2929_v37 }
 0x577   : > { %v2931_v4 = vand.u32 4294901760, %v2930_v53 }
 0x578   : > { %3116 = vmatmul.f32.gmra.mxu0 %v2930_v53 }
 0x579   : > { %v2932_v6 = vsub.f32 %v2930_v53, %v2931_v4 }
 0x57a   : > { %3173 = vmatmul.f32.gmra.mxu1 %v2931_v4 }
 0x57b   : > { %v2933_v32 = vand.u32 4294901760, %v2932_v6 }
 0x57d   : > { %2934 = vmatmul.f32.gmra.mxu2 %v2933_v32 }
 0x57e   : > { %3291 = vmatmul.f32.vlgmr.msrb.gmra.mxu3 %v6293_v28 }
 0x57f   : > { %3689 = vmatpush.msrb.mxu3 %v3688_v60 }
 0x580   : > { %3349 = vmatmul.f32.vlgmr.msra.gmra.mxu0 %v3348_v43  ;;  %v3612_v43 = vld [vmem:[#allocation7 + $0x248] sm:$0xff] }
 0x581   : > { %3799 = vmatpush.msra.mxu0 %v6338_v14  ;;  %v6401_v17 = vand.u32 4294901760, %v3612_v43 }
 0x582   : > { %3414 = vmatmul.f32.vlgmr.msra.gmra.mxu1 %v6318_v54 }
 0x583   : > { %3867 = vmatpush.msra.mxu1 %v6333_v1  ;;  %v6408_v29 = vsub.f32 %v3612_v43, %v6401_v17 }
 0x585   : > { %3242 = vmatmul.f32.vlgmr.msrb.gmra.mxu2 %v6293_v28  ;;  %3869 = vmatpush.msra.mxu1 %v6340_v9 }
 0x586   : > { %3295 = vmatmul.f32.gmra.mxu3 %v6302_v62  ;;  %3620 = vmatpush.msrb.mxu2 %v6333_v1 }
 0x587   : > { %3871 = vmatpush.msra.mxu1 %v6349_v36 }
 0x588   : > { %3357 = vmatmul.f32.gmra.mxu0 %v3356_v61  ;;  %3622 = vmatpush.msrb.mxu2 %v6340_v9  ;;  %v3611_v61 = vld [vmem:[#allocation7 + $0x240] sm:$0xff] }
 0x58a   : > { %3418 = vmatmul.f32.gmra.mxu1 %v3352_v42  ;;  %3624 = vmatpush.msrb.mxu2 %v6349_v36 }
 0x58d   : > { %3246 = vmatmul.f32.gmra.mxu2 %v6302_v62 }
 0x58e   : > { %3299 = vmatmul.f32.gmra.mxu3 %v2921_v21 }
 0x590   : > { %3365 = vmatmul.f32.gmra.mxu0 %v3364_v51 }
 0x592   : > { %3422 = vmatmul.f32.gmra.mxu1 %v3360_v55 }
 0x595   : > { %3250 = vmatmul.f32.gmra.mxu2 %v2921_v21  ;;  %v6346_v21 = vsub.f32 %v3617_v15, %v6340_v9 }
 0x596   : > { %3303 = vmatmul.f32.gmra.mxu3 %v2929_v37 }
 0x597   : > { %v3692_v46 = vand.u32 4294901760, %v6346_v21  ;;  %3802 = vmatpush.msra.mxu0 %v6346_v21 }
 0x598   : > { %3373 = vmatmul.f32.gmra.mxu0 %v3372_v63  ;;  %v3610_v63 = vld [vmem:[#allocation7 + $0x238] sm:$0xff] }
 0x599   : > { %v3693_v50 = vsub.f32 %v6346_v21, %v3692_v46  ;;  %3805 = vmatpush.msra.mxu0 %v6358_v52 }
 0x59a   : > { %3426 = vmatmul.f32.gmra.mxu1 %v3368_v12 }
 0x59b   : > { %v3694_v4 = vand.u32 4294901760, %v3693_v50  ;;  %v3607_v50 = vld [vmem:[#allocation7 + $0x220] sm:$0xff] }
 0x59d   : > { %3254 = vmatmul.f32.gmra.mxu2 %v2929_v37  ;;  %3695 = vmatpush.msrb.mxu3 %v3694_v4  ;;  %v6464_v4 = vand.u32 4294901760, %v3607_v50 }
 0x59e   : > { %3498 = vmatmul.f32.vlgmr.msra.gmra.mxu3 %v3346_v48  ;;  %v3613_v48 = vld [vmem:[#allocation7 + $0x250] sm:$0xff] }
 0x5a0   : > { %3549 = vmatmul.f32.vlgmr.msrb.gmra.mxu0 %v6318_v54 }
 0x5a2   : > { %3586 = vmatmul.f32.vlgmr.msrb.gmra.mxu1 %v6318_v54  ;;  %v3615_v54 = vld [vmem:[#allocation7 + $0x260] sm:$0xff] }
 0x5a3   : > { %v6361_v35 = vand.u32 4294901760, %v3615_v54 }
 0x5a5   : > { %3456 = vmatmul.f32.vlgmr.msra.gmra.mxu2 %v3345_v5  ;;  %v3614_v5 = vld [vmem:[#allocation7 + $0x258] sm:$0xff]  ;;  %v6374_v37 = vsub.f32 %v3615_v54, %v6361_v35  ;;  %3873 = vmatpush.msra.mxu1 %v6361_v35 }
 0x5a6   : > { %3504 = vmatmul.f32.gmra.mxu3 %v3354_v20  ;;  %v6378_v16 = vand.u32 4294901760, %v3614_v5  ;;  %3626 = vmatpush.msrb.mxu2 %v6361_v35  ;;  %v3700_v20 = vand.u32 4294901760, %v3699_v30 }
 0x5a7   : > { %v3704_v7 = vand.u32 4294901760, %v6374_v37  ;;  %3808 = vmatpush.msra.mxu0 %v6374_v37 }
 0x5a8   : > { %3553 = vmatmul.f32.gmra.mxu0 %v3352_v42  ;;  %v6391_v32 = vsub.f32 %v3614_v5, %v6378_v16  ;;  %3875 = vmatpush.msra.mxu1 %v6378_v16 }
 0x5a9   : > { %3628 = vmatpush.msrb.mxu2 %v6378_v16  ;;  %3701 = vmatpush.msrb.mxu3 %v3700_v20 }
 0x5aa   : > { %3590 = vmatmul.f32.gmra.mxu1 %v3352_v42  ;;  %v3710_v45 = vand.u32 4294901760, %v6391_v32  ;;  %3811 = vmatpush.msra.mxu0 %v6391_v32 }
 0x5ac   : > { %v3711_v38 = vsub.f32 %v6391_v32, %v3710_v45 }
 0x5ad   : > { %3461 = vmatmul.f32.gmra.mxu2 %v3353_v3  ;;  %v6388_v3 = vand.u32 4294901760, %v3613_v48 }
 0x5ae   : > { %3510 = vmatmul.f32.gmra.mxu3 %v3362_v2 }
 0x5af   : > { %v6399_v8 = vsub.f32 %v3613_v48, %v6388_v3  ;;  %3877 = vmatpush.msra.mxu1 %v6388_v3  ;;  %3630 = vmatpush.msrb.mxu2 %v6388_v3 }
 0x5b0   : > { %3557 = vmatmul.f32.gmra.mxu0 %v3360_v55 }
 0x5b1   : > { %3814 = vmatpush.msra.mxu0 %v6399_v8  ;;  %3879 = vmatpush.msra.mxu1 %v6401_v17 }
 0x5b2   : > { %3594 = vmatmul.f32.gmra.mxu1 %v3360_v55  ;;  %v3705_v55 = vsub.f32 %v6374_v37, %v3704_v7  ;;  %3632 = vmatpush.msrb.mxu2 %v6401_v17 }
 0x5b3   : > { %3817 = vmatpush.msra.mxu0 %v6408_v29 }
 0x5b4   : > { %v3706_v2 = vand.u32 4294901760, %v3705_v55  ;;  %v6480_v55 = vsub.f32 %v3607_v50, %v6464_v4 }
 0x5b5   : > { %3466 = vmatmul.f32.gmra.mxu2 %v3361_v33 }
 0x5b6   : > { %3516 = vmatmul.f32.gmra.mxu3 %v3370_v13  ;;  %v7105_v32 = vand.u32 4294901760, %v6480_v55 }
 0x5b7   : > { %3707 = vmatpush.msrb.mxu3 %v3706_v2  ;;  %v3605_v2 = vld [vmem:[#allocation7 + $0x210] sm:$0xff] }
 0x5b8   : > { %3561 = vmatmul.f32.gmra.mxu0 %v3368_v12 }
 0x5ba   : > { %3598 = vmatmul.f32.gmra.mxu1 %v3368_v12  ;;  %v3716_v12 = vand.u32 4294901760, %v6399_v8 }
 0x5bd   : > { %3471 = vmatmul.f32.gmra.mxu2 %v3369_v34  ;;  %v6410_v34 = vand.u32 4294901760, %v3611_v61 }
 0x5bf   : > { %3881 = vmatpush.msra.mxu1 %v6410_v34  ;;  %3634 = vmatpush.msrb.mxu2 %v6410_v34 }
 0x5dc   : > { %v3102_v28 = vpop.f32.mrf.mxu0 }
 0x5de   : > { %v3156_v11 = vpop.f32.mrf.mxu1 }
 0x5e0   : > { %v3036_v26 = vpop.f32.mrf.mxu3 }
 0x5e5   : > { %v3107_v18 = vpop.f32.mrf.mxu0 }
 0x5e7   : > { %v3162_v25 = vpop.f32.mrf.mxu1 }
 0x5e8   : > { %v2911_v19 = vpop.f32.mrf.mxu2 }
 0x5e9   : > { %v3037_v24 = vadd.f32 %v3036_v26, %v2911_v19  ;;  %v3040_v62 = vpop.f32.mrf.mxu3  ;;  %v6428_v26 = vsub.f32 %v3611_v61, %v6410_v34  ;;  %v3609_v19 = vld [vmem:[#allocation7 + $0x230] sm:$0xff] }
 0x5eb   : > { %v3103_v47 = vadd.f32 %v3102_v28, %v3037_v24  ;;  %v3717_v28 = vsub.f32 %v6399_v8, %v3716_v12  ;;  %v3728_v22 = vand.u32 4294901760, %v6428_v26  ;;  %3820 = vmatpush.msra.mxu0 %v6428_v26 }
 0x5ed   : > { %v3112_v49 = vpop.f32.mrf.mxu0  ;;  %v6331_v58 = vadd.f32 %v3156_v11, %v3103_v47  ;;  %v3722_v11 = vand.u32 4294901760, %v6408_v29  ;;  %v3718_v47 = vand.u32 4294901760, %v3717_v28  ;;  %v7076_v28 = vand.u32 4294901760, %v6480_v55 }
 0x5ef   : > { %v6335_v23 = vpop.f32.mrf.mxu1 }
 0x5f0   : > { %v2919_v41 = vpop.f32.mrf.mxu2 }
 0x5f1   : > { %v3041_v40 = vadd.f32 %v3040_v62, %v2919_v41  ;;  %v3044_v39 = vpop.f32.mrf.mxu3 }
 0x5f3   : > { %v3108_v57 = vadd.f32 %v3107_v18, %v3041_v40  ;;  %v6430_v18 = vand.u32 4294901760, %v3610_v63  ;;  %v6446_v40 = vand.u32 4294901760, %v3609_v19 }
 0x5f5   : > { %v6364_v0 = vpop.f32.mrf.mxu0  ;;  %v6366_v31 = vadd.f32 %v3162_v25, %v3108_v57  ;;  %v3712_v25 = vand.u32 4294901760, %v3711_v38  ;;  %v6443_v41 = vsub.f32 %v3610_v63, %v6430_v18  ;;  %v3729_v57 = vsub.f32 %v6428_v26, %v3728_v22  ;;  %3883 = vmatpush.msra.mxu1 %v6430_v18  ;;  %3636 = vmatpush.msrb.mxu2 %v6430_v18 }
 0x5f6   : > { %v6458_v60 = vsub.f32 %v3609_v19, %v6446_v40 }
 0x5f7   : > { %v6381_v42 = vpop.f32.mrf.mxu1  ;;  %3713 = vmatpush.msrb.mxu3 %v3712_v25  ;;  %v3734_v5 = vand.u32 4294901760, %v6443_v41  ;;  %3823 = vmatpush.msra.mxu0 %v6443_v41  ;;  %v3730_v48 = vand.u32 4294901760, %v3729_v57  ;;  %v3753_v57 = vsub.f32 %v6480_v55, %v7076_v28 }
 0x5f8   : > { %v2927_v53 = vpop.f32.mrf.mxu2  ;;  %3885 = vmatpush.msra.mxu1 %v6446_v40  ;;  %3638 = vmatpush.msrb.mxu2 %v6446_v40 }
 0x5f9   : > { %v3045_v6 = vadd.f32 %v3044_v39, %v2927_v53  ;;  %v3048_v44 = vpop.f32.mrf.mxu3  ;;  %v3608_v39 = vld [vmem:[#allocation7 + $0x228] sm:$0xff]  ;;  %3719 = vmatpush.msrb.mxu3 %v3718_v47  ;;  %v3735_v30 = vsub.f32 %v6443_v41, %v3734_v5  ;;  %3826 = vmatpush.msra.mxu0 %v6458_v60 }
 0x5fa   : > { %v6451_v54 = vand.u32 4294901760, %v3608_v39 }
 0x5fb   : > { %v3113_v33 = vadd.f32 %v3112_v49, %v3045_v6  ;;  %v3723_v49 = vsub.f32 %v6408_v29, %v3722_v11  ;;  %v7079_v6 = vand.u32 4294901760, %v6458_v60 }
 0x5fc   : > { %v6462_v53 = vsub.f32 %v3608_v39, %v6451_v54  ;;  %3887 = vmatpush.msra.mxu1 %v6451_v54  ;;  %3640 = vmatpush.msrb.mxu2 %v6451_v54 }
 0x5fd   : > { %v6413_v51 = vpop.f32.mrf.mxu0  ;;  %v6416_v13 = vadd.f32 %v6335_v23, %v3113_v33  ;;  %v3724_v27 = vand.u32 4294901760, %v3723_v49  ;;  %v3741_v61 = vsub.f32 %v6458_v60, %v7079_v6  ;;  %v6501_v49 = vand.u32 4294901760, %v3605_v2 }
 0x5fe   : > { %v7078_v20 = vand.u32 4294901760, %v6462_v53  ;;  %3829 = vmatpush.msra.mxu0 %v6462_v53  ;;  %3889 = vmatpush.msra.mxu1 %v6464_v4 }
 0x5ff   : > { %v6435_v62 = vpop.f32.mrf.mxu1  ;;  %3725 = vmatpush.msrb.mxu3 %v3724_v27  ;;  %3642 = vmatpush.msrb.mxu2 %v6464_v4  ;;  %v3742_v47 = vand.u32 4294901760, %v3741_v61 }
 0x600   : > { %v2935_v24 = vpop.f32.mrf.mxu2  ;;  %v3747_v63 = vsub.f32 %v6462_v53, %v7078_v20  ;;  %3832 = vmatpush.msra.mxu0 %v6480_v55 }
 0x601   : > { %v3049_v23 = vadd.f32 %v3048_v44, %v2935_v24  ;;  %v3292_v15 = vpop.f32.mrf.mxu3  ;;  %v3606_v44 = vld [vmem:[#allocation7 + $0x218] sm:$0xff]  ;;  %3731 = vmatpush.msrb.mxu3 %v3730_v48  ;;  %v6516_v48 = vsub.f32 %v3605_v2, %v6501_v49 }
 0x602   : > { %v6482_v33 = vand.u32 4294901760, %v3606_v44  ;;  %v3748_v27 = vand.u32 4294901760, %v3747_v63 }
 0x603   : > { %v3118_v59 = vadd.f32 %v6364_v0, %v3049_v23  ;;  %v3604_v23 = vld [vmem:[#allocation7 + $0x208] sm:$0xff]  ;;  %v7107_v29 = vand.u32 4294901760, %v6516_v48 }
 0x604   : > { %v6495_v25 = vsub.f32 %v3606_v44, %v6482_v33  ;;  %v6509_v50 = vand.u32 4294901760, %v3604_v23  ;;  %3891 = vmatpush.msra.mxu1 %v6482_v33  ;;  %3644 = vmatpush.msrb.mxu2 %v6482_v33  ;;  %v3754_v44 = vand.u32 4294901760, %v3753_v57 }
 0x605   : > { %v6469_v0 = vadd.f32 %v6381_v42, %v3118_v59  ;;  %v6476_v43 = vpop.f32.mrf.mxu0  ;;  %v3736_v42 = vand.u32 4294901760, %v3735_v30  ;;  %v3603_v30 = vld [vmem:[#allocation7 + $0x200] sm:$0xff] }
 0x606   : > { %v7075_v59 = vand.u32 4294901760, %v6495_v25  ;;  %3835 = vmatpush.msra.mxu0 %v6495_v25  ;;  %v6523_v61 = vsub.f32 %v3604_v23, %v6509_v50  ;;  %3893 = vmatpush.msra.mxu1 %v6501_v49 }
 0x607   : > { %3737 = vmatpush.msrb.mxu3 %v3736_v42  ;;  %v6503_v39 = vpop.f32.mrf.mxu1  ;;  %3646 = vmatpush.msrb.mxu2 %v6501_v49 }
 0x608   : > { %v3243_v38 = vpop.f32.mrf.mxu2  ;;  %v3759_v42 = vsub.f32 %v6495_v25, %v7075_v59  ;;  %3838 = vmatpush.msra.mxu0 %v6516_v48  ;;  %v7077_v63 = vand.u32 4294901760, %v6523_v61  ;;  %3895 = vmatpush.msra.mxu1 %v6509_v50 }
 0x609   : > { %v3244_v19 = vadd.f32 %v3243_v38, %v6331_v58  ;;  %v3296_v24 = vpop.f32.mrf.mxu3  ;;  %3743 = vmatpush.msrb.mxu3 %v3742_v47  ;;  %v6525_v38 = vand.u32 4294901760, %v3603_v30  ;;  %3648 = vmatpush.msrb.mxu2 %v6509_v50 }
 0x60a   : > { %v3760_v2 = vand.u32 4294901760, %v3759_v42  ;;  %3841 = vmatpush.msra.mxu0 %v6523_v61  ;;  %v3771_v57 = vsub.f32 %v6523_v61, %v7077_v63 }
 0x60b   : > { %v6513_v58 = vadd.f32 %v3292_v15, %v3244_v19  ;;  %3749 = vmatpush.msrb.mxu3 %v3748_v27  ;;  %v7074_v15 = vand.u32 4294901760, %v6516_v48  ;;  %v6533_v19 = vsub.f32 %v3603_v30, %v6525_v38  ;;  %3897 = vmatpush.msra.mxu1 %v6525_v38 }
 0x60c   : > { %3650 = vmatpush.msrb.mxu2 %v6525_v38  ;;  %v3772_v59 = vand.u32 4294901760, %v3771_v57 }
 0x60d   : > { %3755 = vmatpush.msrb.mxu3 %v3754_v44  ;;  %v3765_v47 = vsub.f32 %v6516_v48, %v7074_v15  ;;  %v6541_v27 = vpop.f32.mrf.mxu0  ;;  %v3776_v30 = vand.u32 4294901760, %v6533_v19  ;;  %3844 = vmatpush.msra.mxu0 %v6533_v19 }
 0x60e   : > { %3926 = vmatpush.msra.mxu2 %v3686_v56 }
 0x60f   : > { %3761 = vmatpush.msrb.mxu3 %v3760_v2  ;;  %v3766_v15 = vand.u32 4294901760, %v3765_v47  ;;  %v3777_v28 = vsub.f32 %v6533_v19, %v3776_v30  ;;  %v6558_v20 = vpop.f32.mrf.mxu1 }
 0x610   : > { %v3247_v23 = vpop.f32.mrf.mxu2  ;;  %3930 = vmatpush.msra.mxu2 %v3692_v46 }
 0x611   : > { %v3248_v44 = vadd.f32 %v3247_v23, %v6366_v31  ;;  %v3300_v42 = vpop.f32.mrf.mxu3  ;;  %3767 = vmatpush.msrb.mxu3 %v3766_v15  ;;  %v3778_v6 = vand.u32 4294901760, %v3777_v28 }
 0x612   : > { %3934 = vmatpush.msra.mxu2 %v3698_v10  ;;  %v7103_v10 = vand.u32 4294901760, %v6458_v60 }
 0x613   : > { %v6556_v63 = vadd.f32 %v3296_v24, %v3248_v44  ;;  %3773 = vmatpush.msrb.mxu3 %v3772_v59 }
 0x614   : > { %3938 = vmatpush.msra.mxu2 %v3704_v7  ;;  %v3416_v7 = vadd.f32 %v6435_v62, %v6413_v51 }
 0x615   : > { %3779 = vmatpush.msrb.mxu3 %v3778_v6  ;;  %v6568_v24 = vpop.f32.mrf.mxu0 }
 0x616   : > { %3942 = vmatpush.msra.mxu2 %v3710_v45 }
 0x617   : > { %4005 = vmatpush.msra.mxu3 %v6333_v1  ;;  %v6578_v1 = vpop.f32.mrf.mxu1 }
 0x618   : > { %v3251_v31 = vpop.f32.mrf.mxu2  ;;  %3946 = vmatpush.msra.mxu2 %v3716_v12 }
 0x619   : > { %v3252_v14 = vadd.f32 %v3251_v31, %v6416_v13  ;;  %v3304_v56 = vpop.f32.mrf.mxu3  ;;  %4007 = vmatpush.msra.mxu3 %v6340_v9  ;;  %v7108_v13 = vand.u32 4294901760, %v6523_v61  ;;  %v3428_v61 = vadd.f32 %v6578_v1, %v6568_v24 }
 0x61a   : > { %3950 = vmatpush.msra.mxu2 %v3722_v11  ;;  %v3420_v11 = vadd.f32 %v6503_v39, %v6476_v43 }
 0x61b   : > { %v6573_v21 = vadd.f32 %v3300_v42, %v3252_v14  ;;  %4009 = vmatpush.msra.mxu3 %v6349_v36 }
 0x61c   : > { %3954 = vmatpush.msra.mxu2 %v3728_v22 }
 0x61d   : > { %4011 = vmatpush.msra.mxu3 %v6361_v35  ;;  %v3550_v35 = vpop.f32.mrf.mxu0 }
 0x61e   : > { %3958 = vmatpush.msra.mxu2 %v3734_v5 }
 0x61f   : > { %4013 = vmatpush.msra.mxu3 %v6378_v16  ;;  %v3587_v37 = vpop.f32.mrf.mxu1  ;;  %v7104_v16 = vand.u32 4294901760, %v6462_v53 }
 0x620   : > { %v3255_v46 = vpop.f32.mrf.mxu2  ;;  %3962 = vmatpush.msra.mxu2 %v7103_v10 }
 0x621   : > { %v3256_v9 = vadd.f32 %v3255_v46, %v6469_v0  ;;  %v3499_v52 = vpop.f32.mrf.mxu3  ;;  %4015 = vmatpush.msra.mxu3 %v6388_v3 }
 0x622   : > { %3966 = vmatpush.msra.mxu2 %v7104_v16 }
 0x623   : > { %v6590_v36 = vadd.f32 %v3304_v56, %v3256_v9  ;;  %4017 = vmatpush.msra.mxu3 %v6401_v17  ;;  %v7106_v17 = vand.u32 4294901760, %v6495_v25 }
 0x624   : > { %3970 = vmatpush.msra.mxu2 %v7105_v32 }
 0x625   : > { %4019 = vmatpush.msra.mxu3 %v6410_v34  ;;  %v3554_v51 = vpop.f32.mrf.mxu0 }
 0x626   : > { %3974 = vmatpush.msra.mxu2 %v7106_v17 }
 0x627   : > { %4021 = vmatpush.msra.mxu3 %v6430_v18  ;;  %v3591_v62 = vpop.f32.mrf.mxu1 }
 0x628   : > { %v3457_v3 = vpop.f32.mrf.mxu2  ;;  %3978 = vmatpush.msra.mxu2 %v7107_v29 }
 0x629   : > { %v3458_v8 = vadd.f32 %v3457_v3, %v3416_v7  ;;  %4023 = vmatpush.msra.mxu3 %v6446_v40  ;;  %v3505_v12 = vpop.f32.mrf.mxu3 }
 0x62a   : > { %3982 = vmatpush.msra.mxu2 %v7108_v13 }
 0x62b   : > { %v3500_v45 = vadd.f32 %v3499_v52, %v3458_v8  ;;  %4025 = vmatpush.msra.mxu3 %v6451_v54 }
 0x62c   : > { %3986 = vmatpush.msra.mxu2 %v3776_v30 }
 0x62d   : > { %v3551_v34 = vadd.f32 %v3550_v35, %v3500_v45  ;;  %4027 = vmatpush.msra.mxu3 %v6464_v4  ;;  %v3424_v4 = vadd.f32 %v6558_v20, %v6541_v27  ;;  %v3558_v55 = vpop.f32.mrf.mxu0 }
 0x62f   : > { %v3588_v26 = vadd.f32 %v3587_v37, %v3551_v34  ;;  %4029 = vmatpush.msra.mxu3 %v6482_v33 }
 0x630   : > { %v3462_v18 = vpop.f32.mrf.mxu2 }
 0x631   : > { %v3651_v22 = vand.u32 4294901760, %v3588_v26  ;;  %v3463_v41 = vadd.f32 %v3462_v18, %v3420_v11  ;;  %4031 = vmatpush.msra.mxu3 %v6501_v49  ;;  %v3511_v53 = vpop.f32.mrf.mxu3  ;;  %v3595_v49 = vpop.f32.mrf.mxu1 }
 0x633   : > { %v3652_v40 = vsub.f32 %v3588_v26, %v3651_v22  ;;  %v3506_v54 = vadd.f32 %v3505_v12, %v3463_v41  ;;  %3781 = vmatmul.f32.vlgmr.msrb.gmra.mxu3 %v3651_v22 }
 0x634   : > { %4033 = vmatpush.msra.mxu3 %v6509_v50 }
 0x635   : > { %v3653_v5 = vand.u32 4294901760, %v3652_v40  ;;  %v3555_v60 = vadd.f32 %v3554_v51, %v3506_v54  ;;  %3847 = vmatmul.f32.vlgmr.msra.gmra.mxu0 %v3652_v40  ;;  %v3562_v27 = vpop.f32.mrf.mxu0 }
 0x636   : > { %4035 = vmatpush.msra.mxu3 %v6525_v38 }
 0x637   : > { %v3654_v0 = vsub.f32 %v3652_v40, %v3653_v5  ;;  %v3592_v6 = vadd.f32 %v3591_v62, %v3555_v60  ;;  %3901 = vmatmul.f32.vlgmr.msra.gmra.mxu1 %v3653_v5 }
 0x638   : > { %v3467_v43 = vpop.f32.mrf.mxu2 }
 0x639   : > { %v3655_v33 = vand.u32 4294901760, %v3654_v0  ;;  %v3659_v28 = vand.u32 4294901760, %v3592_v6  ;;  %v3468_v25 = vadd.f32 %v3467_v43, %v3424_v4  ;;  %v3517_v2 = vpop.f32.mrf.mxu3  ;;  %v3599_v44 = vpop.f32.mrf.mxu1  ;;  %v4912_v4 = vmov 0  }
 0x63b   : > { %v3660_v39 = vsub.f32 %v3592_v6, %v3659_v28  ;;  %v3512_v59 = vadd.f32 %v3511_v53, %v3468_v25  ;;  %3656 = vmatmul.f32.vlgmr.msrb.gmra.mxu2 %v3655_v33  ;;  %3785 = vmatmul.f32.gmra.mxu3 %v3659_v28 }
 0x63d   : > { %v3559_v50 = vadd.f32 %v3558_v55, %v3512_v59  ;;  %3852 = vmatmul.f32.gmra.mxu0 %v3660_v39  ;;  %v3661_v48 = vand.u32 4294901760, %v3660_v39 }
 0x63f   : > { %v3596_v20 = vadd.f32 %v3595_v49, %v3559_v50  ;;  %3907 = vmatmul.f32.gmra.mxu1 %v3661_v48  ;;  %v3662_v38 = vsub.f32 %v3660_v39, %v3661_v48 }
 0x640   : > { %v3472_v15 = vpop.f32.mrf.mxu2 }
 0x641   : > { %v3667_v19 = vand.u32 4294901760, %v3596_v20  ;;  %v3473_v47 = vadd.f32 %v3472_v15, %v3428_v61  ;;  %v3663_v23 = vand.u32 4294901760, %v3662_v38 }
 0x643   : > { %v3668_v57 = vsub.f32 %v3596_v20, %v3667_v19  ;;  %v3518_v30 = vadd.f32 %v3517_v2, %v3473_v47  ;;  %3664 = vmatmul.f32.gmra.mxu2 %v3663_v23  ;;  %3789 = vmatmul.f32.gmra.mxu3 %v3667_v19 }
 0x645   : > { %v3563_v42 = vadd.f32 %v3562_v27, %v3518_v30  ;;  %3857 = vmatmul.f32.gmra.mxu0 %v3668_v57  ;;  %v3669_v31 = vand.u32 4294901760, %v3668_v57 }
 0x647   : > { %v3600_v14 = vadd.f32 %v3599_v44, %v3563_v42  ;;  %3913 = vmatmul.f32.gmra.mxu1 %v3669_v31  ;;  %v3670_v56 = vsub.f32 %v3668_v57, %v3669_v31  ;;  %v4054_v44 = vmul.f32 %v6556_v63, %v6556_v63 }
 0x649   : > { %v3675_v24 = vand.u32 4294901760, %v3600_v14  ;;  %v3671_v1 = vand.u32 4294901760, %v3670_v56 }
 0x64b   : > { %v3676_v46 = vsub.f32 %v3600_v14, %v3675_v24  ;;  %3672 = vmatmul.f32.gmra.mxu2 %v3671_v1  ;;  %3793 = vmatmul.f32.gmra.mxu3 %v3675_v24 }
 0x64d   : > { %3862 = vmatmul.f32.gmra.mxu0 %v3676_v46  ;;  %v3677_v9 = vand.u32 4294901760, %v3676_v46 }
 0x64f   : > { %3919 = vmatmul.f32.gmra.mxu1 %v3677_v9  ;;  %v3678_v52 = vsub.f32 %v3676_v46, %v3677_v9 }
 0x651   : > { %v3679_v35 = vand.u32 4294901760, %v3678_v52 }
 0x653   : > { %3680 = vmatmul.f32.gmra.mxu2 %v3679_v35  ;;  %4037 = vmatmul.f32.vlgmr.msra.gmra.mxu3 %v3651_v22 }
 0x65b   : > { %3988 = vmatmul.f32.vlgmr.msra.gmra.mxu2 %v3651_v22  ;;  %4041 = vmatmul.f32.gmra.mxu3 %v3659_v28  ;;  %v4053_v22 = vmul.f32 %v6513_v58, %v6513_v58 }
 0x663   : > { %3992 = vmatmul.f32.gmra.mxu2 %v3659_v28  ;;  %4045 = vmatmul.f32.gmra.mxu3 %v3667_v19 }
 0x66b   : > { %3996 = vmatmul.f32.gmra.mxu2 %v3667_v19  ;;  %4049 = vmatmul.f32.gmra.mxu3 %v3675_v24 }
 0x673   : > { %4000 = vmatmul.f32.gmra.mxu2 %v3675_v24 }
 0x6b2   : > { %v3848_v29 = vpop.f32.mrf.mxu0 }
 0x6b4   : > { %v3902_v51 = vpop.f32.mrf.mxu1 }
 0x6b6   : > { %v3782_v10 = vpop.f32.mrf.mxu3 }
 0x6ba   : > { %v3853_v54 = vpop.f32.mrf.mxu0 }
 0x6bc   : > { %v3908_v53 = vpop.f32.mrf.mxu1 }
 0x6be   : > { %v3657_v37 = vpop.f32.mrf.mxu2  ;;  %v3786_v16 = vpop.f32.mrf.mxu3 }
 0x6bf   : > { %v3783_v8 = vadd.f32 %v3782_v10, %v3657_v37 }
 0x6c1   : > { %v3849_v34 = vadd.f32 %v3848_v29, %v3783_v8 }
 0x6c2   : > { %v3858_v20 = vpop.f32.mrf.mxu0 }
 0x6c3   : > { %v3903_v13 = vadd.f32 %v3902_v51, %v3849_v34 }
 0x6c4   : > { %v3914_v42 = vpop.f32.mrf.mxu1 }
 0x6c6   : > { %v3665_v7 = vpop.f32.mrf.mxu2  ;;  %v3790_v3 = vpop.f32.mrf.mxu3 }
 0x6c7   : > { %v3787_v41 = vadd.f32 %v3786_v16, %v3665_v7 }
 0x6c9   : > { %v3854_v60 = vadd.f32 %v3853_v54, %v3787_v41 }
 0x6cb   : > { %v3909_v28 = vadd.f32 %v3908_v53, %v3854_v60 }
 0x6ce   : > { %v3673_v32 = vpop.f32.mrf.mxu2  ;;  %v3794_v17 = vpop.f32.mrf.mxu3 }
 0x6cf   : > { %v3791_v25 = vadd.f32 %v3790_v3, %v3673_v32 }
 0x6d1   : > { %v3859_v15 = vadd.f32 %v3858_v20, %v3791_v25 }
 0x6d3   : > { %v3915_v1 = vadd.f32 %v3914_v42, %v3859_v15  ;;  %v4055_v15 = vmul.f32 %v6573_v21, %v6573_v21 }
 0x6d6   : > { %v3681_v45 = vpop.f32.mrf.mxu2  ;;  %v4038_v18 = vpop.f32.mrf.mxu3 }
 0x6d7   : > { %v6624_v12 = vadd.f32 %v3794_v17, %v3681_v45 }
 0x6de   : > { %v3989_v11 = vpop.f32.mrf.mxu2  ;;  %v4042_v47 = vpop.f32.mrf.mxu3 }
 0x6df   : > { %v3990_v26 = vadd.f32 %v3989_v11, %v3903_v13 }
 0x6e1   : > { %v6626_v62 = vadd.f32 %v4038_v18, %v3990_v26 }
 0x6e3   : > { %v4057_v40 = vmul.f32 %v6626_v62, %v6626_v62 }
 0x6e5   : > { %v6632_v5 = vadd.f32 %v4057_v40, %v4053_v22 }
 0x6e6   : > { %v3993_v55 = vpop.f32.mrf.mxu2 }
 0x6e7   : > { %4727 = vrsqrt.f32 %v6632_v5  ;;  %vm4113_vm13 = vcmp.ge.f32.partialorder %v6632_v5, 0.0110469  ;;  %vm4121_vm14 = vcmp.ge.f32.partialorder %v6632_v5, 0.04518029  ;;  %vm4133_vm15 = vcmp.ge.f32.partialorder %v6632_v5, 0.10557281 }
 0x6e8   : > { %v4117_v0 = vsel %vm4113_vm13, 1, %v4912_v4  ;;  %v4125_v6 = vsel %vm4121_vm14, 1, %v4912_v4  ;;  %vm4145_vm0 = vcmp.ge.f32.partialorder %v6632_v5, 0.19822858  ;;  %v4137_v33 = vsel %vm4133_vm15, 1, %v4912_v4 }
 0x6e9   : > { %v4129_v43 = vadd.s32 %v4125_v6, %v4117_v0  ;;  %vm4157_vm1 = vcmp.ge.f32.partialorder %v6632_v5, 0.33333334  ;;  %v4149_v59 = vsel %vm4145_vm0, 1, %v4912_v4  ;;  %v3994_v50 = vadd.f32 %v3993_v55, %v3909_v28 }
 0x6ea   : > { %vm4169_vm2 = vcmp.ge.f32.partialorder %v6632_v5, 0.52786404  ;;  %v4161_v38 = vsel %vm4157_vm1, 1, %v4912_v4  ;;  %vm4181_vm3 = vcmp.ge.f32.partialorder %v6632_v5, 0.8107274  ;;  %vm4072_vm6 = vcmp.eq.f32.partialorder %v6632_v5, inf }
 0x6eb   : > { %v4141_v49 = vadd.s32 %v4137_v33, %v4129_v43  ;;  %v4173_v23 = vsel %vm4169_vm2, 1, %v4912_v4  ;;  %v6649_v27 = vadd.f32 %v4042_v47, %v3994_v50  ;;  %vm4193_vm4 = vcmp.ge.f32.partialorder %v6632_v5, 1.2334602 }
 0x6ec   : > { %v4185_v31 = vsel %vm4181_vm3, 1, %v4912_v4  ;;  %vm4205_vm5 = vcmp.ge.f32.partialorder %v6632_v5, 1.8944272  ;;  %vm4074_vm7 = vcmp.eq.f32.partialorder %v6632_v5, 0.0  ;;  %v4197_v46 = vsel %vm4193_vm4, 1, %v4912_v4 }
 0x6ed   : > { %v4728_v39 = vpop.eup %4727  ;;  %v4153_v61 = vadd.s32 %v4149_v59, %v4141_v49  ;;  %v4058_v14 = vmul.f32 %v6649_v27, %v6649_v27  ;;  %v4075_v35 = vand.u32 2147483648, %v6632_v5  ;;  %vm4217_vm8 = vcmp.ge.f32.partialorder %v6632_v5, 3.0 }
 0x6ee   : > { %v4066_v48 = vmul.f32 %v4728_v39, %v6632_v5  ;;  %v4209_v37 = vsel %vm4205_vm5, 1, %v4912_v4  ;;  %vm4229_vm9 = vcmp.ge.f32.partialorder %v6632_v5, 5.044681  ;;  %vm4241_vm10 = vcmp.ge.f32.partialorder %v6632_v5, 9.472136  ;;  %v3997_v3 = vpop.f32.mrf.mxu2 }
 0x6ef   : > { %v4165_v19 = vadd.s32 %v4161_v38, %v4153_v61  ;;  %v6661_v9 = vadd.f32 %v4058_v14, %v4054_v44  ;;  %v4221_v32 = vsel %vm4217_vm8, 1, %v4912_v4  ;;  %v4233_v13 = vsel %vm4229_vm9, 1, %v4912_v4 }
 0x6f0   : > { %v4067_v2 = vmul.f32 %v4728_v39, %v4066_v48  ;;  %v3998_v26 = vadd.f32 %v3997_v3, %v3915_v1  ;;  %vm4253_vm15 = vcmp.ge.f32.partialorder %v6632_v5, 22.133545  ;;  %v4245_v54 = vsel %vm4241_vm10, 1, %v4912_v4 }
 0x6f1   : > { %v4177_v30 = vadd.s32 %v4173_v23, %v4165_v19  ;;  %4729 = vrsqrt.f32 %v6661_v9  ;;  %vm4114_vm11 = vcmp.ge.f32.partialorder %v6661_v9, 0.0110469  ;;  %vm4122_vm12 = vcmp.ge.f32.partialorder %v6661_v9, 0.04518029 }
 0x6f2   : > { %v4068_v57 = vmul.f32 0.5, %v4067_v2  ;;  %v4118_v8 = vsel %vm4114_vm11, 1, %v4912_v4  ;;  %v4126_v17 = vsel %vm4122_vm12, 1, %v4912_v4  ;;  %vm4134_vm13 = vcmp.ge.f32.partialorder %v6661_v9, 0.10557281 }
 0x6f3   : > { %v4189_v24 = vadd.s32 %v4185_v31, %v4177_v30  ;;  %v4130_v34 = vadd.s32 %v4126_v17, %v4118_v8  ;;  %vm4146_vm14 = vcmp.ge.f32.partialorder %v6661_v9, 0.19822858  ;;  %v4138_v11 = vsel %vm4134_vm13, 1, %v4912_v4 }
 0x6f4   : > { %v4069_v56 = vsub.f32 1.5, %v4068_v57  ;;  %vm4265_vm0 = vcmp.ge.f32.partialorder %v6632_v5, 90.52313  ;;  %v4150_v60 = vsel %vm4146_vm14, 1, %v4912_v4  ;;  %vm4158_vm1 = vcmp.ge.f32.partialorder %v6661_v9, 0.33333334 }
 0x6f5   : > { %v4201_v10 = vadd.s32 %v4197_v46, %v4189_v24  ;;  %v4142_v41 = vadd.s32 %v4138_v11, %v4130_v34  ;;  %v4257_v43 = vsel %vm4253_vm15, 1, %v4912_v4  ;;  %vm4170_vm3 = vcmp.ge.f32.partialorder %v6661_v9, 0.52786404 }
 0x6f6   : > { %v4070_v52 = vmul.f32 %v4728_v39, %v4069_v56  ;;  %v4162_v25 = vsel %vm4158_vm1, 1, %v4912_v4  ;;  %v4269_v49 = vsel %vm4265_vm0, 1, %v4912_v4  ;;  %vm4182_vm4 = vcmp.ge.f32.partialorder %v6661_v9, 0.8107274 }
 0x6f7   : > { %v4213_v7 = vadd.s32 %v4209_v37, %v4201_v10  ;;  %v4730_v40 = vpop.eup %4729  ;;  %v4154_v6 = vadd.s32 %v4150_v60, %v4142_v41  ;;  %v4174_v48 = vsel %vm4170_vm3, 1, %v4912_v4  ;;  %vm4194_vm5 = vcmp.ge.f32.partialorder %v6661_v9, 1.2334602 }
 0x6f8   : > { %v4071_v16 = vmul.f32 %v4070_v52, %v6632_v5  ;;  %v4078_v0 = vmul.f32 %v4730_v40, %v6661_v9  ;;  %v4186_v2 = vsel %vm4182_vm4, 1, %v4912_v4  ;;  %vm4086_vm8 = vcmp.eq.f32.partialorder %v6661_v9, 0.0 }
 0x6f9   : > { %v4225_v29 = vadd.s32 %v4221_v32, %v4213_v7  ;;  %v4166_v59 = vadd.s32 %v4162_v25, %v4154_v6  ;;  %v4198_v30 = vsel %vm4194_vm5, 1, %v4912_v4  ;;  %vm4218_vm9 = vcmp.ge.f32.partialorder %v6661_v9, 3.0 }
 0x6fa   : > { %v4073_v45 = vsel %vm4072_vm6, %v6632_v5, %v4071_v16  ;;  %v4079_v39 = vmul.f32 %v4730_v40, %v4078_v0  ;;  %vm4084_vm6 = vcmp.eq.f32.partialorder %v6661_v9, inf  ;;  %v4087_v24 = vand.u32 2147483648, %v6661_v9 }
 0x6fb   : > { %v4076_v51 = vsel %vm4074_vm7, %v4075_v35, %v4073_v45  ;;  %v4237_v18 = vadd.s32 %v4233_v13, %v4225_v29  ;;  %v4178_v20 = vadd.s32 %v4174_v48, %v4166_v59  ;;  %vm4206_vm7 = vcmp.ge.f32.partialorder %v6661_v9, 1.8944272  ;;  %v3920_v59 = vpop.f32.mrf.mxu1 }
 0x6fc   : > { %v6688_v22 = vadd.f32 %v4076_v51, %v6626_v62  ;;  %v4046_v62 = vpop.f32.mrf.mxu3  ;;  %v4080_v61 = vmul.f32 0.5, %v4079_v39  ;;  %v4210_v1 = vsel %vm4206_vm7, 1, %v4912_v4  ;;  %vm4230_vm11 = vcmp.ge.f32.partialorder %v6661_v9, 5.044681 }
 0x6fd   : > { %v4249_v53 = vadd.s32 %v4245_v54, %v4237_v18  ;;  %v6703_v33 = vadd.f32 %v4046_v62, %v3998_v26  ;;  %v4190_v47 = vadd.s32 %v4186_v2, %v4178_v20  ;;  %v4222_v37 = vsel %vm4218_vm9, 1, %v4912_v4  ;;  %v3863_v54 = vpop.f32.mrf.mxu0 }
 0x6fe   : > { %vm4281_vm2 = vcmp.gt.f32.partialorder %v6688_v22, 0.0  ;;  %v4081_v19 = vsub.f32 1.5, %v4080_v61  ;;  %vm4242_vm14 = vcmp.ge.f32.partialorder %v6661_v9, 9.472136  ;;  %v4234_v8 = vsel %vm4230_vm11, 1, %v4912_v4 }
 0x6ff   : > { %v4285_v55 = vsel %vm4281_vm2, %v6688_v22, 1.0  ;;  %v4261_v28 = vadd.s32 %v4257_v43, %v4249_v53  ;;  %v4059_v38 = vmul.f32 %v6703_v33, %v6703_v33  ;;  %v4202_v31 = vadd.s32 %v4198_v30, %v4190_v47 }
 0x700   : > { %4731 = vrcp.f32 %v4285_v55  ;;  %v4298_v57 = vand.u32 2147483647, %v4285_v55  ;;  %v4082_v42 = vmul.f32 %v4730_v40, %v4081_v19  ;;  %vm4294_vm10 = vweird.f32 %v4285_v55 }
 0x701   : > { %v6708_v50 = vadd.s32 %v4269_v49, %v4261_v28  ;;  %v6722_v14 = vadd.f32 %v4059_v38, %v4055_v15  ;;  %v4300_v56 = vand.u32 2147483648, %v4285_v55  ;;  %v4214_v35 = vadd.s32 %v4210_v1, %v4202_v31 }
 0x702   : > { %v4083_v52 = vmul.f32 %v4082_v42, %v6661_v9  ;;  %vm6728_vm13 = vcmp.eq.f32.partialorder %v4298_v57, 8.507059e+37  ;;  %vm4254_vm1 = vcmp.ge.f32.partialorder %v6661_v9, 22.133545  ;;  %v4246_v51 = vsel %vm4242_vm14, 1, %v4912_v4 }
 0x703   : > { %v4226_v3 = vadd.s32 %v4222_v37, %v4214_v35  ;;  %vm4115_vm15 = vcmp.ge.f32.partialorder %v6722_v14, 0.0110469  ;;  %4733 = vrsqrt.f32 %v6722_v14  ;;  %vm4123_vm0 = vcmp.ge.f32.partialorder %v6722_v14, 0.04518029 }
 0x704   : > { %v4085_v7 = vsel %vm4084_vm6, %v6661_v9, %v4083_v52  ;;  %v4301_v34 = vor.u32 1.1754944e-38, %v4300_v56  ;;  %vm4266_vm4 = vcmp.ge.f32.partialorder %v6661_v9, 90.52313  ;;  %v4119_v13 = vsel %vm4115_vm15, 1, %v4912_v4 }
 0x705   : > { %v4088_v32 = vsel %vm4086_vm8, %v4087_v24, %v4085_v7  ;;  %v4238_v45 = vadd.s32 %v4234_v8, %v4226_v3  ;;  %v4127_v18 = vsel %vm4123_vm0, 1, %v4912_v4  ;;  %v4258_v41 = vsel %vm4254_vm1, 1, %v4912_v4 }
 0x706   : > { %v4732_v23 = vpop.eup %4731  ;;  %v6745_v29 = vadd.f32 %v4088_v32, %v6649_v27  ;;  %vm4135_vm6 = vcmp.ge.f32.partialorder %v6722_v14, 0.10557281  ;;  %v3864_v6 = vadd.f32 %v3863_v54, %v6624_v12  ;;  %vm4513_vm7 = vcmp.gt.f32.partialorder %v6632_v5, 0.0 }
 0x707   : > { %v4290_v44 = vmul.f32 %v4732_v23, %v4285_v55  ;;  %vm4295_vm12 = vweird.f32 %v4732_v23  ;;  %v4250_v26 = vadd.s32 %v4246_v51, %v4238_v45  ;;  %v4270_v62 = vsel %vm4266_vm4, 1, %v4912_v4 }
 0x708   : > { %vm4296_vm3 = vmor %vm4294_vm10, %vm4295_vm12  ;;  %vm4282_vm5 = vcmp.gt.f32.partialorder %v6745_v29, 0.0  ;;  %v4131_v43 = vadd.s32 %v4127_v18, %v4119_v13  ;;  %v4139_v12 = vsel %vm4135_vm6, 1, %v4912_v4  ;;  %vm4147_vm12 = vcmp.ge.f32.partialorder %v6722_v14, 0.19822858 }
 0x709   : > { %v4291_v46 = vsub.f32 1.0, %v4290_v44  ;;  %v6760_v40 = vsel %vm4282_vm5, %v6745_v29, 1.0  ;;  %v4262_v53 = vadd.s32 %v4258_v41, %v4250_v26  ;;  %v6767_v0 = vpop.eup %4733  ;;  %v6788_v39 = vmul.f32 %v6590_v36, %v6590_v36 }
 0x70a   : > { %4735 = vrcp.f32 %v6760_v40  ;;  %v4090_v49 = vmul.f32 %v6767_v0, %v6722_v14  ;;  %v4913_v61 = vmov 7   ;;  %v4143_v38 = vadd.s32 %v4139_v12, %v4131_v43 }
 0x70b   : > { %v4292_v16 = vmul.f32 %v4732_v23, %v4291_v46  ;;  %v6794_v20 = vsel %vm4513_vm7, 15, %v4913_v61  ;;  %v4525_v19 = vmul.u32 16, %v6708_v50  ;;  %v6798_v47 = vadd.f32 %v3920_v59, %v3864_v6 }
 0x70c   : > { %v4099_v30 = vand.u32 2147483648, %v6722_v14  ;;  %v4151_v44 = vsel %vm4147_vm12, 1, %v4912_v4  ;;  %v4091_v42 = vmul.f32 %v6767_v0, %v4090_v49  ;;  %vm4159_vm15 = vcmp.ge.f32.partialorder %v6722_v14, 0.33333334 }
 0x70d   : > { %v4293_v17 = vadd.f32 %v4732_v23, %v4292_v16  ;;  %v4155_v24 = vadd.s32 %v4151_v44, %v4143_v38  ;;  %vm4171_vm0 = vcmp.ge.f32.partialorder %v6722_v14, 0.52786404  ;;  %v4313_v46 = vand.u32 2147483647, %v6760_v40 }
 0x70e   : > { %v4315_v52 = vand.u32 2147483648, %v6760_v40  ;;  %vm4309_vm6 = vweird.f32 %v6760_v40  ;;  %v4092_v16 = vmul.f32 0.5, %v4091_v42  ;;  %v4163_v7 = vsel %vm4159_vm15, 1, %v4912_v4 }
 0x70f   : > { %v4297_v11 = vsel %vm4296_vm3, %v4732_v23, %v4293_v17  ;;  %v4167_v8 = vadd.s32 %v4163_v7, %v4155_v24  ;;  %vm4219_vm12 = vcmp.ge.f32.partialorder %v6722_v14, 3.0 }
 0x710   : > { %v4302_v27 = vsel %vm6728_vm13, %v4301_v34, %v4297_v11  ;;  %v4736_v15 = vpop.eup %4735  ;;  %v4316_v34 = vor.u32 1.1754944e-38, %v4315_v52  ;;  %v4093_v13 = vsub.f32 1.5, %v4092_v16 }
 0x711   : > { %v6763_v60 = vmul.f32 %v4302_v27, %v6513_v58  ;;  %v6777_v58 = vadd.s32 %v4270_v62, %v4262_v53  ;;  %v4305_v57 = vmul.f32 %v4736_v15, %v6760_v40  ;;  %vm4310_vm4 = vweird.f32 %v4736_v15 }
 0x712   : > { %v4175_v27 = vsel %vm4171_vm0, 1, %v4912_v4 }
 0x713   : > { %vm4349_vm8 = vcmp.ge.f32.partialorder %v6763_v60, -4.70463  ;;  %vm4357_vm9 = vcmp.ge.f32.partialorder %v6763_v60, -2.2460368  ;;  %vm4369_vm10 = vcmp.ge.f32.partialorder %v6763_v60, -1.3763819  ;;  %v4179_v54 = vadd.s32 %v4175_v27, %v4167_v8 }
 0x714   : > { %v4353_v55 = vsel %vm4349_vm8, 1, %v4912_v4  ;;  %v4361_v28 = vsel %vm4357_vm9, 1, %v4912_v4  ;;  %vm4381_vm11 = vcmp.ge.f32.partialorder %v6763_v60, -0.90040404  ;;  %v4373_v48 = vsel %vm4369_vm10, 1, %v4912_v4  ;;  %vm4311_vm9 = vmor %vm4309_vm6, %vm4310_vm4 }
 0x715   : > { %v4365_v25 = vadd.s32 %v4361_v28, %v4353_v55  ;;  %vm4393_vm13 = vcmp.ge.f32.partialorder %v6763_v60, -0.57735026  ;;  %v4385_v23 = vsel %vm4381_vm11, 1, %v4912_v4  ;;  %vm4405_vm14 = vcmp.ge.f32.partialorder %v6763_v60, -0.3249197 }
 0x716   : > { %v4397_v31 = vsel %vm4393_vm13, 1, %v4912_v4  ;;  %v4306_v56 = vsub.f32 1.0, %v4305_v57  ;;  %vm4417_vm1 = vcmp.ge.f32.partialorder %v6763_v60, -0.10510424  ;;  %v4409_v35 = vsel %vm4405_vm14, 1, %v4912_v4 }
 0x717   : > { %v4377_v2 = vadd.s32 %v4373_v48, %v4365_v25  ;;  %vm4429_vm3 = vcmp.ge.f32.partialorder %v6763_v60, 0.10510424  ;;  %v4421_v3 = vsel %vm4417_vm1, 1, %v4912_v4  ;;  %vm4441_vm7 = vcmp.ge.f32.partialorder %v6763_v60, 0.3249197 }
 0x718   : > { %v4307_v10 = vmul.f32 %v4736_v15, %v4306_v56  ;;  %v4433_v45 = vsel %vm4429_vm3, 1, %v4912_v4  ;;  %vm4453_vm8 = vcmp.ge.f32.partialorder %v6763_v60, 0.57735026  ;;  %vm4465_vm10 = vcmp.ge.f32.partialorder %v6763_v60, 0.90040404 }
 0x719   : > { %v4389_v5 = vadd.s32 %v4385_v23, %v4377_v2  ;;  %vm4314_vm11 = vcmp.eq.f32.partialorder %v4313_v46, 8.507059e+37  ;;  %v4445_v26 = vsel %vm4441_vm7, 1, %v4912_v4  ;;  %v4457_v41 = vsel %vm4453_vm8, 1, %v4912_v4 }
 0x71a   : > { %v4308_v32 = vadd.f32 %v4736_v15, %v4307_v10  ;;  %vm4183_vm13 = vcmp.ge.f32.partialorder %v6722_v14, 0.8107274  ;;  %v4469_v6 = vsel %vm4465_vm10, 1, %v4912_v4  ;;  %vm4477_vm14 = vcmp.ge.f32.partialorder %v6763_v60, 1.3763819 }
 0x71b   : > { %v4401_v1 = vadd.s32 %v4397_v31, %v4389_v5  ;;  %vm4489_vm15 = vcmp.ge.f32.partialorder %v6763_v60, 2.2460368  ;;  %vm4096_vm1 = vcmp.eq.f32.partialorder %v6722_v14, inf  ;;  %vm4098_vm6 = vcmp.eq.f32.partialorder %v6722_v14, 0.0  ;;  %v4001_v31 = vpop.f32.mrf.mxu2 }
 0x71c   : > { %v4312_v51 = vsel %vm4311_vm9, %v4736_v15, %v4308_v32  ;;  %v4187_v28 = vsel %vm4183_vm13, 1, %v4912_v4  ;;  %vm4195_vm8 = vcmp.ge.f32.partialorder %v6722_v14, 1.2334602  ;;  %vm4501_vm9 = vcmp.ge.f32.partialorder %v6763_v60, 4.70463 }
 0x71d   : > { %v4413_v37 = vadd.s32 %v4409_v35, %v4401_v1  ;;  %v4317_v18 = vsel %vm4314_vm11, %v4316_v34, %v4312_v51  ;;  %v4191_v25 = vadd.s32 %v4187_v28, %v4179_v54  ;;  %vm4207_vm11 = vcmp.ge.f32.partialorder %v6722_v14, 1.8944272  ;;  %v4050_v34 = vpop.f32.mrf.mxu3 }
 0x71e   : > { %v6830_v40 = vmul.f32 %v4317_v18, %v6556_v63  ;;  %v4094_v63 = vmul.f32 %v6767_v0, %v4093_v13  ;;  %v4481_v0 = vsel %vm4477_vm14, 1, %v4912_v4  ;;  %v4493_v2 = vsel %vm4489_vm15, 1, %v4912_v4 }
 0x71f   : > { %v4425_v17 = vadd.s32 %v4421_v3, %v4413_v37  ;;  %v4199_v57 = vsel %vm4195_vm8, 1, %v4912_v4  ;;  %v4505_v44 = vsel %vm4501_vm9, 1, %v4912_v4  ;;  %v4211_v1 = vsel %vm4207_vm11, 1, %v4912_v4 }
 0x720   : > { %vm4350_vm0 = vcmp.ge.f32.partialorder %v6830_v40, -4.70463  ;;  %vm4358_vm3 = vcmp.ge.f32.partialorder %v6830_v40, -2.2460368  ;;  %vm4370_vm4 = vcmp.ge.f32.partialorder %v6830_v40, -1.3763819  ;;  %v4095_v38 = vmul.f32 %v4094_v63, %v6722_v14 }
 0x721   : > { %v4437_v11 = vadd.s32 %v4433_v45, %v4425_v17  ;;  %v4354_v43 = vsel %vm4350_vm0, 1, %v4912_v4  ;;  %v4362_v55 = vsel %vm4358_vm3, 1, %v4912_v4  ;;  %vm4382_vm7 = vcmp.ge.f32.partialorder %v6830_v40, -0.90040404 }
 0x722   : > { %v4366_v12 = vadd.s32 %v4362_v55, %v4354_v43  ;;  %v4374_v59 = vsel %vm4370_vm4, 1, %v4912_v4  ;;  %vm4394_vm10 = vcmp.ge.f32.partialorder %v6830_v40, -0.57735026  ;;  %v4386_v23 = vsel %vm4382_vm7, 1, %v4912_v4 }
 0x723   : > { %v4449_v53 = vadd.s32 %v4445_v26, %v4437_v11  ;;  %vm4406_vm13 = vcmp.ge.f32.partialorder %v6830_v40, -0.3249197  ;;  %v4203_v42 = vadd.s32 %v4199_v57, %v4191_v25  ;;  %v4398_v24 = vsel %vm4394_vm10, 1, %v4912_v4 }
 0x724   : > { %v4378_v48 = vadd.s32 %v4374_v59, %v4366_v12  ;;  %v4223_v60 = vsel %vm4219_vm12, 1, %v4912_v4  ;;  %vm4418_vm14 = vcmp.ge.f32.partialorder %v6830_v40, -0.10510424  ;;  %v4097_v52 = vsel %vm4096_vm1, %v6722_v14, %v4095_v38 }
 0x725   : > { %v4461_v62 = vadd.s32 %v4457_v41, %v4449_v53  ;;  %vm4231_vm15 = vcmp.ge.f32.partialorder %v6722_v14, 5.044681  ;;  %v4410_v10 = vsel %vm4406_vm13, 1, %v4912_v4  ;;  %v4100_v37 = vsel %vm4098_vm6, %v4099_v30, %v4097_v52 }
 0x726   : > { %v4390_v5 = vadd.s32 %v4386_v23, %v4378_v48  ;;  %v4002_v16 = vadd.f32 %v4001_v31, %v6798_v47  ;;  %vm4430_vm12 = vcmp.ge.f32.partialorder %v6830_v40, 0.10510424  ;;  %v4215_v3 = vadd.s32 %v4211_v1, %v4203_v42 }
 0x727   : > { %v4473_v49 = vadd.s32 %v4469_v6, %v4461_v62  ;;  %vm4243_vm0 = vcmp.ge.f32.partialorder %v6722_v14, 9.472136  ;;  %v4422_v30 = vsel %vm4418_vm14, 1, %v4912_v4  ;;  %vm4255_vm1 = vcmp.ge.f32.partialorder %v6722_v14, 22.133545 }
 0x728   : > { %v4402_v46 = vadd.s32 %v4398_v24, %v4390_v5  ;;  %v6898_v47 = vadd.f32 %v4100_v37, %v6703_v33  ;;  %vm4442_vm3 = vcmp.ge.f32.partialorder %v6830_v40, 0.3249197  ;;  %v4227_v45 = vadd.s32 %v4223_v60, %v4215_v3 }
 0x729   : > { %v4485_v15 = vadd.s32 %v4481_v0, %v4473_v49  ;;  %v4434_v51 = vsel %vm4430_vm12, 1, %v4912_v4  ;;  %v4235_v22 = vsel %vm4231_vm15, 1, %v4912_v4  ;;  %vm4454_vm4 = vcmp.ge.f32.partialorder %v6830_v40, 0.57735026 }
 0x72a   : > { %v4414_v7 = vadd.s32 %v4410_v10, %v4402_v46  ;;  %v4239_v50 = vadd.s32 %v4235_v22, %v4227_v45  ;;  %v4446_v13 = vsel %vm4442_vm3, 1, %v4912_v4  ;;  %vm4466_vm6 = vcmp.ge.f32.partialorder %v6830_v40, 0.90040404 }
 0x72b   : > { %v4497_v56 = vadd.s32 %v4493_v2, %v4485_v15  ;;  %v4247_v11 = vsel %vm4243_vm0, 1, %v4912_v4  ;;  %vm4267_vm7 = vcmp.ge.f32.partialorder %v6722_v14, 90.52313  ;;  %v4458_v41 = vsel %vm4454_vm4, 1, %v4912_v4 }
 0x72c   : > { %v4426_v17 = vadd.s32 %v4422_v30, %v4414_v7  ;;  %v4251_v18 = vadd.s32 %v4247_v11, %v4239_v50  ;;  %v4259_v54 = vsel %vm4255_vm1, 1, %v4912_v4  ;;  %vm4478_vm8 = vcmp.ge.f32.partialorder %v6830_v40, 1.3763819 }
 0x72d   : > { %v4509_v35 = vadd.s32 %v4505_v44, %v4497_v56  ;;  %v4470_v62 = vsel %vm4466_vm6, 1, %v4912_v4  ;;  %v4271_v43 = vsel %vm4267_vm7, 1, %v4912_v4  ;;  %vm4490_vm9 = vcmp.ge.f32.partialorder %v6830_v40, 2.2460368 }
 0x72e   : > { %v4438_v33 = vadd.s32 %v4434_v51, %v4426_v17  ;;  %v4263_v6 = vadd.s32 %v4259_v54, %v4251_v18  ;;  %v4482_v25 = vsel %vm4478_vm8, 1, %v4912_v4  ;;  %vm4502_vm10 = vcmp.ge.f32.partialorder %v6830_v40, 4.70463 }
 0x72f   : > { %v4521_v32 = vsel %vm4281_vm2, %v4509_v35, %v6794_v20  ;;  %vm4283_vm2 = vcmp.gt.f32.partialorder %v6898_v47, 0.0  ;;  %v6908_v20 = vadd.f32 %v4050_v34, %v4002_v16  ;;  %vm4514_vm11 = vcmp.gt.f32.partialorder %v6661_v9, 0.0 }
 0x730   : > { %v4529_v8 = vadd.s32 %v4525_v19, %v4521_v32  ;;  %v4287_v19 = vsel %vm4283_vm2, %v6898_v47, 1.0  ;;  %v4450_v26 = vadd.s32 %v4446_v13, %v4438_v33  ;;  %v6934_v28 = vadd.s32 %v4271_v43, %v4263_v6 }
 0x731   : > { %4737 = vrcp.f32 %v4287_v19  ;;  %v4060_v27 = vmul.f32 %v6908_v20, %v6908_v20  ;;  %v4506_v38 = vsel %vm4502_vm10, 1, %v4912_v4  ;;  %v4330_v15 = vand.u32 2147483648, %v4287_v19 }
 0x732   : > { %4533 = vst [vmem:[%s6890_s5] sm:$0xff] %v4529_v8  ;;  %v4462_v53 = vadd.s32 %v4458_v41, %v4450_v26  ;;  %v4328_v44 = vand.u32 2147483647, %v4287_v19  ;;  %v4518_v5 = vsel %vm4514_vm11, 15, %v4913_v61  ;;  %v4526_v40 = vmul.u32 16, %v6777_v58 }
 0x733   : > { %v6929_v63 = vadd.f32 %v4060_v27, %v6788_v39  ;;  %v4494_v39 = vsel %vm4490_vm9, 1, %v4912_v4  ;;  %vm4324_vm14 = vweird.f32 %v4287_v19  ;;  %v4331_v24 = vor.u32 1.1754944e-38, %v4330_v15 }
 0x734   : > { %v4474_v55 = vadd.s32 %v4470_v62, %v4462_v53  ;;  %vm4329_vm12 = vcmp.eq.f32.partialorder %v4328_v44, 8.507059e+37 }
 0x735   : > { %4739 = vrsqrt.f32 %v6929_v63  ;;  %vm4116_vm4 = vcmp.ge.f32.partialorder %v6929_v63, 0.0110469  ;;  %vm4124_vm6 = vcmp.ge.f32.partialorder %v6929_v63, 0.04518029  ;;  %vm4108_vm9 = vcmp.eq.f32.partialorder %v6929_v63, inf }
 0x736   : > { %v4486_v49 = vadd.s32 %v4482_v25, %v4474_v55  ;;  %v4120_v30 = vsel %vm4116_vm4, 1, %v4912_v4  ;;  %v4128_v8 = vsel %vm4124_vm6, 1, %v4912_v4  ;;  %vm4110_vm11 = vcmp.eq.f32.partialorder %v6929_v63, 0.0 }
 0x737   : > { %v4738_v12 = vpop.eup %4737  ;;  %v4111_v51 = vand.u32 2147483648, %v6929_v63  ;;  %v4132_v50 = vadd.s32 %v4128_v8, %v4120_v30 }
 0x738   : > { %v4320_v0 = vmul.f32 %v4738_v12, %v4287_v19  ;;  %v4498_v59 = vadd.s32 %v4494_v39, %v4486_v49  ;;  %vm4325_vm13 = vweird.f32 %v4738_v12 }
 0x739   : > { %vm4326_vm15 = vmor %vm4324_vm14, %vm4325_vm13  ;;  %vm4136_vm13 = vcmp.ge.f32.partialorder %v6929_v63, 0.10557281 }
 0x73a   : > { %v4321_v48 = vsub.f32 1.0, %v4320_v0  ;;  %v4510_v23 = vadd.s32 %v4506_v38, %v4498_v59  ;;  %v4140_v27 = vsel %vm4136_vm13, 1, %v4912_v4 }
 0x73b   : > { %v4740_v2 = vpop.eup %4739  ;;  %v4144_v54 = vadd.s32 %v4140_v27, %v4132_v50 }
 0x73c   : > { %v4322_v57 = vmul.f32 %v4738_v12, %v4321_v48  ;;  %v4102_v42 = vmul.f32 %v4740_v2, %v6929_v63  ;;  %v4522_v31 = vsel %vm4282_vm5, %v4510_v23, %v4518_v5 }
 0x73d   : > { %v4530_v56 = vadd.s32 %v4526_v40, %v4522_v31 }
 0x73e   : > { %v4323_v9 = vadd.f32 %v4738_v12, %v4322_v57  ;;  %v4103_v1 = vmul.f32 %v4740_v2, %v4102_v42 }
 0x73f   : > { %4534 = vst [vmem:[%s6890_s5 + $0x8] sm:$0xff] %v4530_v56 }
 0x740   : > { %v4327_v60 = vsel %vm4326_vm15, %v4738_v12, %v4323_v9  ;;  %v4104_v52 = vmul.f32 0.5, %v4103_v1 }
 0x741   : > { %v4332_v46 = vsel %vm4329_vm12, %v4331_v24, %v4327_v60  ;;  %vm4148_vm12 = vcmp.ge.f32.partialorder %v6929_v63, 0.19822858  ;;  %v4527_v60 = vmul.u32 16, %v6934_v28 }
 0x742   : > { %v6949_v35 = vmul.f32 %v4332_v46, %v6573_v21  ;;  %v4105_v10 = vsub.f32 1.5, %v4104_v52  ;;  %v4152_v43 = vsel %vm4148_vm12, 1, %v4912_v4 }
 0x743   : > { %v4156_v12 = vadd.s32 %v4152_v43, %v4144_v54 }
 0x744   : > { %vm4351_vm0 = vcmp.ge.f32.partialorder %v6949_v35, -4.70463  ;;  %vm4359_vm1 = vcmp.ge.f32.partialorder %v6949_v35, -2.2460368  ;;  %vm4371_vm5 = vcmp.ge.f32.partialorder %v6949_v35, -1.3763819  ;;  %v4106_v3 = vmul.f32 %v4740_v2, %v4105_v10 }
 0x745   : > { %v4355_v29 = vsel %vm4351_vm0, 1, %v4912_v4  ;;  %v4363_v58 = vsel %vm4359_vm1, 1, %v4912_v4  ;;  %vm4383_vm3 = vcmp.ge.f32.partialorder %v6949_v35, -0.90040404  ;;  %v4375_v16 = vsel %vm4371_vm5, 1, %v4912_v4 }
 0x746   : > { %v4367_v37 = vadd.s32 %v4363_v58, %v4355_v29  ;;  %vm4395_vm7 = vcmp.ge.f32.partialorder %v6949_v35, -0.57735026  ;;  %v4387_v7 = vsel %vm4383_vm3, 1, %v4912_v4  ;;  %vm4407_vm8 = vcmp.ge.f32.partialorder %v6949_v35, -0.3249197 }
 0x747   : > { %v4399_v17 = vsel %vm4395_vm7, 1, %v4912_v4  ;;  %v4107_v45 = vmul.f32 %v4106_v3, %v6929_v63  ;;  %vm4419_vm10 = vcmp.ge.f32.partialorder %v6949_v35, -0.10510424  ;;  %v4411_v22 = vsel %vm4407_vm8, 1, %v4912_v4 }
 0x748   : > { %v4379_v21 = vadd.s32 %v4375_v16, %v4367_v37  ;;  %vm4431_vm14 = vcmp.ge.f32.partialorder %v6949_v35, 0.10510424  ;;  %v4423_v11 = vsel %vm4419_vm10, 1, %v4912_v4  ;;  %vm4443_vm15 = vcmp.ge.f32.partialorder %v6949_v35, 0.3249197 }
 0x749   : > { %v4109_v33 = vsel %vm4108_vm9, %v6929_v63, %v4107_v45  ;;  %v4435_v41 = vsel %vm4431_vm14, 1, %v4912_v4  ;;  %vm4455_vm1 = vcmp.ge.f32.partialorder %v6949_v35, 0.57735026  ;;  %v4447_v6 = vsel %vm4443_vm15, 1, %v4912_v4 }
 0x74a   : > { %v4391_v32 = vadd.s32 %v4387_v7, %v4379_v21  ;;  %v4112_v13 = vsel %vm4110_vm11, %v4111_v51, %v4109_v33  ;;  %vm4467_vm5 = vcmp.ge.f32.partialorder %v6949_v35, 0.90040404  ;;  %v4459_v55 = vsel %vm4455_vm1, 1, %v4912_v4 }
 0x74b   : > { %v6977_v26 = vadd.f32 %v4112_v13, %v6908_v20  ;;  %vm4160_vm3 = vcmp.ge.f32.partialorder %v6929_v63, 0.33333334  ;;  %vm4479_vm4 = vcmp.ge.f32.partialorder %v6949_v35, 1.3763819  ;;  %v4471_v49 = vsel %vm4467_vm5, 1, %v4912_v4 }
 0x74c   : > { %v4403_v34 = vadd.s32 %v4399_v17, %v4391_v32  ;;  %vm4491_vm6 = vcmp.ge.f32.partialorder %v6949_v35, 2.2460368  ;;  %v4164_v39 = vsel %vm4160_vm3, 1, %v4912_v4  ;;  %v4483_v48 = vsel %vm4479_vm4, 1, %v4912_v4 }
 0x74d   : > { %vm4284_vm0 = vcmp.gt.f32.partialorder %v6977_v26, 0.0  ;;  %v4168_v38 = vadd.s32 %v4164_v39, %v4156_v12  ;;  %vm4172_vm7 = vcmp.ge.f32.partialorder %v6929_v63, 0.52786404  ;;  %vm4503_vm8 = vcmp.ge.f32.partialorder %v6949_v35, 4.70463 }
 0x74e   : > { %v4415_v19 = vadd.s32 %v4411_v22, %v4403_v34  ;;  %v4288_v20 = vsel %vm4284_vm0, %v6977_v26, 1.0  ;;  %v4495_v23 = vsel %vm4491_vm6, 1, %v4912_v4  ;;  %vm4515_vm9 = vcmp.gt.f32.partialorder %v6722_v14, 0.0 }
 0x74f   : > { %4741 = vrcp.f32 %v4288_v20  ;;  %v4176_v44 = vsel %vm4172_vm7, 1, %v4912_v4  ;;  %v4507_v40 = vsel %vm4503_vm8, 1, %v4912_v4  ;;  %vm4184_vm10 = vcmp.ge.f32.partialorder %v6929_v63, 0.8107274 }
 0x750   : > { %v4427_v18 = vadd.s32 %v4423_v11, %v4415_v19  ;;  %v4180_v42 = vadd.s32 %v4176_v44, %v4168_v38  ;;  %v4345_v31 = vand.u32 2147483648, %v4288_v20  ;;  %v4343_v24 = vand.u32 2147483647, %v4288_v20 }
 0x751   : > { %v4519_v1 = vsel %vm4515_vm9, 15, %v4913_v61  ;;  %v4188_v46 = vsel %vm4184_vm10, 1, %v4912_v4  ;;  %vm4339_vm13 = vweird.f32 %v4288_v20  ;;  %vm4196_vm14 = vcmp.ge.f32.partialorder %v6929_v63, 1.2334602 }
 0x752   : > { %v4439_v53 = vadd.s32 %v4435_v41, %v4427_v18  ;;  %v4192_v29 = vadd.s32 %v4188_v46, %v4180_v42  ;;  %v4346_v58 = vor.u32 1.1754944e-38, %v4345_v31  ;;  %vm4344_vm12 = vcmp.eq.f32.partialorder %v4343_v24, 8.507059e+37 }
 0x753   : > { %v4200_v16 = vsel %vm4196_vm14, 1, %v4912_v4  ;;  %vm4220_vm6 = vcmp.ge.f32.partialorder %v6929_v63, 3.0  ;;  %vm4232_vm9 = vcmp.ge.f32.partialorder %v6929_v63, 5.044681 }
 0x754   : > { %v4451_v62 = vadd.s32 %v4447_v6, %v4439_v53  ;;  %v4204_v47 = vadd.s32 %v4200_v16, %v4192_v29  ;;  %v4224_v45 = vsel %vm4220_vm6, 1, %v4912_v4  ;;  %v4236_v19 = vsel %vm4232_vm9, 1, %v4912_v4 }
 0x755   : > { %v4742_v59 = vpop.eup %4741  ;;  %vm4516_vm6 = vcmp.gt.f32.partialorder %v6929_v63, 0.0 }
 0x756   : > { %v4463_v25 = vadd.s32 %v4459_v55, %v4451_v62  ;;  %v4335_v2 = vmul.f32 %v4742_v59, %v4288_v20  ;;  %vm4340_vm11 = vweird.f32 %v4742_v59  ;;  %v4520_v44 = vsel %vm4516_vm6, 15, %v4913_v61 }
 0x757   : > { %vm4341_vm15 = vmor %vm4339_vm13, %vm4340_vm11  ;;  %vm4244_vm13 = vcmp.ge.f32.partialorder %v6929_v63, 9.472136 }
 0x758   : > { %v4475_v0 = vadd.s32 %v4471_v49, %v4463_v25  ;;  %v4336_v5 = vsub.f32 1.0, %v4335_v2  ;;  %v4248_v54 = vsel %vm4244_vm13, 1, %v4912_v4 }
 0x75a   : > { %v4487_v15 = vadd.s32 %v4483_v48, %v4475_v0  ;;  %v4337_v56 = vmul.f32 %v4742_v59, %v4336_v5 }
 0x75c   : > { %v4499_v57 = vadd.s32 %v4495_v23, %v4487_v15  ;;  %v4338_v52 = vadd.f32 %v4742_v59, %v4337_v56 }
 0x75e   : > { %v4511_v9 = vadd.s32 %v4507_v40, %v4499_v57  ;;  %v4342_v10 = vsel %vm4341_vm15, %v4742_v59, %v4338_v52 }
 0x75f   : > { %v4347_v37 = vsel %vm4344_vm12, %v4346_v58, %v4342_v10  ;;  %vm4256_vm12 = vcmp.ge.f32.partialorder %v6929_v63, 22.133545 }
 0x760   : > { %v4523_v14 = vsel %vm4283_vm2, %v4511_v9, %v4519_v1  ;;  %v4348_v28 = vmul.f32 %v4347_v37, %v6590_v36  ;;  %vm4208_vm2 = vcmp.ge.f32.partialorder %v6929_v63, 1.8944272  ;;  %v4260_v55 = vsel %vm4256_vm12, 1, %v4912_v4 }
 0x761   : > { %v4531_v35 = vadd.s32 %v4527_v60, %v4523_v14  ;;  %v4212_v3 = vsel %vm4208_vm2, 1, %v4912_v4 }
 0x762   : > { %vm4352_vm1 = vcmp.ge.f32.partialorder %v4348_v28, -4.70463  ;;  %vm4360_vm5 = vcmp.ge.f32.partialorder %v4348_v28, -2.2460368  ;;  %vm4372_vm3 = vcmp.ge.f32.partialorder %v4348_v28, -1.3763819  ;;  %v4216_v30 = vadd.s32 %v4212_v3, %v4204_v47 }
 0x763   : > { %4535 = vst [vmem:[%s6890_s5 + $0x10] sm:$0xff] %v4531_v35  ;;  %v4356_v21 = vsel %vm4352_vm1, 1, %v4912_v4  ;;  %v4364_v7 = vsel %vm4360_vm5, 1, %v4912_v4  ;;  %vm4384_vm4 = vcmp.ge.f32.partialorder %v4348_v28, -0.90040404  ;;  %v4376_v8 = vsel %vm4372_vm3, 1, %v4912_v4 }
 0x764   : > { %v4368_v32 = vadd.s32 %v4364_v7, %v4356_v21  ;;  %vm4396_vm7 = vcmp.ge.f32.partialorder %v4348_v28, -0.57735026  ;;  %v4388_v17 = vsel %vm4384_vm4, 1, %v4912_v4  ;;  %vm4408_vm8 = vcmp.ge.f32.partialorder %v4348_v28, -0.3249197 }
 0x765   : > { %v4228_v51 = vadd.s32 %v4224_v45, %v4216_v30  ;;  %v4400_v22 = vsel %vm4396_vm7, 1, %v4912_v4  ;;  %vm4420_vm10 = vcmp.ge.f32.partialorder %v4348_v28, -0.10510424  ;;  %v4412_v50 = vsel %vm4408_vm8, 1, %v4912_v4 }
 0x766   : > { %v4380_v36 = vadd.s32 %v4376_v8, %v4368_v32  ;;  %vm4432_vm11 = vcmp.ge.f32.partialorder %v4348_v28, 0.10510424  ;;  %v4424_v18 = vsel %vm4420_vm10, 1, %v4912_v4  ;;  %vm4444_vm14 = vcmp.ge.f32.partialorder %v4348_v28, 0.3249197 }
 0x767   : > { %v4240_v11 = vadd.s32 %v4236_v19, %v4228_v51  ;;  %v4436_v41 = vsel %vm4432_vm11, 1, %v4912_v4  ;;  %vm4456_vm15 = vcmp.ge.f32.partialorder %v4348_v28, 0.57735026  ;;  %v4448_v6 = vsel %vm4444_vm14, 1, %v4912_v4 }
 0x768   : > { %v4392_v34 = vadd.s32 %v4388_v17, %v4380_v36  ;;  %vm4468_vm2 = vcmp.ge.f32.partialorder %v4348_v28, 0.90040404  ;;  %v4460_v43 = vsel %vm4456_vm15, 1, %v4912_v4  ;;  %vm4480_vm1 = vcmp.ge.f32.partialorder %v4348_v28, 1.3763819 }
 0x769   : > { %v4252_v20 = vadd.s32 %v4248_v54, %v4240_v11  ;;  %vm4268_vm5 = vcmp.ge.f32.partialorder %v6929_v63, 90.52313  ;;  %v4472_v49 = vsel %vm4468_vm2, 1, %v4912_v4  ;;  %vm4492_vm3 = vcmp.ge.f32.partialorder %v4348_v28, 2.2460368 }
 0x76a   : > { %v4404_v33 = vadd.s32 %v4400_v22, %v4392_v34  ;;  %v4484_v39 = vsel %vm4480_vm1, 1, %v4912_v4  ;;  %v4272_v59 = vsel %vm4268_vm5, 1, %v4912_v4  ;;  %vm4504_vm4 = vcmp.ge.f32.partialorder %v4348_v28, 4.70463 }
 0x76b   : > { %v4264_v25 = vadd.s32 %v4260_v55, %v4252_v20  ;;  %v4496_v15 = vsel %vm4492_vm3, 1, %v4912_v4  ;;  %v4508_v23 = vsel %vm4504_vm4, 1, %v4912_v4 }
 0x76c   : > { %v4416_v13 = vadd.s32 %v4412_v50, %v4404_v33 }
 0x76d   : > { %v4276_v38 = vadd.s32 %v4272_v59, %v4264_v25 }
 0x76e   : > { %v4428_v27 = vadd.s32 %v4424_v18, %v4416_v13 }
 0x76f   : > { %v4528_v5 = vmul.u32 16, %v4276_v38 }
 0x770   : > { %v4440_v53 = vadd.s32 %v4436_v41, %v4428_v27 }
 0x772   : > { %v4452_v62 = vadd.s32 %v4448_v6, %v4440_v53 }
 0x774   : > { %v4464_v12 = vadd.s32 %v4460_v43, %v4452_v62 }
 0x776   : > { %v4476_v0 = vadd.s32 %v4472_v49, %v4464_v12 }
 0x778   : > { %v4488_v48 = vadd.s32 %v4484_v39, %v4476_v0 }
 0x77a   : > { %v4500_v2 = vadd.s32 %v4496_v15, %v4488_v48 }
 0x77c   : > { %v4512_v57 = vadd.s32 %v4508_v23, %v4500_v2 }
 0x77e   : > { %v4524_v40 = vsel %vm4284_vm0, %v4512_v57, %v4520_v44 }
 0x77f   : > { %v4532_v42 = vadd.s32 %v4528_v5, %v4524_v40 }
 0x781   : > { %4536 = vst [vmem:[%s6890_s5 + $0x18] sm:$0xff] %v4532_v42 }
 0x782 PF: > { %p16_p4 = scmp.ge.s32.totalorder %s5002_s14, 4   ;;  %s7111_s15 = smov %s4897_s16 }
 0x783   : > { %s7112_s16 = smov %s4901_s17  ;;  %s7113_s17 = smov %s5017_s22 }
 0x784   : > { %s7114_s18 = smov %s5002_s14  ;;  %18 = sbr.rel (!%p16_p4) target bundleno = 5 (0x5), region = 96 }
 0x789   :  { %4558 = vsyncpa [#allocation3], 1 }
 0x78a   :  { %4560 = vsyncpa [#allocation3 + $0x1], 1 }
 0x78b   :  { %4561 = vsyncpa [#allocation5], 1 }
 0x78c   :  { %4562 = vsyncpa [#allocation8], 1 }

// kernel: _lambda_.3
= control target key start
LH: loop header
LB: loop body
LE: loop exit
PB: predicated region body
PF: predicated region fallthrough
CT: control target
= control target key end

     0   :  { %s10425_s0 = inlined_call_operand.vmem [shape: s32[2,1,4096], index: 0, kind: input, shape index: {}]   ;;  %s10426_s1 = inlined_call_operand.hbm [shape: bf16[18,256], index: 1, kind: input, shape index: {}]   ;;  %s10427_s2 = inlined_call_operand.hbm [shape: f32[18,4096], index: 2, kind: input, shape index: {}]   ;;  %s10428_s3 = inlined_call_operand.hbm [shape: f32[8,18], index: 3, kind: input, shape index: {}]   ;;  %s10429_s4 = inlined_call_operand.hbm [shape: f32[8,4096], index: 4, kind: input, shape index: {}]   ;;  %s10430_s5 = inlined_call_operand.vmem [shape: f32[2,8,4096], index: 5, kind: output, shape index: {}]  }
   0x1   :  { %10436 = sst [smem:[#allocation18_spill]] %s10426_s1 }
   0x2   :  { %10437 = sst [smem:[#allocation19_spill]] %s10428_s3 }
   0x3   :  { %10 = vsyncpa [#allocation3], 0 }
   0x4   :  { %11 = vsyncpa [#allocation5], 0 }
   0x5   :  { %13 = vsyncpa [#allocation5 + $0x1], 0 }
   0x6   :  { %14 = vsyncpa [#allocation8], 0 }
   0x7   :  { %16 = vsyncpa [#allocation8 + $0x1], 0  ;;  %s7334_s18 = smov 0   ;;  %s7336_s19 = smov 0  }
   0x8   :  { %s7338_s20 = smov 0   ;;  %s7340_s21 = smov 0  }
   0x9   :  { %s7342_s22 = smov 0   ;;  %s7344_s23 = smov 0  }
   0xa   :  { %s7346_s24 = smov 0   ;;  %s7348_s25 = smov 0  }
   0xb LB: > { %10438 = sst [smem:[#allocation13_spill]] %s7287_s23  ;;  %s10431_s26 = sadd.s32 4294967295, %s7295_s25   ;;  %s7295_s25 = sphi %s7348_s25, %s22_s25   ;;  %s7291_s24 = sphi %s7346_s24, %s10456_s24   ;;  %s7287_s23 = sphi %s7344_s23, %s10455_s23   ;;  %s7283_s22 = sphi %s7342_s22, %s10454_s22   ;;  %s7279_s21 = sphi %s7340_s21, %s10453_s21   ;;  %s7275_s20 = sphi %s7338_s20, %s10459_s20   ;;  %s7271_s19 = sphi %s7336_s19, %s10458_s19   ;;  %s7267_s18 = sphi %s7334_s18, %s10457_s18  }
   0xc   : > { %10439 = sst [smem:[#allocation14_spill]] %s7291_s24  ;;  %s90_s27 = sadd.s32 1, %s7275_s20 }
   0xd   : > { %p97_p0 = scmp.ne.s32.totalorder %s7275_s20, %s7271_s19  ;;  %p98_p1 = scmp.eq.s32.totalorder %s7295_s25, 0 }
   0xe   : > { %p103_p2 = scmp.ne.s32.totalorder %s7271_s19, %s7267_s18  ;;  %p7380_p3 = scmp.eq.s32.totalorder %s10431_s26, 0 }
   0xf   : > { %p7384_p4 = por %p98_p1, %p97_p0  ;;  %p5937_p5 = scmp.ge.s32.totalorder %s7295_s25, 1 }
  0x10   : > { %p7391_p6 = por %p7380_p3, %p103_p2  ;;  %p189_p7 = scmp.lt.s32.totalorder %s7295_s25, 5 }
  0x11   : > { %s10443_s3 = sld [smem:[#allocation19_spill]]  ;;  %s7297_s10 = smov [#allocation6]  }
  0x12   : > { %p7399_p8 = pnand %p5937_p5, %p189_p7  ;;  %s217_s11 = sshll.u32 %s7297_s10, 4  ;;  %s218_s11 = int_to_ptr.vmem [resolvable:$true] %s217_s11 }
  0x13   : > { %p7023_p10 = scmp.lt.s32.totalorder %s7295_s25, 4  ;;  %s10446_s1 = sld [smem:[#allocation18_spill]] }
  0x14   : > { %p7007_p9 = pneg %p7399_p8  ;;  %s7298_s16 = smov [#allocation2]  }
  0x15   : > { %p7410_p12 = pnand %p7023_p10, %p7384_p4  ;;  %s202_s17 = sshll.u32 %s7298_s16, 4  ;;  %s203_s17 = int_to_ptr.vmem [resolvable:$true] %s202_s17 }
  0x16   : > { %p7008_p11 = pnand %p7007_p9, %p7380_p3  ;;  %s10432_s18 = smov 128  }
  0x17   : > { %s215_s8 = sshll.u32 %s10443_s3, 4  ;;  %s7300_s29 = smov 8   ;;  %s216_s8 = int_to_ptr.hbm [resolvable:$true] %s215_s8 }
  0x18   : > { %7013 = dma.hbm_to_vmem [thread:$0]  (!%p7008_p11), %s216_s8, 128, %s218_s11, [#allocation5]  }
  0x19   : > { %s200_s15 = sshll.u32 %s10446_s1, 4  ;;  %s31_s6 = sadd.s32 1, %s7287_s23  ;;  %s201_s15 = int_to_ptr.hbm [resolvable:$true] %s200_s15 }
  0x1a   : > { %7010 = dma.hbm_to_vmem [thread:$0]  (!%p7008_p11), %s201_s15, 384, %s203_s17, [#allocation3], %s10432_s18, %s10432_s18, %s7300_s29  }
  0x1b   : > { %p32_p13 = scmp.ge.s32.totalorder %s31_s6, 2  ;;  %s34_s7 = sadd.s32 1, %s7291_s24 }
  0x1c   : > { %s240_s8 = sand.u32 1, %s7295_s25   ;;  %s7423_s10 = sand.u32 1, %s7275_s20  }
  0x1d   : > { %s10461_s6 = smov (%p32_p13, %s31_s6), 0  ;;  %s10463_s7 = smov (!%p32_p13, %s34_s7), %s7291_s24 }
  0x1e   : > { %10447 = sst [smem:[#allocation15_spill]] %s10461_s6  ;;  %s87_s11 = ssub.s32 %s7287_s23, %s10461_s6 }
  0x1f   : > { %p36_p0 = scmp.ge.s32.totalorder %s10463_s7, 2  ;;  %p88_p1 = scmp.eq.s32.totalorder %s87_s11, 0 }
  0x20   : > { %s6993_s13 = smul.u32 384, %s7423_s10  ;;  %s6989_s14 = sshll.u32 %s7287_s23, 7 }
  0x21   : > { %s10465_s7 = smov (%p36_p0, %s10463_s7), 0  ;;  %s249_s29 = scalar_lea.hbm %s10427_s2, %s6989_s14 }
  0x22   : > { %10448 = sst [smem:[#allocation16_spill]] %s10465_s7  ;;  %s250_s26 = sshll.u32 %s249_s29, 4  ;;  %s251_s26 = int_to_ptr.hbm [resolvable:$true] %s250_s26 }
  0x23   : > { %s7437_s15 = scalar_select %p88_p1, %s7275_s20, %s90_s27  }
  0x24   : > { %s244_s18 = scalar_lea.vmem [#allocation4], %s6993_s13  ;;  %s241_s3 = scalar_lea.sflag [#allocation5], %s240_s8 }
  0x25   : > { %10449 = sst [smem:[#allocation17_spill]] %s7437_s15  ;;  %s252_s1 = sshll.u32 %s244_s18, 4  ;;  %s253_s1 = int_to_ptr.vmem [resolvable:$true] %s252_s1 }
  0x26   : > { %s7301_s11 = smov 4096   ;;  %s7302_s6 = smov 2048  }
  0x27   : > { %s10450_s24 = smov 128   ;;  %s5943_s7 = sshll.u32 %s7423_s10, 7 }
  0x28   : > { %7017 = dma.hbm_to_vmem [thread:$0]  (!%p7410_p12), %s251_s26, 6144, %s253_s1, %s241_s3, %s7301_s11, %s7302_s6, %s10450_s24  }
  0x29   : > { %s271_s15 = scalar_lea.hbm %s10429_s4, %s6989_s14  ;;  %s266_s17 = scalar_lea.vmem [#allocation7], %s5943_s7 }
  0x2a   : > { %s273_s16 = sshll.u32 %s271_s15, 4  ;;  %s275_s29 = sshll.u32 %s266_s17, 4  ;;  %s274_s16 = int_to_ptr.hbm [resolvable:$true] %s273_s16  ;;  %s276_s29 = int_to_ptr.vmem [resolvable:$true] %s275_s29 }
  0x2b   : > { %s263_s13 = scalar_lea.sflag [#allocation8], %s7423_s10  ;;  %284 = sbr.rel (%p7399_p8) target bundleno = 687 (0x2af), region = 40 }
  0x2c   : > { %7020 = dma.hbm_to_vmem [thread:$0]  (!%p7410_p12), %s274_s16, 2048, %s276_s29, %s263_s13  }
  0x30   : > { %7250 = dma.done.wait (%p7380_p3), [#allocation3], 384  }
  0x31   : > { %7252 = vsyncadd (%p7380_p3), [#allocation3], 4294966912  ;;  %s10451_s1 = sadd.s32 4294967295, %s7295_s25   ;;  %s293_s23 = sand.u32 1, %s7271_s19  }
  0x32   : > { %s291_s3 = sand.u32 1, %s10451_s1   ;;  %s6994_s24 = smul.u32 384, %s293_s23 }
  0x33   : > { %s292_s26 = scalar_lea.sflag [#allocation5], %s291_s3 }
  0x34   : > { %s7461_s18 = scalar_lea.vmem [#allocation4], %s6994_s24 }
  0x35   : > { %7254 = dma.done.wait (%p7391_p6), %s292_s26, 6144  }
  0x36   : > { %7256 = vsyncadd (%p7391_p6), %s292_s26, 4294961152 }
  0x37   : > { %7258 = dma.done.wait (%p7380_p3), [#allocation5], 128  }
  0x38   : > { %7260 = vsyncadd (%p7380_p3), [#allocation5], 4294967168  ;;  %s5949_s9 = sshll.u32 %s293_s23, 7  ;;  %s307_s12 = scalar_lea.sflag [#allocation8], %s293_s23 }
  0x39   : > { %s7471_s6 = scalar_lea.vmem [#allocation7], %s5949_s9 }
  0x3a   : > { %7262 = dma.done.wait (%p7391_p6), %s307_s12, 2048  }
  0x3b   : > { %7264 = vsyncadd (%p7391_p6), %s307_s12, 4294965248  ;;  %s5950_s7 = sshll.u32 %s7279_s21, 4  ;;  %p356_p2 = scmp.lt.s32.totalorder %s7283_s22, 1  ;;  %v378_v0 = vlaneseq  ;;  %v7303_v13 = vmov 1.0|1.0  }
  0x3c   : > { %p358_p4 = scmp.lt.s32.totalorder %s5950_s7, 31  ;;  %v6469_v38 = vld [vmem:[#allocation2] sm:$0xf]  ;;  %v6992_v39 = vld [vmem:[#allocation2 + $0x4] sm:$0xf0] }
  0x3d   : > { %s10467_s22 = smov (!%p356_p2, %s7283_s22), 1  ;;  %v7480_v1 = vshrl.u32 %v378_v0, 7  ;;  %v6991_v40 = vld [vmem:[#allocation2 + $0x4] sm:$0xf]  ;;  %v6471_v41 = vld [vmem:[#allocation2 + $0x8] sm:$0xf0]  ;;  %v7799_v43 = vor.u32 %v6992_v39, %v6469_v38 }
  0x3e   : > { %s10469_s7 = smov (!%p358_p4, %s5950_s7), 31  ;;  %s5951_s28 = sshll.u32 %s10467_s22, 5  ;;  %v7809_v44 = vor.u32 %v6991_v40, %v6471_v41  ;;  %v2221_v45 = vld [vmem:[#allocation2 + $0x10] sm:$0x11] }
  0x3f   : > { %s7482_s8 = sadd.s32 %s5951_s28, %s10469_s7  ;;  %v7491_v2 = vadd.s32 112, %v7480_v1  ;;  %v7494_v3 = vadd.s32 120, %v7480_v1  ;;  %v7497_v4 = vadd.s32 240, %v7480_v1  ;;  %v7500_v5 = vadd.s32 248, %v7480_v1 }
  0x40   : > { %s7488_s30 = scalar_lea.vmem %s10425_s0, %s7482_s8  ;;  %v7512_v9 = vadd.s32 96, %v7480_v1  ;;  %v7515_v10 = vadd.s32 104, %v7480_v1  ;;  %v7518_v11 = vadd.s32 224, %v7480_v1  ;;  %v7521_v12 = vadd.s32 232, %v7480_v1  ;;  %s5954_s21 = sshll.u32 %s7482_s8, 3 }
  0x41   : > { %v7503_v6 = vld [vmem:[%s7488_s30] sm:$0xff]  ;;  %v7545_v14 = vadd.s32 80, %v7480_v1  ;;  %v7548_v15 = vadd.s32 88, %v7480_v1  ;;  %v7556_v16 = vadd.s32 208, %v7480_v1  ;;  %v7559_v17 = vadd.s32 216, %v7480_v1  ;;  %v8292_v54 = vld [vmem:[%s7488_s30 + $0x8] sm:$0xff]  ;;  %s10247_s11 = scalar_lea.vmem %s10430_s5, %s5954_s21 }
  0x42   : > { %v7506_v7 = vperm.slane %v7503_v6, 0  ;;  %v7509_v8 = vperm.slane %v7503_v6, 1  ;;  %v7586_v18 = vadd.s32 64, %v7480_v1  ;;  %v7589_v19 = vadd.s32 72, %v7480_v1 }
  0x43   : > { %v7597_v20 = vadd.s32 192, %v7480_v1  ;;  %v7600_v21 = vadd.s32 200, %v7480_v1  ;;  %v7624_v22 = vadd.s32 48, %v7480_v1  ;;  %v7627_v23 = vadd.s32 56, %v7480_v1 }
  0x44   : > { %vm651_vm0 = vcmp.eq.s32.totalorder %v7491_v2, %v7506_v7  ;;  %vm667_vm1 = vcmp.eq.s32.totalorder %v7494_v3, %v7506_v7  ;;  %vm907_vm2 = vcmp.eq.s32.totalorder %v7497_v4, %v7506_v7  ;;  %vm923_vm3 = vcmp.eq.s32.totalorder %v7500_v5, %v7506_v7 }
  0x45   : > { %vm6475_vm4 = vmpackc.low %vm667_vm1, %vm651_vm0  ;;  %vm652_vm5 = vcmp.eq.s32.totalorder %v7491_v2, %v7509_v8  ;;  %vm668_vm6 = vcmp.eq.s32.totalorder %v7494_v3, %v7509_v8  ;;  %vm908_vm7 = vcmp.eq.s32.totalorder %v7497_v4, %v7509_v8  ;;  %vm924_vm8 = vcmp.eq.s32.totalorder %v7500_v5, %v7509_v8 }
  0x46   : > { %6476 = vmatpush.bf16.msk.msra.mxu0 %vm6475_vm4, %v7303_v13  ;;  %vm6491_vm9 = vmpackc.low %vm923_vm3, %vm907_vm2  ;;  %vm619_vm10 = vcmp.eq.s32.totalorder %v7512_v9, %v7506_v7  ;;  %vm635_vm11 = vcmp.eq.s32.totalorder %v7515_v10, %v7506_v7  ;;  %vm875_vm13 = vcmp.eq.s32.totalorder %v7518_v11, %v7506_v7  ;;  %vm891_vm14 = vcmp.eq.s32.totalorder %v7521_v12, %v7506_v7 }
  0x47   : > { %6492 = vmatpush.bf16.msk.msra.mxu1 %vm6491_vm9, %v7303_v13  ;;  %vm6507_vm12 = vmpackc.low %vm668_vm6, %vm652_vm5  ;;  %vm620_vm0 = vcmp.eq.s32.totalorder %v7512_v9, %v7509_v8  ;;  %vm636_vm1 = vcmp.eq.s32.totalorder %v7515_v10, %v7509_v8  ;;  %vm876_vm3 = vcmp.eq.s32.totalorder %v7518_v11, %v7509_v8  ;;  %vm892_vm4 = vcmp.eq.s32.totalorder %v7521_v12, %v7509_v8 }
  0x48   : > { %6508 = vmatpush.bf16.msk.msra.mxu2 %vm6507_vm12, %v7303_v13  ;;  %vm6523_vm15 = vmpackc.low %vm924_vm8, %vm908_vm7  ;;  %vm587_vm6 = vcmp.eq.s32.totalorder %v7545_v14, %v7506_v7  ;;  %vm603_vm7 = vcmp.eq.s32.totalorder %v7548_v15, %v7506_v7  ;;  %vm843_vm9 = vcmp.eq.s32.totalorder %v7556_v16, %v7506_v7  ;;  %vm588_vm12 = vcmp.eq.s32.totalorder %v7545_v14, %v7509_v8 }
  0x49   : > { %6524 = vmatpush.bf16.msk.msra.mxu3 %vm6523_vm15, %v7303_v13  ;;  %vm6477_vm2 = vmpackc.low %vm635_vm11, %vm619_vm10  ;;  %vm859_vm10 = vcmp.eq.s32.totalorder %v7559_v17, %v7506_v7  ;;  %vm844_vm15 = vcmp.eq.s32.totalorder %v7556_v16, %v7509_v8  ;;  %v7635_v24 = vadd.s32 176, %v7480_v1  ;;  %v7638_v25 = vadd.s32 184, %v7480_v1 }
  0x4a   : > { %6478 = vmatpush.bf16.msk.msra.mxu0 %vm6477_vm2, %v7303_v13  ;;  %vm6493_vm5 = vmpackc.low %vm891_vm14, %vm875_vm13  ;;  %vm604_vm13 = vcmp.eq.s32.totalorder %v7548_v15, %v7509_v8  ;;  %vm555_vm2 = vcmp.eq.s32.totalorder %v7586_v18, %v7506_v7  ;;  %v7662_v26 = vadd.s32 32, %v7480_v1  ;;  %v7665_v27 = vadd.s32 40, %v7480_v1 }
  0x4b   : > { %6494 = vmatpush.bf16.msk.msra.mxu1 %vm6493_vm5, %v7303_v13  ;;  %vm6509_vm8 = vmpackc.low %vm636_vm1, %vm620_vm0  ;;  %vm860_vm0 = vcmp.eq.s32.totalorder %v7559_v17, %v7509_v8  ;;  %vm811_vm5 = vcmp.eq.s32.totalorder %v7597_v20, %v7506_v7  ;;  %v7673_v28 = vadd.s32 160, %v7480_v1  ;;  %v7676_v29 = vadd.s32 168, %v7480_v1 }
  0x4c   : > { %6510 = vmatpush.bf16.msk.msra.mxu2 %vm6509_vm8, %v7303_v13  ;;  %vm6525_vm11 = vmpackc.low %vm892_vm4, %vm876_vm3  ;;  %vm571_vm3 = vcmp.eq.s32.totalorder %v7589_v19, %v7506_v7  ;;  %vm556_vm8 = vcmp.eq.s32.totalorder %v7586_v18, %v7509_v8  ;;  %v7700_v30 = vadd.s32 16, %v7480_v1  ;;  %v7703_v31 = vadd.s32 24, %v7480_v1 }
  0x4d   : > { %6526 = vmatpush.bf16.msk.msra.mxu3 %vm6525_vm11, %v7303_v13  ;;  %vm6479_vm14 = vmpackc.low %vm603_vm7, %vm587_vm6  ;;  %vm827_vm6 = vcmp.eq.s32.totalorder %v7600_v21, %v7506_v7  ;;  %vm812_vm11 = vcmp.eq.s32.totalorder %v7597_v20, %v7509_v8  ;;  %v7711_v32 = vadd.s32 144, %v7480_v1  ;;  %v7714_v33 = vadd.s32 152, %v7480_v1 }
  0x4e   : > { %6480 = vmatpush.bf16.msk.msra.mxu0 %vm6479_vm14, %v7303_v13  ;;  %vm6495_vm1 = vmpackc.low %vm859_vm10, %vm843_vm9  ;;  %vm572_vm9 = vcmp.eq.s32.totalorder %v7589_v19, %v7509_v8  ;;  %vm523_vm14 = vcmp.eq.s32.totalorder %v7624_v22, %v7506_v7  ;;  %v7738_v34 = vadd.s32 8, %v7480_v1  ;;  %v7746_v35 = vadd.s32 128, %v7480_v1 }
  0x4f   : > { %6496 = vmatpush.bf16.msk.msra.mxu1 %vm6495_vm1, %v7303_v13  ;;  %vm6511_vm4 = vmpackc.low %vm604_vm13, %vm588_vm12  ;;  %vm828_vm12 = vcmp.eq.s32.totalorder %v7600_v21, %v7509_v8  ;;  %vm779_vm1 = vcmp.eq.s32.totalorder %v7635_v24, %v7506_v7  ;;  %v7749_v36 = vadd.s32 136, %v7480_v1  ;;  %v7767_v37 = vperm.slane %v7503_v6, 2 }
  0x50   : > { %6512 = vmatpush.bf16.msk.msra.mxu2 %vm6511_vm4, %v7303_v13  ;;  %vm6527_vm7 = vmpackc.low %vm860_vm0, %vm844_vm15  ;;  %vm539_vm15 = vcmp.eq.s32.totalorder %v7627_v23, %v7506_v7  ;;  %vm524_vm4 = vcmp.eq.s32.totalorder %v7624_v22, %v7509_v8  ;;  %v7786_v42 = vperm.slane %v7503_v6, 3  ;;  %v2229_v46 = vunpack.c.l.b16 %v2221_v45 }
  0x51   : > { %6528 = vmatpush.bf16.msk.msra.mxu3 %vm6527_vm7, %v7303_v13  ;;  %vm6481_vm10 = vmpackc.low %vm571_vm3, %vm555_vm2  ;;  %vm795_vm2 = vcmp.eq.s32.totalorder %v7638_v25, %v7506_v7  ;;  %vm780_vm7 = vcmp.eq.s32.totalorder %v7635_v24, %v7509_v8  ;;  %v2230_v47 = vunpack.c.h.b16 %v2221_v45  ;;  %v7964_v50 = vperm.slane %v7503_v6, 4 }
  0x52   : > { %6482 = vmatpush.bf16.msk.msra.mxu0 %vm6481_vm10, %v7303_v13  ;;  %vm6497_vm13 = vmpackc.low %vm827_vm6, %vm811_vm5  ;;  %vm540_vm5 = vcmp.eq.s32.totalorder %v7627_v23, %v7509_v8  ;;  %vm491_vm10 = vcmp.eq.s32.totalorder %v7662_v26, %v7506_v7  ;;  %v7890_v48 = vpack.c.b16 %v2229_v46, %v2229_v46  ;;  %v7977_v51 = vperm.slane %v7503_v6, 5 }
  0x53   : > { %6498 = vmatpush.bf16.msk.msra.mxu1 %vm6497_vm13, %v7303_v13  ;;  %vm6513_vm0 = vmpackc.low %vm572_vm9, %vm556_vm8  ;;  %vm796_vm8 = vcmp.eq.s32.totalorder %v7638_v25, %v7509_v8  ;;  %vm747_vm13 = vcmp.eq.s32.totalorder %v7673_v28, %v7506_v7  ;;  %v7897_v49 = vpack.c.b16 %v2230_v47, %v2230_v47  ;;  %v8138_v52 = vperm.slane %v7503_v6, 6 }
  0x54   : > { %6514 = vmatpush.bf16.msk.msra.mxu2 %vm6513_vm0, %v7303_v13  ;;  %vm6529_vm3 = vmpackc.low %vm828_vm12, %vm812_vm11  ;;  %vm507_vm11 = vcmp.eq.s32.totalorder %v7665_v27, %v7506_v7  ;;  %vm492_vm0 = vcmp.eq.s32.totalorder %v7662_v26, %v7509_v8  ;;  %v8151_v53 = vperm.slane %v7503_v6, 7  ;;  %v8315_v55 = vperm.slane %v8292_v54, 0 }
  0x55   : > { %6530 = vmatpush.bf16.msk.msra.mxu3 %vm6529_vm3, %v7303_v13  ;;  %vm6483_vm6 = vmpackc.low %vm539_vm15, %vm523_vm14  ;;  %vm763_vm14 = vcmp.eq.s32.totalorder %v7676_v29, %v7506_v7  ;;  %vm748_vm3 = vcmp.eq.s32.totalorder %v7673_v28, %v7509_v8  ;;  %v8328_v56 = vperm.slane %v8292_v54, 1  ;;  %v8489_v57 = vperm.slane %v8292_v54, 2 }
  0x56   : > { %6484 = vmatpush.bf16.msk.msra.mxu0 %vm6483_vm6, %v7303_v13  ;;  %vm6499_vm9 = vmpackc.low %vm795_vm2, %vm779_vm1  ;;  %vm508_vm1 = vcmp.eq.s32.totalorder %v7665_v27, %v7509_v8  ;;  %vm459_vm6 = vcmp.eq.s32.totalorder %v7700_v30, %v7506_v7  ;;  %v8502_v58 = vperm.slane %v8292_v54, 3 }
  0x57   : > { %6500 = vmatpush.bf16.msk.msra.mxu1 %vm6499_vm9, %v7303_v13  ;;  %vm6515_vm12 = vmpackc.low %vm540_vm5, %vm524_vm4  ;;  %vm764_vm4 = vcmp.eq.s32.totalorder %v7676_v29, %v7509_v8  ;;  %vm715_vm9 = vcmp.eq.s32.totalorder %v7711_v32, %v7506_v7 }
  0x58   : > { %6516 = vmatpush.bf16.msk.msra.mxu2 %vm6515_vm12, %v7303_v13  ;;  %vm6531_vm15 = vmpackc.low %vm796_vm8, %vm780_vm7  ;;  %vm475_vm7 = vcmp.eq.s32.totalorder %v7703_v31, %v7506_v7  ;;  %vm460_vm12 = vcmp.eq.s32.totalorder %v7700_v30, %v7509_v8 }
  0x59   : > { %6532 = vmatpush.bf16.msk.msra.mxu3 %vm6531_vm15, %v7303_v13  ;;  %vm6485_vm2 = vmpackc.low %vm507_vm11, %vm491_vm10  ;;  %vm731_vm10 = vcmp.eq.s32.totalorder %v7714_v33, %v7506_v7  ;;  %vm716_vm15 = vcmp.eq.s32.totalorder %v7711_v32, %v7509_v8 }
  0x5a   : > { %6486 = vmatpush.bf16.msk.msra.mxu0 %vm6485_vm2, %v7303_v13  ;;  %vm6501_vm5 = vmpackc.low %vm763_vm14, %vm747_vm13  ;;  %vm476_vm13 = vcmp.eq.s32.totalorder %v7703_v31, %v7509_v8  ;;  %vm427_vm2 = vcmp.eq.s32.totalorder %v7480_v1, %v7506_v7 }
  0x5b   : > { %6502 = vmatpush.bf16.msk.msra.mxu1 %vm6501_vm5, %v7303_v13  ;;  %vm6517_vm8 = vmpackc.low %vm508_vm1, %vm492_vm0  ;;  %vm732_vm0 = vcmp.eq.s32.totalorder %v7714_v33, %v7509_v8  ;;  %vm683_vm5 = vcmp.eq.s32.totalorder %v7746_v35, %v7506_v7 }
  0x5c   : > { %6518 = vmatpush.bf16.msk.msra.mxu2 %vm6517_vm8, %v7303_v13  ;;  %vm6533_vm11 = vmpackc.low %vm764_vm4, %vm748_vm3  ;;  %vm443_vm3 = vcmp.eq.s32.totalorder %v7738_v34, %v7506_v7  ;;  %vm428_vm8 = vcmp.eq.s32.totalorder %v7480_v1, %v7509_v8 }
  0x5d   : > { %6534 = vmatpush.bf16.msk.msra.mxu3 %vm6533_vm11, %v7303_v13  ;;  %vm6487_vm14 = vmpackc.low %vm475_vm7, %vm459_vm6  ;;  %vm699_vm6 = vcmp.eq.s32.totalorder %v7749_v36, %v7506_v7  ;;  %vm684_vm11 = vcmp.eq.s32.totalorder %v7746_v35, %v7509_v8 }
  0x5e   : > { %6488 = vmatpush.bf16.msk.msra.mxu0 %vm6487_vm14, %v7303_v13  ;;  %vm6503_vm1 = vmpackc.low %vm731_vm10, %vm715_vm9  ;;  %vm444_vm9 = vcmp.eq.s32.totalorder %v7738_v34, %v7509_v8  ;;  %vm653_vm14 = vcmp.eq.s32.totalorder %v7491_v2, %v7767_v37 }
  0x5f   : > { %6504 = vmatpush.bf16.msk.msra.mxu1 %vm6503_vm1, %v7303_v13  ;;  %vm6519_vm4 = vmpackc.low %vm476_vm13, %vm460_vm12  ;;  %vm700_vm12 = vcmp.eq.s32.totalorder %v7749_v36, %v7509_v8  ;;  %vm909_vm1 = vcmp.eq.s32.totalorder %v7497_v4, %v7767_v37 }
  0x60   : > { %6520 = vmatpush.bf16.msk.msra.mxu2 %vm6519_vm4, %v7303_v13  ;;  %vm6535_vm7 = vmpackc.low %vm732_vm0, %vm716_vm15  ;;  %vm669_vm15 = vcmp.eq.s32.totalorder %v7494_v3, %v7767_v37  ;;  %vm654_vm4 = vcmp.eq.s32.totalorder %v7491_v2, %v7786_v42 }
  0x61   : > { %6536 = vmatpush.bf16.msk.msra.mxu3 %vm6535_vm7, %v7303_v13  ;;  %vm6489_vm10 = vmpackc.low %vm443_vm3, %vm427_vm2  ;;  %vm925_vm2 = vcmp.eq.s32.totalorder %v7500_v5, %v7767_v37  ;;  %vm910_vm7 = vcmp.eq.s32.totalorder %v7497_v4, %v7786_v42 }
  0x62   : > { %6490 = vmatpush.bf16.msk.msra.mxu0 %vm6489_vm10, %v7303_v13  ;;  %vm6505_vm13 = vmpackc.low %vm699_vm6, %vm683_vm5  ;;  %vm670_vm5 = vcmp.eq.s32.totalorder %v7494_v3, %v7786_v42  ;;  %vm621_vm10 = vcmp.eq.s32.totalorder %v7512_v9, %v7767_v37 }
  0x63   : > { %6506 = vmatpush.bf16.msk.msra.mxu1 %vm6505_vm13, %v7303_v13  ;;  %vm6521_vm0 = vmpackc.low %vm444_vm9, %vm428_vm8  ;;  %vm926_vm8 = vcmp.eq.s32.totalorder %v7500_v5, %v7786_v42  ;;  %vm877_vm13 = vcmp.eq.s32.totalorder %v7518_v11, %v7767_v37 }
  0x64   : > { %6522 = vmatpush.bf16.msk.msra.mxu2 %vm6521_vm0, %v7303_v13  ;;  %vm6537_vm3 = vmpackc.low %vm700_vm12, %vm684_vm11  ;;  %vm637_vm11 = vcmp.eq.s32.totalorder %v7515_v10, %v7767_v37  ;;  %vm622_vm0 = vcmp.eq.s32.totalorder %v7512_v9, %v7786_v42 }
  0x65   : > { %6538 = vmatpush.bf16.msk.msra.mxu3 %vm6537_vm3, %v7303_v13  ;;  %vm6539_vm6 = vmpackc.low %vm669_vm15, %vm653_vm14  ;;  %2247 = vmatmul.bf16.vlgmr.msra.gmra.mxu0 %v7799_v43  ;;  %vm893_vm14 = vcmp.eq.s32.totalorder %v7521_v12, %v7767_v37  ;;  %vm878_vm3 = vcmp.eq.s32.totalorder %v7518_v11, %v7786_v42 }
  0x66   : > { %6540 = vmatpush.bf16.msk.msrb.mxu0 %vm6539_vm6, %v7303_v13  ;;  %vm6555_vm9 = vmpackc.low %vm925_vm2, %vm909_vm1  ;;  %2265 = vmatmul.bf16.vlgmr.msra.gmra.mxu1 %v7809_v44  ;;  %vm638_vm1 = vcmp.eq.s32.totalorder %v7515_v10, %v7786_v42  ;;  %vm589_vm6 = vcmp.eq.s32.totalorder %v7545_v14, %v7767_v37 }
  0x67   : > { %6556 = vmatpush.bf16.msk.msrb.mxu1 %vm6555_vm9, %v7303_v13  ;;  %vm6571_vm12 = vmpackc.low %vm670_vm5, %vm654_vm4  ;;  %2283 = vmatmul.bf16.vlgmr.msra.gmra.mxu2 %v7799_v43  ;;  %vm894_vm4 = vcmp.eq.s32.totalorder %v7521_v12, %v7786_v42  ;;  %vm845_vm9 = vcmp.eq.s32.totalorder %v7556_v16, %v7767_v37 }
  0x68   : > { %6572 = vmatpush.bf16.msk.msrb.mxu2 %vm6571_vm12, %v7303_v13  ;;  %vm6587_vm15 = vmpackc.low %vm926_vm8, %vm910_vm7  ;;  %2301 = vmatmul.bf16.vlgmr.msra.gmra.mxu3 %v7809_v44  ;;  %vm605_vm7 = vcmp.eq.s32.totalorder %v7548_v15, %v7767_v37  ;;  %vm590_vm12 = vcmp.eq.s32.totalorder %v7545_v14, %v7786_v42 }
  0x69   : > { %6588 = vmatpush.bf16.msk.msrb.mxu3 %vm6587_vm15, %v7303_v13  ;;  %vm6541_vm2 = vmpackc.low %vm637_vm11, %vm621_vm10  ;;  %vm861_vm10 = vcmp.eq.s32.totalorder %v7559_v17, %v7767_v37  ;;  %vm846_vm15 = vcmp.eq.s32.totalorder %v7556_v16, %v7786_v42 }
  0x6a   : > { %6542 = vmatpush.bf16.msk.msrb.mxu0 %vm6541_vm2, %v7303_v13  ;;  %vm6557_vm5 = vmpackc.low %vm893_vm14, %vm877_vm13  ;;  %vm606_vm13 = vcmp.eq.s32.totalorder %v7548_v15, %v7786_v42  ;;  %vm557_vm2 = vcmp.eq.s32.totalorder %v7586_v18, %v7767_v37 }
  0x6b   : > { %6558 = vmatpush.bf16.msk.msrb.mxu1 %vm6557_vm5, %v7303_v13  ;;  %vm6573_vm8 = vmpackc.low %vm638_vm1, %vm622_vm0  ;;  %vm862_vm0 = vcmp.eq.s32.totalorder %v7559_v17, %v7786_v42  ;;  %vm813_vm5 = vcmp.eq.s32.totalorder %v7597_v20, %v7767_v37 }
  0x6c   : > { %6574 = vmatpush.bf16.msk.msrb.mxu2 %vm6573_vm8, %v7303_v13  ;;  %vm6589_vm11 = vmpackc.low %vm894_vm4, %vm878_vm3  ;;  %vm573_vm3 = vcmp.eq.s32.totalorder %v7589_v19, %v7767_v37  ;;  %vm558_vm8 = vcmp.eq.s32.totalorder %v7586_v18, %v7786_v42 }
  0x6d   : > { %6590 = vmatpush.bf16.msk.msrb.mxu3 %vm6589_vm11, %v7303_v13  ;;  %vm6543_vm14 = vmpackc.low %vm605_vm7, %vm589_vm6  ;;  %vm829_vm6 = vcmp.eq.s32.totalorder %v7600_v21, %v7767_v37  ;;  %vm814_vm11 = vcmp.eq.s32.totalorder %v7597_v20, %v7786_v42 }
  0x6e   : > { %6544 = vmatpush.bf16.msk.msrb.mxu0 %vm6543_vm14, %v7303_v13  ;;  %vm6559_vm1 = vmpackc.low %vm861_vm10, %vm845_vm9  ;;  %vm574_vm9 = vcmp.eq.s32.totalorder %v7589_v19, %v7786_v42  ;;  %vm525_vm14 = vcmp.eq.s32.totalorder %v7624_v22, %v7767_v37 }
  0x6f   : > { %6560 = vmatpush.bf16.msk.msrb.mxu1 %vm6559_vm1, %v7303_v13  ;;  %vm6575_vm4 = vmpackc.low %vm606_vm13, %vm590_vm12  ;;  %vm830_vm12 = vcmp.eq.s32.totalorder %v7600_v21, %v7786_v42  ;;  %vm781_vm1 = vcmp.eq.s32.totalorder %v7635_v24, %v7767_v37 }
  0x70   : > { %6576 = vmatpush.bf16.msk.msrb.mxu2 %vm6575_vm4, %v7303_v13  ;;  %vm6591_vm7 = vmpackc.low %vm862_vm0, %vm846_vm15  ;;  %vm541_vm15 = vcmp.eq.s32.totalorder %v7627_v23, %v7767_v37  ;;  %vm526_vm4 = vcmp.eq.s32.totalorder %v7624_v22, %v7786_v42 }
  0x71   : > { %6592 = vmatpush.bf16.msk.msrb.mxu3 %vm6591_vm7, %v7303_v13  ;;  %vm6545_vm10 = vmpackc.low %vm573_vm3, %vm557_vm2  ;;  %vm797_vm2 = vcmp.eq.s32.totalorder %v7638_v25, %v7767_v37  ;;  %vm782_vm7 = vcmp.eq.s32.totalorder %v7635_v24, %v7786_v42 }
  0x72   : > { %6546 = vmatpush.bf16.msk.msrb.mxu0 %vm6545_vm10, %v7303_v13  ;;  %vm6561_vm13 = vmpackc.low %vm829_vm6, %vm813_vm5  ;;  %vm542_vm5 = vcmp.eq.s32.totalorder %v7627_v23, %v7786_v42  ;;  %vm493_vm10 = vcmp.eq.s32.totalorder %v7662_v26, %v7767_v37 }
  0x73   : > { %6562 = vmatpush.bf16.msk.msrb.mxu1 %vm6561_vm13, %v7303_v13  ;;  %vm6577_vm0 = vmpackc.low %vm574_vm9, %vm558_vm8  ;;  %vm798_vm8 = vcmp.eq.s32.totalorder %v7638_v25, %v7786_v42  ;;  %vm749_vm13 = vcmp.eq.s32.totalorder %v7673_v28, %v7767_v37 }
  0x74   : > { %6578 = vmatpush.bf16.msk.msrb.mxu2 %vm6577_vm0, %v7303_v13  ;;  %vm6593_vm3 = vmpackc.low %vm830_vm12, %vm814_vm11  ;;  %vm509_vm11 = vcmp.eq.s32.totalorder %v7665_v27, %v7767_v37  ;;  %vm494_vm0 = vcmp.eq.s32.totalorder %v7662_v26, %v7786_v42 }
  0x75   : > { %6594 = vmatpush.bf16.msk.msrb.mxu3 %vm6593_vm3, %v7303_v13  ;;  %vm6547_vm6 = vmpackc.low %vm541_vm15, %vm525_vm14  ;;  %2252 = vmatmul.bf16.gmra.mxu0 %v7890_v48  ;;  %vm765_vm14 = vcmp.eq.s32.totalorder %v7676_v29, %v7767_v37  ;;  %vm750_vm3 = vcmp.eq.s32.totalorder %v7673_v28, %v7786_v42 }
  0x76   : > { %6548 = vmatpush.bf16.msk.msrb.mxu0 %vm6547_vm6, %v7303_v13  ;;  %vm6563_vm9 = vmpackc.low %vm797_vm2, %vm781_vm1  ;;  %2270 = vmatmul.bf16.gmra.mxu1 %v7897_v49  ;;  %vm510_vm1 = vcmp.eq.s32.totalorder %v7665_v27, %v7786_v42  ;;  %vm461_vm6 = vcmp.eq.s32.totalorder %v7700_v30, %v7767_v37 }
  0x77   : > { %6564 = vmatpush.bf16.msk.msrb.mxu1 %vm6563_vm9, %v7303_v13  ;;  %vm6579_vm12 = vmpackc.low %vm542_vm5, %vm526_vm4  ;;  %2288 = vmatmul.bf16.gmra.mxu2 %v7890_v48  ;;  %vm766_vm4 = vcmp.eq.s32.totalorder %v7676_v29, %v7786_v42  ;;  %vm717_vm9 = vcmp.eq.s32.totalorder %v7711_v32, %v7767_v37 }
  0x78   : > { %6580 = vmatpush.bf16.msk.msrb.mxu2 %vm6579_vm12, %v7303_v13  ;;  %vm6595_vm15 = vmpackc.low %vm798_vm8, %vm782_vm7  ;;  %2306 = vmatmul.bf16.gmra.mxu3 %v7897_v49  ;;  %vm477_vm7 = vcmp.eq.s32.totalorder %v7703_v31, %v7767_v37  ;;  %vm462_vm12 = vcmp.eq.s32.totalorder %v7700_v30, %v7786_v42 }
  0x79   : > { %6596 = vmatpush.bf16.msk.msrb.mxu3 %vm6595_vm15, %v7303_v13  ;;  %vm6549_vm2 = vmpackc.low %vm509_vm11, %vm493_vm10  ;;  %vm733_vm10 = vcmp.eq.s32.totalorder %v7714_v33, %v7767_v37  ;;  %vm718_vm15 = vcmp.eq.s32.totalorder %v7711_v32, %v7786_v42 }
  0x7a   : > { %6550 = vmatpush.bf16.msk.msrb.mxu0 %vm6549_vm2, %v7303_v13  ;;  %vm6565_vm5 = vmpackc.low %vm765_vm14, %vm749_vm13  ;;  %vm478_vm13 = vcmp.eq.s32.totalorder %v7703_v31, %v7786_v42  ;;  %vm429_vm2 = vcmp.eq.s32.totalorder %v7480_v1, %v7767_v37 }
  0x7b   : > { %6566 = vmatpush.bf16.msk.msrb.mxu1 %vm6565_vm5, %v7303_v13  ;;  %vm6581_vm8 = vmpackc.low %vm510_vm1, %vm494_vm0  ;;  %vm734_vm0 = vcmp.eq.s32.totalorder %v7714_v33, %v7786_v42  ;;  %vm685_vm5 = vcmp.eq.s32.totalorder %v7746_v35, %v7767_v37 }
  0x7c   : > { %6582 = vmatpush.bf16.msk.msrb.mxu2 %vm6581_vm8, %v7303_v13  ;;  %vm6597_vm11 = vmpackc.low %vm766_vm4, %vm750_vm3  ;;  %vm445_vm3 = vcmp.eq.s32.totalorder %v7738_v34, %v7767_v37  ;;  %vm430_vm8 = vcmp.eq.s32.totalorder %v7480_v1, %v7786_v42 }
  0x7d   : > { %6598 = vmatpush.bf16.msk.msrb.mxu3 %vm6597_vm11, %v7303_v13  ;;  %vm6551_vm14 = vmpackc.low %vm477_vm7, %vm461_vm6  ;;  %vm701_vm6 = vcmp.eq.s32.totalorder %v7749_v36, %v7767_v37  ;;  %vm686_vm11 = vcmp.eq.s32.totalorder %v7746_v35, %v7786_v42 }
  0x7e   : > { %6552 = vmatpush.bf16.msk.msrb.mxu0 %vm6551_vm14, %v7303_v13  ;;  %vm6567_vm1 = vmpackc.low %vm733_vm10, %vm717_vm9  ;;  %vm446_vm9 = vcmp.eq.s32.totalorder %v7738_v34, %v7786_v42  ;;  %vm655_vm14 = vcmp.eq.s32.totalorder %v7491_v2, %v7964_v50 }
  0x7f   : > { %6568 = vmatpush.bf16.msk.msrb.mxu1 %vm6567_vm1, %v7303_v13  ;;  %vm6583_vm4 = vmpackc.low %vm478_vm13, %vm462_vm12  ;;  %vm702_vm12 = vcmp.eq.s32.totalorder %v7749_v36, %v7786_v42  ;;  %vm911_vm1 = vcmp.eq.s32.totalorder %v7497_v4, %v7964_v50 }
  0x80   : > { %6584 = vmatpush.bf16.msk.msrb.mxu2 %vm6583_vm4, %v7303_v13  ;;  %vm6599_vm7 = vmpackc.low %vm734_vm0, %vm718_vm15  ;;  %vm671_vm15 = vcmp.eq.s32.totalorder %v7494_v3, %v7964_v50  ;;  %vm656_vm4 = vcmp.eq.s32.totalorder %v7491_v2, %v7977_v51 }
  0x81   : > { %6600 = vmatpush.bf16.msk.msrb.mxu3 %vm6599_vm7, %v7303_v13  ;;  %vm6553_vm10 = vmpackc.low %vm445_vm3, %vm429_vm2  ;;  %vm927_vm2 = vcmp.eq.s32.totalorder %v7500_v5, %v7964_v50  ;;  %vm912_vm7 = vcmp.eq.s32.totalorder %v7497_v4, %v7977_v51 }
  0x82   : > { %6554 = vmatpush.bf16.msk.msrb.mxu0 %vm6553_vm10, %v7303_v13  ;;  %vm6569_vm13 = vmpackc.low %vm701_vm6, %vm685_vm5  ;;  %vm672_vm5 = vcmp.eq.s32.totalorder %v7494_v3, %v7977_v51  ;;  %vm623_vm10 = vcmp.eq.s32.totalorder %v7512_v9, %v7964_v50 }
  0x83   : > { %6570 = vmatpush.bf16.msk.msrb.mxu1 %vm6569_vm13, %v7303_v13  ;;  %vm6585_vm0 = vmpackc.low %vm446_vm9, %vm430_vm8  ;;  %vm928_vm8 = vcmp.eq.s32.totalorder %v7500_v5, %v7977_v51  ;;  %vm879_vm13 = vcmp.eq.s32.totalorder %v7518_v11, %v7964_v50 }
  0x84   : > { %6586 = vmatpush.bf16.msk.msrb.mxu2 %vm6585_vm0, %v7303_v13  ;;  %vm6601_vm3 = vmpackc.low %vm702_vm12, %vm686_vm11  ;;  %vm639_vm11 = vcmp.eq.s32.totalorder %v7515_v10, %v7964_v50  ;;  %vm624_vm0 = vcmp.eq.s32.totalorder %v7512_v9, %v7977_v51 }
  0x85   : > { %6602 = vmatpush.bf16.msk.msrb.mxu3 %vm6601_vm3, %v7303_v13  ;;  %vm6603_vm6 = vmpackc.low %vm671_vm15, %vm655_vm14  ;;  %2319 = vmatmul.bf16.vlgmr.msrb.gmra.mxu0 %v7799_v43  ;;  %vm895_vm14 = vcmp.eq.s32.totalorder %v7521_v12, %v7964_v50  ;;  %vm880_vm3 = vcmp.eq.s32.totalorder %v7518_v11, %v7977_v51 }
  0x86   : > { %6604 = vmatpush.bf16.msk.msra.mxu0 %vm6603_vm6, %v7303_v13  ;;  %vm6619_vm9 = vmpackc.low %vm927_vm2, %vm911_vm1  ;;  %2337 = vmatmul.bf16.vlgmr.msrb.gmra.mxu1 %v7809_v44  ;;  %vm640_vm1 = vcmp.eq.s32.totalorder %v7515_v10, %v7977_v51  ;;  %vm591_vm6 = vcmp.eq.s32.totalorder %v7545_v14, %v7964_v50 }
  0x87   : > { %6620 = vmatpush.bf16.msk.msra.mxu1 %vm6619_vm9, %v7303_v13  ;;  %vm6635_vm12 = vmpackc.low %vm672_vm5, %vm656_vm4  ;;  %2355 = vmatmul.bf16.vlgmr.msrb.gmra.mxu2 %v7799_v43  ;;  %vm896_vm4 = vcmp.eq.s32.totalorder %v7521_v12, %v7977_v51  ;;  %vm847_vm9 = vcmp.eq.s32.totalorder %v7556_v16, %v7964_v50 }
  0x88   : > { %6636 = vmatpush.bf16.msk.msra.mxu2 %vm6635_vm12, %v7303_v13  ;;  %vm6651_vm15 = vmpackc.low %vm928_vm8, %vm912_vm7  ;;  %2373 = vmatmul.bf16.vlgmr.msrb.gmra.mxu3 %v7809_v44  ;;  %vm607_vm7 = vcmp.eq.s32.totalorder %v7548_v15, %v7964_v50  ;;  %vm592_vm12 = vcmp.eq.s32.totalorder %v7545_v14, %v7977_v51 }
  0x89   : > { %6652 = vmatpush.bf16.msk.msra.mxu3 %vm6651_vm15, %v7303_v13  ;;  %vm6605_vm2 = vmpackc.low %vm639_vm11, %vm623_vm10  ;;  %vm863_vm10 = vcmp.eq.s32.totalorder %v7559_v17, %v7964_v50  ;;  %vm848_vm15 = vcmp.eq.s32.totalorder %v7556_v16, %v7977_v51 }
  0x8a   : > { %6606 = vmatpush.bf16.msk.msra.mxu0 %vm6605_vm2, %v7303_v13  ;;  %vm6621_vm5 = vmpackc.low %vm895_vm14, %vm879_vm13  ;;  %vm608_vm13 = vcmp.eq.s32.totalorder %v7548_v15, %v7977_v51  ;;  %vm559_vm2 = vcmp.eq.s32.totalorder %v7586_v18, %v7964_v50 }
  0x8b   : > { %6622 = vmatpush.bf16.msk.msra.mxu1 %vm6621_vm5, %v7303_v13  ;;  %vm6637_vm8 = vmpackc.low %vm640_vm1, %vm624_vm0  ;;  %vm864_vm0 = vcmp.eq.s32.totalorder %v7559_v17, %v7977_v51  ;;  %vm815_vm5 = vcmp.eq.s32.totalorder %v7597_v20, %v7964_v50 }
  0x8c   : > { %6638 = vmatpush.bf16.msk.msra.mxu2 %vm6637_vm8, %v7303_v13  ;;  %vm6653_vm11 = vmpackc.low %vm896_vm4, %vm880_vm3  ;;  %vm575_vm3 = vcmp.eq.s32.totalorder %v7589_v19, %v7964_v50  ;;  %vm560_vm8 = vcmp.eq.s32.totalorder %v7586_v18, %v7977_v51 }
  0x8d   : > { %6654 = vmatpush.bf16.msk.msra.mxu3 %vm6653_vm11, %v7303_v13  ;;  %vm6607_vm14 = vmpackc.low %vm607_vm7, %vm591_vm6  ;;  %vm831_vm6 = vcmp.eq.s32.totalorder %v7600_v21, %v7964_v50  ;;  %vm816_vm11 = vcmp.eq.s32.totalorder %v7597_v20, %v7977_v51 }
  0x8e   : > { %6608 = vmatpush.bf16.msk.msra.mxu0 %vm6607_vm14, %v7303_v13  ;;  %vm6623_vm1 = vmpackc.low %vm863_vm10, %vm847_vm9  ;;  %vm576_vm9 = vcmp.eq.s32.totalorder %v7589_v19, %v7977_v51  ;;  %vm527_vm14 = vcmp.eq.s32.totalorder %v7624_v22, %v7964_v50 }
  0x8f   : > { %6624 = vmatpush.bf16.msk.msra.mxu1 %vm6623_vm1, %v7303_v13  ;;  %vm6639_vm4 = vmpackc.low %vm608_vm13, %vm592_vm12  ;;  %vm832_vm12 = vcmp.eq.s32.totalorder %v7600_v21, %v7977_v51  ;;  %vm783_vm1 = vcmp.eq.s32.totalorder %v7635_v24, %v7964_v50 }
  0x90   : > { %6640 = vmatpush.bf16.msk.msra.mxu2 %vm6639_vm4, %v7303_v13  ;;  %vm6655_vm7 = vmpackc.low %vm864_vm0, %vm848_vm15  ;;  %vm543_vm15 = vcmp.eq.s32.totalorder %v7627_v23, %v7964_v50  ;;  %vm528_vm4 = vcmp.eq.s32.totalorder %v7624_v22, %v7977_v51 }
  0x91   : > { %6656 = vmatpush.bf16.msk.msra.mxu3 %vm6655_vm7, %v7303_v13  ;;  %vm6609_vm10 = vmpackc.low %vm575_vm3, %vm559_vm2  ;;  %vm799_vm2 = vcmp.eq.s32.totalorder %v7638_v25, %v7964_v50  ;;  %vm784_vm7 = vcmp.eq.s32.totalorder %v7635_v24, %v7977_v51 }
  0x92   : > { %6610 = vmatpush.bf16.msk.msra.mxu0 %vm6609_vm10, %v7303_v13  ;;  %vm6625_vm13 = vmpackc.low %vm831_vm6, %vm815_vm5  ;;  %vm544_vm5 = vcmp.eq.s32.totalorder %v7627_v23, %v7977_v51  ;;  %vm495_vm10 = vcmp.eq.s32.totalorder %v7662_v26, %v7964_v50 }
  0x93   : > { %6626 = vmatpush.bf16.msk.msra.mxu1 %vm6625_vm13, %v7303_v13  ;;  %vm6641_vm0 = vmpackc.low %vm576_vm9, %vm560_vm8  ;;  %vm800_vm8 = vcmp.eq.s32.totalorder %v7638_v25, %v7977_v51  ;;  %vm751_vm13 = vcmp.eq.s32.totalorder %v7673_v28, %v7964_v50 }
  0x94   : > { %6642 = vmatpush.bf16.msk.msra.mxu2 %vm6641_vm0, %v7303_v13  ;;  %vm6657_vm3 = vmpackc.low %vm832_vm12, %vm816_vm11  ;;  %vm511_vm11 = vcmp.eq.s32.totalorder %v7665_v27, %v7964_v50  ;;  %vm496_vm0 = vcmp.eq.s32.totalorder %v7662_v26, %v7977_v51 }
  0x95   : > { %6658 = vmatpush.bf16.msk.msra.mxu3 %vm6657_vm3, %v7303_v13  ;;  %vm6611_vm6 = vmpackc.low %vm543_vm15, %vm527_vm14  ;;  %2324 = vmatmul.bf16.gmra.mxu0 %v7890_v48  ;;  %vm767_vm14 = vcmp.eq.s32.totalorder %v7676_v29, %v7964_v50  ;;  %vm752_vm3 = vcmp.eq.s32.totalorder %v7673_v28, %v7977_v51 }
  0x96   : > { %6612 = vmatpush.bf16.msk.msra.mxu0 %vm6611_vm6, %v7303_v13  ;;  %vm6627_vm9 = vmpackc.low %vm799_vm2, %vm783_vm1  ;;  %2342 = vmatmul.bf16.gmra.mxu1 %v7897_v49  ;;  %vm512_vm1 = vcmp.eq.s32.totalorder %v7665_v27, %v7977_v51  ;;  %vm463_vm6 = vcmp.eq.s32.totalorder %v7700_v30, %v7964_v50 }
  0x97   : > { %6628 = vmatpush.bf16.msk.msra.mxu1 %vm6627_vm9, %v7303_v13  ;;  %vm6643_vm12 = vmpackc.low %vm544_vm5, %vm528_vm4  ;;  %2360 = vmatmul.bf16.gmra.mxu2 %v7890_v48  ;;  %vm768_vm4 = vcmp.eq.s32.totalorder %v7676_v29, %v7977_v51  ;;  %vm719_vm9 = vcmp.eq.s32.totalorder %v7711_v32, %v7964_v50 }
  0x98   : > { %6644 = vmatpush.bf16.msk.msra.mxu2 %vm6643_vm12, %v7303_v13  ;;  %vm6659_vm15 = vmpackc.low %vm800_vm8, %vm784_vm7  ;;  %2378 = vmatmul.bf16.gmra.mxu3 %v7897_v49  ;;  %vm479_vm7 = vcmp.eq.s32.totalorder %v7703_v31, %v7964_v50  ;;  %vm464_vm12 = vcmp.eq.s32.totalorder %v7700_v30, %v7977_v51 }
  0x99   : > { %6660 = vmatpush.bf16.msk.msra.mxu3 %vm6659_vm15, %v7303_v13  ;;  %vm6613_vm2 = vmpackc.low %vm511_vm11, %vm495_vm10  ;;  %vm735_vm10 = vcmp.eq.s32.totalorder %v7714_v33, %v7964_v50  ;;  %vm720_vm15 = vcmp.eq.s32.totalorder %v7711_v32, %v7977_v51 }
  0x9a   : > { %6614 = vmatpush.bf16.msk.msra.mxu0 %vm6613_vm2, %v7303_v13  ;;  %vm6629_vm5 = vmpackc.low %vm767_vm14, %vm751_vm13  ;;  %vm480_vm13 = vcmp.eq.s32.totalorder %v7703_v31, %v7977_v51  ;;  %vm431_vm2 = vcmp.eq.s32.totalorder %v7480_v1, %v7964_v50 }
  0x9b   : > { %6630 = vmatpush.bf16.msk.msra.mxu1 %vm6629_vm5, %v7303_v13  ;;  %vm6645_vm8 = vmpackc.low %vm512_vm1, %vm496_vm0  ;;  %vm736_vm0 = vcmp.eq.s32.totalorder %v7714_v33, %v7977_v51  ;;  %vm687_vm5 = vcmp.eq.s32.totalorder %v7746_v35, %v7964_v50 }
  0x9c   : > { %6646 = vmatpush.bf16.msk.msra.mxu2 %vm6645_vm8, %v7303_v13  ;;  %vm6661_vm11 = vmpackc.low %vm768_vm4, %vm752_vm3  ;;  %vm447_vm3 = vcmp.eq.s32.totalorder %v7738_v34, %v7964_v50  ;;  %vm432_vm8 = vcmp.eq.s32.totalorder %v7480_v1, %v7977_v51 }
  0x9d   : > { %6662 = vmatpush.bf16.msk.msra.mxu3 %vm6661_vm11, %v7303_v13  ;;  %vm6615_vm14 = vmpackc.low %vm479_vm7, %vm463_vm6  ;;  %vm703_vm6 = vcmp.eq.s32.totalorder %v7749_v36, %v7964_v50  ;;  %vm688_vm11 = vcmp.eq.s32.totalorder %v7746_v35, %v7977_v51 }
  0x9e   : > { %6616 = vmatpush.bf16.msk.msra.mxu0 %vm6615_vm14, %v7303_v13  ;;  %vm6631_vm1 = vmpackc.low %vm735_vm10, %vm719_vm9  ;;  %vm448_vm9 = vcmp.eq.s32.totalorder %v7738_v34, %v7977_v51  ;;  %vm657_vm14 = vcmp.eq.s32.totalorder %v7491_v2, %v8138_v52 }
  0x9f   : > { %6632 = vmatpush.bf16.msk.msra.mxu1 %vm6631_vm1, %v7303_v13  ;;  %vm6647_vm4 = vmpackc.low %vm480_vm13, %vm464_vm12  ;;  %vm704_vm12 = vcmp.eq.s32.totalorder %v7749_v36, %v7977_v51  ;;  %vm913_vm1 = vcmp.eq.s32.totalorder %v7497_v4, %v8138_v52 }
  0xa0   : > { %6648 = vmatpush.bf16.msk.msra.mxu2 %vm6647_vm4, %v7303_v13  ;;  %vm6663_vm7 = vmpackc.low %vm736_vm0, %vm720_vm15  ;;  %vm673_vm15 = vcmp.eq.s32.totalorder %v7494_v3, %v8138_v52  ;;  %vm658_vm4 = vcmp.eq.s32.totalorder %v7491_v2, %v8151_v53 }
  0xa1   : > { %6664 = vmatpush.bf16.msk.msra.mxu3 %vm6663_vm7, %v7303_v13  ;;  %vm6617_vm10 = vmpackc.low %vm447_vm3, %vm431_vm2  ;;  %vm929_vm2 = vcmp.eq.s32.totalorder %v7500_v5, %v8138_v52  ;;  %vm914_vm7 = vcmp.eq.s32.totalorder %v7497_v4, %v8151_v53 }
  0xa2   : > { %6618 = vmatpush.bf16.msk.msra.mxu0 %vm6617_vm10, %v7303_v13  ;;  %vm6633_vm13 = vmpackc.low %vm703_vm6, %vm687_vm5  ;;  %vm674_vm5 = vcmp.eq.s32.totalorder %v7494_v3, %v8151_v53  ;;  %vm625_vm10 = vcmp.eq.s32.totalorder %v7512_v9, %v8138_v52 }
  0xa3   : > { %6634 = vmatpush.bf16.msk.msra.mxu1 %vm6633_vm13, %v7303_v13  ;;  %vm6649_vm0 = vmpackc.low %vm448_vm9, %vm432_vm8  ;;  %vm930_vm8 = vcmp.eq.s32.totalorder %v7500_v5, %v8151_v53  ;;  %vm881_vm13 = vcmp.eq.s32.totalorder %v7518_v11, %v8138_v52 }
  0xa4   : > { %6650 = vmatpush.bf16.msk.msra.mxu2 %vm6649_vm0, %v7303_v13  ;;  %vm6665_vm3 = vmpackc.low %vm704_vm12, %vm688_vm11  ;;  %vm641_vm11 = vcmp.eq.s32.totalorder %v7515_v10, %v8138_v52  ;;  %vm626_vm0 = vcmp.eq.s32.totalorder %v7512_v9, %v8151_v53 }
  0xa5   : > { %6666 = vmatpush.bf16.msk.msra.mxu3 %vm6665_vm3, %v7303_v13  ;;  %vm6667_vm6 = vmpackc.low %vm673_vm15, %vm657_vm14  ;;  %2391 = vmatmul.bf16.vlgmr.msra.gmra.mxu0 %v7799_v43  ;;  %vm897_vm14 = vcmp.eq.s32.totalorder %v7521_v12, %v8138_v52  ;;  %vm882_vm3 = vcmp.eq.s32.totalorder %v7518_v11, %v8151_v53 }
  0xa6   : > { %6668 = vmatpush.bf16.msk.msrb.mxu0 %vm6667_vm6, %v7303_v13  ;;  %vm6683_vm9 = vmpackc.low %vm929_vm2, %vm913_vm1  ;;  %2409 = vmatmul.bf16.vlgmr.msra.gmra.mxu1 %v7809_v44  ;;  %vm642_vm1 = vcmp.eq.s32.totalorder %v7515_v10, %v8151_v53  ;;  %vm593_vm6 = vcmp.eq.s32.totalorder %v7545_v14, %v8138_v52 }
  0xa7   : > { %6684 = vmatpush.bf16.msk.msrb.mxu1 %vm6683_vm9, %v7303_v13  ;;  %vm6699_vm12 = vmpackc.low %vm674_vm5, %vm658_vm4  ;;  %2427 = vmatmul.bf16.vlgmr.msra.gmra.mxu2 %v7799_v43  ;;  %vm898_vm4 = vcmp.eq.s32.totalorder %v7521_v12, %v8151_v53  ;;  %vm849_vm9 = vcmp.eq.s32.totalorder %v7556_v16, %v8138_v52 }
  0xa8   : > { %6700 = vmatpush.bf16.msk.msrb.mxu2 %vm6699_vm12, %v7303_v13  ;;  %vm6715_vm15 = vmpackc.low %vm930_vm8, %vm914_vm7  ;;  %2445 = vmatmul.bf16.vlgmr.msra.gmra.mxu3 %v7809_v44  ;;  %vm609_vm7 = vcmp.eq.s32.totalorder %v7548_v15, %v8138_v52  ;;  %vm594_vm12 = vcmp.eq.s32.totalorder %v7545_v14, %v8151_v53 }
  0xa9   : > { %6716 = vmatpush.bf16.msk.msrb.mxu3 %vm6715_vm15, %v7303_v13  ;;  %vm6669_vm2 = vmpackc.low %vm641_vm11, %vm625_vm10  ;;  %vm865_vm10 = vcmp.eq.s32.totalorder %v7559_v17, %v8138_v52  ;;  %vm850_vm15 = vcmp.eq.s32.totalorder %v7556_v16, %v8151_v53 }
  0xaa   : > { %6670 = vmatpush.bf16.msk.msrb.mxu0 %vm6669_vm2, %v7303_v13  ;;  %vm6685_vm5 = vmpackc.low %vm897_vm14, %vm881_vm13  ;;  %vm610_vm13 = vcmp.eq.s32.totalorder %v7548_v15, %v8151_v53  ;;  %vm561_vm2 = vcmp.eq.s32.totalorder %v7586_v18, %v8138_v52 }
  0xab   : > { %6686 = vmatpush.bf16.msk.msrb.mxu1 %vm6685_vm5, %v7303_v13  ;;  %vm6701_vm8 = vmpackc.low %vm642_vm1, %vm626_vm0  ;;  %vm866_vm0 = vcmp.eq.s32.totalorder %v7559_v17, %v8151_v53  ;;  %vm817_vm5 = vcmp.eq.s32.totalorder %v7597_v20, %v8138_v52 }
  0xac   : > { %6702 = vmatpush.bf16.msk.msrb.mxu2 %vm6701_vm8, %v7303_v13  ;;  %vm6717_vm11 = vmpackc.low %vm898_vm4, %vm882_vm3  ;;  %vm577_vm3 = vcmp.eq.s32.totalorder %v7589_v19, %v8138_v52  ;;  %vm562_vm8 = vcmp.eq.s32.totalorder %v7586_v18, %v8151_v53 }
  0xad   : > { %6718 = vmatpush.bf16.msk.msrb.mxu3 %vm6717_vm11, %v7303_v13  ;;  %vm6671_vm14 = vmpackc.low %vm609_vm7, %vm593_vm6  ;;  %vm833_vm6 = vcmp.eq.s32.totalorder %v7600_v21, %v8138_v52  ;;  %vm818_vm11 = vcmp.eq.s32.totalorder %v7597_v20, %v8151_v53 }
  0xae   : > { %6672 = vmatpush.bf16.msk.msrb.mxu0 %vm6671_vm14, %v7303_v13  ;;  %vm6687_vm1 = vmpackc.low %vm865_vm10, %vm849_vm9  ;;  %vm578_vm9 = vcmp.eq.s32.totalorder %v7589_v19, %v8151_v53  ;;  %vm529_vm14 = vcmp.eq.s32.totalorder %v7624_v22, %v8138_v52 }
  0xaf   : > { %6688 = vmatpush.bf16.msk.msrb.mxu1 %vm6687_vm1, %v7303_v13  ;;  %vm6703_vm4 = vmpackc.low %vm610_vm13, %vm594_vm12  ;;  %vm834_vm12 = vcmp.eq.s32.totalorder %v7600_v21, %v8151_v53  ;;  %vm785_vm1 = vcmp.eq.s32.totalorder %v7635_v24, %v8138_v52 }
  0xb0   : > { %6704 = vmatpush.bf16.msk.msrb.mxu2 %vm6703_vm4, %v7303_v13  ;;  %vm6719_vm7 = vmpackc.low %vm866_vm0, %vm850_vm15  ;;  %vm545_vm15 = vcmp.eq.s32.totalorder %v7627_v23, %v8138_v52  ;;  %vm530_vm4 = vcmp.eq.s32.totalorder %v7624_v22, %v8151_v53 }
  0xb1   : > { %6720 = vmatpush.bf16.msk.msrb.mxu3 %vm6719_vm7, %v7303_v13  ;;  %vm6673_vm10 = vmpackc.low %vm577_vm3, %vm561_vm2  ;;  %vm801_vm2 = vcmp.eq.s32.totalorder %v7638_v25, %v8138_v52  ;;  %vm786_vm7 = vcmp.eq.s32.totalorder %v7635_v24, %v8151_v53 }
  0xb2   : > { %6674 = vmatpush.bf16.msk.msrb.mxu0 %vm6673_vm10, %v7303_v13  ;;  %vm6689_vm13 = vmpackc.low %vm833_vm6, %vm817_vm5  ;;  %vm546_vm5 = vcmp.eq.s32.totalorder %v7627_v23, %v8151_v53  ;;  %vm497_vm10 = vcmp.eq.s32.totalorder %v7662_v26, %v8138_v52 }
  0xb3   : > { %6690 = vmatpush.bf16.msk.msrb.mxu1 %vm6689_vm13, %v7303_v13  ;;  %vm6705_vm0 = vmpackc.low %vm578_vm9, %vm562_vm8  ;;  %vm802_vm8 = vcmp.eq.s32.totalorder %v7638_v25, %v8151_v53  ;;  %vm753_vm13 = vcmp.eq.s32.totalorder %v7673_v28, %v8138_v52 }
  0xb4   : > { %6706 = vmatpush.bf16.msk.msrb.mxu2 %vm6705_vm0, %v7303_v13  ;;  %vm6721_vm3 = vmpackc.low %vm834_vm12, %vm818_vm11  ;;  %vm513_vm11 = vcmp.eq.s32.totalorder %v7665_v27, %v8138_v52  ;;  %vm498_vm0 = vcmp.eq.s32.totalorder %v7662_v26, %v8151_v53 }
  0xb5   : > { %6722 = vmatpush.bf16.msk.msrb.mxu3 %vm6721_vm3, %v7303_v13  ;;  %vm6675_vm6 = vmpackc.low %vm545_vm15, %vm529_vm14  ;;  %2396 = vmatmul.bf16.gmra.mxu0 %v7890_v48  ;;  %vm769_vm14 = vcmp.eq.s32.totalorder %v7676_v29, %v8138_v52  ;;  %vm754_vm3 = vcmp.eq.s32.totalorder %v7673_v28, %v8151_v53 }
  0xb6   : > { %6676 = vmatpush.bf16.msk.msrb.mxu0 %vm6675_vm6, %v7303_v13  ;;  %vm6691_vm9 = vmpackc.low %vm801_vm2, %vm785_vm1  ;;  %2414 = vmatmul.bf16.gmra.mxu1 %v7897_v49  ;;  %vm514_vm1 = vcmp.eq.s32.totalorder %v7665_v27, %v8151_v53  ;;  %vm465_vm6 = vcmp.eq.s32.totalorder %v7700_v30, %v8138_v52 }
  0xb7   : > { %6692 = vmatpush.bf16.msk.msrb.mxu1 %vm6691_vm9, %v7303_v13  ;;  %vm6707_vm12 = vmpackc.low %vm546_vm5, %vm530_vm4  ;;  %2432 = vmatmul.bf16.gmra.mxu2 %v7890_v48  ;;  %vm770_vm4 = vcmp.eq.s32.totalorder %v7676_v29, %v8151_v53  ;;  %vm721_vm9 = vcmp.eq.s32.totalorder %v7711_v32, %v8138_v52 }
  0xb8   : > { %6708 = vmatpush.bf16.msk.msrb.mxu2 %vm6707_vm12, %v7303_v13  ;;  %vm6723_vm15 = vmpackc.low %vm802_vm8, %vm786_vm7  ;;  %2450 = vmatmul.bf16.gmra.mxu3 %v7897_v49  ;;  %vm481_vm7 = vcmp.eq.s32.totalorder %v7703_v31, %v8138_v52  ;;  %vm466_vm12 = vcmp.eq.s32.totalorder %v7700_v30, %v8151_v53 }
  0xb9   : > { %6724 = vmatpush.bf16.msk.msrb.mxu3 %vm6723_vm15, %v7303_v13  ;;  %vm6677_vm2 = vmpackc.low %vm513_vm11, %vm497_vm10  ;;  %vm737_vm10 = vcmp.eq.s32.totalorder %v7714_v33, %v8138_v52  ;;  %vm722_vm15 = vcmp.eq.s32.totalorder %v7711_v32, %v8151_v53 }
  0xba   : > { %6678 = vmatpush.bf16.msk.msrb.mxu0 %vm6677_vm2, %v7303_v13  ;;  %vm6693_vm5 = vmpackc.low %vm769_vm14, %vm753_vm13  ;;  %vm482_vm13 = vcmp.eq.s32.totalorder %v7703_v31, %v8151_v53  ;;  %vm433_vm2 = vcmp.eq.s32.totalorder %v7480_v1, %v8138_v52 }
  0xbb   : > { %6694 = vmatpush.bf16.msk.msrb.mxu1 %vm6693_vm5, %v7303_v13  ;;  %vm6709_vm8 = vmpackc.low %vm514_vm1, %vm498_vm0  ;;  %vm738_vm0 = vcmp.eq.s32.totalorder %v7714_v33, %v8151_v53  ;;  %vm689_vm5 = vcmp.eq.s32.totalorder %v7746_v35, %v8138_v52 }
  0xbc   : > { %6710 = vmatpush.bf16.msk.msrb.mxu2 %vm6709_vm8, %v7303_v13  ;;  %vm6725_vm11 = vmpackc.low %vm770_vm4, %vm754_vm3  ;;  %vm449_vm3 = vcmp.eq.s32.totalorder %v7738_v34, %v8138_v52  ;;  %vm434_vm8 = vcmp.eq.s32.totalorder %v7480_v1, %v8151_v53 }
  0xbd   : > { %6726 = vmatpush.bf16.msk.msrb.mxu3 %vm6725_vm11, %v7303_v13  ;;  %vm6679_vm14 = vmpackc.low %vm481_vm7, %vm465_vm6  ;;  %vm705_vm6 = vcmp.eq.s32.totalorder %v7749_v36, %v8138_v52  ;;  %vm690_vm11 = vcmp.eq.s32.totalorder %v7746_v35, %v8151_v53  ;;  %v8714_v52 = vperm.slane %v8292_v54, 4 }
  0xbe   : > { %6680 = vmatpush.bf16.msk.msrb.mxu0 %vm6679_vm14, %v7303_v13  ;;  %vm6695_vm1 = vmpackc.low %vm737_vm10, %vm721_vm9  ;;  %vm450_vm9 = vcmp.eq.s32.totalorder %v7738_v34, %v8151_v53  ;;  %vm659_vm14 = vcmp.eq.s32.totalorder %v7491_v2, %v8315_v55 }
  0xbf   : > { %6696 = vmatpush.bf16.msk.msrb.mxu1 %vm6695_vm1, %v7303_v13  ;;  %vm6711_vm4 = vmpackc.low %vm482_vm13, %vm466_vm12  ;;  %vm706_vm12 = vcmp.eq.s32.totalorder %v7749_v36, %v8151_v53  ;;  %vm915_vm1 = vcmp.eq.s32.totalorder %v7497_v4, %v8315_v55  ;;  %v8727_v53 = vperm.slane %v8292_v54, 5 }
  0xc0   : > { %6712 = vmatpush.bf16.msk.msrb.mxu2 %vm6711_vm4, %v7303_v13  ;;  %vm6727_vm7 = vmpackc.low %vm738_vm0, %vm722_vm15  ;;  %vm675_vm15 = vcmp.eq.s32.totalorder %v7494_v3, %v8315_v55  ;;  %vm660_vm4 = vcmp.eq.s32.totalorder %v7491_v2, %v8328_v56 }
  0xc1   : > { %6728 = vmatpush.bf16.msk.msrb.mxu3 %vm6727_vm7, %v7303_v13  ;;  %vm6681_vm10 = vmpackc.low %vm449_vm3, %vm433_vm2  ;;  %vm931_vm2 = vcmp.eq.s32.totalorder %v7500_v5, %v8315_v55  ;;  %vm916_vm7 = vcmp.eq.s32.totalorder %v7497_v4, %v8328_v56 }
  0xc2   : > { %6682 = vmatpush.bf16.msk.msrb.mxu0 %vm6681_vm10, %v7303_v13  ;;  %vm6697_vm13 = vmpackc.low %vm705_vm6, %vm689_vm5  ;;  %vm676_vm5 = vcmp.eq.s32.totalorder %v7494_v3, %v8328_v56  ;;  %vm627_vm10 = vcmp.eq.s32.totalorder %v7512_v9, %v8315_v55 }
  0xc3   : > { %6698 = vmatpush.bf16.msk.msrb.mxu1 %vm6697_vm13, %v7303_v13  ;;  %vm6713_vm0 = vmpackc.low %vm450_vm9, %vm434_vm8  ;;  %vm932_vm8 = vcmp.eq.s32.totalorder %v7500_v5, %v8328_v56  ;;  %vm883_vm13 = vcmp.eq.s32.totalorder %v7518_v11, %v8315_v55 }
  0xc4   : > { %6714 = vmatpush.bf16.msk.msrb.mxu2 %vm6713_vm0, %v7303_v13  ;;  %vm6729_vm3 = vmpackc.low %vm706_vm12, %vm690_vm11  ;;  %vm643_vm11 = vcmp.eq.s32.totalorder %v7515_v10, %v8315_v55  ;;  %vm628_vm0 = vcmp.eq.s32.totalorder %v7512_v9, %v8328_v56 }
  0xc5   : > { %6730 = vmatpush.bf16.msk.msrb.mxu3 %vm6729_vm3, %v7303_v13  ;;  %vm6731_vm6 = vmpackc.low %vm675_vm15, %vm659_vm14  ;;  %2463 = vmatmul.bf16.vlgmr.msrb.gmra.mxu0 %v7799_v43  ;;  %vm899_vm14 = vcmp.eq.s32.totalorder %v7521_v12, %v8315_v55  ;;  %vm884_vm3 = vcmp.eq.s32.totalorder %v7518_v11, %v8328_v56 }
  0xc6   : > { %6732 = vmatpush.bf16.msk.msra.mxu0 %vm6731_vm6, %v7303_v13  ;;  %vm6747_vm9 = vmpackc.low %vm931_vm2, %vm915_vm1  ;;  %2481 = vmatmul.bf16.vlgmr.msrb.gmra.mxu1 %v7809_v44  ;;  %vm644_vm1 = vcmp.eq.s32.totalorder %v7515_v10, %v8328_v56  ;;  %vm595_vm6 = vcmp.eq.s32.totalorder %v7545_v14, %v8315_v55 }
  0xc7   : > { %6748 = vmatpush.bf16.msk.msra.mxu1 %vm6747_vm9, %v7303_v13  ;;  %vm6763_vm12 = vmpackc.low %vm676_vm5, %vm660_vm4  ;;  %2499 = vmatmul.bf16.vlgmr.msrb.gmra.mxu2 %v7799_v43  ;;  %vm900_vm4 = vcmp.eq.s32.totalorder %v7521_v12, %v8328_v56  ;;  %vm851_vm9 = vcmp.eq.s32.totalorder %v7556_v16, %v8315_v55 }
  0xc8   : > { %6764 = vmatpush.bf16.msk.msra.mxu2 %vm6763_vm12, %v7303_v13  ;;  %vm6779_vm15 = vmpackc.low %vm932_vm8, %vm916_vm7  ;;  %2517 = vmatmul.bf16.vlgmr.msrb.gmra.mxu3 %v7809_v44  ;;  %vm611_vm7 = vcmp.eq.s32.totalorder %v7548_v15, %v8315_v55  ;;  %vm596_vm12 = vcmp.eq.s32.totalorder %v7545_v14, %v8328_v56 }
  0xc9   : > { %6780 = vmatpush.bf16.msk.msra.mxu3 %vm6779_vm15, %v7303_v13  ;;  %vm6733_vm2 = vmpackc.low %vm643_vm11, %vm627_vm10  ;;  %vm867_vm10 = vcmp.eq.s32.totalorder %v7559_v17, %v8315_v55  ;;  %vm852_vm15 = vcmp.eq.s32.totalorder %v7556_v16, %v8328_v56 }
  0xca   : > { %6734 = vmatpush.bf16.msk.msra.mxu0 %vm6733_vm2, %v7303_v13  ;;  %vm6749_vm5 = vmpackc.low %vm899_vm14, %vm883_vm13  ;;  %vm612_vm13 = vcmp.eq.s32.totalorder %v7548_v15, %v8328_v56  ;;  %vm563_vm2 = vcmp.eq.s32.totalorder %v7586_v18, %v8315_v55 }
  0xcb   : > { %6750 = vmatpush.bf16.msk.msra.mxu1 %vm6749_vm5, %v7303_v13  ;;  %vm6765_vm8 = vmpackc.low %vm644_vm1, %vm628_vm0  ;;  %vm868_vm0 = vcmp.eq.s32.totalorder %v7559_v17, %v8328_v56  ;;  %vm819_vm5 = vcmp.eq.s32.totalorder %v7597_v20, %v8315_v55 }
  0xcc   : > { %6766 = vmatpush.bf16.msk.msra.mxu2 %vm6765_vm8, %v7303_v13  ;;  %vm6781_vm11 = vmpackc.low %vm900_vm4, %vm884_vm3  ;;  %vm579_vm3 = vcmp.eq.s32.totalorder %v7589_v19, %v8315_v55  ;;  %vm564_vm8 = vcmp.eq.s32.totalorder %v7586_v18, %v8328_v56 }
  0xcd   : > { %6782 = vmatpush.bf16.msk.msra.mxu3 %vm6781_vm11, %v7303_v13  ;;  %vm6735_vm14 = vmpackc.low %vm611_vm7, %vm595_vm6  ;;  %vm835_vm6 = vcmp.eq.s32.totalorder %v7600_v21, %v8315_v55  ;;  %vm820_vm11 = vcmp.eq.s32.totalorder %v7597_v20, %v8328_v56 }
  0xce   : > { %6736 = vmatpush.bf16.msk.msra.mxu0 %vm6735_vm14, %v7303_v13  ;;  %vm6751_vm1 = vmpackc.low %vm867_vm10, %vm851_vm9  ;;  %vm580_vm9 = vcmp.eq.s32.totalorder %v7589_v19, %v8328_v56  ;;  %vm531_vm14 = vcmp.eq.s32.totalorder %v7624_v22, %v8315_v55 }
  0xcf   : > { %6752 = vmatpush.bf16.msk.msra.mxu1 %vm6751_vm1, %v7303_v13  ;;  %vm6767_vm4 = vmpackc.low %vm612_vm13, %vm596_vm12  ;;  %vm836_vm12 = vcmp.eq.s32.totalorder %v7600_v21, %v8328_v56  ;;  %vm787_vm1 = vcmp.eq.s32.totalorder %v7635_v24, %v8315_v55 }
  0xd0   : > { %6768 = vmatpush.bf16.msk.msra.mxu2 %vm6767_vm4, %v7303_v13  ;;  %vm6783_vm7 = vmpackc.low %vm868_vm0, %vm852_vm15  ;;  %vm547_vm15 = vcmp.eq.s32.totalorder %v7627_v23, %v8315_v55  ;;  %vm532_vm4 = vcmp.eq.s32.totalorder %v7624_v22, %v8328_v56 }
  0xd1   : > { %6784 = vmatpush.bf16.msk.msra.mxu3 %vm6783_vm7, %v7303_v13  ;;  %vm6737_vm10 = vmpackc.low %vm579_vm3, %vm563_vm2  ;;  %vm803_vm2 = vcmp.eq.s32.totalorder %v7638_v25, %v8315_v55  ;;  %vm788_vm7 = vcmp.eq.s32.totalorder %v7635_v24, %v8328_v56 }
  0xd2   : > { %6738 = vmatpush.bf16.msk.msra.mxu0 %vm6737_vm10, %v7303_v13  ;;  %vm6753_vm13 = vmpackc.low %vm835_vm6, %vm819_vm5  ;;  %vm548_vm5 = vcmp.eq.s32.totalorder %v7627_v23, %v8328_v56  ;;  %vm499_vm10 = vcmp.eq.s32.totalorder %v7662_v26, %v8315_v55 }
  0xd3   : > { %6754 = vmatpush.bf16.msk.msra.mxu1 %vm6753_vm13, %v7303_v13  ;;  %vm6769_vm0 = vmpackc.low %vm580_vm9, %vm564_vm8  ;;  %vm804_vm8 = vcmp.eq.s32.totalorder %v7638_v25, %v8328_v56  ;;  %vm755_vm13 = vcmp.eq.s32.totalorder %v7673_v28, %v8315_v55 }
  0xd4   : > { %6770 = vmatpush.bf16.msk.msra.mxu2 %vm6769_vm0, %v7303_v13  ;;  %vm6785_vm3 = vmpackc.low %vm836_vm12, %vm820_vm11  ;;  %vm515_vm11 = vcmp.eq.s32.totalorder %v7665_v27, %v8315_v55  ;;  %vm500_vm0 = vcmp.eq.s32.totalorder %v7662_v26, %v8328_v56 }
  0xd5   : > { %6786 = vmatpush.bf16.msk.msra.mxu3 %vm6785_vm3, %v7303_v13  ;;  %vm6739_vm6 = vmpackc.low %vm547_vm15, %vm531_vm14  ;;  %2468 = vmatmul.bf16.gmra.mxu0 %v7890_v48  ;;  %vm771_vm14 = vcmp.eq.s32.totalorder %v7676_v29, %v8315_v55  ;;  %vm756_vm3 = vcmp.eq.s32.totalorder %v7673_v28, %v8328_v56 }
  0xd6   : > { %6740 = vmatpush.bf16.msk.msra.mxu0 %vm6739_vm6, %v7303_v13  ;;  %vm6755_vm9 = vmpackc.low %vm803_vm2, %vm787_vm1  ;;  %2486 = vmatmul.bf16.gmra.mxu1 %v7897_v49  ;;  %vm516_vm1 = vcmp.eq.s32.totalorder %v7665_v27, %v8328_v56  ;;  %vm467_vm6 = vcmp.eq.s32.totalorder %v7700_v30, %v8315_v55 }
  0xd7   : > { %6756 = vmatpush.bf16.msk.msra.mxu1 %vm6755_vm9, %v7303_v13  ;;  %vm6771_vm12 = vmpackc.low %vm548_vm5, %vm532_vm4  ;;  %2504 = vmatmul.bf16.gmra.mxu2 %v7890_v48  ;;  %vm772_vm4 = vcmp.eq.s32.totalorder %v7676_v29, %v8328_v56  ;;  %vm723_vm9 = vcmp.eq.s32.totalorder %v7711_v32, %v8315_v55 }
  0xd8   : > { %6772 = vmatpush.bf16.msk.msra.mxu2 %vm6771_vm12, %v7303_v13  ;;  %vm6787_vm15 = vmpackc.low %vm804_vm8, %vm788_vm7  ;;  %2522 = vmatmul.bf16.gmra.mxu3 %v7897_v49  ;;  %vm483_vm7 = vcmp.eq.s32.totalorder %v7703_v31, %v8315_v55  ;;  %vm468_vm12 = vcmp.eq.s32.totalorder %v7700_v30, %v8328_v56 }
  0xd9   : > { %6788 = vmatpush.bf16.msk.msra.mxu3 %vm6787_vm15, %v7303_v13  ;;  %vm6741_vm2 = vmpackc.low %vm515_vm11, %vm499_vm10  ;;  %vm739_vm10 = vcmp.eq.s32.totalorder %v7714_v33, %v8315_v55  ;;  %vm724_vm15 = vcmp.eq.s32.totalorder %v7711_v32, %v8328_v56 }
  0xda   : > { %6742 = vmatpush.bf16.msk.msra.mxu0 %vm6741_vm2, %v7303_v13  ;;  %vm6757_vm5 = vmpackc.low %vm771_vm14, %vm755_vm13  ;;  %vm484_vm13 = vcmp.eq.s32.totalorder %v7703_v31, %v8328_v56  ;;  %vm435_vm2 = vcmp.eq.s32.totalorder %v7480_v1, %v8315_v55 }
  0xdb   : > { %6758 = vmatpush.bf16.msk.msra.mxu1 %vm6757_vm5, %v7303_v13  ;;  %vm6773_vm8 = vmpackc.low %vm516_vm1, %vm500_vm0  ;;  %vm740_vm0 = vcmp.eq.s32.totalorder %v7714_v33, %v8328_v56  ;;  %vm691_vm5 = vcmp.eq.s32.totalorder %v7746_v35, %v8315_v55 }
  0xdc   : > { %6774 = vmatpush.bf16.msk.msra.mxu2 %vm6773_vm8, %v7303_v13  ;;  %vm6789_vm11 = vmpackc.low %vm772_vm4, %vm756_vm3  ;;  %vm451_vm3 = vcmp.eq.s32.totalorder %v7738_v34, %v8315_v55  ;;  %vm436_vm8 = vcmp.eq.s32.totalorder %v7480_v1, %v8328_v56 }
  0xdd   : > { %6790 = vmatpush.bf16.msk.msra.mxu3 %vm6789_vm11, %v7303_v13  ;;  %vm6743_vm14 = vmpackc.low %vm483_vm7, %vm467_vm6  ;;  %vm707_vm6 = vcmp.eq.s32.totalorder %v7749_v36, %v8315_v55  ;;  %vm692_vm11 = vcmp.eq.s32.totalorder %v7746_v35, %v8328_v56 }
  0xde   : > { %6744 = vmatpush.bf16.msk.msra.mxu0 %vm6743_vm14, %v7303_v13  ;;  %vm6759_vm1 = vmpackc.low %vm739_vm10, %vm723_vm9  ;;  %vm452_vm9 = vcmp.eq.s32.totalorder %v7738_v34, %v8328_v56  ;;  %vm661_vm14 = vcmp.eq.s32.totalorder %v7491_v2, %v8489_v57 }
  0xdf   : > { %6760 = vmatpush.bf16.msk.msra.mxu1 %vm6759_vm1, %v7303_v13  ;;  %vm6775_vm4 = vmpackc.low %vm484_vm13, %vm468_vm12  ;;  %vm708_vm12 = vcmp.eq.s32.totalorder %v7749_v36, %v8328_v56  ;;  %vm917_vm1 = vcmp.eq.s32.totalorder %v7497_v4, %v8489_v57 }
  0xe0   : > { %6776 = vmatpush.bf16.msk.msra.mxu2 %vm6775_vm4, %v7303_v13  ;;  %vm6791_vm7 = vmpackc.low %vm740_vm0, %vm724_vm15  ;;  %vm677_vm15 = vcmp.eq.s32.totalorder %v7494_v3, %v8489_v57  ;;  %vm662_vm4 = vcmp.eq.s32.totalorder %v7491_v2, %v8502_v58 }
  0xe1   : > { %6792 = vmatpush.bf16.msk.msra.mxu3 %vm6791_vm7, %v7303_v13  ;;  %vm6745_vm10 = vmpackc.low %vm451_vm3, %vm435_vm2  ;;  %vm933_vm2 = vcmp.eq.s32.totalorder %v7500_v5, %v8489_v57  ;;  %vm918_vm7 = vcmp.eq.s32.totalorder %v7497_v4, %v8502_v58 }
  0xe2   : > { %6746 = vmatpush.bf16.msk.msra.mxu0 %vm6745_vm10, %v7303_v13  ;;  %vm6761_vm13 = vmpackc.low %vm707_vm6, %vm691_vm5  ;;  %v2248_v59 = vpop.f32.mrf.mxu0  ;;  %vm678_vm5 = vcmp.eq.s32.totalorder %v7494_v3, %v8502_v58  ;;  %vm629_vm10 = vcmp.eq.s32.totalorder %v7512_v9, %v8489_v57 }
  0xe3   : > { %6762 = vmatpush.bf16.msk.msra.mxu1 %vm6761_vm13, %v7303_v13  ;;  %vm6777_vm0 = vmpackc.low %vm452_vm9, %vm436_vm8  ;;  %v2266_v60 = vpop.f32.mrf.mxu1  ;;  %vm934_vm8 = vcmp.eq.s32.totalorder %v7500_v5, %v8502_v58  ;;  %vm885_vm13 = vcmp.eq.s32.totalorder %v7518_v11, %v8489_v57 }
  0xe4   : > { %6778 = vmatpush.bf16.msk.msra.mxu2 %vm6777_vm0, %v7303_v13  ;;  %vm6793_vm3 = vmpackc.low %vm708_vm12, %vm692_vm11  ;;  %v8524_v61 = vadd.f32 %v2266_v60, %v2248_v59  ;;  %vm645_vm11 = vcmp.eq.s32.totalorder %v7515_v10, %v8489_v57  ;;  %vm630_vm0 = vcmp.eq.s32.totalorder %v7512_v9, %v8502_v58 }
  0xe5   : > { %6794 = vmatpush.bf16.msk.msra.mxu3 %vm6793_vm3, %v7303_v13  ;;  %vm6795_vm6 = vmpackc.low %vm677_vm15, %vm661_vm14  ;;  %2535 = vmatmul.bf16.vlgmr.msra.gmra.mxu0 %v7799_v43  ;;  %vm901_vm14 = vcmp.eq.s32.totalorder %v7521_v12, %v8489_v57  ;;  %vm886_vm3 = vcmp.eq.s32.totalorder %v7518_v11, %v8502_v58 }
  0xe6   : > { %6796 = vmatpush.bf16.msk.msrb.mxu0 %vm6795_vm6, %v7303_v13  ;;  %vm6811_vm9 = vmpackc.low %vm933_vm2, %vm917_vm1  ;;  %2553 = vmatmul.bf16.vlgmr.msra.gmra.mxu1 %v7809_v44  ;;  %vm646_vm1 = vcmp.eq.s32.totalorder %v7515_v10, %v8502_v58  ;;  %vm597_vm6 = vcmp.eq.s32.totalorder %v7545_v14, %v8489_v57 }
  0xe7   : > { %6812 = vmatpush.bf16.msk.msrb.mxu1 %vm6811_vm9, %v7303_v13  ;;  %vm6827_vm12 = vmpackc.low %vm678_vm5, %vm662_vm4  ;;  %2571 = vmatmul.bf16.vlgmr.msra.gmra.mxu2 %v7799_v43  ;;  %vm902_vm4 = vcmp.eq.s32.totalorder %v7521_v12, %v8502_v58  ;;  %vm853_vm9 = vcmp.eq.s32.totalorder %v7556_v16, %v8489_v57 }
  0xe8   : > { %6828 = vmatpush.bf16.msk.msrb.mxu2 %vm6827_vm12, %v7303_v13  ;;  %vm6843_vm15 = vmpackc.low %vm934_vm8, %vm918_vm7  ;;  %2589 = vmatmul.bf16.vlgmr.msra.gmra.mxu3 %v7809_v44  ;;  %vm613_vm7 = vcmp.eq.s32.totalorder %v7548_v15, %v8489_v57  ;;  %vm598_vm12 = vcmp.eq.s32.totalorder %v7545_v14, %v8502_v58 }
  0xe9   : > { %6844 = vmatpush.bf16.msk.msrb.mxu3 %vm6843_vm15, %v7303_v13  ;;  %vm6797_vm2 = vmpackc.low %vm645_vm11, %vm629_vm10  ;;  %vm869_vm10 = vcmp.eq.s32.totalorder %v7559_v17, %v8489_v57  ;;  %vm854_vm15 = vcmp.eq.s32.totalorder %v7556_v16, %v8502_v58 }
  0xea   : > { %6798 = vmatpush.bf16.msk.msrb.mxu0 %vm6797_vm2, %v7303_v13  ;;  %vm6813_vm5 = vmpackc.low %vm901_vm14, %vm885_vm13  ;;  %v2284_v62 = vpop.f32.mrf.mxu2  ;;  %v2250_v63 = vpop.f32.mrf.mxu0  ;;  %vm614_vm13 = vcmp.eq.s32.totalorder %v7548_v15, %v8502_v58  ;;  %vm565_vm2 = vcmp.eq.s32.totalorder %v7586_v18, %v8489_v57 }
  0xeb   : > { %6814 = vmatpush.bf16.msk.msrb.mxu1 %vm6813_vm5, %v7303_v13  ;;  %vm6829_vm8 = vmpackc.low %vm646_vm1, %vm630_vm0  ;;  %v2302_v0 = vpop.f32.mrf.mxu3  ;;  %v2268_v6 = vpop.f32.mrf.mxu1  ;;  %vm870_vm0 = vcmp.eq.s32.totalorder %v7559_v17, %v8502_v58  ;;  %vm821_vm5 = vcmp.eq.s32.totalorder %v7597_v20, %v8489_v57 }
  0xec   : > { %6830 = vmatpush.bf16.msk.msrb.mxu2 %vm6829_vm8, %v7303_v13  ;;  %vm6845_vm11 = vmpackc.low %vm902_vm4, %vm886_vm3  ;;  %v8573_v7 = vadd.f32 %v2302_v0, %v2284_v62  ;;  %v8575_v8 = vadd.f32 %v2268_v6, %v2250_v63  ;;  %vm581_vm3 = vcmp.eq.s32.totalorder %v7589_v19, %v8489_v57  ;;  %vm566_vm8 = vcmp.eq.s32.totalorder %v7586_v18, %v8502_v58 }
  0xed   : > { %6846 = vmatpush.bf16.msk.msrb.mxu3 %vm6845_vm11, %v7303_v13  ;;  %vm6799_vm14 = vmpackc.low %vm613_vm7, %vm597_vm6  ;;  %vm837_vm6 = vcmp.eq.s32.totalorder %v7600_v21, %v8489_v57  ;;  %vm822_vm11 = vcmp.eq.s32.totalorder %v7597_v20, %v8502_v58 }
  0xee   : > { %6800 = vmatpush.bf16.msk.msrb.mxu0 %vm6799_vm14, %v7303_v13  ;;  %vm6815_vm1 = vmpackc.low %vm869_vm10, %vm853_vm9  ;;  %vm582_vm9 = vcmp.eq.s32.totalorder %v7589_v19, %v8502_v58  ;;  %vm533_vm14 = vcmp.eq.s32.totalorder %v7624_v22, %v8489_v57 }
  0xef   : > { %6816 = vmatpush.bf16.msk.msrb.mxu1 %vm6815_vm1, %v7303_v13  ;;  %vm6831_vm4 = vmpackc.low %vm614_vm13, %vm598_vm12  ;;  %vm838_vm12 = vcmp.eq.s32.totalorder %v7600_v21, %v8502_v58  ;;  %vm789_vm1 = vcmp.eq.s32.totalorder %v7635_v24, %v8489_v57 }
  0xf0   : > { %6832 = vmatpush.bf16.msk.msrb.mxu2 %vm6831_vm4, %v7303_v13  ;;  %vm6847_vm7 = vmpackc.low %vm870_vm0, %vm854_vm15  ;;  %vm549_vm15 = vcmp.eq.s32.totalorder %v7627_v23, %v8489_v57  ;;  %vm534_vm4 = vcmp.eq.s32.totalorder %v7624_v22, %v8502_v58 }
  0xf1   : > { %6848 = vmatpush.bf16.msk.msrb.mxu3 %vm6847_vm7, %v7303_v13  ;;  %vm6801_vm10 = vmpackc.low %vm581_vm3, %vm565_vm2  ;;  %vm805_vm2 = vcmp.eq.s32.totalorder %v7638_v25, %v8489_v57  ;;  %vm790_vm7 = vcmp.eq.s32.totalorder %v7635_v24, %v8502_v58 }
  0xf2   : > { %6802 = vmatpush.bf16.msk.msrb.mxu0 %vm6801_vm10, %v7303_v13  ;;  %vm6817_vm13 = vmpackc.low %vm837_vm6, %vm821_vm5  ;;  %v2286_v37 = vpop.f32.mrf.mxu2  ;;  %v2253_v38 = vpop.f32.mrf.mxu0  ;;  %vm550_vm5 = vcmp.eq.s32.totalorder %v7627_v23, %v8502_v58  ;;  %vm501_vm10 = vcmp.eq.s32.totalorder %v7662_v26, %v8489_v57 }
  0xf3   : > { %6818 = vmatpush.bf16.msk.msrb.mxu1 %vm6817_vm13, %v7303_v13  ;;  %vm6833_vm0 = vmpackc.low %vm582_vm9, %vm566_vm8  ;;  %v2304_v39 = vpop.f32.mrf.mxu3  ;;  %v2271_v40 = vpop.f32.mrf.mxu1  ;;  %vm806_vm8 = vcmp.eq.s32.totalorder %v7638_v25, %v8502_v58  ;;  %vm757_vm13 = vcmp.eq.s32.totalorder %v7673_v28, %v8489_v57 }
  0xf4   : > { %6834 = vmatpush.bf16.msk.msrb.mxu2 %vm6833_vm0, %v7303_v13  ;;  %vm6849_vm3 = vmpackc.low %vm838_vm12, %vm822_vm11  ;;  %v8629_v41 = vadd.f32 %v2304_v39, %v2286_v37  ;;  %v8631_v42 = vadd.f32 %v2271_v40, %v2253_v38  ;;  %vm517_vm11 = vcmp.eq.s32.totalorder %v7665_v27, %v8489_v57  ;;  %vm502_vm0 = vcmp.eq.s32.totalorder %v7662_v26, %v8502_v58 }
  0xf5   : > { %6850 = vmatpush.bf16.msk.msrb.mxu3 %vm6849_vm3, %v7303_v13  ;;  %vm6803_vm6 = vmpackc.low %vm549_vm15, %vm533_vm14  ;;  %2540 = vmatmul.bf16.gmra.mxu0 %v7890_v48  ;;  %vm773_vm14 = vcmp.eq.s32.totalorder %v7676_v29, %v8489_v57  ;;  %vm758_vm3 = vcmp.eq.s32.totalorder %v7673_v28, %v8502_v58 }
  0xf6   : > { %6804 = vmatpush.bf16.msk.msrb.mxu0 %vm6803_vm6, %v7303_v13  ;;  %vm6819_vm9 = vmpackc.low %vm805_vm2, %vm789_vm1  ;;  %2558 = vmatmul.bf16.gmra.mxu1 %v7897_v49  ;;  %vm518_vm1 = vcmp.eq.s32.totalorder %v7665_v27, %v8502_v58  ;;  %vm469_vm6 = vcmp.eq.s32.totalorder %v7700_v30, %v8489_v57 }
  0xf7   : > { %6820 = vmatpush.bf16.msk.msrb.mxu1 %vm6819_vm9, %v7303_v13  ;;  %vm6835_vm12 = vmpackc.low %vm550_vm5, %vm534_vm4  ;;  %2576 = vmatmul.bf16.gmra.mxu2 %v7890_v48  ;;  %vm774_vm4 = vcmp.eq.s32.totalorder %v7676_v29, %v8502_v58  ;;  %vm725_vm9 = vcmp.eq.s32.totalorder %v7711_v32, %v8489_v57 }
  0xf8   : > { %6836 = vmatpush.bf16.msk.msrb.mxu2 %vm6835_vm12, %v7303_v13  ;;  %vm6851_vm15 = vmpackc.low %vm806_vm8, %vm790_vm7  ;;  %2594 = vmatmul.bf16.gmra.mxu3 %v7897_v49  ;;  %vm485_vm7 = vcmp.eq.s32.totalorder %v7703_v31, %v8489_v57  ;;  %vm470_vm12 = vcmp.eq.s32.totalorder %v7700_v30, %v8502_v58 }
  0xf9   : > { %6852 = vmatpush.bf16.msk.msrb.mxu3 %vm6851_vm15, %v7303_v13  ;;  %vm6805_vm2 = vmpackc.low %vm517_vm11, %vm501_vm10  ;;  %vm741_vm10 = vcmp.eq.s32.totalorder %v7714_v33, %v8489_v57  ;;  %vm726_vm15 = vcmp.eq.s32.totalorder %v7711_v32, %v8502_v58 }
  0xfa   : > { %6806 = vmatpush.bf16.msk.msrb.mxu0 %vm6805_vm2, %v7303_v13  ;;  %vm6821_vm5 = vmpackc.low %vm773_vm14, %vm757_vm13  ;;  %v2289_v45 = vpop.f32.mrf.mxu2  ;;  %v2255_v46 = vpop.f32.mrf.mxu0  ;;  %vm486_vm13 = vcmp.eq.s32.totalorder %v7703_v31, %v8502_v58  ;;  %vm437_vm2 = vcmp.eq.s32.totalorder %v7480_v1, %v8489_v57 }
  0xfb   : > { %6822 = vmatpush.bf16.msk.msrb.mxu1 %vm6821_vm5, %v7303_v13  ;;  %vm6837_vm8 = vmpackc.low %vm518_vm1, %vm502_vm0  ;;  %v2307_v47 = vpop.f32.mrf.mxu3  ;;  %v2273_v50 = vpop.f32.mrf.mxu1  ;;  %vm742_vm0 = vcmp.eq.s32.totalorder %v7714_v33, %v8502_v58  ;;  %vm693_vm5 = vcmp.eq.s32.totalorder %v7746_v35, %v8489_v57 }
  0xfc   : > { %6838 = vmatpush.bf16.msk.msrb.mxu2 %vm6837_vm8, %v7303_v13  ;;  %vm6853_vm11 = vmpackc.low %vm774_vm4, %vm758_vm3  ;;  %v8695_v51 = vadd.f32 %v2307_v47, %v2289_v45  ;;  %vm453_vm3 = vcmp.eq.s32.totalorder %v7738_v34, %v8489_v57  ;;  %vm438_vm8 = vcmp.eq.s32.totalorder %v7480_v1, %v8502_v58 }
  0xfd   : > { %6854 = vmatpush.bf16.msk.msrb.mxu3 %vm6853_vm11, %v7303_v13  ;;  %vm6807_vm14 = vmpackc.low %vm485_vm7, %vm469_vm6  ;;  %vm709_vm6 = vcmp.eq.s32.totalorder %v7749_v36, %v8489_v57  ;;  %vm694_vm11 = vcmp.eq.s32.totalorder %v7746_v35, %v8502_v58 }
  0xfe   : > { %6808 = vmatpush.bf16.msk.msrb.mxu0 %vm6807_vm14, %v7303_v13  ;;  %vm6823_vm1 = vmpackc.low %vm741_vm10, %vm725_vm9  ;;  %vm454_vm9 = vcmp.eq.s32.totalorder %v7738_v34, %v8502_v58  ;;  %vm663_vm14 = vcmp.eq.s32.totalorder %v7491_v2, %v8714_v52 }
  0xff   : > { %6824 = vmatpush.bf16.msk.msrb.mxu1 %vm6823_vm1, %v7303_v13  ;;  %vm6839_vm4 = vmpackc.low %vm486_vm13, %vm470_vm12  ;;  %vm710_vm12 = vcmp.eq.s32.totalorder %v7749_v36, %v8502_v58  ;;  %vm919_vm1 = vcmp.eq.s32.totalorder %v7497_v4, %v8714_v52 }
 0x100   : > { %6840 = vmatpush.bf16.msk.msrb.mxu2 %vm6839_vm4, %v7303_v13  ;;  %vm6855_vm7 = vmpackc.low %vm742_vm0, %vm726_vm15  ;;  %vm679_vm15 = vcmp.eq.s32.totalorder %v7494_v3, %v8714_v52  ;;  %vm664_vm4 = vcmp.eq.s32.totalorder %v7491_v2, %v8727_v53 }
 0x101   : > { %6856 = vmatpush.bf16.msk.msrb.mxu3 %vm6855_vm7, %v7303_v13  ;;  %vm6809_vm10 = vmpackc.low %vm453_vm3, %vm437_vm2  ;;  %vm935_vm2 = vcmp.eq.s32.totalorder %v7500_v5, %v8714_v52  ;;  %vm920_vm7 = vcmp.eq.s32.totalorder %v7497_v4, %v8727_v53 }
 0x102   : > { %6810 = vmatpush.bf16.msk.msrb.mxu0 %vm6809_vm10, %v7303_v13  ;;  %vm6825_vm13 = vmpackc.low %vm709_vm6, %vm693_vm5  ;;  %v2291_v55 = vpop.f32.mrf.mxu2  ;;  %v2320_v56 = vpop.f32.mrf.mxu0  ;;  %vm680_vm5 = vcmp.eq.s32.totalorder %v7494_v3, %v8727_v53  ;;  %vm631_vm10 = vcmp.eq.s32.totalorder %v7512_v9, %v8714_v52 }
 0x103   : > { %6826 = vmatpush.bf16.msk.msrb.mxu1 %vm6825_vm13, %v7303_v13  ;;  %vm6841_vm0 = vmpackc.low %vm454_vm9, %vm438_vm8  ;;  %v2309_v57 = vpop.f32.mrf.mxu3  ;;  %v2338_v59 = vpop.f32.mrf.mxu1  ;;  %vm936_vm8 = vcmp.eq.s32.totalorder %v7500_v5, %v8727_v53  ;;  %vm887_vm13 = vcmp.eq.s32.totalorder %v7518_v11, %v8714_v52 }
 0x104   : > { %6842 = vmatpush.bf16.msk.msrb.mxu2 %vm6841_vm0, %v7303_v13  ;;  %vm6857_vm3 = vmpackc.low %vm710_vm12, %vm694_vm11  ;;  %v8752_v60 = vadd.f32 %v2338_v59, %v2320_v56  ;;  %vm647_vm11 = vcmp.eq.s32.totalorder %v7515_v10, %v8714_v52  ;;  %vm632_vm0 = vcmp.eq.s32.totalorder %v7512_v9, %v8727_v53 }
 0x105   : > { %6858 = vmatpush.bf16.msk.msrb.mxu3 %vm6857_vm3, %v7303_v13  ;;  %vm6859_vm6 = vmpackc.low %vm679_vm15, %vm663_vm14  ;;  %2607 = vmatmul.bf16.vlgmr.msrb.gmra.mxu0 %v7799_v43  ;;  %vm903_vm14 = vcmp.eq.s32.totalorder %v7521_v12, %v8714_v52  ;;  %vm888_vm3 = vcmp.eq.s32.totalorder %v7518_v11, %v8727_v53 }
 0x106   : > { %6860 = vmatpush.bf16.msk.msra.mxu0 %vm6859_vm6, %v7303_v13  ;;  %vm6875_vm9 = vmpackc.low %vm935_vm2, %vm919_vm1  ;;  %2625 = vmatmul.bf16.vlgmr.msrb.gmra.mxu1 %v7809_v44  ;;  %vm648_vm1 = vcmp.eq.s32.totalorder %v7515_v10, %v8727_v53  ;;  %vm599_vm6 = vcmp.eq.s32.totalorder %v7545_v14, %v8714_v52 }
 0x107   : > { %6876 = vmatpush.bf16.msk.msra.mxu1 %vm6875_vm9, %v7303_v13  ;;  %vm6891_vm12 = vmpackc.low %vm680_vm5, %vm664_vm4  ;;  %2643 = vmatmul.bf16.vlgmr.msrb.gmra.mxu2 %v7799_v43  ;;  %vm904_vm4 = vcmp.eq.s32.totalorder %v7521_v12, %v8727_v53  ;;  %vm855_vm9 = vcmp.eq.s32.totalorder %v7556_v16, %v8714_v52 }
 0x108   : > { %6892 = vmatpush.bf16.msk.msra.mxu2 %vm6891_vm12, %v7303_v13  ;;  %vm6907_vm15 = vmpackc.low %vm936_vm8, %vm920_vm7  ;;  %2661 = vmatmul.bf16.vlgmr.msrb.gmra.mxu3 %v7809_v44  ;;  %vm615_vm7 = vcmp.eq.s32.totalorder %v7548_v15, %v8714_v52  ;;  %vm600_vm12 = vcmp.eq.s32.totalorder %v7545_v14, %v8727_v53 }
 0x109   : > { %6908 = vmatpush.bf16.msk.msra.mxu3 %vm6907_vm15, %v7303_v13  ;;  %vm6861_vm2 = vmpackc.low %vm647_vm11, %vm631_vm10  ;;  %vm871_vm10 = vcmp.eq.s32.totalorder %v7559_v17, %v8714_v52  ;;  %vm856_vm15 = vcmp.eq.s32.totalorder %v7556_v16, %v8727_v53 }
 0x10a   : > { %6862 = vmatpush.bf16.msk.msra.mxu0 %vm6861_vm2, %v7303_v13  ;;  %vm6877_vm5 = vmpackc.low %vm903_vm14, %vm887_vm13  ;;  %v2356_v58 = vpop.f32.mrf.mxu2  ;;  %v2322_v62 = vpop.f32.mrf.mxu0  ;;  %vm616_vm13 = vcmp.eq.s32.totalorder %v7548_v15, %v8727_v53  ;;  %vm567_vm2 = vcmp.eq.s32.totalorder %v7586_v18, %v8714_v52 }
 0x10b   : > { %6878 = vmatpush.bf16.msk.msra.mxu1 %vm6877_vm5, %v7303_v13  ;;  %vm6893_vm8 = vmpackc.low %vm648_vm1, %vm632_vm0  ;;  %v2374_v63 = vpop.f32.mrf.mxu3  ;;  %v2340_v0 = vpop.f32.mrf.mxu1  ;;  %vm872_vm0 = vcmp.eq.s32.totalorder %v7559_v17, %v8727_v53  ;;  %vm823_vm5 = vcmp.eq.s32.totalorder %v7597_v20, %v8714_v52 }
 0x10c   : > { %6894 = vmatpush.bf16.msk.msra.mxu2 %vm6893_vm8, %v7303_v13  ;;  %vm6909_vm11 = vmpackc.low %vm904_vm4, %vm888_vm3  ;;  %v8810_v6 = vadd.f32 %v2374_v63, %v2356_v58  ;;  %v8812_v37 = vadd.f32 %v2340_v0, %v2322_v62  ;;  %vm583_vm3 = vcmp.eq.s32.totalorder %v7589_v19, %v8714_v52  ;;  %vm568_vm8 = vcmp.eq.s32.totalorder %v7586_v18, %v8727_v53 }
 0x10d   : > { %6910 = vmatpush.bf16.msk.msra.mxu3 %vm6909_vm11, %v7303_v13  ;;  %vm6863_vm14 = vmpackc.low %vm615_vm7, %vm599_vm6  ;;  %vm839_vm6 = vcmp.eq.s32.totalorder %v7600_v21, %v8714_v52  ;;  %vm824_vm11 = vcmp.eq.s32.totalorder %v7597_v20, %v8727_v53  ;;  %v8951_v58 = vperm.slane %v8292_v54, 6  ;;  %v8964_v62 = vperm.slane %v8292_v54, 7 }
 0x10e   : > { %6864 = vmatpush.bf16.msk.msra.mxu0 %vm6863_vm14, %v7303_v13  ;;  %vm6879_vm1 = vmpackc.low %vm871_vm10, %vm855_vm9  ;;  %vm584_vm9 = vcmp.eq.s32.totalorder %v7589_v19, %v8727_v53  ;;  %vm535_vm14 = vcmp.eq.s32.totalorder %v7624_v22, %v8714_v52 }
 0x10f   : > { %6880 = vmatpush.bf16.msk.msra.mxu1 %vm6879_vm1, %v7303_v13  ;;  %vm6895_vm4 = vmpackc.low %vm616_vm13, %vm600_vm12  ;;  %vm840_vm12 = vcmp.eq.s32.totalorder %v7600_v21, %v8727_v53  ;;  %vm791_vm1 = vcmp.eq.s32.totalorder %v7635_v24, %v8714_v52 }
 0x110   : > { %6896 = vmatpush.bf16.msk.msra.mxu2 %vm6895_vm4, %v7303_v13  ;;  %vm6911_vm7 = vmpackc.low %vm872_vm0, %vm856_vm15  ;;  %vm551_vm15 = vcmp.eq.s32.totalorder %v7627_v23, %v8714_v52  ;;  %vm536_vm4 = vcmp.eq.s32.totalorder %v7624_v22, %v8727_v53 }
 0x111   : > { %6912 = vmatpush.bf16.msk.msra.mxu3 %vm6911_vm7, %v7303_v13  ;;  %vm6865_vm10 = vmpackc.low %vm583_vm3, %vm567_vm2  ;;  %vm807_vm2 = vcmp.eq.s32.totalorder %v7638_v25, %v8714_v52  ;;  %vm792_vm7 = vcmp.eq.s32.totalorder %v7635_v24, %v8727_v53 }
 0x112   : > { %6866 = vmatpush.bf16.msk.msra.mxu0 %vm6865_vm10, %v7303_v13  ;;  %vm6881_vm13 = vmpackc.low %vm839_vm6, %vm823_vm5  ;;  %v2358_v38 = vpop.f32.mrf.mxu2  ;;  %v2325_v39 = vpop.f32.mrf.mxu0  ;;  %vm552_vm5 = vcmp.eq.s32.totalorder %v7627_v23, %v8727_v53  ;;  %vm503_vm10 = vcmp.eq.s32.totalorder %v7662_v26, %v8714_v52 }
 0x113   : > { %6882 = vmatpush.bf16.msk.msra.mxu1 %vm6881_vm13, %v7303_v13  ;;  %vm6897_vm0 = vmpackc.low %vm584_vm9, %vm568_vm8  ;;  %v2376_v40 = vpop.f32.mrf.mxu3  ;;  %v2343_v45 = vpop.f32.mrf.mxu1  ;;  %vm808_vm8 = vcmp.eq.s32.totalorder %v7638_v25, %v8727_v53  ;;  %vm759_vm13 = vcmp.eq.s32.totalorder %v7673_v28, %v8714_v52 }
 0x114   : > { %6898 = vmatpush.bf16.msk.msra.mxu2 %vm6897_vm0, %v7303_v13  ;;  %vm6913_vm3 = vmpackc.low %vm840_vm12, %vm824_vm11  ;;  %v8866_v46 = vadd.f32 %v2376_v40, %v2358_v38  ;;  %v8868_v47 = vadd.f32 %v2343_v45, %v2325_v39  ;;  %vm519_vm11 = vcmp.eq.s32.totalorder %v7665_v27, %v8714_v52  ;;  %vm504_vm0 = vcmp.eq.s32.totalorder %v7662_v26, %v8727_v53  ;;  %v2816_v45 = vld [vmem:[%s7461_s18 + $0x8] sm:$0xff] }
 0x115   : > { %6914 = vmatpush.bf16.msk.msra.mxu3 %vm6913_vm3, %v7303_v13  ;;  %vm6867_vm6 = vmpackc.low %vm551_vm15, %vm535_vm14  ;;  %2612 = vmatmul.bf16.gmra.mxu0 %v7890_v48  ;;  %vm775_vm14 = vcmp.eq.s32.totalorder %v7676_v29, %v8714_v52  ;;  %vm760_vm3 = vcmp.eq.s32.totalorder %v7673_v28, %v8727_v53 }
 0x116   : > { %6868 = vmatpush.bf16.msk.msra.mxu0 %vm6867_vm6, %v7303_v13  ;;  %vm6883_vm9 = vmpackc.low %vm807_vm2, %vm791_vm1  ;;  %2630 = vmatmul.bf16.gmra.mxu1 %v7897_v49  ;;  %vm520_vm1 = vcmp.eq.s32.totalorder %v7665_v27, %v8727_v53  ;;  %vm471_vm6 = vcmp.eq.s32.totalorder %v7700_v30, %v8714_v52 }
 0x117   : > { %6884 = vmatpush.bf16.msk.msra.mxu1 %vm6883_vm9, %v7303_v13  ;;  %vm6899_vm12 = vmpackc.low %vm552_vm5, %vm536_vm4  ;;  %2648 = vmatmul.bf16.gmra.mxu2 %v7890_v48  ;;  %vm776_vm4 = vcmp.eq.s32.totalorder %v7676_v29, %v8727_v53  ;;  %vm727_vm9 = vcmp.eq.s32.totalorder %v7711_v32, %v8714_v52 }
 0x118   : > { %6900 = vmatpush.bf16.msk.msra.mxu2 %vm6899_vm12, %v7303_v13  ;;  %vm6915_vm15 = vmpackc.low %vm808_vm8, %vm792_vm7  ;;  %2666 = vmatmul.bf16.gmra.mxu3 %v7897_v49  ;;  %vm487_vm7 = vcmp.eq.s32.totalorder %v7703_v31, %v8714_v52  ;;  %vm472_vm12 = vcmp.eq.s32.totalorder %v7700_v30, %v8727_v53 }
 0x119   : > { %6916 = vmatpush.bf16.msk.msra.mxu3 %vm6915_vm15, %v7303_v13  ;;  %vm6869_vm2 = vmpackc.low %vm519_vm11, %vm503_vm10  ;;  %vm743_vm10 = vcmp.eq.s32.totalorder %v7714_v33, %v8714_v52  ;;  %vm728_vm15 = vcmp.eq.s32.totalorder %v7711_v32, %v8727_v53 }
 0x11a   : > { %6870 = vmatpush.bf16.msk.msra.mxu0 %vm6869_vm2, %v7303_v13  ;;  %vm6885_vm5 = vmpackc.low %vm775_vm14, %vm759_vm13  ;;  %v2361_v50 = vpop.f32.mrf.mxu2  ;;  %v2327_v55 = vpop.f32.mrf.mxu0  ;;  %vm488_vm13 = vcmp.eq.s32.totalorder %v7703_v31, %v8727_v53  ;;  %vm439_vm2 = vcmp.eq.s32.totalorder %v7480_v1, %v8714_v52 }
 0x11b   : > { %6886 = vmatpush.bf16.msk.msra.mxu1 %vm6885_vm5, %v7303_v13  ;;  %vm6901_vm8 = vmpackc.low %vm520_vm1, %vm504_vm0  ;;  %v2379_v56 = vpop.f32.mrf.mxu3  ;;  %v2345_v57 = vpop.f32.mrf.mxu1  ;;  %vm744_vm0 = vcmp.eq.s32.totalorder %v7714_v33, %v8727_v53  ;;  %vm695_vm5 = vcmp.eq.s32.totalorder %v7746_v35, %v8714_v52 }
 0x11c   : > { %6902 = vmatpush.bf16.msk.msra.mxu2 %vm6901_vm8, %v7303_v13  ;;  %vm6917_vm11 = vmpackc.low %vm776_vm4, %vm760_vm3  ;;  %v8932_v59 = vadd.f32 %v2379_v56, %v2361_v50  ;;  %vm455_vm3 = vcmp.eq.s32.totalorder %v7738_v34, %v8714_v52  ;;  %vm440_vm8 = vcmp.eq.s32.totalorder %v7480_v1, %v8727_v53  ;;  %v2864_v56 = vmul.f32 %v2816_v45, %v8573_v7 }
 0x11d   : > { %6918 = vmatpush.bf16.msk.msra.mxu3 %vm6917_vm11, %v7303_v13  ;;  %vm6871_vm14 = vmpackc.low %vm487_vm7, %vm471_vm6  ;;  %vm711_vm6 = vcmp.eq.s32.totalorder %v7749_v36, %v8714_v52  ;;  %vm696_vm11 = vcmp.eq.s32.totalorder %v7746_v35, %v8727_v53 }
 0x11e   : > { %6872 = vmatpush.bf16.msk.msra.mxu0 %vm6871_vm14, %v7303_v13  ;;  %vm6887_vm1 = vmpackc.low %vm743_vm10, %vm727_vm9  ;;  %vm456_vm9 = vcmp.eq.s32.totalorder %v7738_v34, %v8727_v53  ;;  %vm665_vm14 = vcmp.eq.s32.totalorder %v7491_v2, %v8951_v58  ;;  %v9297_v7 = vand.u32 4294901760, %v2864_v56 }
 0x11f   : > { %6888 = vmatpush.bf16.msk.msra.mxu1 %vm6887_vm1, %v7303_v13  ;;  %vm6903_vm4 = vmpackc.low %vm488_vm13, %vm472_vm12  ;;  %vm712_vm12 = vcmp.eq.s32.totalorder %v7749_v36, %v8727_v53  ;;  %vm921_vm1 = vcmp.eq.s32.totalorder %v7497_v4, %v8951_v58 }
 0x120   : > { %6904 = vmatpush.bf16.msk.msra.mxu2 %vm6903_vm4, %v7303_v13  ;;  %vm6919_vm7 = vmpackc.low %vm744_vm0, %vm728_vm15  ;;  %vm681_vm15 = vcmp.eq.s32.totalorder %v7494_v3, %v8951_v58  ;;  %vm666_vm4 = vcmp.eq.s32.totalorder %v7491_v2, %v8964_v62  ;;  %v2847_v2 = vld [vmem:[%s7461_s18 + $0x100] sm:$0x3] }
 0x121   : > { %6920 = vmatpush.bf16.msk.msra.mxu3 %vm6919_vm7, %v7303_v13  ;;  %vm6873_vm10 = vmpackc.low %vm455_vm3, %vm439_vm2  ;;  %vm937_vm2 = vcmp.eq.s32.totalorder %v7500_v5, %v8951_v58  ;;  %vm922_vm7 = vcmp.eq.s32.totalorder %v7497_v4, %v8964_v62 }
 0x122   : > { %6874 = vmatpush.bf16.msk.msra.mxu0 %vm6873_vm10, %v7303_v13  ;;  %vm6889_vm13 = vmpackc.low %vm711_vm6, %vm695_vm5  ;;  %v2363_v54 = vpop.f32.mrf.mxu2  ;;  %v8976_v52 = vpop.f32.mrf.mxu0  ;;  %vm682_vm5 = vcmp.eq.s32.totalorder %v7494_v3, %v8964_v62  ;;  %vm633_vm10 = vcmp.eq.s32.totalorder %v7512_v9, %v8951_v58 }
 0x123   : > { %6890 = vmatpush.bf16.msk.msra.mxu1 %vm6889_vm13, %v7303_v13  ;;  %vm6905_vm0 = vmpackc.low %vm456_vm9, %vm440_vm8  ;;  %v2381_v63 = vpop.f32.mrf.mxu3  ;;  %v8983_v0 = vpop.f32.mrf.mxu1  ;;  %vm938_vm8 = vcmp.eq.s32.totalorder %v7500_v5, %v8964_v62  ;;  %vm889_vm13 = vcmp.eq.s32.totalorder %v7518_v11, %v8951_v58  ;;  %v2895_v5 = vmul.f32 %v2847_v2, %v8631_v42 }
 0x124   : > { %6906 = vmatpush.bf16.msk.msra.mxu2 %vm6905_vm0, %v7303_v13  ;;  %vm6921_vm3 = vmpackc.low %vm712_vm12, %vm696_vm11  ;;  %vm649_vm11 = vcmp.eq.s32.totalorder %v7515_v10, %v8951_v58  ;;  %vm634_vm0 = vcmp.eq.s32.totalorder %v7512_v9, %v8964_v62 }
 0x125   : > { %6922 = vmatpush.bf16.msk.msra.mxu3 %vm6921_vm3, %v7303_v13  ;;  %vm6923_vm6 = vmpackc.low %vm681_vm15, %vm665_vm14  ;;  %2679 = vmatmul.bf16.vlgmr.msra.gmra.mxu0 %v7799_v43  ;;  %vm905_vm14 = vcmp.eq.s32.totalorder %v7521_v12, %v8951_v58  ;;  %vm890_vm3 = vcmp.eq.s32.totalorder %v7518_v11, %v8964_v62  ;;  %v2831_v11 = vld [vmem:[%s7461_s18 + $0x80] sm:$0xff] }
 0x126   : > { %6924 = vmatpush.bf16.msk.msrb.mxu0 %vm6923_vm6, %v7303_v13  ;;  %vm6939_vm9 = vmpackc.low %vm937_vm2, %vm921_vm1  ;;  %2697 = vmatmul.bf16.vlgmr.msra.gmra.mxu1 %v7809_v44  ;;  %vm650_vm1 = vcmp.eq.s32.totalorder %v7515_v10, %v8964_v62  ;;  %vm601_vm6 = vcmp.eq.s32.totalorder %v7545_v14, %v8951_v58 }
 0x127   : > { %6940 = vmatpush.bf16.msk.msrb.mxu1 %vm6939_vm9, %v7303_v13  ;;  %vm6955_vm12 = vmpackc.low %vm682_vm5, %vm666_vm4  ;;  %2715 = vmatmul.bf16.vlgmr.msra.gmra.mxu2 %v7799_v43  ;;  %vm906_vm4 = vcmp.eq.s32.totalorder %v7521_v12, %v8964_v62  ;;  %vm857_vm9 = vcmp.eq.s32.totalorder %v7556_v16, %v8951_v58 }
 0x128   : > { %6956 = vmatpush.bf16.msk.msrb.mxu2 %vm6955_vm12, %v7303_v13  ;;  %vm6971_vm15 = vmpackc.low %vm938_vm8, %vm922_vm7  ;;  %2733 = vmatmul.bf16.vlgmr.msra.gmra.mxu3 %v7809_v44  ;;  %vm617_vm7 = vcmp.eq.s32.totalorder %v7548_v15, %v8951_v58 }
 0x129   : > { %6972 = vmatpush.bf16.msk.msrb.mxu3 %vm6971_vm15, %v7303_v13  ;;  %vm6925_vm2 = vmpackc.low %vm649_vm11, %vm633_vm10  ;;  %vm873_vm10 = vcmp.eq.s32.totalorder %v7559_v17, %v8951_v58  ;;  %vm2932_vm11 = vcmask 1041408  }
 0x12a   : > { %6926 = vmatpush.bf16.msk.msrb.mxu0 %vm6925_vm2, %v7303_v13  ;;  %vm6941_vm5 = vmpackc.low %vm905_vm14, %vm889_vm13  ;;  %v2428_v3 = vpop.f32.mrf.mxu2  ;;  %v9037_v4 = vpop.f32.mrf.mxu0  ;;  %vm602_vm13 = vcmp.eq.s32.totalorder %v7545_v14, %v8964_v62  ;;  %vm618_vm14 = vcmp.eq.s32.totalorder %v7548_v15, %v8964_v62  ;;  %v2934_v12 = vsel %vm2932_vm11, %v2895_v5, 0  ;;  %v2815_v14 = vld [vmem:[%s7461_s18] sm:$0xff]  ;;  %v2879_v15 = vmul.f32 %v2831_v11, %v8575_v8 }
 0x12b   : > { %6942 = vmatpush.bf16.msk.msrb.mxu1 %vm6941_vm5, %v7303_v13  ;;  %vm6957_vm8 = vmpackc.low %vm650_vm1, %vm634_vm0  ;;  %v2446_v10 = vpop.f32.mrf.mxu3  ;;  %v9048_v53 = vpop.f32.mrf.mxu1  ;;  %vm858_vm0 = vcmp.eq.s32.totalorder %v7556_v16, %v8964_v62  ;;  %vm874_vm1 = vcmp.eq.s32.totalorder %v7559_v17, %v8964_v62  ;;  %v9104_v16 = vand.u32 4294901760, %v2934_v12  ;;  %v2848_v17 = vld [vmem:[%s7461_s18 + $0x108] sm:$0x3]  ;;  %v2863_v38 = vmul.f32 %v2815_v14, %v8524_v61 }
 0x12c   : > { %6958 = vmatpush.bf16.msk.msrb.mxu2 %vm6957_vm8, %v7303_v13  ;;  %vm6973_vm12 = vmpackc.low %vm906_vm4, %vm890_vm3  ;;  %v9061_v9 = vadd.f32 %v2446_v10, %v2428_v3  ;;  %vm569_vm3 = vcmp.eq.s32.totalorder %v7586_v18, %v8951_v58  ;;  %vm585_vm4 = vcmp.eq.s32.totalorder %v7589_v19, %v8951_v58  ;;  %v2896_v61 = vmul.f32 %v2848_v17, %v8695_v51  ;;  %v2832_v51 = vld [vmem:[%s7461_s18 + $0x88] sm:$0xff] }
 0x12d   : > { %6974 = vmatpush.bf16.msk.msrb.mxu3 %vm6973_vm12, %v7303_v13  ;;  %vm6927_vm15 = vmpackc.low %vm617_vm7, %vm601_vm6  ;;  %vm825_vm6 = vcmp.eq.s32.totalorder %v7597_v20, %v8951_v58  ;;  %vm841_vm7 = vcmp.eq.s32.totalorder %v7600_v21, %v8951_v58  ;;  %v9344_v11 = vsub.f32 %v2864_v56, %v9297_v7 }
 0x12e   : > { %6928 = vmatpush.bf16.msk.msrb.mxu0 %vm6927_vm15, %v7303_v13  ;;  %vm6943_vm2 = vmpackc.low %vm873_vm10, %vm857_vm9  ;;  %vm570_vm9 = vcmp.eq.s32.totalorder %v7586_v18, %v8964_v62  ;;  %vm586_vm10 = vcmp.eq.s32.totalorder %v7589_v19, %v8964_v62  ;;  %v9144_v19 = vand.u32 4294901760, %v2879_v15 }
 0x12f   : > { %6944 = vmatpush.bf16.msk.msrb.mxu1 %vm6943_vm2, %v7303_v13  ;;  %vm6959_vm5 = vmpackc.low %vm618_vm14, %vm602_vm13  ;;  %vm826_vm13 = vcmp.eq.s32.totalorder %v7597_v20, %v8964_v62  ;;  %vm842_vm14 = vcmp.eq.s32.totalorder %v7600_v21, %v8964_v62  ;;  %v9160_v20 = vsub.f32 %v2934_v12, %v9104_v16  ;;  %v9174_v21 = vand.u32 4294901760, %v2863_v38 }
 0x130   : > { %6960 = vmatpush.bf16.msk.msrb.mxu2 %vm6959_vm5, %v7303_v13  ;;  %vm6975_vm8 = vmpackc.low %vm874_vm1, %vm858_vm0  ;;  %vm537_vm0 = vcmp.eq.s32.totalorder %v7624_v22, %v8951_v58  ;;  %vm553_vm1 = vcmp.eq.s32.totalorder %v7627_v23, %v8951_v58 }
 0x131   : > { %6976 = vmatpush.bf16.msk.msrb.mxu3 %vm6975_vm8, %v7303_v13  ;;  %vm6929_vm12 = vmpackc.low %vm585_vm4, %vm569_vm3  ;;  %vm793_vm3 = vcmp.eq.s32.totalorder %v7635_v24, %v8951_v58  ;;  %vm809_vm4 = vcmp.eq.s32.totalorder %v7638_v25, %v8951_v58 }
 0x132   : > { %6930 = vmatpush.bf16.msk.msrb.mxu0 %vm6929_vm12, %v7303_v13  ;;  %vm6945_vm15 = vmpackc.low %vm841_vm7, %vm825_vm6  ;;  %v2430_v8 = vpop.f32.mrf.mxu2  ;;  %v9115_v42 = vpop.f32.mrf.mxu0  ;;  %vm538_vm6 = vcmp.eq.s32.totalorder %v7624_v22, %v8964_v62  ;;  %vm554_vm7 = vcmp.eq.s32.totalorder %v7627_v23, %v8964_v62  ;;  %v9203_v22 = vsub.f32 %v2879_v15, %v9144_v19  ;;  %v2937_v23 = vsel %vm2932_vm11, %v2896_v61, 0 }
 0x133   : > { %6946 = vmatpush.bf16.msk.msrb.mxu1 %vm6945_vm15, %v7303_v13  ;;  %vm6961_vm2 = vmpackc.low %vm586_vm10, %vm570_vm9  ;;  %v2448_v39 = vpop.f32.mrf.mxu3  ;;  %v9129_v40 = vpop.f32.mrf.mxu1  ;;  %vm794_vm9 = vcmp.eq.s32.totalorder %v7635_v24, %v8964_v62  ;;  %vm810_vm10 = vcmp.eq.s32.totalorder %v7638_v25, %v8964_v62  ;;  %v2880_v24 = vmul.f32 %v2832_v51, %v8629_v41  ;;  %v3024_v25 = vand.u32 4294901760, %v9160_v20 }
 0x134   : > { %6962 = vmatpush.bf16.msk.msrb.mxu2 %vm6961_vm2, %v7303_v13  ;;  %vm6977_vm5 = vmpackc.low %vm842_vm14, %vm826_vm13  ;;  %v9142_v18 = vadd.f32 %v2448_v39, %v2430_v8  ;;  %vm505_vm13 = vcmp.eq.s32.totalorder %v7662_v26, %v8951_v58  ;;  %vm521_vm14 = vcmp.eq.s32.totalorder %v7665_v27, %v8951_v58  ;;  %v9231_v41 = vsub.f32 %v2863_v38, %v9174_v21 }
 0x135   : > { %6978 = vmatpush.bf16.msk.msrb.mxu3 %vm6977_vm5, %v7303_v13  ;;  %vm6931_vm8 = vmpackc.low %vm553_vm1, %vm537_vm0  ;;  %2684 = vmatmul.bf16.gmra.mxu0 %v7890_v48  ;;  %vm761_vm0 = vcmp.eq.s32.totalorder %v7673_v28, %v8951_v58  ;;  %vm777_vm1 = vcmp.eq.s32.totalorder %v7676_v29, %v8951_v58  ;;  %v9245_v63 = vand.u32 4294901760, %v2937_v23 }
 0x136   : > { %6932 = vmatpush.bf16.msk.msrb.mxu0 %vm6931_vm8, %v7303_v13  ;;  %vm6947_vm12 = vmpackc.low %vm809_vm4, %vm793_vm3  ;;  %2702 = vmatmul.bf16.gmra.mxu1 %v7897_v49  ;;  %vm506_vm3 = vcmp.eq.s32.totalorder %v7662_v26, %v8964_v62  ;;  %vm522_vm4 = vcmp.eq.s32.totalorder %v7665_v27, %v8964_v62  ;;  %v3030_v27 = vand.u32 4294901760, %v9203_v22 }
 0x137   : > { %6948 = vmatpush.bf16.msk.msrb.mxu1 %vm6947_vm12, %v7303_v13  ;;  %vm6963_vm15 = vmpackc.low %vm554_vm7, %vm538_vm6  ;;  %2720 = vmatmul.bf16.gmra.mxu2 %v7890_v48  ;;  %vm762_vm6 = vcmp.eq.s32.totalorder %v7673_v28, %v8964_v62  ;;  %vm778_vm7 = vcmp.eq.s32.totalorder %v7676_v29, %v8964_v62  ;;  %v9272_v28 = vand.u32 4294901760, %v2880_v24  ;;  %v3025_v29 = vsub.f32 %v9160_v20, %v3024_v25 }
 0x138   : > { %6964 = vmatpush.bf16.msk.msrb.mxu2 %vm6963_vm15, %v7303_v13  ;;  %vm6979_vm2 = vmpackc.low %vm810_vm10, %vm794_vm9  ;;  %2738 = vmatmul.bf16.gmra.mxu3 %v7897_v49  ;;  %vm473_vm9 = vcmp.eq.s32.totalorder %v7700_v30, %v8951_v58  ;;  %vm489_vm10 = vcmp.eq.s32.totalorder %v7703_v31, %v8951_v58  ;;  %v9300_v2 = vsub.f32 %v2937_v23, %v9245_v63 }
 0x139   : > { %6980 = vmatpush.bf16.msk.msrb.mxu3 %vm6979_vm2, %v7303_v13  ;;  %vm6933_vm5 = vmpackc.low %vm521_vm14, %vm505_vm13  ;;  %vm729_vm13 = vcmp.eq.s32.totalorder %v7711_v32, %v8951_v58  ;;  %vm745_vm14 = vcmp.eq.s32.totalorder %v7714_v33, %v8951_v58 }
 0x13a   : > { %6934 = vmatpush.bf16.msk.msrb.mxu0 %vm6933_vm5, %v7303_v13  ;;  %vm6949_vm8 = vmpackc.low %vm777_vm1, %vm761_vm0  ;;  %v2433_v50 = vpop.f32.mrf.mxu2  ;;  %v2399_v55 = vpop.f32.mrf.mxu0  ;;  %vm474_vm0 = vcmp.eq.s32.totalorder %v7700_v30, %v8964_v62  ;;  %vm490_vm1 = vcmp.eq.s32.totalorder %v7703_v31, %v8964_v62  ;;  %v3036_v31 = vand.u32 4294901760, %v9231_v41  ;;  %v3031_v30 = vsub.f32 %v9203_v22, %v3030_v27 }
 0x13b   : > { %6950 = vmatpush.bf16.msk.msrb.mxu1 %vm6949_vm8, %v7303_v13  ;;  %vm6965_vm12 = vmpackc.low %vm522_vm4, %vm506_vm3  ;;  %v2451_v57 = vpop.f32.mrf.mxu3  ;;  %v2417_v54 = vpop.f32.mrf.mxu1  ;;  %vm730_vm3 = vcmp.eq.s32.totalorder %v7711_v32, %v8964_v62  ;;  %vm746_vm4 = vcmp.eq.s32.totalorder %v7714_v33, %v8964_v62  ;;  %v9325_v32 = vsub.f32 %v2880_v24, %v9272_v28  ;;  %v2849_v55 = vld [vmem:[%s7461_s18 + $0x110] sm:$0x3] }
 0x13c   : > { %6966 = vmatpush.bf16.msk.msrb.mxu2 %vm6965_vm12, %v7303_v13  ;;  %vm6981_vm15 = vmpackc.low %vm778_vm7, %vm762_vm6  ;;  %v9258_v26 = vadd.f32 %v2451_v57, %v2433_v50  ;;  %vm441_vm6 = vcmp.eq.s32.totalorder %v7480_v1, %v8951_v58  ;;  %vm457_vm7 = vcmp.eq.s32.totalorder %v7738_v34, %v8951_v58  ;;  %v3037_v3 = vsub.f32 %v9231_v41, %v3036_v31 }
 0x13d   : > { %6982 = vmatpush.bf16.msk.msrb.mxu3 %vm6981_vm15, %v7303_v13  ;;  %vm6935_vm2 = vmpackc.low %vm489_vm10, %vm473_vm9  ;;  %vm697_vm9 = vcmp.eq.s32.totalorder %v7746_v35, %v8951_v58  ;;  %vm713_vm10 = vcmp.eq.s32.totalorder %v7749_v36, %v8951_v58  ;;  %v3196_v58 = vand.u32 4294901760, %v9300_v2  ;;  %v3032_v12 = vand.u32 4294901760, %v3031_v30 }
 0x13e   : > { %6936 = vmatpush.bf16.msk.msrb.mxu0 %vm6935_vm2, %v7303_v13  ;;  %vm6951_vm5 = vmpackc.low %vm745_vm14, %vm729_vm13  ;;  %vm442_vm13 = vcmp.eq.s32.totalorder %v7480_v1, %v8964_v62  ;;  %vm458_vm14 = vcmp.eq.s32.totalorder %v7738_v34, %v8964_v62  ;;  %v3026_v1 = vand.u32 4294901760, %v3025_v29  ;;  %v3202_v14 = vand.u32 4294901760, %v9325_v32 }
 0x13f   : > { %6952 = vmatpush.bf16.msk.msrb.mxu1 %vm6951_vm5, %v7303_v13  ;;  %vm6967_vm8 = vmpackc.low %vm490_vm1, %vm474_vm0  ;;  %vm698_vm0 = vcmp.eq.s32.totalorder %v7746_v35, %v8964_v62  ;;  %vm714_vm1 = vcmp.eq.s32.totalorder %v7749_v36, %v8964_v62  ;;  %v3038_v35 = vand.u32 4294901760, %v3037_v3  ;;  %v3208_v36 = vand.u32 4294901760, %v9344_v11 }
 0x140   : > { %6968 = vmatpush.bf16.msk.msrb.mxu2 %vm6967_vm8, %v7303_v13  ;;  %vm6983_vm12 = vmpackc.low %vm746_vm4, %vm730_vm3  ;;  %v3203_v62 = vsub.f32 %v9325_v32, %v3202_v14  ;;  %vm2928_vm5 = vcmask 146432  }
 0x141   : > { %6984 = vmatpush.bf16.msk.msrb.mxu3 %vm6983_vm12, %v7303_v13  ;;  %vm6937_vm15 = vmpackc.low %vm457_vm7, %vm441_vm6  ;;  %v3209_v51 = vsub.f32 %v9344_v11, %v3208_v36 }
 0x142   : > { %6938 = vmatpush.bf16.msk.msrb.mxu0 %vm6937_vm15, %v7303_v13  ;;  %vm6953_vm2 = vmpackc.low %vm713_vm10, %vm697_vm9  ;;  %v2435_v33 = vpop.f32.mrf.mxu2  ;;  %v9334_v34 = vpop.f32.mrf.mxu0 }
 0x143   : > { %6954 = vmatpush.bf16.msk.msrb.mxu1 %vm6953_vm2, %v7303_v13  ;;  %vm6969_vm3 = vmpackc.low %vm458_vm14, %vm442_vm13  ;;  %v2453_v5 = vpop.f32.mrf.mxu3  ;;  %v9341_v10 = vpop.f32.mrf.mxu1 }
 0x144   : > { %6970 = vmatpush.bf16.msk.msrb.mxu2 %vm6969_vm3, %v7303_v13  ;;  %vm6985_vm4 = vmpackc.low %vm714_vm1, %vm698_vm0 }
 0x145   : > { %6986 = vmatpush.bf16.msk.msrb.mxu3 %vm6985_vm4, %v7303_v13  ;;  %v3197_v13 = vsub.f32 %v9300_v2, %v3196_v58  ;;  %2751 = vmatmul.bf16.vlgmr.msrb.gmra.mxu0 %v7799_v43 }
 0x146   : > { %2995 = vmatpush.msra.mxu0 %v9104_v16  ;;  %2769 = vmatmul.bf16.vlgmr.msrb.gmra.mxu1 %v7809_v44 }
 0x147   : > { %3027 = vmatpush.msra.mxu1 %v3026_v1  ;;  %2787 = vmatmul.bf16.vlgmr.msrb.gmra.mxu2 %v7799_v43  ;;  %v3198_v39 = vand.u32 4294901760, %v3197_v13  ;;  %v3204_v43 = vand.u32 4294901760, %v3203_v62  ;;  %v2817_v1 = vld [vmem:[%s7461_s18 + $0x10] sm:$0xff] }
 0x148   : > { %3060 = vmatpush.msra.mxu2 %v9160_v20  ;;  %2997 = vmatpush.msra.mxu0 %v9144_v19  ;;  %v2911_v20 = vld [vmem:[#allocation6] sm:$0xff] }
 0x149   : > { %3087 = vmatpush.msra.mxu3 %v9104_v16  ;;  %3033 = vmatpush.msra.mxu1 %v3032_v12 }
 0x14a   : > { %3063 = vmatpush.msra.mxu2 %v9203_v22  ;;  %2999 = vmatpush.msra.mxu0 %v9174_v21  ;;  %v2500_v15 = vpop.f32.mrf.mxu2  ;;  %v9372_v17 = vpop.f32.mrf.mxu0 }
 0x14b   : > { %3089 = vmatpush.msra.mxu3 %v9144_v19  ;;  %3039 = vmatpush.msra.mxu1 %v3038_v35  ;;  %v2518_v8 = vpop.f32.mrf.mxu3  ;;  %v9376_v38 = vpop.f32.mrf.mxu1 }
 0x14c   : > { %3066 = vmatpush.msra.mxu2 %v9231_v41  ;;  %2805 = vmatmul.bf16.vlgmr.msrb.gmra.mxu3 %v7809_v44  ;;  %v9381_v61 = vadd.f32 %v2518_v8, %v2500_v15  ;;  %v3210_v44 = vand.u32 4294901760, %v3209_v51  ;;  %v2834_v51 = vld [vmem:[%s7461_s18 + $0x98] sm:$0xff] }
 0x14d   : > { %3091 = vmatpush.msra.mxu3 %v9174_v21  ;;  %3115 = vmatpush.msrb.mxu0 %v3024_v25 }
 0x14e   : > { %3143 = vmatpush.msrb.mxu1 %v9104_v16  ;;  %3167 = vmatpush.msrb.mxu2 %v9245_v63 }
 0x14f   : > { %3199 = vmatpush.msrb.mxu3 %v3198_v39  ;;  %3119 = vmatpush.msrb.mxu0 %v3030_v27  ;;  %v2897_v27 = vmul.f32 %v2849_v55, %v8868_v47  ;;  %v2865_v47 = vmul.f32 %v2817_v1, %v8752_v60 }
 0x150   : > { %3145 = vmatpush.msrb.mxu1 %v9144_v19  ;;  %3169 = vmatpush.msrb.mxu2 %v9272_v28  ;;  %v2930_v19 = vsel %vm2928_vm5, %v2911_v20, 0 }
 0x151   : > { %3205 = vmatpush.msrb.mxu3 %v3204_v43  ;;  %3123 = vmatpush.msrb.mxu0 %v3036_v31  ;;  %v9400_v50 = vand.u32 4294901760, %v2930_v19  ;;  %v2833_v31 = vld [vmem:[%s7461_s18 + $0x90] sm:$0xff]  ;;  %v2940_v33 = vsel %vm2932_vm11, %v2897_v27, 0 }
 0x152   : > { %3147 = vmatpush.msrb.mxu1 %v9174_v21  ;;  %3171 = vmatpush.msrb.mxu2 %v9297_v7  ;;  %v2502_v16 = vpop.f32.mrf.mxu2  ;;  %v2469_v45 = vpop.f32.mrf.mxu0  ;;  %v2881_v3 = vmul.f32 %v2833_v31, %v8812_v37  ;;  %v9426_v35 = vand.u32 4294901760, %v2940_v33  ;;  %v9435_v37 = vand.u32 4294901760, %v2865_v47 }
 0x153   : > { %3211 = vmatpush.msrb.mxu3 %v3210_v44  ;;  %v2520_v22 = vpop.f32.mrf.mxu3  ;;  %v2487_v23 = vpop.f32.mrf.mxu1  ;;  %v9405_v56 = vsub.f32 %v2930_v19, %v9400_v50  ;;  %v2818_v44 = vld [vmem:[%s7461_s18 + $0x18] sm:$0xff] }
 0x154   : > { %v9396_v24 = vadd.f32 %v2520_v22, %v2502_v16  ;;  %v9398_v25 = vadd.f32 %v2487_v23, %v2469_v45  ;;  %v9430_v15 = vand.u32 4294901760, %v2881_v3  ;;  %v9439_v43 = vsub.f32 %v2940_v33, %v9426_v35 }
 0x155   : > { %2756 = vmatmul.bf16.gmra.mxu0 %v7890_v48  ;;  %v9415_v30 = vand.u32 4294901760, %v9405_v56  ;;  %v2882_v16 = vmul.f32 %v2834_v51, %v8866_v46  ;;  %v9449_v22 = vsub.f32 %v2865_v47, %v9435_v37  ;;  %v2411_v51 = vadd.f32 %v8983_v0, %v8976_v52  ;;  %v2852_v52 = vld [vmem:[%s7461_s18 + $0x128] sm:$0x3] }
 0x156   : > { %2774 = vmatmul.bf16.gmra.mxu1 %v7897_v49  ;;  %v9443_v60 = vsub.f32 %v2881_v3, %v9430_v15  ;;  %v3368_v55 = vand.u32 4294901760, %v9439_v43 }
 0x157   : > { %2792 = vmatmul.bf16.gmra.mxu2 %v7890_v48  ;;  %v2850_v48 = vld [vmem:[%s7461_s18 + $0x118] sm:$0x3]  ;;  %v9467_v27 = vand.u32 4294901760, %v2882_v16 }
 0x158   : > { %v2898_v8 = vmul.f32 %v2850_v48, %v8932_v59 }
 0x159   : > { %v9495_v1 = vsub.f32 %v2882_v16, %v9467_v27 }
 0x15a   : > { %v2505_v21 = vpop.f32.mrf.mxu2  ;;  %v2471_v41 = vpop.f32.mrf.mxu0  ;;  %v2943_v20 = vsel %vm2932_vm11, %v2898_v8, 0 }
 0x15b   : > { %v2523_v57 = vpop.f32.mrf.mxu3  ;;  %v2489_v54 = vpop.f32.mrf.mxu1  ;;  %v9455_v41 = vand.u32 4294901760, %v2943_v20  ;;  %v3546_v8 = vand.u32 4294901760, %v9495_v1 }
 0x15c   : > { %2810 = vmatmul.bf16.gmra.mxu3 %v7897_v49  ;;  %v9411_v29 = vadd.f32 %v2523_v57, %v2505_v21  ;;  %v3003_v49 = vsub.f32 %v9405_v56, %v9415_v30  ;;  %v2866_v21 = vmul.f32 %v2818_v44, %v8810_v6  ;;  %v3374_v54 = vand.u32 4294901760, %v9443_v60 }
 0x15d   : > { %v3369_v6 = vsub.f32 %v9439_v43, %v3368_v55  ;;  %v9481_v31 = vsub.f32 %v2943_v20, %v9455_v41  ;;  %v3547_v0 = vsub.f32 %v9495_v1, %v3546_v8 }
 0x15e   : > { %v9433_v39 = vand.u32 4294901760, %v3003_v49  ;;  %v2413_v49 = vadd.f32 %v9048_v53, %v9037_v4  ;;  %v2819_v4 = vld [vmem:[%s7461_s18 + $0x20] sm:$0xff] }
 0x162   : > { %v2507_v5 = vpop.f32.mrf.mxu2  ;;  %v9421_v12 = vpop.f32.mrf.mxu0 }
 0x163   : > { %v2525_v13 = vpop.f32.mrf.mxu3  ;;  %v9428_v62 = vpop.f32.mrf.mxu1  ;;  %v3540_v5 = vand.u32 4294901760, %v9481_v31 }
 0x164   : > { %v2835_v13 = vld [vmem:[%s7461_s18 + $0xa0] sm:$0xff] }
 0x165   : > { %3005 = vmatmul.f32.vlgmr.msra.gmra.mxu0 %v9433_v39  ;;  %v3541_v20 = vsub.f32 %v9481_v31, %v3540_v5 }
 0x166   : > { %3041 = vmatmul.f32.vlgmr.msra.gmra.mxu1 %v9400_v50  ;;  %3232 = vmatpush.msra.mxu0 %v9300_v2  ;;  %v3380_v2 = vand.u32 4294901760, %v9449_v22 }
 0x167   : > { %3069 = vmatmul.f32.vlgmr.msra.gmra.mxu2 %v9405_v56  ;;  %3259 = vmatpush.msra.mxu1 %v9245_v63 }
 0x168   : > { %3287 = vmatpush.msra.mxu2 %v3196_v58  ;;  %3235 = vmatpush.msra.mxu0 %v9325_v32  ;;  %v9478_v58 = vand.u32 4294901760, %v2866_v21  ;;  %v2851_v32 = vld [vmem:[%s7461_s18 + $0x120] sm:$0x3] }
 0x169   : > { %3261 = vmatpush.msra.mxu1 %v9272_v28 }
 0x16a   : > { %v2572_v45 = vpop.f32.mrf.mxu2  ;;  %v2538_v59 = vpop.f32.mrf.mxu0  ;;  %3291 = vmatpush.msra.mxu2 %v3202_v14  ;;  %3238 = vmatpush.msra.mxu0 %v9344_v11  ;;  %v3375_v14 = vsub.f32 %v9443_v60, %v3374_v54 }
 0x16b   : > { %v2590_v23 = vpop.f32.mrf.mxu3  ;;  %v2556_v19 = vpop.f32.mrf.mxu1  ;;  %3263 = vmatpush.msra.mxu1 %v9297_v7 }
 0x16c   : > { %3095 = vmatmul.f32.vlgmr.msra.gmra.mxu3 %v9415_v30  ;;  %v9459_v46 = vadd.f32 %v2590_v23, %v2572_v45  ;;  %v9461_v57 = vadd.f32 %v2556_v19, %v2538_v59  ;;  %3295 = vmatpush.msra.mxu2 %v3208_v36  ;;  %v3381_v36 = vsub.f32 %v9449_v22, %v3380_v2  ;;  %v3376_v47 = vand.u32 4294901760, %v3375_v14 }
 0x16d   : > { %3315 = vmatpush.msra.mxu3 %v9245_v63  ;;  %v2416_v63 = vadd.f32 %v9129_v40, %v9115_v42  ;;  %3125 = vmatmul.f32.vlgmr.msrb.gmra.mxu0 %v9400_v50  ;;  %v2883_v45 = vmul.f32 %v2835_v13, %v2413_v49  ;;  %v2867_v19 = vmul.f32 %v2819_v4, %v2411_v51 }
 0x16e   : > { %3149 = vmatmul.f32.vlgmr.msrb.gmra.mxu1 %v9400_v50  ;;  %3339 = vmatpush.msrb.mxu0 %v9426_v35  ;;  %v3382_v44 = vand.u32 4294901760, %v3381_v36 }
 0x16f   : > { %3317 = vmatpush.msra.mxu3 %v9272_v28  ;;  %3177 = vmatmul.f32.vlgmr.msrb.gmra.mxu2 %v9433_v39  ;;  %v3370_v28 = vand.u32 4294901760, %v3369_v6  ;;  %v2899_v3 = vmul.f32 %v2851_v32, %v2416_v63  ;;  %v3542_v32 = vand.u32 4294901760, %v3541_v20 }
 0x170   : > { %3404 = vmatpush.msrb.mxu2 %v9439_v43  ;;  %3341 = vmatpush.msrb.mxu0 %v9430_v15  ;;  %v3548_v43 = vand.u32 4294901760, %v3547_v0 }
 0x171   : > { %3319 = vmatpush.msra.mxu3 %v9297_v7  ;;  %v9509_v7 = vsub.f32 %v2866_v21, %v9478_v58  ;;  %3371 = vmatpush.msrb.mxu1 %v3370_v28  ;;  %v2946_v53 = vsel %vm2932_vm11, %v2899_v3, 0  ;;  %v2900_v28 = vmul.f32 %v2852_v52, %v9258_v26 }
 0x172   : > { %v2574_v42 = vpop.f32.mrf.mxu2  ;;  %v9499_v40 = vpop.f32.mrf.mxu0  ;;  %3407 = vmatpush.msrb.mxu2 %v9443_v60  ;;  %3343 = vmatpush.msrb.mxu0 %v9435_v37  ;;  %v9543_v21 = vand.u32 4294901760, %v2946_v53 }
 0x173   : > { %v2592_v11 = vpop.f32.mrf.mxu3  ;;  %v9506_v33 = vpop.f32.mrf.mxu1  ;;  %3377 = vmatpush.msrb.mxu1 %v3376_v47  ;;  %v3552_v16 = vand.u32 4294901760, %v9509_v7 }
 0x174   : > { %3213 = vmatmul.f32.vlgmr.msrb.gmra.mxu3 %v9400_v50  ;;  %v9513_v48 = vadd.f32 %v2592_v11, %v2574_v42  ;;  %3410 = vmatpush.msrb.mxu2 %v9449_v22  ;;  %v9555_v42 = vand.u32 4294901760, %v2883_v45  ;;  %v2836_v11 = vld [vmem:[%s7461_s18 + $0xa8] sm:$0xff]  ;;  %v9566_v36 = vsub.f32 %v2946_v53, %v9543_v21 }
 0x175   : > { %3431 = vmatpush.msrb.mxu3 %v9426_v35  ;;  %3383 = vmatpush.msrb.mxu1 %v3382_v44  ;;  %v3553_v14 = vsub.f32 %v9509_v7, %v3552_v16  ;;  %v2884_v3 = vmul.f32 %v2836_v11, %v9142_v18 }
 0x176   : > { %3241 = vmatmul.f32.vlgmr.msra.gmra.mxu0 %v9405_v56  ;;  %3267 = vmatmul.f32.vlgmr.msra.gmra.mxu1 %v9415_v30  ;;  %v9574_v60 = vsub.f32 %v2883_v45, %v9555_v42 }
 0x177   : > { %3433 = vmatpush.msrb.mxu3 %v9430_v15  ;;  %3297 = vmatmul.f32.vlgmr.msra.gmra.mxu2 %v9400_v50  ;;  %v3554_v26 = vand.u32 4294901760, %v3553_v14  ;;  %v9600_v44 = vand.u32 4294901760, %v2884_v3  ;;  %v2483_v14 = vadd.f32 %v9341_v10, %v9334_v34  ;;  %v2854_v34 = vld [vmem:[%s7461_s18 + $0x138] sm:$0x3] }
 0x178   : > { %3459 = vmatpush.msra.mxu0 %v3368_v55  ;;  %3487 = vmatpush.msra.mxu1 %v9426_v35  ;;  %v9562_v55 = vand.u32 4294901760, %v2867_v19  ;;  %v2820_v35 = vld [vmem:[%s7461_s18 + $0x28] sm:$0xff]  ;;  %v3718_v51 = vand.u32 4294901760, %v9574_v60 }
 0x179   : > { %3435 = vmatpush.msrb.mxu3 %v9435_v37  ;;  %3511 = vmatpush.msra.mxu2 %v9455_v41  ;;  %v2868_v18 = vmul.f32 %v2820_v35, %v9061_v9 }
 0x17a   : > { %v9541_v59 = vpop.f32.mrf.mxu2  ;;  %v2543_v23 = vpop.f32.mrf.mxu0  ;;  %3463 = vmatpush.msra.mxu0 %v3374_v54  ;;  %3489 = vmatpush.msra.mxu1 %v9430_v15  ;;  %v2949_v54 = vsel %vm2932_vm11, %v2900_v28, 0  ;;  %v9584_v22 = vsub.f32 %v2867_v19, %v9562_v55  ;;  %v2485_v19 = vadd.f32 %v9376_v38, %v9372_v17  ;;  %v2821_v17 = vld [vmem:[%s7461_s18 + $0x30] sm:$0xff] }
 0x17b   : > { %v9547_v6 = vpop.f32.mrf.mxu3  ;;  %v2561_v63 = vpop.f32.mrf.mxu1  ;;  %3513 = vmatpush.msra.mxu2 %v9467_v27  ;;  %v9592_v13 = vand.u32 4294901760, %v2949_v54 }
 0x17c   : > { %3321 = vmatmul.f32.vlgmr.msra.gmra.mxu3 %v9400_v50  ;;  %3467 = vmatpush.msra.mxu0 %v3380_v2 }
 0x17d   : > { %3543 = vmatpush.msra.mxu3 %v3542_v32  ;;  %3491 = vmatpush.msra.mxu1 %v9435_v37  ;;  %v3712_v37 = vand.u32 4294901760, %v9566_v36  ;;  %v9614_v4 = vsub.f32 %v2949_v54, %v9592_v13  ;;  %v2837_v32 = vld [vmem:[%s7461_s18 + $0xb0] sm:$0xff] }
 0x17e   : > { %3515 = vmatpush.msra.mxu2 %v9478_v58  ;;  %3349 = vmatmul.f32.vlgmr.msrb.gmra.mxu0 %v9433_v39 }
 0x17f   : > { %3549 = vmatpush.msra.mxu3 %v3548_v43  ;;  %3385 = vmatmul.f32.vlgmr.msrb.gmra.mxu1 %v9400_v50  ;;  %v3713_v9 = vsub.f32 %v9566_v36, %v3712_v37  ;;  %v3884_v23 = vand.u32 4294901760, %v9614_v4 }
 0x180   : > { %3413 = vmatmul.f32.vlgmr.msrb.gmra.mxu2 %v9405_v56  ;;  %3576 = vmatpush.msrb.mxu0 %v9481_v31  ;;  %v3724_v31 = vand.u32 4294901760, %v9584_v22 }
 0x181   : > { %3555 = vmatpush.msra.mxu3 %v3554_v26  ;;  %3603 = vmatpush.msrb.mxu1 %v9455_v41  ;;  %v3885_v43 = vsub.f32 %v9614_v4, %v3884_v23  ;;  %v2885_v26 = vmul.f32 %v2837_v32, %v2485_v19 }
 0x182   : > { %v2579_v15 = vpop.f32.mrf.mxu2  ;;  %v9581_v49 = vpop.f32.mrf.mxu0  ;;  %3631 = vmatpush.msrb.mxu2 %v3540_v5  ;;  %3579 = vmatpush.msrb.mxu0 %v9495_v1  ;;  %v9611_v5 = vand.u32 4294901760, %v2868_v18  ;;  %v3719_v1 = vsub.f32 %v9574_v60, %v3718_v51 }
 0x183   : > { %v2597_v2 = vpop.f32.mrf.mxu3  ;;  %v9588_v47 = vpop.f32.mrf.mxu1  ;;  %3605 = vmatpush.msrb.mxu1 %v9467_v27 }
 0x184   : > { %3439 = vmatmul.f32.vlgmr.msrb.gmra.mxu3 %v9415_v30  ;;  %3635 = vmatpush.msrb.mxu2 %v3546_v8  ;;  %v9626_v8 = vsub.f32 %v2884_v3, %v9600_v44  ;;  %v3720_v63 = vand.u32 4294901760, %v3719_v1  ;;  %v2869_v3 = vmul.f32 %v2821_v17, %v2483_v14  ;;  %v9691_v1 = vand.u32 4294901760, %v2885_v26 }
 0x185   : > { %3659 = vmatpush.msrb.mxu3 %v9455_v41  ;;  %3582 = vmatpush.msrb.mxu0 %v9509_v7  ;;  %v2853_v41 = vld [vmem:[%s7461_s18 + $0x130] sm:$0x3]  ;;  %v3714_v7 = vand.u32 4294901760, %v3713_v9  ;;  %v3886_v9 = vand.u32 4294901760, %v3885_v43 }
 0x186   : > { %3607 = vmatpush.msrb.mxu1 %v9478_v58  ;;  %3639 = vmatpush.msrb.mxu2 %v3552_v16  ;;  %v3725_v16 = vsub.f32 %v9584_v22, %v3724_v31  ;;  %v2901_v52 = vmul.f32 %v2853_v41, %v9398_v25  ;;  %v3890_v25 = vand.u32 4294901760, %v9626_v8 }
 0x187   : > { %3661 = vmatpush.msrb.mxu3 %v9467_v27  ;;  %3469 = vmatmul.f32.vlgmr.msra.gmra.mxu0 %v9400_v50 }
 0x188   : > { %3493 = vmatmul.f32.vlgmr.msra.gmra.mxu1 %v9400_v50  ;;  %3521 = vmatmul.f32.vlgmr.msra.gmra.mxu2 %v9433_v39  ;;  %v3726_v28 = vand.u32 4294901760, %v3725_v16  ;;  %v2952_v38 = vsel %vm2932_vm11, %v2901_v52, 0  ;;  %v3891_v10 = vsub.f32 %v9626_v8, %v3890_v25 }
 0x189   : > { %3663 = vmatpush.msrb.mxu3 %v9478_v58  ;;  %v9640_v58 = vsub.f32 %v2868_v18, %v9611_v5  ;;  %3683 = vmatpush.msra.mxu0 %v9543_v21  ;;  %v9677_v15 = vand.u32 4294901760, %v2952_v38 }
 0x18a   : > { %v2644_v27 = vpop.f32.mrf.mxu2  ;;  %v9630_v53 = vpop.f32.mrf.mxu0  ;;  %3715 = vmatpush.msra.mxu1 %v3714_v7  ;;  %3748 = vmatpush.msra.mxu2 %v9566_v36  ;;  %v3892_v36 = vand.u32 4294901760, %v3891_v10  ;;  %v2838_v7 = vld [vmem:[%s7461_s18 + $0xb8] sm:$0xff]  ;;  %v2839_v10 = vld [vmem:[%s7461_s18 + $0xc0] sm:$0xff] }
 0x18b   : > { %v2662_v20 = vpop.f32.mrf.mxu3  ;;  %v9637_v45 = vpop.f32.mrf.mxu1  ;;  %3685 = vmatpush.msra.mxu0 %v9555_v42  ;;  %v3896_v11 = vand.u32 4294901760, %v9640_v58  ;;  %v2886_v16 = vmul.f32 %v2838_v7, %v9396_v24 }
 0x18c   : > { %3557 = vmatmul.f32.vlgmr.msra.gmra.mxu3 %v9400_v50  ;;  %v9645_v0 = vadd.f32 %v2662_v20, %v2644_v27  ;;  %3721 = vmatpush.msra.mxu1 %v3720_v63  ;;  %v2902_v27 = vmul.f32 %v2854_v34, %v9411_v29  ;;  %v9702_v20 = vsub.f32 %v2952_v38, %v9677_v15 }
 0x18d   : > { %3775 = vmatpush.msra.mxu3 %v9543_v21  ;;  %3751 = vmatpush.msra.mxu2 %v9574_v60  ;;  %v3897_v41 = vsub.f32 %v9640_v58, %v3896_v11  ;;  %v9710_v60 = vsub.f32 %v2885_v26, %v9691_v1  ;;  %v9736_v14 = vand.u32 4294901760, %v2886_v16 }
 0x18e   : > { %3687 = vmatpush.msra.mxu0 %v9562_v55  ;;  %3727 = vmatpush.msra.mxu1 %v3726_v28  ;;  %v4056_v19 = vand.u32 4294901760, %v9702_v20 }
 0x18f   : > { %3777 = vmatpush.msra.mxu3 %v9555_v42  ;;  %3754 = vmatpush.msra.mxu2 %v9584_v22  ;;  %v3898_v29 = vand.u32 4294901760, %v3897_v41  ;;  %v4062_v32 = vand.u32 4294901760, %v9710_v60  ;;  %v9764_v17 = vsub.f32 %v2886_v16, %v9736_v14 }
 0x190   : > { %3585 = vmatmul.f32.vlgmr.msrb.gmra.mxu0 %v9405_v56  ;;  %3611 = vmatmul.f32.vlgmr.msrb.gmra.mxu1 %v9415_v30 }
 0x191   : > { %3779 = vmatpush.msra.mxu3 %v9562_v55  ;;  %3641 = vmatmul.f32.vlgmr.msrb.gmra.mxu2 %v9400_v50 }
 0x192   : > { %v9673_v35 = vpop.f32.mrf.mxu2  ;;  %v9675_v54 = vpop.f32.mrf.mxu0  ;;  %3803 = vmatpush.msrb.mxu0 %v3712_v37  ;;  %3831 = vmatpush.msrb.mxu1 %v9543_v21  ;;  %v9698_v37 = vand.u32 4294901760, %v2869_v3  ;;  %v2822_v21 = vld [vmem:[%s7461_s18 + $0x38] sm:$0xff] }
 0x193   : > { %v9681_v2 = vpop.f32.mrf.mxu3  ;;  %v9683_v18 = vpop.f32.mrf.mxu1  ;;  %3855 = vmatpush.msrb.mxu2 %v9592_v13  ;;  %v2870_v24 = vmul.f32 %v2822_v21, %v9381_v61  ;;  %v4057_v61 = vsub.f32 %v9702_v20, %v4056_v19  ;;  %v2887_v21 = vmul.f32 %v2839_v10, %v9461_v57 }
 0x194   : > { %3665 = vmatmul.f32.vlgmr.msrb.gmra.mxu3 %v9400_v50  ;;  %3807 = vmatpush.msrb.mxu0 %v3718_v51  ;;  %v2955_v51 = vsel %vm2932_vm11, %v2902_v27, 0  ;;  %v2823_v27 = vld [vmem:[%s7461_s18 + $0x40] sm:$0xff] }
 0x195   : > { %3887 = vmatpush.msrb.mxu3 %v3886_v9  ;;  %3833 = vmatpush.msrb.mxu1 %v9555_v42  ;;  %v9728_v63 = vand.u32 4294901760, %v2955_v51  ;;  %v2555_v9 = vadd.f32 %v9428_v62, %v9421_v12  ;;  %v2596_v12 = vadd.f32 %v9547_v6, %v9541_v59  ;;  %v2856_v62 = vld [vmem:[%s7461_s18 + $0x148] sm:$0x3] }
 0x196   : > { %3857 = vmatpush.msrb.mxu2 %v9600_v44  ;;  %3811 = vmatpush.msrb.mxu0 %v3724_v31  ;;  %v9720_v31 = vsub.f32 %v2869_v3, %v9698_v37  ;;  %v4234_v3 = vand.u32 4294901760, %v9764_v17 }
 0x197   : > { %3893 = vmatpush.msrb.mxu3 %v3892_v36  ;;  %3835 = vmatpush.msrb.mxu1 %v9562_v55  ;;  %v9750_v28 = vsub.f32 %v2955_v51, %v9728_v63 }
 0x198   : > { %3859 = vmatpush.msrb.mxu2 %v9611_v5  ;;  %3693 = vmatmul.f32.vlgmr.msra.gmra.mxu0 %v9433_v39  ;;  %v4235_v51 = vsub.f32 %v9764_v17, %v4234_v3 }
 0x199   : > { %3899 = vmatpush.msrb.mxu3 %v3898_v29  ;;  %3729 = vmatmul.f32.vlgmr.msra.gmra.mxu1 %v9400_v50  ;;  %v4228_v26 = vand.u32 4294901760, %v9750_v28 }
 0x19a   : > { %v9717_v42 = vpop.f32.mrf.mxu2  ;;  %v2615_v22 = vpop.f32.mrf.mxu0  ;;  %3757 = vmatmul.f32.vlgmr.msra.gmra.mxu2 %v9405_v56  ;;  %3920 = vmatpush.msra.mxu0 %v9614_v4  ;;  %v4068_v4 = vand.u32 4294901760, %v9720_v31 }
 0x19b   : > { %v9724_v52 = vpop.f32.mrf.mxu3  ;;  %v2633_v55 = vpop.f32.mrf.mxu1  ;;  %3947 = vmatpush.msra.mxu1 %v9592_v13  ;;  %3975 = vmatpush.msra.mxu2 %v3884_v23  ;;  %v9747_v23 = vand.u32 4294901760, %v2870_v24  ;;  %v4229_v7 = vsub.f32 %v9750_v28, %v4228_v26 }
 0x19c   : > { %3783 = vmatmul.f32.vlgmr.msra.gmra.mxu3 %v9415_v30  ;;  %3923 = vmatpush.msra.mxu0 %v9626_v8  ;;  %v2855_v8 = vld [vmem:[%s7461_s18 + $0x140] sm:$0x3]  ;;  %v4069_v38 = vsub.f32 %v9720_v31, %v4068_v4  ;;  %v2871_v55 = vmul.f32 %v2823_v27, %v2555_v9 }
 0x19d   : > { %4003 = vmatpush.msra.mxu3 %v9592_v13  ;;  %3949 = vmatpush.msra.mxu1 %v9600_v44  ;;  %v2560_v13 = vadd.f32 %v9506_v33, %v9499_v40 }
 0x19e   : > { %3979 = vmatpush.msra.mxu2 %v3890_v25  ;;  %3926 = vmatpush.msra.mxu0 %v9640_v58  ;;  %v4063_v25 = vsub.f32 %v9710_v60, %v4062_v32  ;;  %v4070_v41 = vand.u32 4294901760, %v4069_v38 }
 0x19f   : > { %4005 = vmatpush.msra.mxu3 %v9600_v44  ;;  %3951 = vmatpush.msra.mxu1 %v9611_v5  ;;  %v4058_v44 = vand.u32 4294901760, %v4057_v61 }
 0x1a0   : > { %3983 = vmatpush.msra.mxu2 %v3896_v11  ;;  %3813 = vmatmul.f32.vlgmr.msrb.gmra.mxu0 %v9400_v50  ;;  %v2903_v11 = vmul.f32 %v2855_v8, %v2560_v13  ;;  %v4064_v34 = vand.u32 4294901760, %v4063_v25  ;;  %v9825_v8 = vand.u32 4294901760, %v2887_v21  ;;  %v2904_v25 = vmul.f32 %v2856_v62, %v2596_v12 }
 0x1a1   : > { %4007 = vmatpush.msra.mxu3 %v9611_v5  ;;  %3837 = vmatmul.f32.vlgmr.msrb.gmra.mxu1 %v9400_v50  ;;  %v9778_v5 = vsub.f32 %v2870_v24, %v9747_v23  ;;  %v4230_v24 = vand.u32 4294901760, %v4229_v7  ;;  %v2629_v62 = vadd.f32 %v9637_v45, %v9630_v53  ;;  %v2825_v53 = vld [vmem:[%s7461_s18 + $0x50] sm:$0xff] }
 0x1a2   : > { %v2651_v40 = vpop.f32.mrf.mxu2  ;;  %v9768_v33 = vpop.f32.mrf.mxu0  ;;  %3865 = vmatmul.f32.vlgmr.msrb.gmra.mxu2 %v9433_v39  ;;  %4027 = vmatpush.msrb.mxu0 %v9677_v15  ;;  %v2958_v36 = vsel %vm2932_vm11, %v2903_v11, 0 }
 0x1a3   : > { %v2669_v58 = vpop.f32.mrf.mxu3  ;;  %v9775_v43 = vpop.f32.mrf.mxu1  ;;  %4059 = vmatpush.msrb.mxu1 %v4058_v44  ;;  %4092 = vmatpush.msrb.mxu2 %v9702_v20  ;;  %v4240_v29 = vand.u32 4294901760, %v9778_v5  ;;  %v9811_v57 = vand.u32 4294901760, %v2958_v36  ;;  %v4236_v20 = vand.u32 4294901760, %v4235_v51  ;;  %v2840_v40 = vld [vmem:[%s7461_s18 + $0xc8] sm:$0xff] }
 0x1a4   : > { %3901 = vmatmul.f32.vlgmr.msrb.gmra.mxu3 %v9400_v50  ;;  %4029 = vmatpush.msrb.mxu0 %v9691_v1  ;;  %v2824_v58 = vld [vmem:[%s7461_s18 + $0x48] sm:$0xff]  ;;  %v2888_v38 = vmul.f32 %v2840_v40, %v9513_v48 }
 0x1a5   : > { %4119 = vmatpush.msrb.mxu3 %v9677_v15  ;;  %4065 = vmatpush.msrb.mxu1 %v4064_v34  ;;  %v4241_v13 = vsub.f32 %v9778_v5, %v4240_v29  ;;  %v9835_v44 = vsub.f32 %v2958_v36, %v9811_v57  ;;  %v2872_v34 = vmul.f32 %v2824_v58, %v9459_v46 }
 0x1a6   : > { %4095 = vmatpush.msrb.mxu2 %v9710_v60  ;;  %4031 = vmatpush.msrb.mxu0 %v9698_v37  ;;  %v9843_v60 = vsub.f32 %v2887_v21, %v9825_v8 }
 0x1a7   : > { %4121 = vmatpush.msrb.mxu3 %v9691_v1  ;;  %4071 = vmatpush.msrb.mxu1 %v4070_v41  ;;  %v4400_v48 = vand.u32 4294901760, %v9835_v44  ;;  %v9873_v41 = vand.u32 4294901760, %v2888_v38 }
 0x1a8   : > { %4098 = vmatpush.msrb.mxu2 %v9720_v31  ;;  %3929 = vmatmul.f32.vlgmr.msra.gmra.mxu0 %v9405_v56  ;;  %v4406_v9 = vand.u32 4294901760, %v9843_v60 }
 0x1a9   : > { %4123 = vmatpush.msrb.mxu3 %v9698_v37  ;;  %3955 = vmatmul.f32.vlgmr.msra.gmra.mxu1 %v9415_v30  ;;  %v4401_v46 = vsub.f32 %v9835_v44, %v4400_v48  ;;  %v9901_v36 = vsub.f32 %v2888_v38, %v9873_v41 }
 0x1aa   : > { %v2716_v16 = vpop.f32.mrf.mxu2  ;;  %v9809_v22 = vpop.f32.mrf.mxu0  ;;  %3985 = vmatmul.f32.vlgmr.msra.gmra.mxu2 %v9400_v50  ;;  %4147 = vmatpush.msra.mxu0 %v4056_v19  ;;  %v9831_v19 = vand.u32 4294901760, %v2871_v55 }
 0x1ab   : > { %v2734_v59 = vpop.f32.mrf.mxu3  ;;  %v9815_v6 = vpop.f32.mrf.mxu1  ;;  %4175 = vmatpush.msra.mxu1 %v9677_v15  ;;  %4199 = vmatpush.msra.mxu2 %v9728_v63  ;;  %v4242_v15 = vand.u32 4294901760, %v4241_v13 }
 0x1ac   : > { %4009 = vmatmul.f32.vlgmr.msra.gmra.mxu3 %v9400_v50  ;;  %v9820_v61 = vadd.f32 %v2734_v59, %v2716_v16  ;;  %4151 = vmatpush.msra.mxu0 %v4062_v32  ;;  %v2961_v32 = vsel %vm2932_vm11, %v2904_v25, 0  ;;  %v2841_v16 = vld [vmem:[%s7461_s18 + $0xd0] sm:$0xff]  ;;  %v2627_v59 = vadd.f32 %v9588_v47, %v9581_v49  ;;  %v2668_v49 = vadd.f32 %v9724_v52, %v9717_v42  ;;  %v2858_v47 = vld [vmem:[%s7461_s18 + $0x158] sm:$0x3] }
 0x1ad   : > { %4231 = vmatpush.msra.mxu3 %v4230_v24  ;;  %4177 = vmatpush.msra.mxu1 %v9691_v1  ;;  %v9865_v10 = vand.u32 4294901760, %v2961_v32 }
 0x1ae   : > { %4201 = vmatpush.msra.mxu2 %v9736_v14  ;;  %4155 = vmatpush.msra.mxu0 %v4068_v4  ;;  %v9855_v4 = vsub.f32 %v2871_v55, %v9831_v19  ;;  %v4578_v55 = vand.u32 4294901760, %v9901_v36  ;;  %v2873_v58 = vmul.f32 %v2825_v53, %v2627_v59  ;;  %v2701_v53 = vadd.f32 %v9815_v6, %v9809_v22 }
 0x1af   : > { %4237 = vmatpush.msra.mxu3 %v4236_v20  ;;  %4179 = vmatpush.msra.mxu1 %v9698_v37  ;;  %v9887_v27 = vsub.f32 %v2961_v32, %v9865_v10  ;;  %v2889_v20 = vmul.f32 %v2841_v16, %v2629_v62 }
 0x1b0   : > { %4203 = vmatpush.msra.mxu2 %v9747_v23  ;;  %4037 = vmatmul.f32.vlgmr.msrb.gmra.mxu0 %v9433_v39  ;;  %v4579_v40 = vsub.f32 %v9901_v36, %v4578_v55 }
 0x1b1   : > { %4243 = vmatpush.msra.mxu3 %v4242_v15  ;;  %4073 = vmatmul.f32.vlgmr.msrb.gmra.mxu1 %v9400_v50  ;;  %v4572_v12 = vand.u32 4294901760, %v9887_v27 }
 0x1b2   : > { %v9850_v1 = vpop.f32.mrf.mxu2  ;;  %v9852_v31 = vpop.f32.mrf.mxu0  ;;  %4101 = vmatmul.f32.vlgmr.msrb.gmra.mxu2 %v9405_v56  ;;  %4264 = vmatpush.msrb.mxu0 %v9750_v28  ;;  %v4412_v28 = vand.u32 4294901760, %v9855_v4 }
 0x1b3   : > { %v9859_v11 = vpop.f32.mrf.mxu3  ;;  %v9861_v37 = vpop.f32.mrf.mxu1  ;;  %4291 = vmatpush.msrb.mxu1 %v9728_v63  ;;  %4319 = vmatpush.msrb.mxu2 %v4228_v26  ;;  %v9884_v26 = vand.u32 4294901760, %v2872_v34  ;;  %v4573_v13 = vsub.f32 %v9887_v27, %v4572_v12 }
 0x1b4   : > { %4127 = vmatmul.f32.vlgmr.msrb.gmra.mxu3 %v9415_v30  ;;  %4267 = vmatpush.msrb.mxu0 %v9764_v17  ;;  %v2857_v17 = vld [vmem:[%s7461_s18 + $0x150] sm:$0x3]  ;;  %v4413_v7 = vsub.f32 %v9855_v4, %v4412_v28  ;;  %v2704_v16 = vadd.f32 %v9861_v37, %v9852_v31 }
 0x1b5   : > { %4347 = vmatpush.msrb.mxu3 %v9728_v63  ;;  %4293 = vmatpush.msrb.mxu1 %v9736_v14  ;;  %v2632_v63 = vadd.f32 %v9683_v18, %v9675_v54  ;;  %v4574_v52 = vand.u32 4294901760, %v4573_v13  ;;  %v2843_v13 = vld [vmem:[%s7461_s18 + $0xe0] sm:$0xff] }
 0x1b6   : > { %4323 = vmatpush.msrb.mxu2 %v4234_v3  ;;  %4270 = vmatpush.msrb.mxu0 %v9778_v5  ;;  %v4407_v3 = vsub.f32 %v9843_v60, %v4406_v9  ;;  %v4414_v24 = vand.u32 4294901760, %v4413_v7 }
 0x1b7   : > { %4349 = vmatpush.msrb.mxu3 %v9736_v14  ;;  %4295 = vmatpush.msrb.mxu1 %v9747_v23  ;;  %v4402_v14 = vand.u32 4294901760, %v4401_v46  ;;  %v2905_v21 = vmul.f32 %v2857_v17, %v2632_v63  ;;  %v2906_v46 = vmul.f32 %v2858_v47, %v2668_v49  ;;  %v2665_v63 = vadd.f32 %v9681_v2, %v9673_v35  ;;  %v2842_v17 = vld [vmem:[%s7461_s18 + $0xd8] sm:$0xff] }
 0x1b8   : > { %4327 = vmatpush.msrb.mxu2 %v4240_v29  ;;  %4157 = vmatmul.f32.vlgmr.msra.gmra.mxu0 %v9400_v50  ;;  %v4408_v51 = vand.u32 4294901760, %v4407_v3  ;;  %v2699_v49 = vadd.f32 %v9775_v43, %v9768_v33 }
 0x1b9   : > { %4351 = vmatpush.msrb.mxu3 %v9747_v23  ;;  %4181 = vmatmul.f32.vlgmr.msra.gmra.mxu1 %v9400_v50  ;;  %v9915_v23 = vsub.f32 %v2872_v34, %v9884_v26  ;;  %v2964_v45 = vsel %vm2932_vm11, %v2905_v21, 0  ;;  %v9957_v34 = vand.u32 4294901760, %v2889_v20 }
 0x1ba   : > { %v9905_v54 = vpop.f32.mrf.mxu2  ;;  %v2687_v18 = vpop.f32.mrf.mxu0  ;;  %4209 = vmatmul.f32.vlgmr.msra.gmra.mxu2 %v9433_v39  ;;  %4371 = vmatpush.msra.mxu0 %v9811_v57  ;;  %v9947_v32 = vand.u32 4294901760, %v2964_v45 }
 0x1bb   : > { %v9909_v5 = vpop.f32.mrf.mxu3  ;;  %v2705_v29 = vpop.f32.mrf.mxu1  ;;  %4403 = vmatpush.msra.mxu1 %v4402_v14  ;;  %4436 = vmatpush.msra.mxu2 %v9835_v44  ;;  %v4584_v25 = vand.u32 4294901760, %v9915_v23  ;;  %v4580_v44 = vand.u32 4294901760, %v4579_v40  ;;  %v2967_v18 = vsel %vm2932_vm11, %v2906_v46, 0  ;;  %v2827_v40 = vld [vmem:[%s7461_s18 + $0x60] sm:$0xff] }
 0x1bc   : > { %4245 = vmatmul.f32.vlgmr.msra.gmra.mxu3 %v9400_v50  ;;  %4373 = vmatpush.msra.mxu0 %v9825_v8  ;;  %v9969_v3 = vsub.f32 %v2964_v45, %v9947_v32  ;;  %v9994_v7 = vand.u32 4294901760, %v2967_v18 }
 0x1bd   : > { %4463 = vmatpush.msra.mxu3 %v9811_v57  ;;  %4409 = vmatpush.msra.mxu1 %v4408_v51  ;;  %v4585_v38 = vsub.f32 %v9915_v23, %v4584_v25 }
 0x1be   : > { %4439 = vmatpush.msra.mxu2 %v9843_v60  ;;  %4375 = vmatpush.msra.mxu0 %v9831_v19  ;;  %v2826_v60 = vld [vmem:[%s7461_s18 + $0x58] sm:$0xff]  ;;  %v10022_v51 = vsub.f32 %v2967_v18, %v9994_v7 }
 0x1bf   : > { %4465 = vmatpush.msra.mxu3 %v9825_v8  ;;  %4415 = vmatpush.msra.mxu1 %v4414_v24  ;;  %v4586_v35 = vand.u32 4294901760, %v4585_v38  ;;  %v2874_v14 = vmul.f32 %v2826_v60, %v9645_v0  ;;  %v2860_v38 = vld [vmem:[%s7461_s18 + $0x168] sm:$0x3]  ;;  %v2737_v60 = vadd.f32 %v9859_v11, %v9850_v1 }
 0x1c0   : > { %4442 = vmatpush.msra.mxu2 %v9855_v4  ;;  %4273 = vmatmul.f32.vlgmr.msrb.gmra.mxu0 %v9405_v56 }
 0x1c1   : > { %4467 = vmatpush.msra.mxu3 %v9831_v19  ;;  %4299 = vmatmul.f32.vlgmr.msrb.gmra.mxu1 %v9415_v30 }
 0x1c2   : > { %v2723_v15 = vpop.f32.mrf.mxu2  ;;  %4329 = vmatmul.f32.vlgmr.msrb.gmra.mxu2 %v9400_v50  ;;  %4491 = vmatpush.msrb.mxu0 %v4400_v48  ;;  %v9965_v48 = vand.u32 4294901760, %v2873_v58 }
 0x1c3   : > { %v2741_v42 = vpop.f32.mrf.mxu3  ;;  %4519 = vmatpush.msrb.mxu1 %v9811_v57  ;;  %4543 = vmatpush.msrb.mxu2 %v9865_v10  ;;  %v9973_v57 = vpop.f32.mrf.mxu0 }
 0x1c4   : > { %4353 = vmatmul.f32.vlgmr.msrb.gmra.mxu3 %v9400_v50  ;;  %4495 = vmatpush.msrb.mxu0 %v4406_v9  ;;  %v9977_v2 = vpop.f32.mrf.mxu1  ;;  %v9981_v9 = vsub.f32 %v2889_v20, %v9957_v34  ;;  %v9988_v4 = vsub.f32 %v2873_v58, %v9965_v48  ;;  %v2891_v42 = vmul.f32 %v2843_v13, %v2701_v53 }
 0x1c5   : > { %4575 = vmatpush.msrb.mxu3 %v4574_v52  ;;  %4521 = vmatpush.msrb.mxu1 %v9825_v8  ;;  %v2890_v8 = vmul.f32 %v2842_v17, %v2665_v63  ;;  %v2740_v52 = vadd.f32 %v9909_v5, %v9905_v54  ;;  %v2875_v63 = vmul.f32 %v2827_v40, %v2699_v49  ;;  %v2861_v49 = vld [vmem:[%s7461_s18 + $0x170] sm:$0x3] }
 0x1c6   : > { %4545 = vmatpush.msrb.mxu2 %v9873_v41  ;;  %4499 = vmatpush.msrb.mxu0 %v4412_v28  ;;  %v4744_v28 = vand.u32 4294901760, %v9969_v3  ;;  %v4756_v62 = vand.u32 4294901760, %v9988_v4  ;;  %v10098_v17 = vand.u32 4294901760, %v2891_v42 }
 0x1c7   : > { %4581 = vmatpush.msrb.mxu3 %v4580_v44  ;;  %4523 = vmatpush.msrb.mxu1 %v9831_v19  ;;  %v4750_v19 = vand.u32 4294901760, %v9981_v9  ;;  %v10002_v29 = vand.u32 4294901760, %v2890_v8 }
 0x1c8   : > { %4547 = vmatpush.msrb.mxu2 %v9884_v26  ;;  %4381 = vmatmul.f32.vlgmr.msra.gmra.mxu0 %v9433_v39  ;;  %v4757_v37 = vsub.f32 %v9988_v4, %v4756_v62 }
 0x1c9   : > { %4587 = vmatpush.msrb.mxu3 %v4586_v35  ;;  %4417 = vmatmul.f32.vlgmr.msra.gmra.mxu1 %v9400_v50  ;;  %v4751_v59 = vsub.f32 %v9981_v9, %v4750_v19  ;;  %v10038_v24 = vsub.f32 %v2890_v8, %v10002_v29  ;;  %v2908_v35 = vmul.f32 %v2860_v38, %v2740_v52  ;;  %v10108_v8 = vand.u32 4294901760, %v2875_v63 }
 0x1ca   : > { %4445 = vmatmul.f32.vlgmr.msra.gmra.mxu2 %v9405_v56  ;;  %4608 = vmatpush.msra.mxu0 %v9887_v27  ;;  %v10006_v0 = vpop.f32.mrf.mxu2  ;;  %v4758_v6 = vand.u32 4294901760, %v4757_v37 }
 0x1cb   : > { %4635 = vmatpush.msra.mxu1 %v9865_v10  ;;  %4663 = vmatpush.msra.mxu2 %v4572_v12  ;;  %v10013_v27 = vpop.f32.mrf.mxu0  ;;  %v4745_v12 = vsub.f32 %v9969_v3, %v4744_v28  ;;  %v4752_v45 = vand.u32 4294901760, %v4751_v59  ;;  %v4922_v20 = vand.u32 4294901760, %v10038_v24 }
 0x1cc   : > { %4471 = vmatmul.f32.vlgmr.msra.gmra.mxu3 %v9415_v30  ;;  %4611 = vmatpush.msra.mxu0 %v9901_v36  ;;  %v10028_v36 = vpop.f32.mrf.mxu1 }
 0x1cd   : > { %4691 = vmatpush.msra.mxu3 %v9865_v10  ;;  %4637 = vmatpush.msra.mxu1 %v9873_v41  ;;  %v10019_v10 = vand.u32 4294901760, %v2874_v14  ;;  %v4746_v31 = vand.u32 4294901760, %v4745_v12  ;;  %v4923_v46 = vsub.f32 %v10038_v24, %v4922_v20  ;;  %v10122_v12 = vsub.f32 %v2891_v42, %v10098_v17  ;;  %v2845_v42 = vld [vmem:[%s7461_s18 + $0xf0] sm:$0xff] }
 0x1ce   : > { %4667 = vmatpush.msra.mxu2 %v4578_v55  ;;  %4614 = vmatpush.msra.mxu0 %v9915_v23  ;;  %v2859_v55 = vld [vmem:[%s7461_s18 + $0x160] sm:$0x3] }
 0x1cf   : > { %v10011_v21 = vpop.f32.mrf.mxu3  ;;  %4693 = vmatpush.msra.mxu3 %v9873_v41  ;;  %4639 = vmatpush.msra.mxu1 %v9884_v26  ;;  %v10048_v41 = vsub.f32 %v2874_v14, %v10019_v10  ;;  %v2907_v23 = vmul.f32 %v2859_v55, %v2704_v16  ;;  %v2973_v16 = vsel %vm2932_vm11, %v2908_v35, 0 }
 0x1d0   : > { %4671 = vmatpush.msra.mxu2 %v4584_v25  ;;  %4501 = vmatmul.f32.vlgmr.msrb.gmra.mxu0 %v9400_v50  ;;  %v10135_v59 = vand.u32 4294901760, %v2973_v16 }
 0x1d1   : > { %4695 = vmatpush.msra.mxu3 %v9884_v26  ;;  %4525 = vmatmul.f32.vlgmr.msrb.gmra.mxu1 %v9400_v50  ;;  %v4916_v26 = vand.u32 4294901760, %v10022_v51  ;;  %v2970_v15 = vsel %vm2932_vm11, %v2907_v23, 0  ;;  %v4928_v43 = vand.u32 4294901760, %v10048_v41 }
 0x1d2   : > { %4553 = vmatmul.f32.vlgmr.msrb.gmra.mxu2 %v9433_v39  ;;  %4715 = vmatpush.msrb.mxu0 %v9947_v32  ;;  %v10059_v25 = vpop.f32.mrf.mxu2  ;;  %v10088_v44 = vand.u32 4294901760, %v2970_v15 }
 0x1d3   : > { %4747 = vmatpush.msrb.mxu1 %v4746_v31  ;;  %4780 = vmatpush.msrb.mxu2 %v9969_v3  ;;  %v10067_v47 = vpop.f32.mrf.mxu0  ;;  %v4917_v33 = vsub.f32 %v10022_v51, %v4916_v26  ;;  %v4929_v5 = vsub.f32 %v10048_v41, %v4928_v43  ;;  %v4924_v3 = vand.u32 4294901760, %v4923_v46  ;;  %v5094_v31 = vand.u32 4294901760, %v10122_v12 }
 0x1d4   : > { %4589 = vmatmul.f32.vlgmr.msrb.gmra.mxu3 %v9400_v50  ;;  %4717 = vmatpush.msrb.mxu0 %v9957_v34  ;;  %v10073_v58 = vpop.f32.mrf.mxu1  ;;  %v10112_v14 = vsub.f32 %v2970_v15, %v10088_v44  ;;  %v2771_v46 = vadd.f32 %v9977_v2, %v9973_v57 }
 0x1d5   : > { %4807 = vmatpush.msrb.mxu3 %v9947_v32  ;;  %4753 = vmatpush.msrb.mxu1 %v4752_v45  ;;  %v4918_v54 = vand.u32 4294901760, %v4917_v33  ;;  %v4930_v11 = vand.u32 4294901760, %v4929_v5  ;;  %v2776_v13 = vadd.f32 %v10073_v58, %v10067_v47  ;;  %v2773_v33 = vadd.f32 %v10028_v36, %v10013_v27  ;;  %v2829_v5 = vld [vmem:[%s7461_s18 + $0x70] sm:$0xff] }
 0x1d6   : > { %4783 = vmatpush.msrb.mxu2 %v9981_v9  ;;  %4719 = vmatpush.msrb.mxu0 %v9965_v48 }
 0x1d7   : > { %v10065_v22 = vpop.f32.mrf.mxu3  ;;  %4809 = vmatpush.msrb.mxu3 %v9957_v34  ;;  %4759 = vmatpush.msrb.mxu1 %v4758_v6  ;;  %v5095_v6 = vsub.f32 %v10122_v12, %v5094_v31  ;;  %v2909_v58 = vmul.f32 %v2861_v49, %v2776_v13  ;;  %v2846_v13 = vld [vmem:[%s7461_s18 + $0xf8] sm:$0xff] }
 0x1d8   : > { %4786 = vmatpush.msrb.mxu2 %v9988_v4  ;;  %4617 = vmatmul.f32.vlgmr.msra.gmra.mxu0 %v9405_v56  ;;  %v10129_v4 = vsub.f32 %v2875_v63, %v10108_v8  ;;  %v2830_v49 = vld [vmem:[%s7461_s18 + $0x78] sm:$0xff] }
 0x1d9   : > { %4811 = vmatpush.msrb.mxu3 %v9965_v48  ;;  %4643 = vmatmul.f32.vlgmr.msra.gmra.mxu1 %v9415_v30  ;;  %v2976_v35 = vsel %vm2932_vm11, %v2909_v58, 0 }
 0x1da   : > { %4673 = vmatmul.f32.vlgmr.msra.gmra.mxu2 %v9400_v50  ;;  %4835 = vmatpush.msra.mxu0 %v4744_v28  ;;  %v10106_v18 = vpop.f32.mrf.mxu2  ;;  %v2844_v28 = vld [vmem:[%s7461_s18 + $0xe8] sm:$0xff] }
 0x1db   : > { %4863 = vmatpush.msra.mxu1 %v9947_v32  ;;  %4887 = vmatpush.msra.mxu2 %v9994_v7  ;;  %v2759_v1 = vpop.f32.mrf.mxu0 }
 0x1dc   : > { %4697 = vmatmul.f32.vlgmr.msra.gmra.mxu3 %v9400_v50  ;;  %4839 = vmatpush.msra.mxu0 %v4750_v19  ;;  %v2777_v9 = vpop.f32.mrf.mxu1  ;;  %v2828_v19 = vld [vmem:[%s7461_s18 + $0x68] sm:$0xff] }
 0x1dd   : > { %4919 = vmatpush.msra.mxu3 %v4918_v54  ;;  %4865 = vmatpush.msra.mxu1 %v9957_v34  ;;  %v2892_v34 = vmul.f32 %v2844_v28, %v2737_v60  ;;  %v2876_v55 = vmul.f32 %v2828_v19, %v9820_v61  ;;  %v2877_v19 = vmul.f32 %v2829_v5, %v2771_v46 }
 0x1de   : > { %4889 = vmatpush.msra.mxu2 %v10002_v29  ;;  %4843 = vmatpush.msra.mxu0 %v4756_v62  ;;  %v5088_v62 = vand.u32 4294901760, %v10112_v14 }
 0x1df   : > { %v10116_v32 = vpop.f32.mrf.mxu3  ;;  %4925 = vmatpush.msra.mxu3 %v4924_v3  ;;  %4867 = vmatpush.msra.mxu1 %v9965_v48  ;;  %v2912_v48 = vld [vmem:[%s7471_s6] sm:$0xff]  ;;  %v10144_v37 = vand.u32 4294901760, %v2892_v34  ;;  %v10155_v45 = vand.u32 4294901760, %v2876_v55  ;;  %v2893_v3 = vmul.f32 %v2845_v42, %v2773_v33 }
 0x1e0   : > { %4891 = vmatpush.msra.mxu2 %v10019_v10  ;;  %4725 = vmatmul.f32.vlgmr.msrb.gmra.mxu0 %v9433_v39  ;;  %v2812_v28 = vadd.f32 %v10116_v32, %v10106_v18  ;;  %v2913_v32 = vld [vmem:[%s7471_s6 + $0x8] sm:$0xff] }
 0x1e1   : > { %4931 = vmatpush.msra.mxu3 %v4930_v11  ;;  %4761 = vmatmul.f32.vlgmr.msrb.gmra.mxu1 %v9400_v50  ;;  %v10172_v40 = vsub.f32 %v2892_v34, %v10144_v37  ;;  %v10182_v15 = vsub.f32 %v2876_v55, %v10155_v45  ;;  %v2862_v11 = vld [vmem:[%s7461_s18 + $0x178] sm:$0x3] }
 0x1e2   : > { %4789 = vmatmul.f32.vlgmr.msrb.gmra.mxu2 %v9405_v56  ;;  %4952 = vmatpush.msrb.mxu0 %v10022_v51  ;;  %v2795_v61 = vpop.f32.mrf.mxu2  ;;  %v5089_v51 = vsub.f32 %v10112_v14, %v5088_v62 }
 0x1e3   : > { %4979 = vmatpush.msrb.mxu1 %v9994_v7  ;;  %5007 = vmatpush.msrb.mxu2 %v4916_v26  ;;  %v3006_v53 = vpop.f32.mrf.mxu0  ;;  %v5100_v26 = vand.u32 4294901760, %v10129_v4  ;;  %v5266_v38 = vand.u32 4294901760, %v10172_v40  ;;  %v5272_v2 = vand.u32 4294901760, %v10182_v15  ;;  %v2910_v61 = vmul.f32 %v2862_v11, %v2812_v28 }
 0x1e4   : > { %4815 = vmatmul.f32.vlgmr.msrb.gmra.mxu3 %v9415_v30  ;;  %4955 = vmatpush.msrb.mxu0 %v10038_v24  ;;  %v3007_v24 = vadd.f32 %v3006_v53, %v2912_v48  ;;  %v10225_v48 = vand.u32 4294901760, %v2893_v3 }
 0x1e5   : > { %5035 = vmatpush.msrb.mxu3 %v9994_v7  ;;  %4981 = vmatpush.msrb.mxu1 %v10002_v29  ;;  %v10158_v7 = vsub.f32 %v2973_v16, %v10135_v59  ;;  %v5267_v9 = vsub.f32 %v10172_v40, %v5266_v38  ;;  %v10214_v16 = vand.u32 4294901760, %v2976_v35  ;;  %v5273_v55 = vsub.f32 %v10182_v15, %v5272_v2 }
 0x1e6   : > { %5011 = vmatpush.msrb.mxu2 %v4922_v20  ;;  %4958 = vmatpush.msrb.mxu0 %v10048_v41  ;;  %v3042_v20 = vpop.f32.mrf.mxu1  ;;  %v5101_v41 = vsub.f32 %v10129_v4, %v5100_v26 }
 0x1e7   : > { %v2813_v23 = vpop.f32.mrf.mxu3  ;;  %5037 = vmatpush.msrb.mxu3 %v10002_v29  ;;  %4983 = vmatpush.msrb.mxu1 %v10019_v10  ;;  %v5090_v29 = vand.u32 4294901760, %v5089_v51  ;;  %v3043_v47 = vadd.f32 %v3042_v20, %v3007_v24  ;;  %v10234_v51 = vand.u32 4294901760, %v2877_v19  ;;  %v10238_v24 = vsub.f32 %v2976_v35, %v10214_v16 }
 0x1e8   : > { %5015 = vmatpush.msrb.mxu2 %v4928_v43  ;;  %4845 = vmatmul.f32.vlgmr.msra.gmra.mxu0 %v9400_v50  ;;  %v5096_v43 = vand.u32 4294901760, %v5095_v6  ;;  %v5102_v36 = vand.u32 4294901760, %v5101_v41  ;;  %v10253_v6 = vsub.f32 %v2893_v3, %v10225_v48 }
 0x1e9   : > { %5039 = vmatpush.msrb.mxu3 %v10019_v10  ;;  %4869 = vmatmul.f32.vlgmr.msra.gmra.mxu1 %v9400_v50  ;;  %v5260_v10 = vand.u32 4294901760, %v10158_v7  ;;  %v5432_v41 = vand.u32 4294901760, %v10238_v24 }
 0x1ea   : > { %4897 = vmatmul.f32.vlgmr.msra.gmra.mxu2 %v9433_v39  ;;  %5059 = vmatpush.msra.mxu0 %v10088_v44  ;;  %v3070_v52 = vpop.f32.mrf.mxu2  ;;  %v5438_v42 = vand.u32 4294901760, %v10253_v6 }
 0x1eb   : > { %5091 = vmatpush.msra.mxu1 %v5090_v29  ;;  %5124 = vmatpush.msra.mxu2 %v10112_v14  ;;  %v3071_v27 = vadd.f32 %v3070_v52, %v3043_v47  ;;  %v3126_v54 = vpop.f32.mrf.mxu0  ;;  %v5261_v60 = vsub.f32 %v10158_v7, %v5260_v10  ;;  %v2809_v14 = vadd.f32 %v10065_v22, %v10059_v25  ;;  %v2979_v29 = vsel %vm2932_vm11, %v2910_v61, 0 }
 0x1ec   : > { %4933 = vmatmul.f32.vlgmr.msra.gmra.mxu3 %v9400_v50  ;;  %5061 = vmatpush.msra.mxu0 %v10098_v17  ;;  %v10266_v58 = vand.u32 4294901760, %v2979_v29  ;;  %v5439_v35 = vsub.f32 %v10253_v6, %v5438_v42 }
 0x1ed   : > { %5151 = vmatpush.msra.mxu3 %v10088_v44  ;;  %5097 = vmatpush.msra.mxu1 %v5096_v43  ;;  %v5262_v18 = vand.u32 4294901760, %v5261_v60  ;;  %v2914_v43 = vld [vmem:[%s7471_s6 + $0x10] sm:$0xff] }
 0x1ee   : > { %5127 = vmatpush.msra.mxu2 %v10122_v12  ;;  %5063 = vmatpush.msra.mxu0 %v10108_v8  ;;  %v3150_v57 = vpop.f32.mrf.mxu1  ;;  %v2807_v12 = vadd.f32 %v10011_v21, %v10006_v0  ;;  %v2894_v21 = vmul.f32 %v2846_v13, %v2809_v14 }
 0x1ef   : > { %v3096_v63 = vpop.f32.mrf.mxu3  ;;  %5153 = vmatpush.msra.mxu3 %v10098_v17  ;;  %5103 = vmatpush.msra.mxu1 %v5102_v36 }
 0x1f0   : > { %5130 = vmatpush.msra.mxu2 %v10129_v4  ;;  %v3097_v1 = vadd.f32 %v3096_v63, %v3071_v27  ;;  %4961 = vmatmul.f32.vlgmr.msrb.gmra.mxu0 %v9405_v56  ;;  %v10260_v4 = vsub.f32 %v2877_v19, %v10234_v51  ;;  %v10275_v52 = vand.u32 4294901760, %v2894_v21 }
 0x1f1   : > { %5155 = vmatpush.msra.mxu3 %v10108_v8  ;;  %4987 = vmatmul.f32.vlgmr.msrb.gmra.mxu1 %v9415_v30 }
 0x1f2   : > { %v3127_v34 = vadd.f32 %v3126_v54, %v3097_v1  ;;  %5017 = vmatmul.f32.vlgmr.msrb.gmra.mxu2 %v9400_v50  ;;  %5179 = vmatpush.msrb.mxu0 %v5088_v62  ;;  %v5268_v62 = vand.u32 4294901760, %v5267_v9  ;;  %v3178_v53 = vpop.f32.mrf.mxu2  ;;  %v5444_v63 = vand.u32 4294901760, %v10260_v4  ;;  %v10300_v60 = vsub.f32 %v2894_v21, %v10275_v52 }
 0x1f3   : > { %5207 = vmatpush.msrb.mxu1 %v10088_v44  ;;  %5231 = vmatpush.msrb.mxu2 %v10135_v59  ;;  %v3179_v20 = vadd.f32 %v3178_v53, %v2913_v32  ;;  %v3242_v22 = vpop.f32.mrf.mxu0  ;;  %v5440_v1 = vand.u32 4294901760, %v5439_v35 }
 0x1f4   : > { %5041 = vmatmul.f32.vlgmr.msrb.gmra.mxu3 %v9400_v50  ;;  %v3151_v23 = vadd.f32 %v3150_v57, %v3127_v34  ;;  %5183 = vmatpush.msrb.mxu0 %v5094_v31  ;;  %v5274_v31 = vand.u32 4294901760, %v5273_v55  ;;  %v5610_v9 = vand.u32 4294901760, %v10300_v60 }
 0x1f5   : > { %5263 = vmatpush.msrb.mxu3 %v5262_v18  ;;  %5209 = vmatpush.msrb.mxu1 %v10098_v17 }
 0x1f6   : > { %v5733_v44 = vmax.f32 %v3151_v23, 0.0  ;;  %5233 = vmatpush.msrb.mxu2 %v10144_v37  ;;  %5187 = vmatpush.msrb.mxu0 %v5100_v26  ;;  %v3268_v17 = vpop.f32.mrf.mxu1 }
 0x1f7   : > { %v3214_v25 = vpop.f32.mrf.mxu3  ;;  %5269 = vmatpush.msrb.mxu3 %v5268_v62  ;;  %5211 = vmatpush.msrb.mxu1 %v10108_v8  ;;  %v2878_v8 = vmul.f32 %v2830_v49, %v2807_v12  ;;  %v5611_v62 = vsub.f32 %v10300_v60, %v5610_v9 }
 0x1f8   : > { %v5749_v47 = vmin.f32 %v5733_v44, 1.0  ;;  %5235 = vmatpush.msrb.mxu2 %v10155_v45  ;;  %v3215_v0 = vadd.f32 %v3214_v25, %v3179_v20  ;;  %5069 = vmatmul.f32.vlgmr.msra.gmra.mxu0 %v9433_v39  ;;  %v2915_v44 = vld [vmem:[%s7471_s6 + $0x18] sm:$0xff] }
 0x1f9   : > { %5275 = vmatpush.msrb.mxu3 %v5274_v31  ;;  %5105 = vmatmul.f32.vlgmr.msra.gmra.mxu1 %v9400_v50  ;;  %v10286_v54 = vand.u32 4294901760, %v2878_v8 }
 0x1fa   : > { %5765 = vst [vmem:[%s10247_s11] sm:$0xff] %v5749_v47  ;;  %v3243_v26 = vadd.f32 %v3242_v22, %v3215_v0  ;;  %5133 = vmatmul.f32.vlgmr.msra.gmra.mxu2 %v9405_v56  ;;  %5296 = vmatpush.msra.mxu0 %v10158_v7  ;;  %v3298_v46 = vpop.f32.mrf.mxu2  ;;  %v5612_v22 = vand.u32 4294901760, %v5611_v62  ;;  %v2916_v0 = vld [vmem:[%s7471_s6 + $0x20] sm:$0xff] }
 0x1fb   : > { %5323 = vmatpush.msra.mxu1 %v10135_v59  ;;  %5351 = vmatpush.msra.mxu2 %v5260_v10  ;;  %v3350_v7 = vpop.f32.mrf.mxu0  ;;  %v5433_v10 = vsub.f32 %v10238_v24, %v5432_v41  ;;  %v10310_v3 = vsub.f32 %v2878_v8, %v10286_v54 }
 0x1fc   : > { %5159 = vmatmul.f32.vlgmr.msra.gmra.mxu3 %v9415_v30  ;;  %v3269_v33 = vadd.f32 %v3268_v17, %v3243_v26  ;;  %5299 = vmatpush.msra.mxu0 %v10172_v40  ;;  %v3351_v40 = vadd.f32 %v3350_v7, %v2914_v43 }
 0x1fd   : > { %5379 = vmatpush.msra.mxu3 %v10135_v59  ;;  %5325 = vmatpush.msra.mxu1 %v10144_v37  ;;  %v10289_v59 = vsub.f32 %v2979_v29, %v10266_v58  ;;  %v5616_v23 = vand.u32 4294901760, %v10310_v3 }
 0x1fe   : > { %5355 = vmatpush.msra.mxu2 %v5266_v38  ;;  %v3299_v27 = vadd.f32 %v3298_v46, %v3269_v33  ;;  %5302 = vmatpush.msra.mxu0 %v10182_v15  ;;  %v3386_v38 = vpop.f32.mrf.mxu1  ;;  %v5434_v15 = vand.u32 4294901760, %v5433_v10 }
 0x1ff   : > { %v3322_v36 = vpop.f32.mrf.mxu3  ;;  %5381 = vmatpush.msra.mxu3 %v10144_v37  ;;  %5327 = vmatpush.msra.mxu1 %v10155_v45  ;;  %v3387_v57 = vadd.f32 %v3386_v38, %v3351_v40  ;;  %v5617_v20 = vsub.f32 %v10310_v3, %v5616_v23 }
 0x200   : > { %5359 = vmatpush.msra.mxu2 %v5272_v2  ;;  %v3323_v5 = vadd.f32 %v3322_v36, %v3299_v27  ;;  %5189 = vmatmul.f32.vlgmr.msrb.gmra.mxu0 %v9400_v50  ;;  %v5445_v2 = vsub.f32 %v10260_v4, %v5444_v63 }
 0x201   : > { %5383 = vmatpush.msra.mxu3 %v10155_v45  ;;  %5213 = vmatmul.f32.vlgmr.msrb.gmra.mxu1 %v9400_v50  ;;  %v5604_v45 = vand.u32 4294901760, %v10289_v59 }
 0x202   : > { %v5734_v37 = vmax.f32 %v3323_v5, 0.0  ;;  %5241 = vmatmul.f32.vlgmr.msrb.gmra.mxu2 %v9433_v39  ;;  %5403 = vmatpush.msrb.mxu0 %v10214_v16  ;;  %v5446_v34 = vand.u32 4294901760, %v5445_v2 }
 0x203   : > { %5435 = vmatpush.msrb.mxu1 %v5434_v15  ;;  %5468 = vmatpush.msrb.mxu2 %v10238_v24  ;;  %v3414_v11 = vpop.f32.mrf.mxu2  ;;  %v5605_v55 = vsub.f32 %v10289_v59, %v5604_v45 }
 0x204   : > { %5277 = vmatmul.f32.vlgmr.msrb.gmra.mxu3 %v9400_v50  ;;  %v5750_v28 = vmin.f32 %v5734_v37, 1.0  ;;  %5405 = vmatpush.msrb.mxu0 %v10225_v48  ;;  %v3415_v19 = vadd.f32 %v3414_v11, %v3387_v57  ;;  %v3470_v32 = vpop.f32.mrf.mxu0 }
 0x205   : > { %5495 = vmatpush.msrb.mxu3 %v10214_v16  ;;  %5441 = vmatpush.msrb.mxu1 %v5440_v1  ;;  %v5606_v13 = vand.u32 4294901760, %v5605_v55 }
 0x206   : > { %5766 = vst [vmem:[%s10247_s11 + $0x8] sm:$0xff] %v5750_v28  ;;  %5471 = vmatpush.msrb.mxu2 %v10253_v6  ;;  %5407 = vmatpush.msrb.mxu0 %v10234_v51  ;;  %v3494_v61 = vpop.f32.mrf.mxu1 }
 0x207   : > { %v3440_v18 = vpop.f32.mrf.mxu3  ;;  %5497 = vmatpush.msrb.mxu3 %v10225_v48  ;;  %5447 = vmatpush.msrb.mxu1 %v5446_v34 }
 0x208   : > { %5474 = vmatpush.msrb.mxu2 %v10260_v4  ;;  %v3441_v14 = vadd.f32 %v3440_v18, %v3415_v19  ;;  %5305 = vmatmul.f32.vlgmr.msra.gmra.mxu0 %v9405_v56 }
 0x209   : > { %5499 = vmatpush.msrb.mxu3 %v10234_v51  ;;  %5331 = vmatmul.f32.vlgmr.msra.gmra.mxu1 %v9415_v30 }
 0x20a   : > { %v3471_v53 = vadd.f32 %v3470_v32, %v3441_v14  ;;  %5361 = vmatmul.f32.vlgmr.msra.gmra.mxu2 %v9400_v50  ;;  %5523 = vmatpush.msra.mxu0 %v5432_v41 }
 0x20b   : > { %5551 = vmatpush.msra.mxu1 %v10214_v16  ;;  %5575 = vmatpush.msra.mxu2 %v10266_v58  ;;  %v3522_v12 = vpop.f32.mrf.mxu2  ;;  %v5618_v16 = vand.u32 4294901760, %v5617_v20 }
 0x20c   : > { %5385 = vmatmul.f32.vlgmr.msra.gmra.mxu3 %v9400_v50  ;;  %v3495_v25 = vadd.f32 %v3494_v61, %v3471_v53  ;;  %5527 = vmatpush.msra.mxu0 %v5438_v42  ;;  %v3523_v24 = vadd.f32 %v3522_v12, %v2915_v44 }
 0x20d   : > { %5607 = vmatpush.msra.mxu3 %v5606_v13  ;;  %5553 = vmatpush.msra.mxu1 %v10225_v48  ;;  %v3586_v49 = vpop.f32.mrf.mxu0  ;;  %v2919_v13 = vld [vmem:[%s7471_s6 + $0x38] sm:$0xff] }
 0x20e   : > { %v5735_v31 = vmax.f32 %v3495_v25, 0.0  ;;  %5577 = vmatpush.msra.mxu2 %v10275_v52  ;;  %5531 = vmatpush.msra.mxu0 %v5444_v63  ;;  %v3612_v29 = vpop.f32.mrf.mxu1 }
 0x20f   : > { %v3558_v17 = vpop.f32.mrf.mxu3  ;;  %5613 = vmatpush.msra.mxu3 %v5612_v22  ;;  %5555 = vmatpush.msra.mxu1 %v10234_v51 }
 0x210   : > { %v5751_v6 = vmin.f32 %v5735_v31, 1.0  ;;  %5579 = vmatpush.msra.mxu2 %v10286_v54  ;;  %v3559_v47 = vadd.f32 %v3558_v17, %v3523_v24  ;;  %5413 = vmatmul.f32.vlgmr.msrb.gmra.mxu0 %v9433_v39 }
 0x211   : > { %5619 = vmatpush.msra.mxu3 %v5618_v16  ;;  %5449 = vmatmul.f32.vlgmr.msrb.gmra.mxu1 %v9400_v50 }
 0x212   : > { %5767 = vst [vmem:[%s10247_s11 + $0x10] sm:$0xff] %v5751_v6  ;;  %v3587_v48 = vadd.f32 %v3586_v49, %v3559_v47  ;;  %5477 = vmatmul.f32.vlgmr.msrb.gmra.mxu2 %v9405_v56  ;;  %5640 = vmatpush.msrb.mxu0 %v10289_v59  ;;  %v2920_v6 = vld [vmem:[%s7471_s6 + $0x40] sm:$0xff] }
 0x213   : > { %5667 = vmatpush.msrb.mxu1 %v10266_v58  ;;  %5695 = vmatpush.msrb.mxu2 %v5604_v45 }
 0x214   : > { %5503 = vmatmul.f32.vlgmr.msrb.gmra.mxu3 %v9415_v30  ;;  %v3613_v51 = vadd.f32 %v3612_v29, %v3587_v48  ;;  %5643 = vmatpush.msrb.mxu0 %v10300_v60  ;;  %v3642_v21 = vpop.f32.mrf.mxu2 }
 0x215   : > { %5723 = vmatpush.msrb.mxu3 %v10266_v58  ;;  %5669 = vmatpush.msrb.mxu1 %v10275_v52  ;;  %v3694_v41 = vpop.f32.mrf.mxu0 }
 0x216   : > { %5699 = vmatpush.msrb.mxu2 %v5610_v9  ;;  %v3643_v4 = vadd.f32 %v3642_v21, %v3613_v51  ;;  %5646 = vmatpush.msrb.mxu0 %v10310_v3  ;;  %v3695_v8 = vadd.f32 %v3694_v41, %v2916_v0  ;;  %v3730_v33 = vpop.f32.mrf.mxu1  ;;  %v2918_v3 = vld [vmem:[%s7471_s6 + $0x30] sm:$0xff] }
 0x217   : > { %v3666_v26 = vpop.f32.mrf.mxu3  ;;  %5725 = vmatpush.msrb.mxu3 %v10275_v52  ;;  %5671 = vmatpush.msrb.mxu1 %v10286_v54 }
 0x218   : > { %5703 = vmatpush.msrb.mxu2 %v5616_v23  ;;  %v3667_v58 = vadd.f32 %v3666_v26, %v3643_v4  ;;  %5533 = vmatmul.f32.vlgmr.msra.gmra.mxu0 %v9400_v50  ;;  %v3731_v42 = vadd.f32 %v3730_v33, %v3695_v8 }
 0x219   : > { %5727 = vmatpush.msrb.mxu3 %v10286_v54  ;;  %5557 = vmatmul.f32.vlgmr.msra.gmra.mxu1 %v9400_v50 }
 0x21a   : > { %v5736_v43 = vmax.f32 %v3667_v58, 0.0  ;;  %5585 = vmatmul.f32.vlgmr.msra.gmra.mxu2 %v9433_v39  ;;  %v2917_v39 = vld [vmem:[%s7471_s6 + $0x28] sm:$0xff] }
 0x21c   : > { %5621 = vmatmul.f32.vlgmr.msra.gmra.mxu3 %v9400_v50  ;;  %v5752_v52 = vmin.f32 %v5736_v43, 1.0 }
 0x21d   : > { %v3758_v46 = vpop.f32.mrf.mxu2  ;;  %v3814_v7 = vpop.f32.mrf.mxu0 }
 0x21e   : > { %5768 = vst [vmem:[%s10247_s11 + $0x18] sm:$0xff] %v5752_v52  ;;  %v3759_v27 = vadd.f32 %v3758_v46, %v3731_v42  ;;  %v3838_v10 = vpop.f32.mrf.mxu1 }
 0x21f   : > { %v3784_v36 = vpop.f32.mrf.mxu3 }
 0x220   : > { %v3785_v63 = vadd.f32 %v3784_v36, %v3759_v27  ;;  %5649 = vmatmul.f32.vlgmr.msrb.gmra.mxu0 %v9405_v56 }
 0x221   : > { %5675 = vmatmul.f32.vlgmr.msrb.gmra.mxu1 %v9415_v30 }
 0x222   : > { %v3815_v54 = vadd.f32 %v3814_v7, %v3785_v63  ;;  %5705 = vmatmul.f32.vlgmr.msrb.gmra.mxu2 %v9400_v50  ;;  %v2921_v7 = vld [vmem:[%s7471_s6 + $0x48] sm:$0xff] }
 0x224   : > { %5729 = vmatmul.f32.vlgmr.msrb.gmra.mxu3 %v9400_v50  ;;  %v3839_v59 = vadd.f32 %v3838_v10, %v3815_v54 }
 0x225   : > { %v3866_v40 = vpop.f32.mrf.mxu2  ;;  %v3930_v60 = vpop.f32.mrf.mxu0 }
 0x226   : > { %v5737_v38 = vmax.f32 %v3839_v59, 0.0  ;;  %v3867_v5 = vadd.f32 %v3866_v40, %v2917_v39  ;;  %v3956_v37 = vpop.f32.mrf.mxu1 }
 0x227   : > { %v3902_v35 = vpop.f32.mrf.mxu3 }
 0x228   : > { %v5753_v15 = vmin.f32 %v5737_v38, 1.0  ;;  %v3903_v57 = vadd.f32 %v3902_v35, %v3867_v5 }
 0x22a   : > { %5769 = vst [vmem:[%s10247_s11 + $0x20] sm:$0xff] %v5753_v15  ;;  %v3931_v56 = vadd.f32 %v3930_v60, %v3903_v57  ;;  %v2922_v15 = vld [vmem:[%s7471_s6 + $0x50] sm:$0xff] }
 0x22c   : > { %v3957_v2 = vadd.f32 %v3956_v37, %v3931_v56 }
 0x22d   : > { %v3986_v45 = vpop.f32.mrf.mxu2  ;;  %v4038_v50 = vpop.f32.mrf.mxu0 }
 0x22e   : > { %v3987_v28 = vadd.f32 %v3986_v45, %v3957_v2  ;;  %v4039_v1 = vadd.f32 %v4038_v50, %v2918_v3  ;;  %v4074_v11 = vpop.f32.mrf.mxu1 }
 0x22f   : > { %v4010_v30 = vpop.f32.mrf.mxu3 }
 0x230   : > { %v4011_v9 = vadd.f32 %v4010_v30, %v3987_v28  ;;  %v4075_v34 = vadd.f32 %v4074_v11, %v4039_v1 }
 0x232   : > { %v5738_v19 = vmax.f32 %v4011_v9, 0.0 }
 0x234   : > { %v5754_v18 = vmin.f32 %v5738_v19, 1.0 }
 0x235   : > { %v4102_v32 = vpop.f32.mrf.mxu2  ;;  %v4158_v23 = vpop.f32.mrf.mxu0 }
 0x236   : > { %5770 = vst [vmem:[%s10247_s11 + $0x28] sm:$0xff] %v5754_v18  ;;  %v4103_v55 = vadd.f32 %v4102_v32, %v4075_v34  ;;  %v4182_v14 = vpop.f32.mrf.mxu1 }
 0x237   : > { %v4128_v61 = vpop.f32.mrf.mxu3 }
 0x238   : > { %v4129_v62 = vadd.f32 %v4128_v61, %v4103_v55 }
 0x23a   : > { %v4159_v53 = vadd.f32 %v4158_v23, %v4129_v62  ;;  %v2923_v23 = vld [vmem:[%s7471_s6 + $0x58] sm:$0xff] }
 0x23c   : > { %v4183_v44 = vadd.f32 %v4182_v14, %v4159_v53 }
 0x23d   : > { %v4210_v20 = vpop.f32.mrf.mxu2  ;;  %v4274_v31 = vpop.f32.mrf.mxu0 }
 0x23e   : > { %v5739_v25 = vmax.f32 %v4183_v44, 0.0  ;;  %v4211_v22 = vadd.f32 %v4210_v20, %v2919_v13  ;;  %v4300_v24 = vpop.f32.mrf.mxu1 }
 0x23f   : > { %v4246_v12 = vpop.f32.mrf.mxu3 }
 0x240   : > { %v5755_v17 = vmin.f32 %v5739_v25, 1.0  ;;  %v4247_v49 = vadd.f32 %v4246_v12, %v4211_v22 }
 0x242   : > { %5771 = vst [vmem:[%s10247_s11 + $0x30] sm:$0xff] %v5755_v17  ;;  %v4275_v16 = vadd.f32 %v4274_v31, %v4247_v49  ;;  %v2924_v17 = vld [vmem:[%s7471_s6 + $0x60] sm:$0xff] }
 0x244   : > { %v4301_v29 = vadd.f32 %v4300_v24, %v4275_v16 }
 0x245   : > { %v4330_v47 = vpop.f32.mrf.mxu2  ;;  %v4382_v0 = vpop.f32.mrf.mxu0 }
 0x246   : > { %v4331_v48 = vadd.f32 %v4330_v47, %v4301_v29  ;;  %v4383_v21 = vadd.f32 %v4382_v0, %v2920_v6  ;;  %v4418_v4 = vpop.f32.mrf.mxu1 }
 0x247   : > { %v4354_v51 = vpop.f32.mrf.mxu3 }
 0x248   : > { %v4355_v26 = vadd.f32 %v4354_v51, %v4331_v48  ;;  %v4419_v8 = vadd.f32 %v4418_v4, %v4383_v21 }
 0x24a   : > { %v5740_v41 = vmax.f32 %v4355_v26, 0.0 }
 0x24c   : > { %v5756_v33 = vmin.f32 %v5740_v41, 1.0 }
 0x24d   : > { %v4446_v58 = vpop.f32.mrf.mxu2  ;;  %v4502_v52 = vpop.f32.mrf.mxu0 }
 0x24e   : > { %5772 = vst [vmem:[%s10247_s11 + $0x38] sm:$0xff] %v5756_v33  ;;  %v4447_v43 = vadd.f32 %v4446_v58, %v4419_v8  ;;  %v4526_v46 = vpop.f32.mrf.mxu1 }
 0x24f   : > { %v4472_v42 = vpop.f32.mrf.mxu3 }
 0x250   : > { %v4473_v27 = vadd.f32 %v4472_v42, %v4447_v43 }
 0x252   : > { %v4503_v36 = vadd.f32 %v4502_v52, %v4473_v27  ;;  %v2925_v52 = vld [vmem:[%s7471_s6 + $0x68] sm:$0xff] }
 0x254   : > { %v4527_v10 = vadd.f32 %v4526_v46, %v4503_v36 }
 0x255   : > { %v4554_v63 = vpop.f32.mrf.mxu2  ;;  %v4618_v40 = vpop.f32.mrf.mxu0 }
 0x256   : > { %v5741_v54 = vmax.f32 %v4527_v10, 0.0  ;;  %v4555_v39 = vadd.f32 %v4554_v63, %v2921_v7  ;;  %v4644_v38 = vpop.f32.mrf.mxu1 }
 0x257   : > { %v4590_v59 = vpop.f32.mrf.mxu3 }
 0x258   : > { %v5757_v5 = vmin.f32 %v5741_v54, 1.0  ;;  %v4591_v35 = vadd.f32 %v4590_v59, %v4555_v39 }
 0x25a   : > { %5773 = vst [vmem:[%s10247_s11 + $0x40] sm:$0xff] %v5757_v5  ;;  %v4619_v60 = vadd.f32 %v4618_v40, %v4591_v35  ;;  %v2926_v5 = vld [vmem:[%s7471_s6 + $0x70] sm:$0xff] }
 0x25c   : > { %v4645_v37 = vadd.f32 %v4644_v38, %v4619_v60 }
 0x25d   : > { %v4674_v57 = vpop.f32.mrf.mxu2  ;;  %v4726_v3 = vpop.f32.mrf.mxu0 }
 0x25e   : > { %v4675_v56 = vadd.f32 %v4674_v57, %v4645_v37  ;;  %v4727_v45 = vadd.f32 %v4726_v3, %v2922_v15  ;;  %v4762_v28 = vpop.f32.mrf.mxu1 }
 0x25f   : > { %v4698_v2 = vpop.f32.mrf.mxu3 }
 0x260   : > { %v4699_v30 = vadd.f32 %v4698_v2, %v4675_v56  ;;  %v4763_v1 = vadd.f32 %v4762_v28, %v4727_v45 }
 0x262   : > { %v5742_v50 = vmax.f32 %v4699_v30, 0.0 }
 0x264   : > { %v5758_v11 = vmin.f32 %v5742_v50, 1.0 }
 0x265   : > { %v4790_v9 = vpop.f32.mrf.mxu2  ;;  %v4846_v18 = vpop.f32.mrf.mxu0 }
 0x266   : > { %5774 = vst [vmem:[%s10247_s11 + $0x48] sm:$0xff] %v5758_v11  ;;  %v4791_v19 = vadd.f32 %v4790_v9, %v4763_v1  ;;  %v4870_v32 = vpop.f32.mrf.mxu1 }
 0x267   : > { %v4816_v34 = vpop.f32.mrf.mxu3 }
 0x268   : > { %v4817_v55 = vadd.f32 %v4816_v34, %v4791_v19 }
 0x26a   : > { %v4847_v61 = vadd.f32 %v4846_v18, %v4817_v55  ;;  %v2927_v18 = vld [vmem:[%s7471_s6 + $0x78] sm:$0xff] }
 0x26c   : > { %v4871_v14 = vadd.f32 %v4870_v32, %v4847_v61 }
 0x26d   : > { %v4898_v62 = vpop.f32.mrf.mxu2  ;;  %v4962_v20 = vpop.f32.mrf.mxu0 }
 0x26e   : > { %v5743_v53 = vmax.f32 %v4871_v14, 0.0  ;;  %v4899_v13 = vadd.f32 %v4898_v62, %v2923_v23  ;;  %v4988_v25 = vpop.f32.mrf.mxu1 }
 0x26f   : > { %v4934_v44 = vpop.f32.mrf.mxu3 }
 0x270   : > { %v5759_v22 = vmin.f32 %v5743_v53, 1.0  ;;  %v4935_v12 = vadd.f32 %v4934_v44, %v4899_v13 }
 0x272   : > { %5775 = vst [vmem:[%s10247_s11 + $0x50] sm:$0xff] %v5759_v22  ;;  %v4963_v31 = vadd.f32 %v4962_v20, %v4935_v12 }
 0x274   : > { %v4989_v24 = vadd.f32 %v4988_v25, %v4963_v31 }
 0x275   : > { %v5018_v49 = vpop.f32.mrf.mxu2  ;;  %v5070_v6 = vpop.f32.mrf.mxu0 }
 0x276   : > { %v5019_v16 = vadd.f32 %v5018_v49, %v4989_v24  ;;  %v5071_v47 = vadd.f32 %v5070_v6, %v2924_v17  ;;  %v5106_v48 = vpop.f32.mrf.mxu1 }
 0x277   : > { %v5042_v29 = vpop.f32.mrf.mxu3 }
 0x278   : > { %v5043_v51 = vadd.f32 %v5042_v29, %v5019_v16  ;;  %v5107_v21 = vadd.f32 %v5106_v48, %v5071_v47 }
 0x27a   : > { %v5744_v0 = vmax.f32 %v5043_v51, 0.0 }
 0x27c   : > { %v5760_v4 = vmin.f32 %v5744_v0, 1.0 }
 0x27d   : > { %v5134_v26 = vpop.f32.mrf.mxu2  ;;  %v5190_v33 = vpop.f32.mrf.mxu0 }
 0x27e   : > { %5776 = vst [vmem:[%s10247_s11 + $0x58] sm:$0xff] %v5760_v4  ;;  %v5135_v41 = vadd.f32 %v5134_v26, %v5107_v21  ;;  %v5214_v58 = vpop.f32.mrf.mxu1 }
 0x27f   : > { %v5160_v8 = vpop.f32.mrf.mxu3 }
 0x280   : > { %v5161_v43 = vadd.f32 %v5160_v8, %v5135_v41 }
 0x282   : > { %v5191_v42 = vadd.f32 %v5190_v33, %v5161_v43 }
 0x284   : > { %v5215_v46 = vadd.f32 %v5214_v58, %v5191_v42 }
 0x285   : > { %v5242_v27 = vpop.f32.mrf.mxu2  ;;  %v5306_v63 = vpop.f32.mrf.mxu0 }
 0x286   : > { %v5745_v36 = vmax.f32 %v5215_v46, 0.0  ;;  %v5243_v7 = vadd.f32 %v5242_v27, %v2925_v52  ;;  %v5332_v54 = vpop.f32.mrf.mxu1 }
 0x287   : > { %v5278_v10 = vpop.f32.mrf.mxu3 }
 0x288   : > { %v5761_v39 = vmin.f32 %v5745_v36, 1.0  ;;  %v5279_v59 = vadd.f32 %v5278_v10, %v5243_v7 }
 0x28a   : > { %5777 = vst [vmem:[%s10247_s11 + $0x60] sm:$0xff] %v5761_v39  ;;  %v5307_v40 = vadd.f32 %v5306_v63, %v5279_v59 }
 0x28c   : > { %v5333_v38 = vadd.f32 %v5332_v54, %v5307_v40 }
 0x28d   : > { %v5362_v35 = vpop.f32.mrf.mxu2  ;;  %v5414_v15 = vpop.f32.mrf.mxu0 }
 0x28e   : > { %v5363_v60 = vadd.f32 %v5362_v35, %v5333_v38  ;;  %v5415_v57 = vadd.f32 %v5414_v15, %v2926_v5  ;;  %v5450_v56 = vpop.f32.mrf.mxu1 }
 0x28f   : > { %v5386_v37 = vpop.f32.mrf.mxu3 }
 0x290   : > { %v5387_v2 = vadd.f32 %v5386_v37, %v5363_v60  ;;  %v5451_v45 = vadd.f32 %v5450_v56, %v5415_v57 }
 0x292   : > { %v5746_v3 = vmax.f32 %v5387_v2, 0.0 }
 0x294   : > { %v5762_v28 = vmin.f32 %v5746_v3, 1.0 }
 0x295   : > { %v5478_v30 = vpop.f32.mrf.mxu2  ;;  %v5534_v11 = vpop.f32.mrf.mxu0 }
 0x296   : > { %5778 = vst [vmem:[%s10247_s11 + $0x68] sm:$0xff] %v5762_v28  ;;  %v5479_v50 = vadd.f32 %v5478_v30, %v5451_v45  ;;  %v5558_v9 = vpop.f32.mrf.mxu1 }
 0x297   : > { %v5504_v1 = vpop.f32.mrf.mxu3 }
 0x298   : > { %v5505_v19 = vadd.f32 %v5504_v1, %v5479_v50 }
 0x29a   : > { %v5535_v34 = vadd.f32 %v5534_v11, %v5505_v19 }
 0x29c   : > { %v5559_v32 = vadd.f32 %v5558_v9, %v5535_v34 }
 0x29d   : > { %v5586_v55 = vpop.f32.mrf.mxu2  ;;  %v5650_v62 = vpop.f32.mrf.mxu0 }
 0x29e   : > { %v5747_v61 = vmax.f32 %v5559_v32, 0.0  ;;  %v5587_v23 = vadd.f32 %v5586_v55, %v2927_v18  ;;  %v5676_v44 = vpop.f32.mrf.mxu1 }
 0x29f   : > { %v5622_v14 = vpop.f32.mrf.mxu3 }
 0x2a0   : > { %v5763_v53 = vmin.f32 %v5747_v61, 1.0  ;;  %v5623_v13 = vadd.f32 %v5622_v14, %v5587_v23 }
 0x2a2   : > { %5779 = vst [vmem:[%s10247_s11 + $0x70] sm:$0xff] %v5763_v53  ;;  %v5651_v20 = vadd.f32 %v5650_v62, %v5623_v13 }
 0x2a4   : > { %v5677_v25 = vadd.f32 %v5676_v44, %v5651_v20 }
 0x2a5   : > { %v5706_v22 = vpop.f32.mrf.mxu2 }
 0x2a6   : > { %v5707_v12 = vadd.f32 %v5706_v22, %v5677_v25 }
 0x2a7   : > { %v5730_v31 = vpop.f32.mrf.mxu3 }
 0x2a8   : > { %v5731_v24 = vadd.f32 %v5730_v31, %v5707_v12 }
 0x2aa   : > { %v5748_v17 = vmax.f32 %v5731_v24, 0.0 }
 0x2ac   : > { %v5764_v49 = vmin.f32 %v5748_v17, 1.0 }
 0x2ae   : > { %5780 = vst [vmem:[%s10247_s11 + $0x78] sm:$0xff] %v5764_v49 }
 0x2af PF: > { %s22_s25 = sadd.s32 1, %s7295_s25   ;;  %s10452_s27 = sld [smem:[#allocation17_spill]] }
 0x2b0   : > { %p19_p3 = scmp.ge.s32.totalorder %s22_s25, 6   ;;  %s10453_s21 = sld [smem:[#allocation13_spill]] }
 0x2b1   : > { %s10454_s22 = sld [smem:[#allocation14_spill]]  ;;  %s10457_s18 = smov %s7271_s19 }
 0x2b2   : > { %s10455_s23 = sld [smem:[#allocation15_spill]]  ;;  %s10458_s19 = smov %s7275_s20 }
 0x2b3   : > { %s10456_s24 = sld [smem:[#allocation16_spill]]  ;;  %21 = sbr.rel (!%p19_p3) target bundleno = 11 (0xb), region = 105 }
 0x2b5   : > { %s10459_s20 = smov %s10452_s27 }
 0x2b8   :  { %5811 = vsyncpa [#allocation3], 1 }
 0x2b9   :  { %5813 = vsyncpa [#allocation3 + $0x1], 1 }
 0x2ba   :  { %5814 = vsyncpa [#allocation5], 1 }
 0x2bb   :  { %5816 = vsyncpa [#allocation5 + $0x1], 1 }
 0x2bc   :  { %5817 = vsyncpa [#allocation8], 1 }
 0x2bd   :  { %5819 = vsyncpa [#allocation8 + $0x1], 1 }

</bundles_post_ra>
